<compile_context>
chip_gen: v7x
topology: tpu7x:2x2x1
jax: 0.10.0
libtpu: 0.0.40
codegen_flags: <defaults>
</compile_context>

<pallas_src>
import jax
import jax.numpy as jnp
from jax.experimental import pallas as pl
from jax.experimental.pallas import tpu as pltpu

BN_EPS = 1e-5


def _batchnorm_relu(y, gamma, beta):
    # Train-mode BatchNorm over rows (batch*spatial), per channel, biased var.
    mean = jnp.mean(y, axis=0, keepdims=True)
    var = jnp.mean(jnp.square(y - mean), axis=0, keepdims=True)
    yhat = (y - mean) * jax.lax.rsqrt(var + BN_EPS)
    return jnp.maximum(yhat * gamma + beta, 0.0)


def _make_fused_kernel(B, H1, Hp1, H2, Hp2, H3, C1, C2, C3):
    """Single fused forward kernel.

    H1: conv1 out spatial (img/2), Hp1: after pool (img/4),
    H2: conv2 out spatial (img/8), Hp2: after pool (img/16), H3 == Hp2.
    C1/C2/C3: lane-padded channel widths used in-kernel (128/128/256).
    """
    M1 = B * H1 * H1          # conv1 rows
    MQ = M1 // 4              # rows per pool-phase block (p, q)
    VV = Hp1 // 2             # phase-grid valid side (== H2)

    def kernel(p1_ref, w1_ref, g1_ref, be1_ref,
               w2_ref, g2_ref, be2_ref,
               w3_ref, g3_ref, be3_ref,
               avg_ref, fw1_ref, fb1_ref, fw2_ref, fb2_ref,
               out_ref,
               pool1_ref, a2_ref, p2_ref, y2_ref, a3_ref, p3_ref):
        # ----- conv1: one bf16 MXU matmul (512,256)x(256,128), BN+ReLU ------
        y1 = jnp.dot(p1_ref[...], w1_ref[...],
                     preferred_element_type=jnp.float32)            # (M1, C1)
        y1 = _batchnorm_relu(y1, g1_ref[...], be1_ref[...])

        # ----- 2x2 max-pool: rows are (p, q, b, pi, pj, uu, vv), so the pool
        # is a max over 4 contiguous 128-row blocks (no gathers).
        pool1_ref[...] = jnp.maximum(
            jnp.maximum(y1[0:MQ], y1[MQ:2 * MQ]),
            jnp.maximum(y1[2 * MQ:3 * MQ], y1[3 * MQ:4 * MQ]))      # (MQ, C1)

        # ----- scatter pooled rows into conv2's stride-2 phase grids --------
        # a2[(b,pi,pj), 1+uu, 1+vv, :] = pooled pixel (b, u=2uu+pi, v=2vv+pj);
        # the border of each (H2+2)x(H2+2) grid stays zero (== padding=2).
        a2_ref[...] = jnp.zeros_like(a2_ref)
        for nb in range(B):
            for pi2 in range(2):
                for pj2 in range(2):
                    idx = (nb * 2 + pi2) * 2 + pj2
                    for uu in range(VV):
                        src = (idx * VV + uu) * VV
                        a2_ref[idx, 1 + uu, 1:1 + VV, :] = \
                            pool1_ref[src:src + VV, :]

        # ----- conv2 im2col in-kernel: contiguous (H2, C1) strips only ------
        # tap (i,j), i=2a+pi, j=2b+pj: rows of the padded input with stride 2
        # become contiguous rows of phase grid (pi,pj).
        for i in range(5):
            aa, pi2 = i // 2, i % 2
            for j in range(5):
                bb, pj2 = j // 2, j % 2
                t = i * 5 + j
                for nb in range(B):
                    idx = (nb * 2 + pi2) * 2 + pj2
                    for ho in range(H2):
                        dst = (nb * H2 + ho) * H2
                        p2_ref[dst:dst + H2, t * C1:(t + 1) * C1] = \
                            a2_ref[idx, aa + ho, bb:bb + H2, :]

        # ----- conv2: one bf16 matmul (32,3200)x(3200,128), BN+ReLU ---------
        y2 = jnp.dot(p2_ref[...].astype(jnp.bfloat16), w2_ref[...],
                     preferred_element_type=jnp.float32)            # (M2, C2)
        y2_ref[...] = _batchnorm_relu(y2, g2_ref[...], be2_ref[...])

        # ----- 2x2 max-pool (H2 x H2 -> Hp2 x Hp2) + scatter into conv3's
        # zero-padded (pad=1) input grid.
        a3_ref[...] = jnp.zeros_like(a3_ref)
        for nb in range(B):
            for u2 in range(Hp2):
                for v2 in range(Hp2):
                    r = nb * H2 * H2 + (2 * u2) * H2 + 2 * v2
                    m = jnp.maximum(
                        jnp.maximum(y2_ref[r:r + 1, :],
                                    y2_ref[r + 1:r + 2, :]),
                        jnp.maximum(y2_ref[r + H2:r + H2 + 1, :],
                                    y2_ref[r + H2 + 1:r + H2 + 2, :]))
                    a3_ref[nb, 1 + u2, 1 + v2:2 + v2, :] = m

        # ----- conv3 im2col (stride 1): contiguous strips -------------------
        for i in range(3):
            for j in range(3):
                t = i * 3 + j
                for nb in range(B):
                    for ho in range(H3):
                        dst = (nb * H3 + ho) * H3
                        p3_ref[dst:dst + H3, t * C2:(t + 1) * C2] = \
                            a3_ref[nb, ho + i, j:j + H3, :]

        # ----- conv3: one bf16 matmul (8,1152)x(1152,256), BN+ReLU ----------
        y3 = jnp.dot(p3_ref[...].astype(jnp.bfloat16), w3_ref[...],
                     preferred_element_type=jnp.float32)            # (M3, C3)
        y3 = _batchnorm_relu(y3, g3_ref[...], be3_ref[...])

        # ----- head: AdaptiveAvgPool(1) as a tiny matmul, FC1+ReLU, FC2 -----
        pooled = jnp.dot(avg_ref[...], y3,
                         preferred_element_type=jnp.float32)        # (B, C3)
        h = jnp.dot(pooled.astype(jnp.bfloat16), fw1_ref[...],
                    preferred_element_type=jnp.float32) + fb1_ref[...]
        h = jnp.maximum(h, 0.0)
        d = jnp.dot(h.astype(jnp.bfloat16), fw2_ref[...],
                    preferred_element_type=jnp.float32) + fb2_ref[...]
        # fb2 already holds fc2 bias + flattened canonical control points.
        out_ref[...] = d

    return kernel


def tps_stn_forward(x_nchw, params, canonical):
    x = jnp.transpose(x_nchw, (0, 2, 3, 1)).astype(jnp.float32)     # NHWC
    B, H, W, _ = x.shape
    assert H == W and H % 16 == 0
    H1, Hp1 = H // 2, H // 4
    H2, Hp2 = H // 8, H // 16
    H3 = Hp2
    C1, C2, C3 = 128, 128, 256        # lane-padded channel widths in-kernel
    n_cp = canonical.shape[0]
    NP = 128                          # lane-padded head output width

    # ---- conv1 im2col (input prep for the single fused call) --------------
    k1, s1, pad1 = 7, 2, 3
    xp = jnp.pad(x, ((0, 0), (pad1, pad1), (pad1, pad1), (0, 0)))
    cols = []
    for i in range(k1):
        for j in range(k1):
            cols.append(xp[:, i:i + s1 * H1:s1, j:j + s1 * H1:s1, :])
    p1 = jnp.stack(cols, axis=3).reshape(B, H1, H1, k1 * k1 * 3)    # K=(i,j,c)
    # Row permutation:  h = 4*uu + 2*pi + p ,  w = 4*vv + 2*pj + q
    p1 = p1.reshape(B, H1 // 4, 2, 2, H1 // 4, 2, 2, k1 * k1 * 3)
    p1 = p1.transpose(3, 6, 0, 2, 5, 1, 4, 7).reshape(B * H1 * H1, k1 * k1 * 3)
    K1 = 2 * C1                                   # 147 -> 256 (lane-dense K)
    p1 = jnp.pad(p1, ((0, 0), (0, K1 - p1.shape[1]))).astype(jnp.bfloat16)

    w1 = params['w1'].reshape(k1 * k1 * 3, -1)                      # (147, 64)
    w1 = jnp.pad(w1, ((0, K1 - w1.shape[0]),
                      (0, C1 - w1.shape[1]))).astype(jnp.bfloat16)  # (256,128)
    g1 = jnp.pad(params['g1'], (0, C1 - 64), constant_values=1.0).reshape(1, C1)
    be1 = jnp.pad(params['beta1'], (0, C1 - 64)).reshape(1, C1)

    # conv2 weights: pad Cin 64->128, flatten taps -> (25*128, 128)
    w2 = jnp.pad(params['w2'], ((0, 0), (0, 0), (0, C1 - 64), (0, 0)))
    w2 = w2.reshape(5 * 5 * C1, C2).astype(jnp.bfloat16)
    g2 = params['g2'].reshape(1, C2)
    be2 = params['beta2'].reshape(1, C2)

    # conv3 weights: (3,3,128,256) -> (9*128, 256)
    w3 = params['w3'].reshape(3 * 3 * C2, C3).astype(jnp.bfloat16)
    g3 = params['g3'].reshape(1, C3)
    be3 = params['beta3'].reshape(1, C3)

    # Head: spatial-average matrix, FC weights (bf16), FC2 bias + canonical
    # folded and lane-padded to 128.
    avg = jnp.repeat(jnp.eye(B, dtype=jnp.float32), H3 * H3, axis=1) / float(H3 * H3)
    fw1 = params['fw1'].astype(jnp.bfloat16)                        # (256, 512)
    fb1 = params['fb1'].reshape(1, -1)
    fw2 = jnp.pad(params['fw2'], ((0, 0), (0, NP - 2 * n_cp))).astype(jnp.bfloat16)
    fb2 = jnp.pad(params['fb2'] + canonical.reshape(-1),
                  (0, NP - 2 * n_cp)).reshape(1, NP)

    kernel = _make_fused_kernel(B, H1, Hp1, H2, Hp2, H3, C1, C2, C3)
    inputs = (p1, w1, g1, be1, w2, g2, be2, w3, g3, be3,
              avg, fw1, fb1, fw2, fb2)
    vmem = pl.BlockSpec(memory_space=pltpu.MemorySpace.VMEM)
    out = pl.pallas_call(
        kernel,
        out_shape=jax.ShapeDtypeStruct((B, NP), jnp.float32),
        in_specs=[vmem] * len(inputs),
        out_specs=vmem,
        scratch_shapes=[
            pltpu.VMEM((B * Hp1 * Hp1, C1), jnp.float32),           # pooled conv1
            pltpu.VMEM((B * 4, H2 + 2, H2 + 2, C1), jnp.float32),   # conv2 phase grids
            pltpu.VMEM((B * H2 * H2, 25 * C1), jnp.float32),        # conv2 patches
            pltpu.VMEM((B * H2 * H2, C2), jnp.float32),             # conv2 activations
            pltpu.VMEM((B, H3 + 2, H3 + 2, C2), jnp.float32),       # conv3 padded input
            pltpu.VMEM((B * H3 * H3, 9 * C2), jnp.float32),         # conv3 patches
        ],
    )(*inputs)
    return out[:, :2 * n_cp].reshape(B, n_cp, 2)


if __name__ == "__main__":
    img_size = 32
    grid_size = 5
    n_cp = grid_size * grid_size
    B = 2

    key = jax.random.PRNGKey(0)
    keys = jax.random.split(key, 12)

    def nrm(k, shape, scale=0.05):
        return (scale * jax.random.normal(k, shape)).astype(jnp.float32)

    params = {
        # conv weights stored HWIO (kh, kw, Cin, Cout); same tensor sizes as
        # the PyTorch module.  Conv biases are intentionally absent: they
        # cancel exactly in the following train-mode BatchNorm.
        'w1': nrm(keys[0], (7, 7, 3, 64)),
        'g1': jnp.ones((64,), jnp.float32),   'beta1': jnp.zeros((64,), jnp.float32),
        'w2': nrm(keys[2], (5, 5, 64, 128)),
        'g2': jnp.ones((128,), jnp.float32),  'beta2': jnp.zeros((128,), jnp.float32),
        'w3': nrm(keys[4], (3, 3, 128, 256)),
        'g3': jnp.ones((256,), jnp.float32),  'beta3': jnp.zeros((256,), jnp.float32),
        'fw1': nrm(keys[6], (256, 512)),      'fb1': nrm(keys[7], (512,)),
        'fw2': nrm(keys[8], (512, 2 * n_cp)), 'fb2': nrm(keys[9], (2 * n_cp,)),
    }

    # canonical control points: meshgrid(linspace(-1,1,5), indexing='ij')
    cp1d = jnp.linspace(-1.0, 1.0, grid_size)
    gx, gy = jnp.meshgrid(cp1d, cp1d, indexing='ij')
    canonical = jnp.stack([gx, gy], axis=-1).reshape(-1, 2).astype(jnp.float32)

    x = jax.random.normal(keys[10], (B, 3, img_size, img_size), dtype=jnp.float32)

    fwd = jax.jit(tps_stn_forward)
    out = jax.block_until_ready(fwd(x, params, canonical))

    assert out.shape == (B, n_cp, 2), out.shape
    assert bool(jnp.all(jnp.isfinite(out)))
    print("KERNEL_OK")
</pallas_src>

<mosaic_0001>
module attributes {stable_mosaic.version = 11 : i64} {
  func.func @kernel(%arg0: memref<512x256xbf16, #tpu.memory_space<vmem>>, %arg1: memref<256x128xbf16, #tpu.memory_space<vmem>>, %arg2: memref<1x128xf32, #tpu.memory_space<vmem>>, %arg3: memref<1x128xf32, #tpu.memory_space<vmem>>, %arg4: memref<3200x128xbf16, #tpu.memory_space<vmem>>, %arg5: memref<1x128xf32, #tpu.memory_space<vmem>>, %arg6: memref<1x128xf32, #tpu.memory_space<vmem>>, %arg7: memref<1152x256xbf16, #tpu.memory_space<vmem>>, %arg8: memref<1x256xf32, #tpu.memory_space<vmem>>, %arg9: memref<1x256xf32, #tpu.memory_space<vmem>>, %arg10: memref<2x8xf32, #tpu.memory_space<vmem>>, %arg11: memref<256x512xbf16, #tpu.memory_space<vmem>>, %arg12: memref<1x512xf32, #tpu.memory_space<vmem>>, %arg13: memref<512x128xbf16, #tpu.memory_space<vmem>>, %arg14: memref<1x128xf32, #tpu.memory_space<vmem>>, %arg15: memref<2x128xf32, #tpu.memory_space<vmem>>, %arg16: memref<128x128xf32, #tpu.memory_space<vmem>>, %arg17: memref<8x6x6x128xf32, #tpu.memory_space<vmem>>, %arg18: memref<32x3200xf32, #tpu.memory_space<vmem>>, %arg19: memref<32x128xf32, #tpu.memory_space<vmem>>, %arg20: memref<2x4x4x128xf32, #tpu.memory_space<vmem>>, %arg21: memref<8x1152xf32, #tpu.memory_space<vmem>>) attributes {dimension_semantics = [], scalar_prefetch = 0 : i64, scratch_operands = 6 : i64, tpu.core_type = #tpu.core_type<tc>} {
    %c0 = arith.constant 0 : index
    %c0_0 = arith.constant 0 : index
    %0 = vector.load %arg0[%c0, %c0_0] : memref<512x256xbf16, #tpu.memory_space<vmem>>, vector<512x256xbf16>
    %c0_1 = arith.constant 0 : index
    %c0_2 = arith.constant 0 : index
    %1 = vector.load %arg1[%c0_1, %c0_2] : memref<256x128xbf16, #tpu.memory_space<vmem>>, vector<256x128xbf16>
    %cst = arith.constant dense<0.000000e+00> : vector<512x128xf32>
    %2 = tpu.matmul %0, %1, %cst {dimension_numbers = #tpu.dot_dimension_numbers<[1], [0], [0], [1], [0, 0, 1, 1], [], []>} : vector<512x256xbf16>, vector<256x128xbf16>, vector<512x128xf32> -> vector<512x128xf32>
    %c0_3 = arith.constant 0 : index
    %c0_4 = arith.constant 0 : index
    %3 = vector.load %arg2[%c0_3, %c0_4] : memref<1x128xf32, #tpu.memory_space<vmem>>, vector<1x128xf32>
    %c0_5 = arith.constant 0 : index
    %c0_6 = arith.constant 0 : index
    %4 = vector.load %arg3[%c0_5, %c0_6] : memref<1x128xf32, #tpu.memory_space<vmem>>, vector<1x128xf32>
    %cst_7 = arith.constant dense<0.000000e+00> : vector<128xf32>
    %5 = vector.multi_reduction <add>, %2, %cst_7 [0] : vector<512x128xf32> to vector<128xf32>
    %6 = vector.shape_cast %5 : vector<128xf32> to vector<1x128xf32>
    %cst_8 = arith.constant 5.120000e+02 : f32
    %7 = vector.broadcast %cst_8 : f32 to vector<1x128xf32>
    %8 = arith.divf %6, %7 : vector<1x128xf32>
    %9 = vector.broadcast %8 : vector<1x128xf32> to vector<512x128xf32>
    %10 = arith.subf %2, %9 : vector<512x128xf32>
    %11 = arith.mulf %10, %10 : vector<512x128xf32>
    %cst_9 = arith.constant dense<0.000000e+00> : vector<128xf32>
    %12 = vector.multi_reduction <add>, %11, %cst_9 [0] : vector<512x128xf32> to vector<128xf32>
    %13 = vector.shape_cast %12 : vector<128xf32> to vector<1x128xf32>
    %cst_10 = arith.constant 5.120000e+02 : f32
    %14 = vector.broadcast %cst_10 : f32 to vector<1x128xf32>
    %15 = arith.divf %13, %14 : vector<1x128xf32>
    %16 = vector.broadcast %8 : vector<1x128xf32> to vector<512x128xf32>
    %17 = arith.subf %2, %16 : vector<512x128xf32>
    %cst_11 = arith.constant 9.99999974E-6 : f32
    %18 = vector.broadcast %cst_11 : f32 to vector<1x128xf32>
    %19 = arith.addf %15, %18 : vector<1x128xf32>
    %20 = math.rsqrt %19 : vector<1x128xf32>
    %21 = vector.broadcast %20 : vector<1x128xf32> to vector<512x128xf32>
    %22 = arith.mulf %17, %21 : vector<512x128xf32>
    %23 = vector.broadcast %3 : vector<1x128xf32> to vector<512x128xf32>
    %24 = arith.mulf %22, %23 : vector<512x128xf32>
    %25 = vector.broadcast %4 : vector<1x128xf32> to vector<512x128xf32>
    %26 = arith.addf %24, %25 : vector<512x128xf32>
    %cst_12 = arith.constant 0.000000e+00 : f32
    %27 = vector.broadcast %cst_12 : f32 to vector<512x128xf32>
    %28 = arith.maximumf %26, %27 : vector<512x128xf32>
    %29 = vector.extract_strided_slice %28 {offsets = [0, 0], sizes = [128, 128], strides = [1, 1]} : vector<512x128xf32> to vector<128x128xf32>
    %30 = vector.extract_strided_slice %28 {offsets = [128, 0], sizes = [128, 128], strides = [1, 1]} : vector<512x128xf32> to vector<128x128xf32>
    %31 = arith.maximumf %29, %30 : vector<128x128xf32>
    %32 = vector.extract_strided_slice %28 {offsets = [256, 0], sizes = [128, 128], strides = [1, 1]} : vector<512x128xf32> to vector<128x128xf32>
    %33 = vector.extract_strided_slice %28 {offsets = [384, 0], sizes = [128, 128], strides = [1, 1]} : vector<512x128xf32> to vector<128x128xf32>
    %34 = arith.maximumf %32, %33 : vector<128x128xf32>
    %35 = arith.maximumf %31, %34 : vector<128x128xf32>
    %c0_13 = arith.constant 0 : index
    %c0_14 = arith.constant 0 : index
    %36 = vector.load %arg16[%c0_13, %c0_14] : memref<128x128xf32, #tpu.memory_space<vmem>>, vector<128x128xf32>
    tpu.vector_store %arg16[%c0_13, %c0_14], %35 {strides = array<i32>} : memref<128x128xf32, #tpu.memory_space<vmem>>, vector<128x128xf32>,
    %cst_15 = arith.constant 0.000000e+00 : f32
    %37 = vector.broadcast %cst_15 : f32 to vector<8x6x6x128xf32>
    %c0_16 = arith.constant 0 : index
    %c0_17 = arith.constant 0 : index
    %c0_18 = arith.constant 0 : index
    %c0_19 = arith.constant 0 : index
    %38 = vector.load %arg17[%c0_16, %c0_17, %c0_18, %c0_19] : memref<8x6x6x128xf32, #tpu.memory_space<vmem>>, vector<8x6x6x128xf32>
    tpu.vector_store %arg17[%c0_16, %c0_17, %c0_18, %c0_19], %37 {strides = array<i32>} : memref<8x6x6x128xf32, #tpu.memory_space<vmem>>, vector<8x6x6x128xf32>,
    %c0_20 = arith.constant 0 : index
    %c0_21 = arith.constant 0 : index
    %39 = vector.load %arg16[%c0_20, %c0_21] : memref<128x128xf32, #tpu.memory_space<vmem>>, vector<4x128xf32>
    %c0_22 = arith.constant 0 : index
    %c1 = arith.constant 1 : index
    %c1_23 = arith.constant 1 : index
    %c0_24 = arith.constant 0 : index
    %40 = vector.load %arg17[%c0_22, %c1, %c1_23, %c0_24] : memref<8x6x6x128xf32, #tpu.memory_space<vmem>>, vector<1x1x4x128xf32>
    %41 = vector.shape_cast %40 : vector<1x1x4x128xf32> to vector<4x128xf32>
    %42 = vector.shape_cast %39 : vector<4x128xf32> to vector<1x1x4x128xf32>
    tpu.vector_store %arg17[%c0_22, %c1, %c1_23, %c0_24], %42 {strides = array<i32>} : memref<8x6x6x128xf32, #tpu.memory_space<vmem>>, vector<1x1x4x128xf32>,
    %c4 = arith.constant 4 : index
    %c0_25 = arith.constant 0 : index
    %43 = vector.load %arg16[%c4, %c0_25] : memref<128x128xf32, #tpu.memory_space<vmem>>, vector<4x128xf32>
    %c0_26 = arith.constant 0 : index
    %c2 = arith.constant 2 : index
    %c1_27 = arith.constant 1 : index
    %c0_28 = arith.constant 0 : index
    %44 = vector.load %arg17[%c0_26, %c2, %c1_27, %c0_28] : memref<8x6x6x128xf32, #tpu.memory_space<vmem>>, vector<1x1x4x128xf32>
    %45 = vector.shape_cast %44 : vector<1x1x4x128xf32> to vector<4x128xf32>
    %46 = vector.shape_cast %43 : vector<4x128xf32> to vector<1x1x4x128xf32>
    tpu.vector_store %arg17[%c0_26, %c2, %c1_27, %c0_28], %46 {strides = array<i32>} : memref<8x6x6x128xf32, #tpu.memory_space<vmem>>, vector<1x1x4x128xf32>,
    %c8 = arith.constant 8 : index
    %c0_29 = arith.constant 0 : index
    %47 = vector.load %arg16[%c8, %c0_29] : memref<128x128xf32, #tpu.memory_space<vmem>>, vector<4x128xf32>
    %c0_30 = arith.constant 0 : index
    %c3 = arith.constant 3 : index
    %c1_31 = arith.constant 1 : index
    %c0_32 = arith.constant 0 : index
    %48 = vector.load %arg17[%c0_30, %c3, %c1_31, %c0_32] : memref<8x6x6x128xf32, #tpu.memory_space<vmem>>, vector<1x1x4x128xf32>
    %49 = vector.shape_cast %48 : vector<1x1x4x128xf32> to vector<4x128xf32>
    %50 = vector.shape_cast %47 : vector<4x128xf32> to vector<1x1x4x128xf32>
    tpu.vector_store %arg17[%c0_30, %c3, %c1_31, %c0_32], %50 {strides = array<i32>} : memref<8x6x6x128xf32, #tpu.memory_space<vmem>>, vector<1x1x4x128xf32>,
    %c12 = arith.constant 12 : index
    %c0_33 = arith.constant 0 : index
    %51 = vector.load %arg16[%c12, %c0_33] : memref<128x128xf32, #tpu.memory_space<vmem>>, vector<4x128xf32>
    %c0_34 = arith.constant 0 : index
    %c4_35 = arith.constant 4 : index
    %c1_36 = arith.constant 1 : index
    %c0_37 = arith.constant 0 : index
    %52 = vector.load %arg17[%c0_34, %c4_35, %c1_36, %c0_37] : memref<8x6x6x128xf32, #tpu.memory_space<vmem>>, vector<1x1x4x128xf32>
    %53 = vector.shape_cast %52 : vector<1x1x4x128xf32> to vector<4x128xf32>
    %54 = vector.shape_cast %51 : vector<4x128xf32> to vector<1x1x4x128xf32>
    tpu.vector_store %arg17[%c0_34, %c4_35, %c1_36, %c0_37], %54 {strides = array<i32>} : memref<8x6x6x128xf32, #tpu.memory_space<vmem>>, vector<1x1x4x128xf32>,
    %c16 = arith.constant 16 : index
    %c0_38 = arith.constant 0 : index
    %55 = vector.load %arg16[%c16, %c0_38] : memref<128x128xf32, #tpu.memory_space<vmem>>, vector<4x128xf32>
    %c1_39 = arith.constant 1 : index
    %c1_40 = arith.constant 1 : index
    %c1_41 = arith.constant 1 : index
    %c0_42 = arith.constant 0 : index
    %56 = vector.load %arg17[%c1_39, %c1_40, %c1_41, %c0_42] : memref<8x6x6x128xf32, #tpu.memory_space<vmem>>, vector<1x1x4x128xf32>
    %57 = vector.shape_cast %56 : vector<1x1x4x128xf32> to vector<4x128xf32>
    %58 = vector.shape_cast %55 : vector<4x128xf32> to vector<1x1x4x128xf32>
    tpu.vector_store %arg17[%c1_39, %c1_40, %c1_41, %c0_42], %58 {strides = array<i32>} : memref<8x6x6x128xf32, #tpu.memory_space<vmem>>, vector<1x1x4x128xf32>,
    %c20 = arith.constant 20 : index
    %c0_43 = arith.constant 0 : index
    %59 = vector.load %arg16[%c20, %c0_43] : memref<128x128xf32, #tpu.memory_space<vmem>>, vector<4x128xf32>
    %c1_44 = arith.constant 1 : index
    %c2_45 = arith.constant 2 : index
    %c1_46 = arith.constant 1 : index
    %c0_47 = arith.constant 0 : index
    %60 = vector.load %arg17[%c1_44, %c2_45, %c1_46, %c0_47] : memref<8x6x6x128xf32, #tpu.memory_space<vmem>>, vector<1x1x4x128xf32>
    %61 = vector.shape_cast %60 : vector<1x1x4x128xf32> to vector<4x128xf32>
    %62 = vector.shape_cast %59 : vector<4x128xf32> to vector<1x1x4x128xf32>
    tpu.vector_store %arg17[%c1_44, %c2_45, %c1_46, %c0_47], %62 {strides = array<i32>} : memref<8x6x6x128xf32, #tpu.memory_space<vmem>>, vector<1x1x4x128xf32>,
    %c24 = arith.constant 24 : index
    %c0_48 = arith.constant 0 : index
    %63 = vector.load %arg16[%c24, %c0_48] : memref<128x128xf32, #tpu.memory_space<vmem>>, vector<4x128xf32>
    %c1_49 = arith.constant 1 : index
    %c3_50 = arith.constant 3 : index
    %c1_51 = arith.constant 1 : index
    %c0_52 = arith.constant 0 : index
    %64 = vector.load %arg17[%c1_49, %c3_50, %c1_51, %c0_52] : memref<8x6x6x128xf32, #tpu.memory_space<vmem>>, vector<1x1x4x128xf32>
    %65 = vector.shape_cast %64 : vector<1x1x4x128xf32> to vector<4x128xf32>
    %66 = vector.shape_cast %63 : vector<4x128xf32> to vector<1x1x4x128xf32>
    tpu.vector_store %arg17[%c1_49, %c3_50, %c1_51, %c0_52], %66 {strides = array<i32>} : memref<8x6x6x128xf32, #tpu.memory_space<vmem>>, vector<1x1x4x128xf32>,
    %c28 = arith.constant 28 : index
    %c0_53 = arith.constant 0 : index
    %67 = vector.load %arg16[%c28, %c0_53] : memref<128x128xf32, #tpu.memory_space<vmem>>, vector<4x128xf32>
    %c1_54 = arith.constant 1 : index
    %c4_55 = arith.constant 4 : index
    %c1_56 = arith.constant 1 : index
    %c0_57 = arith.constant 0 : index
    %68 = vector.load %arg17[%c1_54, %c4_55, %c1_56, %c0_57] : memref<8x6x6x128xf32, #tpu.memory_space<vmem>>, vector<1x1x4x128xf32>
    %69 = vector.shape_cast %68 : vector<1x1x4x128xf32> to vector<4x128xf32>
    %70 = vector.shape_cast %67 : vector<4x128xf32> to vector<1x1x4x128xf32>
    tpu.vector_store %arg17[%c1_54, %c4_55, %c1_56, %c0_57], %70 {strides = array<i32>} : memref<8x6x6x128xf32, #tpu.memory_space<vmem>>, vector<1x1x4x128xf32>,
    %c32 = arith.constant 32 : index
    %c0_58 = arith.constant 0 : index
    %71 = vector.load %arg16[%c32, %c0_58] : memref<128x128xf32, #tpu.memory_space<vmem>>, vector<4x128xf32>
    %c2_59 = arith.constant 2 : index
    %c1_60 = arith.constant 1 : index
    %c1_61 = arith.constant 1 : index
    %c0_62 = arith.constant 0 : index
    %72 = vector.load %arg17[%c2_59, %c1_60, %c1_61, %c0_62] : memref<8x6x6x128xf32, #tpu.memory_space<vmem>>, vector<1x1x4x128xf32>
    %73 = vector.shape_cast %72 : vector<1x1x4x128xf32> to vector<4x128xf32>
    %74 = vector.shape_cast %71 : vector<4x128xf32> to vector<1x1x4x128xf32>
    tpu.vector_store %arg17[%c2_59, %c1_60, %c1_61, %c0_62], %74 {strides = array<i32>} : memref<8x6x6x128xf32, #tpu.memory_space<vmem>>, vector<1x1x4x128xf32>,
    %c36 = arith.constant 36 : index
    %c0_63 = arith.constant 0 : index
    %75 = vector.load %arg16[%c36, %c0_63] : memref<128x128xf32, #tpu.memory_space<vmem>>, vector<4x128xf32>
    %c2_64 = arith.constant 2 : index
    %c2_65 = arith.constant 2 : index
    %c1_66 = arith.constant 1 : index
    %c0_67 = arith.constant 0 : index
    %76 = vector.load %arg17[%c2_64, %c2_65, %c1_66, %c0_67] : memref<8x6x6x128xf32, #tpu.memory_space<vmem>>, vector<1x1x4x128xf32>
    %77 = vector.shape_cast %76 : vector<1x1x4x128xf32> to vector<4x128xf32>
    %78 = vector.shape_cast %75 : vector<4x128xf32> to vector<1x1x4x128xf32>
    tpu.vector_store %arg17[%c2_64, %c2_65, %c1_66, %c0_67], %78 {strides = array<i32>} : memref<8x6x6x128xf32, #tpu.memory_space<vmem>>, vector<1x1x4x128xf32>,
    %c40 = arith.constant 40 : index
    %c0_68 = arith.constant 0 : index
    %79 = vector.load %arg16[%c40, %c0_68] : memref<128x128xf32, #tpu.memory_space<vmem>>, vector<4x128xf32>
    %c2_69 = arith.constant 2 : index
    %c3_70 = arith.constant 3 : index
    %c1_71 = arith.constant 1 : index
    %c0_72 = arith.constant 0 : index
    %80 = vector.load %arg17[%c2_69, %c3_70, %c1_71, %c0_72] : memref<8x6x6x128xf32, #tpu.memory_space<vmem>>, vector<1x1x4x128xf32>
    %81 = vector.shape_cast %80 : vector<1x1x4x128xf32> to vector<4x128xf32>
    %82 = vector.shape_cast %79 : vector<4x128xf32> to vector<1x1x4x128xf32>
    tpu.vector_store %arg17[%c2_69, %c3_70, %c1_71, %c0_72], %82 {strides = array<i32>} : memref<8x6x6x128xf32, #tpu.memory_space<vmem>>, vector<1x1x4x128xf32>,
    %c44 = arith.constant 44 : index
    %c0_73 = arith.constant 0 : index
    %83 = vector.load %arg16[%c44, %c0_73] : memref<128x128xf32, #tpu.memory_space<vmem>>, vector<4x128xf32>
    %c2_74 = arith.constant 2 : index
    %c4_75 = arith.constant 4 : index
    %c1_76 = arith.constant 1 : index
    %c0_77 = arith.constant 0 : index
    %84 = vector.load %arg17[%c2_74, %c4_75, %c1_76, %c0_77] : memref<8x6x6x128xf32, #tpu.memory_space<vmem>>, vector<1x1x4x128xf32>
    %85 = vector.shape_cast %84 : vector<1x1x4x128xf32> to vector<4x128xf32>
    %86 = vector.shape_cast %83 : vector<4x128xf32> to vector<1x1x4x128xf32>
    tpu.vector_store %arg17[%c2_74, %c4_75, %c1_76, %c0_77], %86 {strides = array<i32>} : memref<8x6x6x128xf32, #tpu.memory_space<vmem>>, vector<1x1x4x128xf32>,
    %c48 = arith.constant 48 : index
    %c0_78 = arith.constant 0 : index
    %87 = vector.load %arg16[%c48, %c0_78] : memref<128x128xf32, #tpu.memory_space<vmem>>, vector<4x128xf32>
    %c3_79 = arith.constant 3 : index
    %c1_80 = arith.constant 1 : index
    %c1_81 = arith.constant 1 : index
    %c0_82 = arith.constant 0 : index
    %88 = vector.load %arg17[%c3_79, %c1_80, %c1_81, %c0_82] : memref<8x6x6x128xf32, #tpu.memory_space<vmem>>, vector<1x1x4x128xf32>
    %89 = vector.shape_cast %88 : vector<1x1x4x128xf32> to vector<4x128xf32>
    %90 = vector.shape_cast %87 : vector<4x128xf32> to vector<1x1x4x128xf32>
    tpu.vector_store %arg17[%c3_79, %c1_80, %c1_81, %c0_82], %90 {strides = array<i32>} : memref<8x6x6x128xf32, #tpu.memory_space<vmem>>, vector<1x1x4x128xf32>,
    %c52 = arith.constant 52 : index
    %c0_83 = arith.constant 0 : index
    %91 = vector.load %arg16[%c52, %c0_83] : memref<128x128xf32, #tpu.memory_space<vmem>>, vector<4x128xf32>
    %c3_84 = arith.constant 3 : index
    %c2_85 = arith.constant 2 : index
    %c1_86 = arith.constant 1 : index
    %c0_87 = arith.constant 0 : index
    %92 = vector.load %arg17[%c3_84, %c2_85, %c1_86, %c0_87] : memref<8x6x6x128xf32, #tpu.memory_space<vmem>>, vector<1x1x4x128xf32>
    %93 = vector.shape_cast %92 : vector<1x1x4x128xf32> to vector<4x128xf32>
    %94 = vector.shape_cast %91 : vector<4x128xf32> to vector<1x1x4x128xf32>
    tpu.vector_store %arg17[%c3_84, %c2_85, %c1_86, %c0_87], %94 {strides = array<i32>} : memref<8x6x6x128xf32, #tpu.memory_space<vmem>>, vector<1x1x4x128xf32>,
    %c56 = arith.constant 56 : index
    %c0_88 = arith.constant 0 : index
    %95 = vector.load %arg16[%c56, %c0_88] : memref<128x128xf32, #tpu.memory_space<vmem>>, vector<4x128xf32>
    %c3_89 = arith.constant 3 : index
    %c3_90 = arith.constant 3 : index
    %c1_91 = arith.constant 1 : index
    %c0_92 = arith.constant 0 : index
    %96 = vector.load %arg17[%c3_89, %c3_90, %c1_91, %c0_92] : memref<8x6x6x128xf32, #tpu.memory_space<vmem>>, vector<1x1x4x128xf32>
    %97 = vector.shape_cast %96 : vector<1x1x4x128xf32> to vector<4x128xf32>
    %98 = vector.shape_cast %95 : vector<4x128xf32> to vector<1x1x4x128xf32>
    tpu.vector_store %arg17[%c3_89, %c3_90, %c1_91, %c0_92], %98 {strides = array<i32>} : memref<8x6x6x128xf32, #tpu.memory_space<vmem>>, vector<1x1x4x128xf32>,
    %c60 = arith.constant 60 : index
    %c0_93 = arith.constant 0 : index
    %99 = vector.load %arg16[%c60, %c0_93] : memref<128x128xf32, #tpu.memory_space<vmem>>, vector<4x128xf32>
    %c3_94 = arith.constant 3 : index
    %c4_95 = arith.constant 4 : index
    %c1_96 = arith.constant 1 : index
    %c0_97 = arith.constant 0 : index
    %100 = vector.load %arg17[%c3_94, %c4_95, %c1_96, %c0_97] : memref<8x6x6x128xf32, #tpu.memory_space<vmem>>, vector<1x1x4x128xf32>
    %101 = vector.shape_cast %100 : vector<1x1x4x128xf32> to vector<4x128xf32>
    %102 = vector.shape_cast %99 : vector<4x128xf32> to vector<1x1x4x128xf32>
    tpu.vector_store %arg17[%c3_94, %c4_95, %c1_96, %c0_97], %102 {strides = array<i32>} : memref<8x6x6x128xf32, #tpu.memory_space<vmem>>, vector<1x1x4x128xf32>,
    %c64 = arith.constant 64 : index
    %c0_98 = arith.constant 0 : index
    %103 = vector.load %arg16[%c64, %c0_98] : memref<128x128xf32, #tpu.memory_space<vmem>>, vector<4x128xf32>
    %c4_99 = arith.constant 4 : index
    %c1_100 = arith.constant 1 : index
    %c1_101 = arith.constant 1 : index
    %c0_102 = arith.constant 0 : index
    %104 = vector.load %arg17[%c4_99, %c1_100, %c1_101, %c0_102] : memref<8x6x6x128xf32, #tpu.memory_space<vmem>>, vector<1x1x4x128xf32>
    %105 = vector.shape_cast %104 : vector<1x1x4x128xf32> to vector<4x128xf32>
    %106 = vector.shape_cast %103 : vector<4x128xf32> to vector<1x1x4x128xf32>
    tpu.vector_store %arg17[%c4_99, %c1_100, %c1_101, %c0_102], %106 {strides = array<i32>} : memref<8x6x6x128xf32, #tpu.memory_space<vmem>>, vector<1x1x4x128xf32>,
    %c68 = arith.constant 68 : index
    %c0_103 = arith.constant 0 : index
    %107 = vector.load %arg16[%c68, %c0_103] : memref<128x128xf32, #tpu.memory_space<vmem>>, vector<4x128xf32>
    %c4_104 = arith.constant 4 : index
    %c2_105 = arith.constant 2 : index
    %c1_106 = arith.constant 1 : index
    %c0_107 = arith.constant 0 : index
    %108 = vector.load %arg17[%c4_104, %c2_105, %c1_106, %c0_107] : memref<8x6x6x128xf32, #tpu.memory_space<vmem>>, vector<1x1x4x128xf32>
    %109 = vector.shape_cast %108 : vector<1x1x4x128xf32> to vector<4x128xf32>
    %110 = vector.shape_cast %107 : vector<4x128xf32> to vector<1x1x4x128xf32>
    tpu.vector_store %arg17[%c4_104, %c2_105, %c1_106, %c0_107], %110 {strides = array<i32>} : memref<8x6x6x128xf32, #tpu.memory_space<vmem>>, vector<1x1x4x128xf32>,
    %c72 = arith.constant 72 : index
    %c0_108 = arith.constant 0 : index
    %111 = vector.load %arg16[%c72, %c0_108] : memref<128x128xf32, #tpu.memory_space<vmem>>, vector<4x128xf32>
    %c4_109 = arith.constant 4 : index
    %c3_110 = arith.constant 3 : index
    %c1_111 = arith.constant 1 : index
    %c0_112 = arith.constant 0 : index
    %112 = vector.load %arg17[%c4_109, %c3_110, %c1_111, %c0_112] : memref<8x6x6x128xf32, #tpu.memory_space<vmem>>, vector<1x1x4x128xf32>
    %113 = vector.shape_cast %112 : vector<1x1x4x128xf32> to vector<4x128xf32>
    %114 = vector.shape_cast %111 : vector<4x128xf32> to vector<1x1x4x128xf32>
    tpu.vector_store %arg17[%c4_109, %c3_110, %c1_111, %c0_112], %114 {strides = array<i32>} : memref<8x6x6x128xf32, #tpu.memory_space<vmem>>, vector<1x1x4x128xf32>,
    %c76 = arith.constant 76 : index
    %c0_113 = arith.constant 0 : index
    %115 = vector.load %arg16[%c76, %c0_113] : memref<128x128xf32, #tpu.memory_space<vmem>>, vector<4x128xf32>
    %c4_114 = arith.constant 4 : index
    %c4_115 = arith.constant 4 : index
    %c1_116 = arith.constant 1 : index
    %c0_117 = arith.constant 0 : index
    %116 = vector.load %arg17[%c4_114, %c4_115, %c1_116, %c0_117] : memref<8x6x6x128xf32, #tpu.memory_space<vmem>>, vector<1x1x4x128xf32>
    %117 = vector.shape_cast %116 : vector<1x1x4x128xf32> to vector<4x128xf32>
    %118 = vector.shape_cast %115 : vector<4x128xf32> to vector<1x1x4x128xf32>
    tpu.vector_store %arg17[%c4_114, %c4_115, %c1_116, %c0_117], %118 {strides = array<i32>} : memref<8x6x6x128xf32, #tpu.memory_space<vmem>>, vector<1x1x4x128xf32>,
    %c80 = arith.constant 80 : index
    %c0_118 = arith.constant 0 : index
    %119 = vector.load %arg16[%c80, %c0_118] : memref<128x128xf32, #tpu.memory_space<vmem>>, vector<4x128xf32>
    %c5 = arith.constant 5 : index
    %c1_119 = arith.constant 1 : index
    %c1_120 = arith.constant 1 : index
    %c0_121 = arith.constant 0 : index
    %120 = vector.load %arg17[%c5, %c1_119, %c1_120, %c0_121] : memref<8x6x6x128xf32, #tpu.memory_space<vmem>>, vector<1x1x4x128xf32>
    %121 = vector.shape_cast %120 : vector<1x1x4x128xf32> to vector<4x128xf32>
    %122 = vector.shape_cast %119 : vector<4x128xf32> to vector<1x1x4x128xf32>
    tpu.vector_store %arg17[%c5, %c1_119, %c1_120, %c0_121], %122 {strides = array<i32>} : memref<8x6x6x128xf32, #tpu.memory_space<vmem>>, vector<1x1x4x128xf32>,
    %c84 = arith.constant 84 : index
    %c0_122 = arith.constant 0 : index
    %123 = vector.load %arg16[%c84, %c0_122] : memref<128x128xf32, #tpu.memory_space<vmem>>, vector<4x128xf32>
    %c5_123 = arith.constant 5 : index
    %c2_124 = arith.constant 2 : index
    %c1_125 = arith.constant 1 : index
    %c0_126 = arith.constant 0 : index
    %124 = vector.load %arg17[%c5_123, %c2_124, %c1_125, %c0_126] : memref<8x6x6x128xf32, #tpu.memory_space<vmem>>, vector<1x1x4x128xf32>
    %125 = vector.shape_cast %124 : vector<1x1x4x128xf32> to vector<4x128xf32>
    %126 = vector.shape_cast %123 : vector<4x128xf32> to vector<1x1x4x128xf32>
    tpu.vector_store %arg17[%c5_123, %c2_124, %c1_125, %c0_126], %126 {strides = array<i32>} : memref<8x6x6x128xf32, #tpu.memory_space<vmem>>, vector<1x1x4x128xf32>,
    %c88 = arith.constant 88 : index
    %c0_127 = arith.constant 0 : index
    %127 = vector.load %arg16[%c88, %c0_127] : memref<128x128xf32, #tpu.memory_space<vmem>>, vector<4x128xf32>
    %c5_128 = arith.constant 5 : index
    %c3_129 = arith.constant 3 : index
    %c1_130 = arith.constant 1 : index
    %c0_131 = arith.constant 0 : index
    %128 = vector.load %arg17[%c5_128, %c3_129, %c1_130, %c0_131] : memref<8x6x6x128xf32, #tpu.memory_space<vmem>>, vector<1x1x4x128xf32>
    %129 = vector.shape_cast %128 : vector<1x1x4x128xf32> to vector<4x128xf32>
    %130 = vector.shape_cast %127 : vector<4x128xf32> to vector<1x1x4x128xf32>
    tpu.vector_store %arg17[%c5_128, %c3_129, %c1_130, %c0_131], %130 {strides = array<i32>} : memref<8x6x6x128xf32, #tpu.memory_space<vmem>>, vector<1x1x4x128xf32>,
    %c92 = arith.constant 92 : index
    %c0_132 = arith.constant 0 : index
    %131 = vector.load %arg16[%c92, %c0_132] : memref<128x128xf32, #tpu.memory_space<vmem>>, vector<4x128xf32>
    %c5_133 = arith.constant 5 : index
    %c4_134 = arith.constant 4 : index
    %c1_135 = arith.constant 1 : index
    %c0_136 = arith.constant 0 : index
    %132 = vector.load %arg17[%c5_133, %c4_134, %c1_135, %c0_136] : memref<8x6x6x128xf32, #tpu.memory_space<vmem>>, vector<1x1x4x128xf32>
    %133 = vector.shape_cast %132 : vector<1x1x4x128xf32> to vector<4x128xf32>
    %134 = vector.shape_cast %131 : vector<4x128xf32> to vector<1x1x4x128xf32>
    tpu.vector_store %arg17[%c5_133, %c4_134, %c1_135, %c0_136], %134 {strides = array<i32>} : memref<8x6x6x128xf32, #tpu.memory_space<vmem>>, vector<1x1x4x128xf32>,
    %c96 = arith.constant 96 : index
    %c0_137 = arith.constant 0 : index
    %135 = vector.load %arg16[%c96, %c0_137] : memref<128x128xf32, #tpu.memory_space<vmem>>, vector<4x128xf32>
    %c6 = arith.constant 6 : index
    %c1_138 = arith.constant 1 : index
    %c1_139 = arith.constant 1 : index
    %c0_140 = arith.constant 0 : index
    %136 = vector.load %arg17[%c6, %c1_138, %c1_139, %c0_140] : memref<8x6x6x128xf32, #tpu.memory_space<vmem>>, vector<1x1x4x128xf32>
    %137 = vector.shape_cast %136 : vector<1x1x4x128xf32> to vector<4x128xf32>
    %138 = vector.shape_cast %135 : vector<4x128xf32> to vector<1x1x4x128xf32>
    tpu.vector_store %arg17[%c6, %c1_138, %c1_139, %c0_140], %138 {strides = array<i32>} : memref<8x6x6x128xf32, #tpu.memory_space<vmem>>, vector<1x1x4x128xf32>,
    %c100 = arith.constant 100 : index
    %c0_141 = arith.constant 0 : index
    %139 = vector.load %arg16[%c100, %c0_141] : memref<128x128xf32, #tpu.memory_space<vmem>>, vector<4x128xf32>
    %c6_142 = arith.constant 6 : index
    %c2_143 = arith.constant 2 : index
    %c1_144 = arith.constant 1 : index
    %c0_145 = arith.constant 0 : index
    %140 = vector.load %arg17[%c6_142, %c2_143, %c1_144, %c0_145] : memref<8x6x6x128xf32, #tpu.memory_space<vmem>>, vector<1x1x4x128xf32>
    %141 = vector.shape_cast %140 : vector<1x1x4x128xf32> to vector<4x128xf32>
    %142 = vector.shape_cast %139 : vector<4x128xf32> to vector<1x1x4x128xf32>
    tpu.vector_store %arg17[%c6_142, %c2_143, %c1_144, %c0_145], %142 {strides = array<i32>} : memref<8x6x6x128xf32, #tpu.memory_space<vmem>>, vector<1x1x4x128xf32>,
    %c104 = arith.constant 104 : index
    %c0_146 = arith.constant 0 : index
    %143 = vector.load %arg16[%c104, %c0_146] : memref<128x128xf32, #tpu.memory_space<vmem>>, vector<4x128xf32>
    %c6_147 = arith.constant 6 : index
    %c3_148 = arith.constant 3 : index
    %c1_149 = arith.constant 1 : index
    %c0_150 = arith.constant 0 : index
    %144 = vector.load %arg17[%c6_147, %c3_148, %c1_149, %c0_150] : memref<8x6x6x128xf32, #tpu.memory_space<vmem>>, vector<1x1x4x128xf32>
    %145 = vector.shape_cast %144 : vector<1x1x4x128xf32> to vector<4x128xf32>
    %146 = vector.shape_cast %143 : vector<4x128xf32> to vector<1x1x4x128xf32>
    tpu.vector_store %arg17[%c6_147, %c3_148, %c1_149, %c0_150], %146 {strides = array<i32>} : memref<8x6x6x128xf32, #tpu.memory_space<vmem>>, vector<1x1x4x128xf32>,
    %c108 = arith.constant 108 : index
    %c0_151 = arith.constant 0 : index
    %147 = vector.load %arg16[%c108, %c0_151] : memref<128x128xf32, #tpu.memory_space<vmem>>, vector<4x128xf32>
    %c6_152 = arith.constant 6 : index
    %c4_153 = arith.constant 4 : index
    %c1_154 = arith.constant 1 : index
    %c0_155 = arith.constant 0 : index
    %148 = vector.load %arg17[%c6_152, %c4_153, %c1_154, %c0_155] : memref<8x6x6x128xf32, #tpu.memory_space<vmem>>, vector<1x1x4x128xf32>
    %149 = vector.shape_cast %148 : vector<1x1x4x128xf32> to vector<4x128xf32>
    %150 = vector.shape_cast %147 : vector<4x128xf32> to vector<1x1x4x128xf32>
    tpu.vector_store %arg17[%c6_152, %c4_153, %c1_154, %c0_155], %150 {strides = array<i32>} : memref<8x6x6x128xf32, #tpu.memory_space<vmem>>, vector<1x1x4x128xf32>,
    %c112 = arith.constant 112 : index
    %c0_156 = arith.constant 0 : index
    %151 = vector.load %arg16[%c112, %c0_156] : memref<128x128xf32, #tpu.memory_space<vmem>>, vector<4x128xf32>
    %c7 = arith.constant 7 : index
    %c1_157 = arith.constant 1 : index
    %c1_158 = arith.constant 1 : index
    %c0_159 = arith.constant 0 : index
    %152 = vector.load %arg17[%c7, %c1_157, %c1_158, %c0_159] : memref<8x6x6x128xf32, #tpu.memory_space<vmem>>, vector<1x1x4x128xf32>
    %153 = vector.shape_cast %152 : vector<1x1x4x128xf32> to vector<4x128xf32>
    %154 = vector.shape_cast %151 : vector<4x128xf32> to vector<1x1x4x128xf32>
    tpu.vector_store %arg17[%c7, %c1_157, %c1_158, %c0_159], %154 {strides = array<i32>} : memref<8x6x6x128xf32, #tpu.memory_space<vmem>>, vector<1x1x4x128xf32>,
    %c116 = arith.constant 116 : index
    %c0_160 = arith.constant 0 : index
    %155 = vector.load %arg16[%c116, %c0_160] : memref<128x128xf32, #tpu.memory_space<vmem>>, vector<4x128xf32>
    %c7_161 = arith.constant 7 : index
    %c2_162 = arith.constant 2 : index
    %c1_163 = arith.constant 1 : index
    %c0_164 = arith.constant 0 : index
    %156 = vector.load %arg17[%c7_161, %c2_162, %c1_163, %c0_164] : memref<8x6x6x128xf32, #tpu.memory_space<vmem>>, vector<1x1x4x128xf32>
    %157 = vector.shape_cast %156 : vector<1x1x4x128xf32> to vector<4x128xf32>
    %158 = vector.shape_cast %155 : vector<4x128xf32> to vector<1x1x4x128xf32>
    tpu.vector_store %arg17[%c7_161, %c2_162, %c1_163, %c0_164], %158 {strides = array<i32>} : memref<8x6x6x128xf32, #tpu.memory_space<vmem>>, vector<1x1x4x128xf32>,
    %c120 = arith.constant 120 : index
    %c0_165 = arith.constant 0 : index
    %159 = vector.load %arg16[%c120, %c0_165] : memref<128x128xf32, #tpu.memory_space<vmem>>, vector<4x128xf32>
    %c7_166 = arith.constant 7 : index
    %c3_167 = arith.constant 3 : index
    %c1_168 = arith.constant 1 : index
    %c0_169 = arith.constant 0 : index
    %160 = vector.load %arg17[%c7_166, %c3_167, %c1_168, %c0_169] : memref<8x6x6x128xf32, #tpu.memory_space<vmem>>, vector<1x1x4x128xf32>
    %161 = vector.shape_cast %160 : vector<1x1x4x128xf32> to vector<4x128xf32>
    %162 = vector.shape_cast %159 : vector<4x128xf32> to vector<1x1x4x128xf32>
    tpu.vector_store %arg17[%c7_166, %c3_167, %c1_168, %c0_169], %162 {strides = array<i32>} : memref<8x6x6x128xf32, #tpu.memory_space<vmem>>, vector<1x1x4x128xf32>,
    %c124 = arith.constant 124 : index
    %c0_170 = arith.constant 0 : index
    %163 = vector.load %arg16[%c124, %c0_170] : memref<128x128xf32, #tpu.memory_space<vmem>>, vector<4x128xf32>
    %c7_171 = arith.constant 7 : index
    %c4_172 = arith.constant 4 : index
    %c1_173 = arith.constant 1 : index
    %c0_174 = arith.constant 0 : index
    %164 = vector.load %arg17[%c7_171, %c4_172, %c1_173, %c0_174] : memref<8x6x6x128xf32, #tpu.memory_space<vmem>>, vector<1x1x4x128xf32>
    %165 = vector.shape_cast %164 : vector<1x1x4x128xf32> to vector<4x128xf32>
    %166 = vector.shape_cast %163 : vector<4x128xf32> to vector<1x1x4x128xf32>
    tpu.vector_store %arg17[%c7_171, %c4_172, %c1_173, %c0_174], %166 {strides = array<i32>} : memref<8x6x6x128xf32, #tpu.memory_space<vmem>>, vector<1x1x4x128xf32>,
    %c0_175 = arith.constant 0 : index
    %c0_176 = arith.constant 0 : index
    %c0_177 = arith.constant 0 : index
    %c0_178 = arith.constant 0 : index
    %167 = vector.load %arg17[%c0_175, %c0_176, %c0_177, %c0_178] : memref<8x6x6x128xf32, #tpu.memory_space<vmem>>, vector<1x1x4x128xf32>
    %168 = vector.shape_cast %167 : vector<1x1x4x128xf32> to vector<4x128xf32>
    %c0_179 = arith.constant 0 : index
    %c0_180 = arith.constant 0 : index
    %169 = vector.load %arg18[%c0_179, %c0_180] : memref<32x3200xf32, #tpu.memory_space<vmem>>, vector<4x128xf32>
    tpu.vector_store %arg18[%c0_179, %c0_180], %168 {strides = array<i32>} : memref<32x3200xf32, #tpu.memory_space<vmem>>, vector<4x128xf32>,
    %c0_181 = arith.constant 0 : index
    %c1_182 = arith.constant 1 : index
    %c0_183 = arith.constant 0 : index
    %c0_184 = arith.constant 0 : index
    %170 = vector.load %arg17[%c0_181, %c1_182, %c0_183, %c0_184] : memref<8x6x6x128xf32, #tpu.memory_space<vmem>>, vector<1x1x4x128xf32>
    %171 = vector.shape_cast %170 : vector<1x1x4x128xf32> to vector<4x128xf32>
    %c4_185 = arith.constant 4 : index
    %c0_186 = arith.constant 0 : index
    %172 = vector.load %arg18[%c4_185, %c0_186] : memref<32x3200xf32, #tpu.memory_space<vmem>>, vector<4x128xf32>
    tpu.vector_store %arg18[%c4_185, %c0_186], %171 {strides = array<i32>} : memref<32x3200xf32, #tpu.memory_space<vmem>>, vector<4x128xf32>,
    %c0_187 = arith.constant 0 : index
    %c2_188 = arith.constant 2 : index
    %c0_189 = arith.constant 0 : index
    %c0_190 = arith.constant 0 : index
    %173 = vector.load %arg17[%c0_187, %c2_188, %c0_189, %c0_190] : memref<8x6x6x128xf32, #tpu.memory_space<vmem>>, vector<1x1x4x128xf32>
    %174 = vector.shape_cast %173 : vector<1x1x4x128xf32> to vector<4x128xf32>
    %c8_191 = arith.constant 8 : index
    %c0_192 = arith.constant 0 : index
    %175 = vector.load %arg18[%c8_191, %c0_192] : memref<32x3200xf32, #tpu.memory_space<vmem>>, vector<4x128xf32>
    tpu.vector_store %arg18[%c8_191, %c0_192], %174 {strides = array<i32>} : memref<32x3200xf32, #tpu.memory_space<vmem>>, vector<4x128xf32>,
    %c0_193 = arith.constant 0 : index
    %c3_194 = arith.constant 3 : index
    %c0_195 = arith.constant 0 : index
    %c0_196 = arith.constant 0 : index
    %176 = vector.load %arg17[%c0_193, %c3_194, %c0_195, %c0_196] : memref<8x6x6x128xf32, #tpu.memory_space<vmem>>, vector<1x1x4x128xf32>
    %177 = vector.shape_cast %176 : vector<1x1x4x128xf32> to vector<4x128xf32>
    %c12_197 = arith.constant 12 : index
    %c0_198 = arith.constant 0 : index
    %178 = vector.load %arg18[%c12_197, %c0_198] : memref<32x3200xf32, #tpu.memory_space<vmem>>, vector<4x128xf32>
    tpu.vector_store %arg18[%c12_197, %c0_198], %177 {strides = array<i32>} : memref<32x3200xf32, #tpu.memory_space<vmem>>, vector<4x128xf32>,
    %c4_199 = arith.constant 4 : index
    %c0_200 = arith.constant 0 : index
    %c0_201 = arith.constant 0 : index
    %c0_202 = arith.constant 0 : index
    %179 = vector.load %arg17[%c4_199, %c0_200, %c0_201, %c0_202] : memref<8x6x6x128xf32, #tpu.memory_space<vmem>>, vector<1x1x4x128xf32>
    %180 = vector.shape_cast %179 : vector<1x1x4x128xf32> to vector<4x128xf32>
    %c16_203 = arith.constant 16 : index
    %c0_204 = arith.constant 0 : index
    %181 = vector.load %arg18[%c16_203, %c0_204] : memref<32x3200xf32, #tpu.memory_space<vmem>>, vector<4x128xf32>
    tpu.vector_store %arg18[%c16_203, %c0_204], %180 {strides = array<i32>} : memref<32x3200xf32, #tpu.memory_space<vmem>>, vector<4x128xf32>,
    %c4_205 = arith.constant 4 : index
    %c1_206 = arith.constant 1 : index
    %c0_207 = arith.constant 0 : index
    %c0_208 = arith.constant 0 : index
    %182 = vector.load %arg17[%c4_205, %c1_206, %c0_207, %c0_208] : memref<8x6x6x128xf32, #tpu.memory_space<vmem>>, vector<1x1x4x128xf32>
    %183 = vector.shape_cast %182 : vector<1x1x4x128xf32> to vector<4x128xf32>
    %c20_209 = arith.constant 20 : index
    %c0_210 = arith.constant 0 : index
    %184 = vector.load %arg18[%c20_209, %c0_210] : memref<32x3200xf32, #tpu.memory_space<vmem>>, vector<4x128xf32>
    tpu.vector_store %arg18[%c20_209, %c0_210], %183 {strides = array<i32>} : memref<32x3200xf32, #tpu.memory_space<vmem>>, vector<4x128xf32>,
    %c4_211 = arith.constant 4 : index
    %c2_212 = arith.constant 2 : index
    %c0_213 = arith.constant 0 : index
    %c0_214 = arith.constant 0 : index
    %185 = vector.load %arg17[%c4_211, %c2_212, %c0_213, %c0_214] : memref<8x6x6x128xf32, #tpu.memory_space<vmem>>, vector<1x1x4x128xf32>
    %186 = vector.shape_cast %185 : vector<1x1x4x128xf32> to vector<4x128xf32>
    %c24_215 = arith.constant 24 : index
    %c0_216 = arith.constant 0 : index
    %187 = vector.load %arg18[%c24_215, %c0_216] : memref<32x3200xf32, #tpu.memory_space<vmem>>, vector<4x128xf32>
    tpu.vector_store %arg18[%c24_215, %c0_216], %186 {strides = array<i32>} : memref<32x3200xf32, #tpu.memory_space<vmem>>, vector<4x128xf32>,
    %c4_217 = arith.constant 4 : index
    %c3_218 = arith.constant 3 : index
    %c0_219 = arith.constant 0 : index
    %c0_220 = arith.constant 0 : index
    %188 = vector.load %arg17[%c4_217, %c3_218, %c0_219, %c0_220] : memref<8x6x6x128xf32, #tpu.memory_space<vmem>>, vector<1x1x4x128xf32>
    %189 = vector.shape_cast %188 : vector<1x1x4x128xf32> to vector<4x128xf32>
    %c28_221 = arith.constant 28 : index
    %c0_222 = arith.constant 0 : index
    %190 = vector.load %arg18[%c28_221, %c0_222] : memref<32x3200xf32, #tpu.memory_space<vmem>>, vector<4x128xf32>
    tpu.vector_store %arg18[%c28_221, %c0_222], %189 {strides = array<i32>} : memref<32x3200xf32, #tpu.memory_space<vmem>>, vector<4x128xf32>,
    %c1_223 = arith.constant 1 : index
    %c0_224 = arith.constant 0 : index
    %c0_225 = arith.constant 0 : index
    %c0_226 = arith.constant 0 : index
    %191 = vector.load %arg17[%c1_223, %c0_224, %c0_225, %c0_226] : memref<8x6x6x128xf32, #tpu.memory_space<vmem>>, vector<1x1x4x128xf32>
    %192 = vector.shape_cast %191 : vector<1x1x4x128xf32> to vector<4x128xf32>
    %c0_227 = arith.constant 0 : index
    %c128 = arith.constant 128 : index
    %193 = vector.load %arg18[%c0_227, %c128] : memref<32x3200xf32, #tpu.memory_space<vmem>>, vector<4x128xf32>
    tpu.vector_store %arg18[%c0_227, %c128], %192 {strides = array<i32>} : memref<32x3200xf32, #tpu.memory_space<vmem>>, vector<4x128xf32>,
    %c1_228 = arith.constant 1 : index
    %c1_229 = arith.constant 1 : index
    %c0_230 = arith.constant 0 : index
    %c0_231 = arith.constant 0 : index
    %194 = vector.load %arg17[%c1_228, %c1_229, %c0_230, %c0_231] : memref<8x6x6x128xf32, #tpu.memory_space<vmem>>, vector<1x1x4x128xf32>
    %195 = vector.shape_cast %194 : vector<1x1x4x128xf32> to vector<4x128xf32>
    %c4_232 = arith.constant 4 : index
    %c128_233 = arith.constant 128 : index
    %196 = vector.load %arg18[%c4_232, %c128_233] : memref<32x3200xf32, #tpu.memory_space<vmem>>, vector<4x128xf32>
    tpu.vector_store %arg18[%c4_232, %c128_233], %195 {strides = array<i32>} : memref<32x3200xf32, #tpu.memory_space<vmem>>, vector<4x128xf32>,
    %c1_234 = arith.constant 1 : index
    %c2_235 = arith.constant 2 : index
    %c0_236 = arith.constant 0 : index
    %c0_237 = arith.constant 0 : index
    %197 = vector.load %arg17[%c1_234, %c2_235, %c0_236, %c0_237] : memref<8x6x6x128xf32, #tpu.memory_space<vmem>>, vector<1x1x4x128xf32>
    %198 = vector.shape_cast %197 : vector<1x1x4x128xf32> to vector<4x128xf32>
    %c8_238 = arith.constant 8 : index
    %c128_239 = arith.constant 128 : index
    %199 = vector.load %arg18[%c8_238, %c128_239] : memref<32x3200xf32, #tpu.memory_space<vmem>>, vector<4x128xf32>
    tpu.vector_store %arg18[%c8_238, %c128_239], %198 {strides = array<i32>} : memref<32x3200xf32, #tpu.memory_space<vmem>>, vector<4x128xf32>,
    %c1_240 = arith.constant 1 : index
    %c3_241 = arith.constant 3 : index
    %c0_242 = arith.constant 0 : index
    %c0_243 = arith.constant 0 : index
    %200 = vector.load %arg17[%c1_240, %c3_241, %c0_242, %c0_243] : memref<8x6x6x128xf32, #tpu.memory_space<vmem>>, vector<1x1x4x128xf32>
    %201 = vector.shape_cast %200 : vector<1x1x4x128xf32> to vector<4x128xf32>
    %c12_244 = arith.constant 12 : index
    %c128_245 = arith.constant 128 : index
    %202 = vector.load %arg18[%c12_244, %c128_245] : memref<32x3200xf32, #tpu.memory_space<vmem>>, vector<4x128xf32>
    tpu.vector_store %arg18[%c12_244, %c128_245], %201 {strides = array<i32>} : memref<32x3200xf32, #tpu.memory_space<vmem>>, vector<4x128xf32>,
    %c5_246 = arith.constant 5 : index
    %c0_247 = arith.constant 0 : index
    %c0_248 = arith.constant 0 : index
    %c0_249 = arith.constant 0 : index
    %203 = vector.load %arg17[%c5_246, %c0_247, %c0_248, %c0_249] : memref<8x6x6x128xf32, #tpu.memory_space<vmem>>, vector<1x1x4x128xf32>
    %204 = vector.shape_cast %203 : vector<1x1x4x128xf32> to vector<4x128xf32>
    %c16_250 = arith.constant 16 : index
    %c128_251 = arith.constant 128 : index
    %205 = vector.load %arg18[%c16_250, %c128_251] : memref<32x3200xf32, #tpu.memory_space<vmem>>, vector<4x128xf32>
    tpu.vector_store %arg18[%c16_250, %c128_251], %204 {strides = array<i32>} : memref<32x3200xf32, #tpu.memory_space<vmem>>, vector<4x128xf32>,
    %c5_252 = arith.constant 5 : index
    %c1_253 = arith.constant 1 : index
    %c0_254 = arith.constant 0 : index
    %c0_255 = arith.constant 0 : index
    %206 = vector.load %arg17[%c5_252, %c1_253, %c0_254, %c0_255] : memref<8x6x6x128xf32, #tpu.memory_space<vmem>>, vector<1x1x4x128xf32>
    %207 = vector.shape_cast %206 : vector<1x1x4x128xf32> to vector<4x128xf32>
    %c20_256 = arith.constant 20 : index
    %c128_257 = arith.constant 128 : index
    %208 = vector.load %arg18[%c20_256, %c128_257] : memref<32x3200xf32, #tpu.memory_space<vmem>>, vector<4x128xf32>
    tpu.vector_store %arg18[%c20_256, %c128_257], %207 {strides = array<i32>} : memref<32x3200xf32, #tpu.memory_space<vmem>>, vector<4x128xf32>,
    %c5_258 = arith.constant 5 : index
    %c2_259 = arith.constant 2 : index
    %c0_260 = arith.constant 0 : index
    %c0_261 = arith.constant 0 : index
    %209 = vector.load %arg17[%c5_258, %c2_259, %c0_260, %c0_261] : memref<8x6x6x128xf32, #tpu.memory_space<vmem>>, vector<1x1x4x128xf32>
    %210 = vector.shape_cast %209 : vector<1x1x4x128xf32> to vector<4x128xf32>
    %c24_262 = arith.constant 24 : index
    %c128_263 = arith.constant 128 : index
    %211 = vector.load %arg18[%c24_262, %c128_263] : memref<32x3200xf32, #tpu.memory_space<vmem>>, vector<4x128xf32>
    tpu.vector_store %arg18[%c24_262, %c128_263], %210 {strides = array<i32>} : memref<32x3200xf32, #tpu.memory_space<vmem>>, vector<4x128xf32>,
    %c5_264 = arith.constant 5 : index
    %c3_265 = arith.constant 3 : index
    %c0_266 = arith.constant 0 : index
    %c0_267 = arith.constant 0 : index
    %212 = vector.load %arg17[%c5_264, %c3_265, %c0_266, %c0_267] : memref<8x6x6x128xf32, #tpu.memory_space<vmem>>, vector<1x1x4x128xf32>
    %213 = vector.shape_cast %212 : vector<1x1x4x128xf32> to vector<4x128xf32>
    %c28_268 = arith.constant 28 : index
    %c128_269 = arith.constant 128 : index
    %214 = vector.load %arg18[%c28_268, %c128_269] : memref<32x3200xf32, #tpu.memory_space<vmem>>, vector<4x128xf32>
    tpu.vector_store %arg18[%c28_268, %c128_269], %213 {strides = array<i32>} : memref<32x3200xf32, #tpu.memory_space<vmem>>, vector<4x128xf32>,
    %c0_270 = arith.constant 0 : index
    %c0_271 = arith.constant 0 : index
    %c1_272 = arith.constant 1 : index
    %c0_273 = arith.constant 0 : index
    %215 = vector.load %arg17[%c0_270, %c0_271, %c1_272, %c0_273] : memref<8x6x6x128xf32, #tpu.memory_space<vmem>>, vector<1x1x4x128xf32>
    %216 = vector.shape_cast %215 : vector<1x1x4x128xf32> to vector<4x128xf32>
    %c0_274 = arith.constant 0 : index
    %c256 = arith.constant 256 : index
    %217 = vector.load %arg18[%c0_274, %c256] : memref<32x3200xf32, #tpu.memory_space<vmem>>, vector<4x128xf32>
    tpu.vector_store %arg18[%c0_274, %c256], %216 {strides = array<i32>} : memref<32x3200xf32, #tpu.memory_space<vmem>>, vector<4x128xf32>,
    %c0_275 = arith.constant 0 : index
    %c1_276 = arith.constant 1 : index
    %c1_277 = arith.constant 1 : index
    %c0_278 = arith.constant 0 : index
    %218 = vector.load %arg17[%c0_275, %c1_276, %c1_277, %c0_278] : memref<8x6x6x128xf32, #tpu.memory_space<vmem>>, vector<1x1x4x128xf32>
    %219 = vector.shape_cast %218 : vector<1x1x4x128xf32> to vector<4x128xf32>
    %c4_279 = arith.constant 4 : index
    %c256_280 = arith.constant 256 : index
    %220 = vector.load %arg18[%c4_279, %c256_280] : memref<32x3200xf32, #tpu.memory_space<vmem>>, vector<4x128xf32>
    tpu.vector_store %arg18[%c4_279, %c256_280], %219 {strides = array<i32>} : memref<32x3200xf32, #tpu.memory_space<vmem>>, vector<4x128xf32>,
    %c0_281 = arith.constant 0 : index
    %c2_282 = arith.constant 2 : index
    %c1_283 = arith.constant 1 : index
    %c0_284 = arith.constant 0 : index
    %221 = vector.load %arg17[%c0_281, %c2_282, %c1_283, %c0_284] : memref<8x6x6x128xf32, #tpu.memory_space<vmem>>, vector<1x1x4x128xf32>
    %222 = vector.shape_cast %221 : vector<1x1x4x128xf32> to vector<4x128xf32>
    %c8_285 = arith.constant 8 : index
    %c256_286 = arith.constant 256 : index
    %223 = vector.load %arg18[%c8_285, %c256_286] : memref<32x3200xf32, #tpu.memory_space<vmem>>, vector<4x128xf32>
    tpu.vector_store %arg18[%c8_285, %c256_286], %222 {strides = array<i32>} : memref<32x3200xf32, #tpu.memory_space<vmem>>, vector<4x128xf32>,
    %c0_287 = arith.constant 0 : index
    %c3_288 = arith.constant 3 : index
    %c1_289 = arith.constant 1 : index
    %c0_290 = arith.constant 0 : index
    %224 = vector.load %arg17[%c0_287, %c3_288, %c1_289, %c0_290] : memref<8x6x6x128xf32, #tpu.memory_space<vmem>>, vector<1x1x4x128xf32>
    %225 = vector.shape_cast %224 : vector<1x1x4x128xf32> to vector<4x128xf32>
    %c12_291 = arith.constant 12 : index
    %c256_292 = arith.constant 256 : index
    %226 = vector.load %arg18[%c12_291, %c256_292] : memref<32x3200xf32, #tpu.memory_space<vmem>>, vector<4x128xf32>
    tpu.vector_store %arg18[%c12_291, %c256_292], %225 {strides = array<i32>} : memref<32x3200xf32, #tpu.memory_space<vmem>>, vector<4x128xf32>,
    %c4_293 = arith.constant 4 : index
    %c0_294 = arith.constant 0 : index
    %c1_295 = arith.constant 1 : index
    %c0_296 = arith.constant 0 : index
    %227 = vector.load %arg17[%c4_293, %c0_294, %c1_295, %c0_296] : memref<8x6x6x128xf32, #tpu.memory_space<vmem>>, vector<1x1x4x128xf32>
    %228 = vector.shape_cast %227 : vector<1x1x4x128xf32> to vector<4x128xf32>
    %c16_297 = arith.constant 16 : index
    %c256_298 = arith.constant 256 : index
    %229 = vector.load %arg18[%c16_297, %c256_298] : memref<32x3200xf32, #tpu.memory_space<vmem>>, vector<4x128xf32>
    tpu.vector_store %arg18[%c16_297, %c256_298], %228 {strides = array<i32>} : memref<32x3200xf32, #tpu.memory_space<vmem>>, vector<4x128xf32>,
    %c4_299 = arith.constant 4 : index
    %c1_300 = arith.constant 1 : index
    %c1_301 = arith.constant 1 : index
    %c0_302 = arith.constant 0 : index
    %230 = vector.load %arg17[%c4_299, %c1_300, %c1_301, %c0_302] : memref<8x6x6x128xf32, #tpu.memory_space<vmem>>, vector<1x1x4x128xf32>
    %231 = vector.shape_cast %230 : vector<1x1x4x128xf32> to vector<4x128xf32>
    %c20_303 = arith.constant 20 : index
    %c256_304 = arith.constant 256 : index
    %232 = vector.load %arg18[%c20_303, %c256_304] : memref<32x3200xf32, #tpu.memory_space<vmem>>, vector<4x128xf32>
    tpu.vector_store %arg18[%c20_303, %c256_304], %231 {strides = array<i32>} : memref<32x3200xf32, #tpu.memory_space<vmem>>, vector<4x128xf32>,
    %c4_305 = arith.constant 4 : index
    %c2_306 = arith.constant 2 : index
    %c1_307 = arith.constant 1 : index
    %c0_308 = arith.constant 0 : index
    %233 = vector.load %arg17[%c4_305, %c2_306, %c1_307, %c0_308] : memref<8x6x6x128xf32, #tpu.memory_space<vmem>>, vector<1x1x4x128xf32>
    %234 = vector.shape_cast %233 : vector<1x1x4x128xf32> to vector<4x128xf32>
    %c24_309 = arith.constant 24 : index
    %c256_310 = arith.constant 256 : index
    %235 = vector.load %arg18[%c24_309, %c256_310] : memref<32x3200xf32, #tpu.memory_space<vmem>>, vector<4x128xf32>
    tpu.vector_store %arg18[%c24_309, %c256_310], %234 {strides = array<i32>} : memref<32x3200xf32, #tpu.memory_space<vmem>>, vector<4x128xf32>,
    %c4_311 = arith.constant 4 : index
    %c3_312 = arith.constant 3 : index
    %c1_313 = arith.constant 1 : index
    %c0_314 = arith.constant 0 : index
    %236 = vector.load %arg17[%c4_311, %c3_312, %c1_313, %c0_314] : memref<8x6x6x128xf32, #tpu.memory_space<vmem>>, vector<1x1x4x128xf32>
    %237 = vector.shape_cast %236 : vector<1x1x4x128xf32> to vector<4x128xf32>
    %c28_315 = arith.constant 28 : index
    %c256_316 = arith.constant 256 : index
    %238 = vector.load %arg18[%c28_315, %c256_316] : memref<32x3200xf32, #tpu.memory_space<vmem>>, vector<4x128xf32>
    tpu.vector_store %arg18[%c28_315, %c256_316], %237 {strides = array<i32>} : memref<32x3200xf32, #tpu.memory_space<vmem>>, vector<4x128xf32>,
    %c1_317 = arith.constant 1 : index
    %c0_318 = arith.constant 0 : index
    %c1_319 = arith.constant 1 : index
    %c0_320 = arith.constant 0 : index
    %239 = vector.load %arg17[%c1_317, %c0_318, %c1_319, %c0_320] : memref<8x6x6x128xf32, #tpu.memory_space<vmem>>, vector<1x1x4x128xf32>
    %240 = vector.shape_cast %239 : vector<1x1x4x128xf32> to vector<4x128xf32>
    %c0_321 = arith.constant 0 : index
    %c384 = arith.constant 384 : index
    %241 = vector.load %arg18[%c0_321, %c384] : memref<32x3200xf32, #tpu.memory_space<vmem>>, vector<4x128xf32>
    tpu.vector_store %arg18[%c0_321, %c384], %240 {strides = array<i32>} : memref<32x3200xf32, #tpu.memory_space<vmem>>, vector<4x128xf32>,
    %c1_322 = arith.constant 1 : index
    %c1_323 = arith.constant 1 : index
    %c1_324 = arith.constant 1 : index
    %c0_325 = arith.constant 0 : index
    %242 = vector.load %arg17[%c1_322, %c1_323, %c1_324, %c0_325] : memref<8x6x6x128xf32, #tpu.memory_space<vmem>>, vector<1x1x4x128xf32>
    %243 = vector.shape_cast %242 : vector<1x1x4x128xf32> to vector<4x128xf32>
    %c4_326 = arith.constant 4 : index
    %c384_327 = arith.constant 384 : index
    %244 = vector.load %arg18[%c4_326, %c384_327] : memref<32x3200xf32, #tpu.memory_space<vmem>>, vector<4x128xf32>
    tpu.vector_store %arg18[%c4_326, %c384_327], %243 {strides = array<i32>} : memref<32x3200xf32, #tpu.memory_space<vmem>>, vector<4x128xf32>,
    %c1_328 = arith.constant 1 : index
    %c2_329 = arith.constant 2 : index
    %c1_330 = arith.constant 1 : index
    %c0_331 = arith.constant 0 : index
    %245 = vector.load %arg17[%c1_328, %c2_329, %c1_330, %c0_331] : memref<8x6x6x128xf32, #tpu.memory_space<vmem>>, vector<1x1x4x128xf32>
    %246 = vector.shape_cast %245 : vector<1x1x4x128xf32> to vector<4x128xf32>
    %c8_332 = arith.constant 8 : index
    %c384_333 = arith.constant 384 : index
    %247 = vector.load %arg18[%c8_332, %c384_333] : memref<32x3200xf32, #tpu.memory_space<vmem>>, vector<4x128xf32>
    tpu.vector_store %arg18[%c8_332, %c384_333], %246 {strides = array<i32>} : memref<32x3200xf32, #tpu.memory_space<vmem>>, vector<4x128xf32>,
    %c1_334 = arith.constant 1 : index
    %c3_335 = arith.constant 3 : index
    %c1_336 = arith.constant 1 : index
    %c0_337 = arith.constant 0 : index
    %248 = vector.load %arg17[%c1_334, %c3_335, %c1_336, %c0_337] : memref<8x6x6x128xf32, #tpu.memory_space<vmem>>, vector<1x1x4x128xf32>
    %249 = vector.shape_cast %248 : vector<1x1x4x128xf32> to vector<4x128xf32>
    %c12_338 = arith.constant 12 : index
    %c384_339 = arith.constant 384 : index
    %250 = vector.load %arg18[%c12_338, %c384_339] : memref<32x3200xf32, #tpu.memory_space<vmem>>, vector<4x128xf32>
    tpu.vector_store %arg18[%c12_338, %c384_339], %249 {strides = array<i32>} : memref<32x3200xf32, #tpu.memory_space<vmem>>, vector<4x128xf32>,
    %c5_340 = arith.constant 5 : index
    %c0_341 = arith.constant 0 : index
    %c1_342 = arith.constant 1 : index
    %c0_343 = arith.constant 0 : index
    %251 = vector.load %arg17[%c5_340, %c0_341, %c1_342, %c0_343] : memref<8x6x6x128xf32, #tpu.memory_space<vmem>>, vector<1x1x4x128xf32>
    %252 = vector.shape_cast %251 : vector<1x1x4x128xf32> to vector<4x128xf32>
    %c16_344 = arith.constant 16 : index
    %c384_345 = arith.constant 384 : index
    %253 = vector.load %arg18[%c16_344, %c384_345] : memref<32x3200xf32, #tpu.memory_space<vmem>>, vector<4x128xf32>
    tpu.vector_store %arg18[%c16_344, %c384_345], %252 {strides = array<i32>} : memref<32x3200xf32, #tpu.memory_space<vmem>>, vector<4x128xf32>,
    %c5_346 = arith.constant 5 : index
    %c1_347 = arith.constant 1 : index
    %c1_348 = arith.constant 1 : index
    %c0_349 = arith.constant 0 : index
    %254 = vector.load %arg17[%c5_346, %c1_347, %c1_348, %c0_349] : memref<8x6x6x128xf32, #tpu.memory_space<vmem>>, vector<1x1x4x128xf32>
    %255 = vector.shape_cast %254 : vector<1x1x4x128xf32> to vector<4x128xf32>
    %c20_350 = arith.constant 20 : index
    %c384_351 = arith.constant 384 : index
    %256 = vector.load %arg18[%c20_350, %c384_351] : memref<32x3200xf32, #tpu.memory_space<vmem>>, vector<4x128xf32>
    tpu.vector_store %arg18[%c20_350, %c384_351], %255 {strides = array<i32>} : memref<32x3200xf32, #tpu.memory_space<vmem>>, vector<4x128xf32>,
    %c5_352 = arith.constant 5 : index
    %c2_353 = arith.constant 2 : index
    %c1_354 = arith.constant 1 : index
    %c0_355 = arith.constant 0 : index
    %257 = vector.load %arg17[%c5_352, %c2_353, %c1_354, %c0_355] : memref<8x6x6x128xf32, #tpu.memory_space<vmem>>, vector<1x1x4x128xf32>
    %258 = vector.shape_cast %257 : vector<1x1x4x128xf32> to vector<4x128xf32>
    %c24_356 = arith.constant 24 : index
    %c384_357 = arith.constant 384 : index
    %259 = vector.load %arg18[%c24_356, %c384_357] : memref<32x3200xf32, #tpu.memory_space<vmem>>, vector<4x128xf32>
    tpu.vector_store %arg18[%c24_356, %c384_357], %258 {strides = array<i32>} : memref<32x3200xf32, #tpu.memory_space<vmem>>, vector<4x128xf32>,
    %c5_358 = arith.constant 5 : index
    %c3_359 = arith.constant 3 : index
    %c1_360 = arith.constant 1 : index
    %c0_361 = arith.constant 0 : index
    %260 = vector.load %arg17[%c5_358, %c3_359, %c1_360, %c0_361] : memref<8x6x6x128xf32, #tpu.memory_space<vmem>>, vector<1x1x4x128xf32>
    %261 = vector.shape_cast %260 : vector<1x1x4x128xf32> to vector<4x128xf32>
    %c28_362 = arith.constant 28 : index
    %c384_363 = arith.constant 384 : index
    %262 = vector.load %arg18[%c28_362, %c384_363] : memref<32x3200xf32, #tpu.memory_space<vmem>>, vector<4x128xf32>
    tpu.vector_store %arg18[%c28_362, %c384_363], %261 {strides = array<i32>} : memref<32x3200xf32, #tpu.memory_space<vmem>>, vector<4x128xf32>,
    %c0_364 = arith.constant 0 : index
    %c0_365 = arith.constant 0 : index
    %c2_366 = arith.constant 2 : index
    %c0_367 = arith.constant 0 : index
    %263 = vector.load %arg17[%c0_364, %c0_365, %c2_366, %c0_367] : memref<8x6x6x128xf32, #tpu.memory_space<vmem>>, vector<1x1x4x128xf32>
    %264 = vector.shape_cast %263 : vector<1x1x4x128xf32> to vector<4x128xf32>
    %c0_368 = arith.constant 0 : index
    %c512 = arith.constant 512 : index
    %265 = vector.load %arg18[%c0_368, %c512] : memref<32x3200xf32, #tpu.memory_space<vmem>>, vector<4x128xf32>
    tpu.vector_store %arg18[%c0_368, %c512], %264 {strides = array<i32>} : memref<32x3200xf32, #tpu.memory_space<vmem>>, vector<4x128xf32>,
    %c0_369 = arith.constant 0 : index
    %c1_370 = arith.constant 1 : index
    %c2_371 = arith.constant 2 : index
    %c0_372 = arith.constant 0 : index
    %266 = vector.load %arg17[%c0_369, %c1_370, %c2_371, %c0_372] : memref<8x6x6x128xf32, #tpu.memory_space<vmem>>, vector<1x1x4x128xf32>
    %267 = vector.shape_cast %266 : vector<1x1x4x128xf32> to vector<4x128xf32>
    %c4_373 = arith.constant 4 : index
    %c512_374 = arith.constant 512 : index
    %268 = vector.load %arg18[%c4_373, %c512_374] : memref<32x3200xf32, #tpu.memory_space<vmem>>, vector<4x128xf32>
    tpu.vector_store %arg18[%c4_373, %c512_374], %267 {strides = array<i32>} : memref<32x3200xf32, #tpu.memory_space<vmem>>, vector<4x128xf32>,
    %c0_375 = arith.constant 0 : index
    %c2_376 = arith.constant 2 : index
    %c2_377 = arith.constant 2 : index
    %c0_378 = arith.constant 0 : index
    %269 = vector.load %arg17[%c0_375, %c2_376, %c2_377, %c0_378] : memref<8x6x6x128xf32, #tpu.memory_space<vmem>>, vector<1x1x4x128xf32>
    %270 = vector.shape_cast %269 : vector<1x1x4x128xf32> to vector<4x128xf32>
    %c8_379 = arith.constant 8 : index
    %c512_380 = arith.constant 512 : index
    %271 = vector.load %arg18[%c8_379, %c512_380] : memref<32x3200xf32, #tpu.memory_space<vmem>>, vector<4x128xf32>
    tpu.vector_store %arg18[%c8_379, %c512_380], %270 {strides = array<i32>} : memref<32x3200xf32, #tpu.memory_space<vmem>>, vector<4x128xf32>,
    %c0_381 = arith.constant 0 : index
    %c3_382 = arith.constant 3 : index
    %c2_383 = arith.constant 2 : index
    %c0_384 = arith.constant 0 : index
    %272 = vector.load %arg17[%c0_381, %c3_382, %c2_383, %c0_384] : memref<8x6x6x128xf32, #tpu.memory_space<vmem>>, vector<1x1x4x128xf32>
    %273 = vector.shape_cast %272 : vector<1x1x4x128xf32> to vector<4x128xf32>
    %c12_385 = arith.constant 12 : index
    %c512_386 = arith.constant 512 : index
    %274 = vector.load %arg18[%c12_385, %c512_386] : memref<32x3200xf32, #tpu.memory_space<vmem>>, vector<4x128xf32>
    tpu.vector_store %arg18[%c12_385, %c512_386], %273 {strides = array<i32>} : memref<32x3200xf32, #tpu.memory_space<vmem>>, vector<4x128xf32>,
    %c4_387 = arith.constant 4 : index
    %c0_388 = arith.constant 0 : index
    %c2_389 = arith.constant 2 : index
    %c0_390 = arith.constant 0 : index
    %275 = vector.load %arg17[%c4_387, %c0_388, %c2_389, %c0_390] : memref<8x6x6x128xf32, #tpu.memory_space<vmem>>, vector<1x1x4x128xf32>
    %276 = vector.shape_cast %275 : vector<1x1x4x128xf32> to vector<4x128xf32>
    %c16_391 = arith.constant 16 : index
    %c512_392 = arith.constant 512 : index
    %277 = vector.load %arg18[%c16_391, %c512_392] : memref<32x3200xf32, #tpu.memory_space<vmem>>, vector<4x128xf32>
    tpu.vector_store %arg18[%c16_391, %c512_392], %276 {strides = array<i32>} : memref<32x3200xf32, #tpu.memory_space<vmem>>, vector<4x128xf32>,
    %c4_393 = arith.constant 4 : index
    %c1_394 = arith.constant 1 : index
    %c2_395 = arith.constant 2 : index
    %c0_396 = arith.constant 0 : index
    %278 = vector.load %arg17[%c4_393, %c1_394, %c2_395, %c0_396] : memref<8x6x6x128xf32, #tpu.memory_space<vmem>>, vector<1x1x4x128xf32>
    %279 = vector.shape_cast %278 : vector<1x1x4x128xf32> to vector<4x128xf32>
    %c20_397 = arith.constant 20 : index
    %c512_398 = arith.constant 512 : index
    %280 = vector.load %arg18[%c20_397, %c512_398] : memref<32x3200xf32, #tpu.memory_space<vmem>>, vector<4x128xf32>
    tpu.vector_store %arg18[%c20_397, %c512_398], %279 {strides = array<i32>} : memref<32x3200xf32, #tpu.memory_space<vmem>>, vector<4x128xf32>,
    %c4_399 = arith.constant 4 : index
    %c2_400 = arith.constant 2 : index
    %c2_401 = arith.constant 2 : index
    %c0_402 = arith.constant 0 : index
    %281 = vector.load %arg17[%c4_399, %c2_400, %c2_401, %c0_402] : memref<8x6x6x128xf32, #tpu.memory_space<vmem>>, vector<1x1x4x128xf32>
    %282 = vector.shape_cast %281 : vector<1x1x4x128xf32> to vector<4x128xf32>
    %c24_403 = arith.constant 24 : index
    %c512_404 = arith.constant 512 : index
    %283 = vector.load %arg18[%c24_403, %c512_404] : memref<32x3200xf32, #tpu.memory_space<vmem>>, vector<4x128xf32>
    tpu.vector_store %arg18[%c24_403, %c512_404], %282 {strides = array<i32>} : memref<32x3200xf32, #tpu.memory_space<vmem>>, vector<4x128xf32>,
    %c4_405 = arith.constant 4 : index
    %c3_406 = arith.constant 3 : index
    %c2_407 = arith.constant 2 : index
    %c0_408 = arith.constant 0 : index
    %284 = vector.load %arg17[%c4_405, %c3_406, %c2_407, %c0_408] : memref<8x6x6x128xf32, #tpu.memory_space<vmem>>, vector<1x1x4x128xf32>
    %285 = vector.shape_cast %284 : vector<1x1x4x128xf32> to vector<4x128xf32>
    %c28_409 = arith.constant 28 : index
    %c512_410 = arith.constant 512 : index
    %286 = vector.load %arg18[%c28_409, %c512_410] : memref<32x3200xf32, #tpu.memory_space<vmem>>, vector<4x128xf32>
    tpu.vector_store %arg18[%c28_409, %c512_410], %285 {strides = array<i32>} : memref<32x3200xf32, #tpu.memory_space<vmem>>, vector<4x128xf32>,
    %c2_411 = arith.constant 2 : index
    %c0_412 = arith.constant 0 : index
    %c0_413 = arith.constant 0 : index
    %c0_414 = arith.constant 0 : index
    %287 = vector.load %arg17[%c2_411, %c0_412, %c0_413, %c0_414] : memref<8x6x6x128xf32, #tpu.memory_space<vmem>>, vector<1x1x4x128xf32>
    %288 = vector.shape_cast %287 : vector<1x1x4x128xf32> to vector<4x128xf32>
    %c0_415 = arith.constant 0 : index
    %c640 = arith.constant 640 : index
    %289 = vector.load %arg18[%c0_415, %c640] : memref<32x3200xf32, #tpu.memory_space<vmem>>, vector<4x128xf32>
    tpu.vector_store %arg18[%c0_415, %c640], %288 {strides = array<i32>} : memref<32x3200xf32, #tpu.memory_space<vmem>>, vector<4x128xf32>,
    %c2_416 = arith.constant 2 : index
    %c1_417 = arith.constant 1 : index
    %c0_418 = arith.constant 0 : index
    %c0_419 = arith.constant 0 : index
    %290 = vector.load %arg17[%c2_416, %c1_417, %c0_418, %c0_419] : memref<8x6x6x128xf32, #tpu.memory_space<vmem>>, vector<1x1x4x128xf32>
    %291 = vector.shape_cast %290 : vector<1x1x4x128xf32> to vector<4x128xf32>
    %c4_420 = arith.constant 4 : index
    %c640_421 = arith.constant 640 : index
    %292 = vector.load %arg18[%c4_420, %c640_421] : memref<32x3200xf32, #tpu.memory_space<vmem>>, vector<4x128xf32>
    tpu.vector_store %arg18[%c4_420, %c640_421], %291 {strides = array<i32>} : memref<32x3200xf32, #tpu.memory_space<vmem>>, vector<4x128xf32>,
    %c2_422 = arith.constant 2 : index
    %c2_423 = arith.constant 2 : index
    %c0_424 = arith.constant 0 : index
    %c0_425 = arith.constant 0 : index
    %293 = vector.load %arg17[%c2_422, %c2_423, %c0_424, %c0_425] : memref<8x6x6x128xf32, #tpu.memory_space<vmem>>, vector<1x1x4x128xf32>
    %294 = vector.shape_cast %293 : vector<1x1x4x128xf32> to vector<4x128xf32>
    %c8_426 = arith.constant 8 : index
    %c640_427 = arith.constant 640 : index
    %295 = vector.load %arg18[%c8_426, %c640_427] : memref<32x3200xf32, #tpu.memory_space<vmem>>, vector<4x128xf32>
    tpu.vector_store %arg18[%c8_426, %c640_427], %294 {strides = array<i32>} : memref<32x3200xf32, #tpu.memory_space<vmem>>, vector<4x128xf32>,
    %c2_428 = arith.constant 2 : index
    %c3_429 = arith.constant 3 : index
    %c0_430 = arith.constant 0 : index
    %c0_431 = arith.constant 0 : index
    %296 = vector.load %arg17[%c2_428, %c3_429, %c0_430, %c0_431] : memref<8x6x6x128xf32, #tpu.memory_space<vmem>>, vector<1x1x4x128xf32>
    %297 = vector.shape_cast %296 : vector<1x1x4x128xf32> to vector<4x128xf32>
    %c12_432 = arith.constant 12 : index
    %c640_433 = arith.constant 640 : index
    %298 = vector.load %arg18[%c12_432, %c640_433] : memref<32x3200xf32, #tpu.memory_space<vmem>>, vector<4x128xf32>
    tpu.vector_store %arg18[%c12_432, %c640_433], %297 {strides = array<i32>} : memref<32x3200xf32, #tpu.memory_space<vmem>>, vector<4x128xf32>,
    %c6_434 = arith.constant 6 : index
    %c0_435 = arith.constant 0 : index
    %c0_436 = arith.constant 0 : index
    %c0_437 = arith.constant 0 : index
    %299 = vector.load %arg17[%c6_434, %c0_435, %c0_436, %c0_437] : memref<8x6x6x128xf32, #tpu.memory_space<vmem>>, vector<1x1x4x128xf32>
    %300 = vector.shape_cast %299 : vector<1x1x4x128xf32> to vector<4x128xf32>
    %c16_438 = arith.constant 16 : index
    %c640_439 = arith.constant 640 : index
    %301 = vector.load %arg18[%c16_438, %c640_439] : memref<32x3200xf32, #tpu.memory_space<vmem>>, vector<4x128xf32>
    tpu.vector_store %arg18[%c16_438, %c640_439], %300 {strides = array<i32>} : memref<32x3200xf32, #tpu.memory_space<vmem>>, vector<4x128xf32>,
    %c6_440 = arith.constant 6 : index
    %c1_441 = arith.constant 1 : index
    %c0_442 = arith.constant 0 : index
    %c0_443 = arith.constant 0 : index
    %302 = vector.load %arg17[%c6_440, %c1_441, %c0_442, %c0_443] : memref<8x6x6x128xf32, #tpu.memory_space<vmem>>, vector<1x1x4x128xf32>
    %303 = vector.shape_cast %302 : vector<1x1x4x128xf32> to vector<4x128xf32>
    %c20_444 = arith.constant 20 : index
    %c640_445 = arith.constant 640 : index
    %304 = vector.load %arg18[%c20_444, %c640_445] : memref<32x3200xf32, #tpu.memory_space<vmem>>, vector<4x128xf32>
    tpu.vector_store %arg18[%c20_444, %c640_445], %303 {strides = array<i32>} : memref<32x3200xf32, #tpu.memory_space<vmem>>, vector<4x128xf32>,
    %c6_446 = arith.constant 6 : index
    %c2_447 = arith.constant 2 : index
    %c0_448 = arith.constant 0 : index
    %c0_449 = arith.constant 0 : index
    %305 = vector.load %arg17[%c6_446, %c2_447, %c0_448, %c0_449] : memref<8x6x6x128xf32, #tpu.memory_space<vmem>>, vector<1x1x4x128xf32>
    %306 = vector.shape_cast %305 : vector<1x1x4x128xf32> to vector<4x128xf32>
    %c24_450 = arith.constant 24 : index
    %c640_451 = arith.constant 640 : index
    %307 = vector.load %arg18[%c24_450, %c640_451] : memref<32x3200xf32, #tpu.memory_space<vmem>>, vector<4x128xf32>
    tpu.vector_store %arg18[%c24_450, %c640_451], %306 {strides = array<i32>} : memref<32x3200xf32, #tpu.memory_space<vmem>>, vector<4x128xf32>,
    %c6_452 = arith.constant 6 : index
    %c3_453 = arith.constant 3 : index
    %c0_454 = arith.constant 0 : index
    %c0_455 = arith.constant 0 : index
    %308 = vector.load %arg17[%c6_452, %c3_453, %c0_454, %c0_455] : memref<8x6x6x128xf32, #tpu.memory_space<vmem>>, vector<1x1x4x128xf32>
    %309 = vector.shape_cast %308 : vector<1x1x4x128xf32> to vector<4x128xf32>
    %c28_456 = arith.constant 28 : index
    %c640_457 = arith.constant 640 : index
    %310 = vector.load %arg18[%c28_456, %c640_457] : memref<32x3200xf32, #tpu.memory_space<vmem>>, vector<4x128xf32>
    tpu.vector_store %arg18[%c28_456, %c640_457], %309 {strides = array<i32>} : memref<32x3200xf32, #tpu.memory_space<vmem>>, vector<4x128xf32>,
    %c3_458 = arith.constant 3 : index
    %c0_459 = arith.constant 0 : index
    %c0_460 = arith.constant 0 : index
    %c0_461 = arith.constant 0 : index
    %311 = vector.load %arg17[%c3_458, %c0_459, %c0_460, %c0_461] : memref<8x6x6x128xf32, #tpu.memory_space<vmem>>, vector<1x1x4x128xf32>
    %312 = vector.shape_cast %311 : vector<1x1x4x128xf32> to vector<4x128xf32>
    %c0_462 = arith.constant 0 : index
    %c768 = arith.constant 768 : index
    %313 = vector.load %arg18[%c0_462, %c768] : memref<32x3200xf32, #tpu.memory_space<vmem>>, vector<4x128xf32>
    tpu.vector_store %arg18[%c0_462, %c768], %312 {strides = array<i32>} : memref<32x3200xf32, #tpu.memory_space<vmem>>, vector<4x128xf32>,
    %c3_463 = arith.constant 3 : index
    %c1_464 = arith.constant 1 : index
    %c0_465 = arith.constant 0 : index
    %c0_466 = arith.constant 0 : index
    %314 = vector.load %arg17[%c3_463, %c1_464, %c0_465, %c0_466] : memref<8x6x6x128xf32, #tpu.memory_space<vmem>>, vector<1x1x4x128xf32>
    %315 = vector.shape_cast %314 : vector<1x1x4x128xf32> to vector<4x128xf32>
    %c4_467 = arith.constant 4 : index
    %c768_468 = arith.constant 768 : index
    %316 = vector.load %arg18[%c4_467, %c768_468] : memref<32x3200xf32, #tpu.memory_space<vmem>>, vector<4x128xf32>
    tpu.vector_store %arg18[%c4_467, %c768_468], %315 {strides = array<i32>} : memref<32x3200xf32, #tpu.memory_space<vmem>>, vector<4x128xf32>,
    %c3_469 = arith.constant 3 : index
    %c2_470 = arith.constant 2 : index
    %c0_471 = arith.constant 0 : index
    %c0_472 = arith.constant 0 : index
    %317 = vector.load %arg17[%c3_469, %c2_470, %c0_471, %c0_472] : memref<8x6x6x128xf32, #tpu.memory_space<vmem>>, vector<1x1x4x128xf32>
    %318 = vector.shape_cast %317 : vector<1x1x4x128xf32> to vector<4x128xf32>
    %c8_473 = arith.constant 8 : index
    %c768_474 = arith.constant 768 : index
    %319 = vector.load %arg18[%c8_473, %c768_474] : memref<32x3200xf32, #tpu.memory_space<vmem>>, vector<4x128xf32>
    tpu.vector_store %arg18[%c8_473, %c768_474], %318 {strides = array<i32>} : memref<32x3200xf32, #tpu.memory_space<vmem>>, vector<4x128xf32>,
    %c3_475 = arith.constant 3 : index
    %c3_476 = arith.constant 3 : index
    %c0_477 = arith.constant 0 : index
    %c0_478 = arith.constant 0 : index
    %320 = vector.load %arg17[%c3_475, %c3_476, %c0_477, %c0_478] : memref<8x6x6x128xf32, #tpu.memory_space<vmem>>, vector<1x1x4x128xf32>
    %321 = vector.shape_cast %320 : vector<1x1x4x128xf32> to vector<4x128xf32>
    %c12_479 = arith.constant 12 : index
    %c768_480 = arith.constant 768 : index
    %322 = vector.load %arg18[%c12_479, %c768_480] : memref<32x3200xf32, #tpu.memory_space<vmem>>, vector<4x128xf32>
    tpu.vector_store %arg18[%c12_479, %c768_480], %321 {strides = array<i32>} : memref<32x3200xf32, #tpu.memory_space<vmem>>, vector<4x128xf32>,
    %c7_481 = arith.constant 7 : index
    %c0_482 = arith.constant 0 : index
    %c0_483 = arith.constant 0 : index
    %c0_484 = arith.constant 0 : index
    %323 = vector.load %arg17[%c7_481, %c0_482, %c0_483, %c0_484] : memref<8x6x6x128xf32, #tpu.memory_space<vmem>>, vector<1x1x4x128xf32>
    %324 = vector.shape_cast %323 : vector<1x1x4x128xf32> to vector<4x128xf32>
    %c16_485 = arith.constant 16 : index
    %c768_486 = arith.constant 768 : index
    %325 = vector.load %arg18[%c16_485, %c768_486] : memref<32x3200xf32, #tpu.memory_space<vmem>>, vector<4x128xf32>
    tpu.vector_store %arg18[%c16_485, %c768_486], %324 {strides = array<i32>} : memref<32x3200xf32, #tpu.memory_space<vmem>>, vector<4x128xf32>,
    %c7_487 = arith.constant 7 : index
    %c1_488 = arith.constant 1 : index
    %c0_489 = arith.constant 0 : index
    %c0_490 = arith.constant 0 : index
    %326 = vector.load %arg17[%c7_487, %c1_488, %c0_489, %c0_490] : memref<8x6x6x128xf32, #tpu.memory_space<vmem>>, vector<1x1x4x128xf32>
    %327 = vector.shape_cast %326 : vector<1x1x4x128xf32> to vector<4x128xf32>
    %c20_491 = arith.constant 20 : index
    %c768_492 = arith.constant 768 : index
    %328 = vector.load %arg18[%c20_491, %c768_492] : memref<32x3200xf32, #tpu.memory_space<vmem>>, vector<4x128xf32>
    tpu.vector_store %arg18[%c20_491, %c768_492], %327 {strides = array<i32>} : memref<32x3200xf32, #tpu.memory_space<vmem>>, vector<4x128xf32>,
    %c7_493 = arith.constant 7 : index
    %c2_494 = arith.constant 2 : index
    %c0_495 = arith.constant 0 : index
    %c0_496 = arith.constant 0 : index
    %329 = vector.load %arg17[%c7_493, %c2_494, %c0_495, %c0_496] : memref<8x6x6x128xf32, #tpu.memory_space<vmem>>, vector<1x1x4x128xf32>
    %330 = vector.shape_cast %329 : vector<1x1x4x128xf32> to vector<4x128xf32>
    %c24_497 = arith.constant 24 : index
    %c768_498 = arith.constant 768 : index
    %331 = vector.load %arg18[%c24_497, %c768_498] : memref<32x3200xf32, #tpu.memory_space<vmem>>, vector<4x128xf32>
    tpu.vector_store %arg18[%c24_497, %c768_498], %330 {strides = array<i32>} : memref<32x3200xf32, #tpu.memory_space<vmem>>, vector<4x128xf32>,
    %c7_499 = arith.constant 7 : index
    %c3_500 = arith.constant 3 : index
    %c0_501 = arith.constant 0 : index
    %c0_502 = arith.constant 0 : index
    %332 = vector.load %arg17[%c7_499, %c3_500, %c0_501, %c0_502] : memref<8x6x6x128xf32, #tpu.memory_space<vmem>>, vector<1x1x4x128xf32>
    %333 = vector.shape_cast %332 : vector<1x1x4x128xf32> to vector<4x128xf32>
    %c28_503 = arith.constant 28 : index
    %c768_504 = arith.constant 768 : index
    %334 = vector.load %arg18[%c28_503, %c768_504] : memref<32x3200xf32, #tpu.memory_space<vmem>>, vector<4x128xf32>
    tpu.vector_store %arg18[%c28_503, %c768_504], %333 {strides = array<i32>} : memref<32x3200xf32, #tpu.memory_space<vmem>>, vector<4x128xf32>,
    %c2_505 = arith.constant 2 : index
    %c0_506 = arith.constant 0 : index
    %c1_507 = arith.constant 1 : index
    %c0_508 = arith.constant 0 : index
    %335 = vector.load %arg17[%c2_505, %c0_506, %c1_507, %c0_508] : memref<8x6x6x128xf32, #tpu.memory_space<vmem>>, vector<1x1x4x128xf32>
    %336 = vector.shape_cast %335 : vector<1x1x4x128xf32> to vector<4x128xf32>
    %c0_509 = arith.constant 0 : index
    %c896 = arith.constant 896 : index
    %337 = vector.load %arg18[%c0_509, %c896] : memref<32x3200xf32, #tpu.memory_space<vmem>>, vector<4x128xf32>
    tpu.vector_store %arg18[%c0_509, %c896], %336 {strides = array<i32>} : memref<32x3200xf32, #tpu.memory_space<vmem>>, vector<4x128xf32>,
    %c2_510 = arith.constant 2 : index
    %c1_511 = arith.constant 1 : index
    %c1_512 = arith.constant 1 : index
    %c0_513 = arith.constant 0 : index
    %338 = vector.load %arg17[%c2_510, %c1_511, %c1_512, %c0_513] : memref<8x6x6x128xf32, #tpu.memory_space<vmem>>, vector<1x1x4x128xf32>
    %339 = vector.shape_cast %338 : vector<1x1x4x128xf32> to vector<4x128xf32>
    %c4_514 = arith.constant 4 : index
    %c896_515 = arith.constant 896 : index
    %340 = vector.load %arg18[%c4_514, %c896_515] : memref<32x3200xf32, #tpu.memory_space<vmem>>, vector<4x128xf32>
    tpu.vector_store %arg18[%c4_514, %c896_515], %339 {strides = array<i32>} : memref<32x3200xf32, #tpu.memory_space<vmem>>, vector<4x128xf32>,
    %c2_516 = arith.constant 2 : index
    %c2_517 = arith.constant 2 : index
    %c1_518 = arith.constant 1 : index
    %c0_519 = arith.constant 0 : index
    %341 = vector.load %arg17[%c2_516, %c2_517, %c1_518, %c0_519] : memref<8x6x6x128xf32, #tpu.memory_space<vmem>>, vector<1x1x4x128xf32>
    %342 = vector.shape_cast %341 : vector<1x1x4x128xf32> to vector<4x128xf32>
    %c8_520 = arith.constant 8 : index
    %c896_521 = arith.constant 896 : index
    %343 = vector.load %arg18[%c8_520, %c896_521] : memref<32x3200xf32, #tpu.memory_space<vmem>>, vector<4x128xf32>
    tpu.vector_store %arg18[%c8_520, %c896_521], %342 {strides = array<i32>} : memref<32x3200xf32, #tpu.memory_space<vmem>>, vector<4x128xf32>,
    %c2_522 = arith.constant 2 : index
    %c3_523 = arith.constant 3 : index
    %c1_524 = arith.constant 1 : index
    %c0_525 = arith.constant 0 : index
    %344 = vector.load %arg17[%c2_522, %c3_523, %c1_524, %c0_525] : memref<8x6x6x128xf32, #tpu.memory_space<vmem>>, vector<1x1x4x128xf32>
    %345 = vector.shape_cast %344 : vector<1x1x4x128xf32> to vector<4x128xf32>
    %c12_526 = arith.constant 12 : index
    %c896_527 = arith.constant 896 : index
    %346 = vector.load %arg18[%c12_526, %c896_527] : memref<32x3200xf32, #tpu.memory_space<vmem>>, vector<4x128xf32>
    tpu.vector_store %arg18[%c12_526, %c896_527], %345 {strides = array<i32>} : memref<32x3200xf32, #tpu.memory_space<vmem>>, vector<4x128xf32>,
    %c6_528 = arith.constant 6 : index
    %c0_529 = arith.constant 0 : index
    %c1_530 = arith.constant 1 : index
    %c0_531 = arith.constant 0 : index
    %347 = vector.load %arg17[%c6_528, %c0_529, %c1_530, %c0_531] : memref<8x6x6x128xf32, #tpu.memory_space<vmem>>, vector<1x1x4x128xf32>
    %348 = vector.shape_cast %347 : vector<1x1x4x128xf32> to vector<4x128xf32>
    %c16_532 = arith.constant 16 : index
    %c896_533 = arith.constant 896 : index
    %349 = vector.load %arg18[%c16_532, %c896_533] : memref<32x3200xf32, #tpu.memory_space<vmem>>, vector<4x128xf32>
    tpu.vector_store %arg18[%c16_532, %c896_533], %348 {strides = array<i32>} : memref<32x3200xf32, #tpu.memory_space<vmem>>, vector<4x128xf32>,
    %c6_534 = arith.constant 6 : index
    %c1_535 = arith.constant 1 : index
    %c1_536 = arith.constant 1 : index
    %c0_537 = arith.constant 0 : index
    %350 = vector.load %arg17[%c6_534, %c1_535, %c1_536, %c0_537] : memref<8x6x6x128xf32, #tpu.memory_space<vmem>>, vector<1x1x4x128xf32>
    %351 = vector.shape_cast %350 : vector<1x1x4x128xf32> to vector<4x128xf32>
    %c20_538 = arith.constant 20 : index
    %c896_539 = arith.constant 896 : index
    %352 = vector.load %arg18[%c20_538, %c896_539] : memref<32x3200xf32, #tpu.memory_space<vmem>>, vector<4x128xf32>
    tpu.vector_store %arg18[%c20_538, %c896_539], %351 {strides = array<i32>} : memref<32x3200xf32, #tpu.memory_space<vmem>>, vector<4x128xf32>,
    %c6_540 = arith.constant 6 : index
    %c2_541 = arith.constant 2 : index
    %c1_542 = arith.constant 1 : index
    %c0_543 = arith.constant 0 : index
    %353 = vector.load %arg17[%c6_540, %c2_541, %c1_542, %c0_543] : memref<8x6x6x128xf32, #tpu.memory_space<vmem>>, vector<1x1x4x128xf32>
    %354 = vector.shape_cast %353 : vector<1x1x4x128xf32> to vector<4x128xf32>
    %c24_544 = arith.constant 24 : index
    %c896_545 = arith.constant 896 : index
    %355 = vector.load %arg18[%c24_544, %c896_545] : memref<32x3200xf32, #tpu.memory_space<vmem>>, vector<4x128xf32>
    tpu.vector_store %arg18[%c24_544, %c896_545], %354 {strides = array<i32>} : memref<32x3200xf32, #tpu.memory_space<vmem>>, vector<4x128xf32>,
    %c6_546 = arith.constant 6 : index
    %c3_547 = arith.constant 3 : index
    %c1_548 = arith.constant 1 : index
    %c0_549 = arith.constant 0 : index
    %356 = vector.load %arg17[%c6_546, %c3_547, %c1_548, %c0_549] : memref<8x6x6x128xf32, #tpu.memory_space<vmem>>, vector<1x1x4x128xf32>
    %357 = vector.shape_cast %356 : vector<1x1x4x128xf32> to vector<4x128xf32>
    %c28_550 = arith.constant 28 : index
    %c896_551 = arith.constant 896 : index
    %358 = vector.load %arg18[%c28_550, %c896_551] : memref<32x3200xf32, #tpu.memory_space<vmem>>, vector<4x128xf32>
    tpu.vector_store %arg18[%c28_550, %c896_551], %357 {strides = array<i32>} : memref<32x3200xf32, #tpu.memory_space<vmem>>, vector<4x128xf32>,
    %c3_552 = arith.constant 3 : index
    %c0_553 = arith.constant 0 : index
    %c1_554 = arith.constant 1 : index
    %c0_555 = arith.constant 0 : index
    %359 = vector.load %arg17[%c3_552, %c0_553, %c1_554, %c0_555] : memref<8x6x6x128xf32, #tpu.memory_space<vmem>>, vector<1x1x4x128xf32>
    %360 = vector.shape_cast %359 : vector<1x1x4x128xf32> to vector<4x128xf32>
    %c0_556 = arith.constant 0 : index
    %c1024 = arith.constant 1024 : index
    %361 = vector.load %arg18[%c0_556, %c1024] : memref<32x3200xf32, #tpu.memory_space<vmem>>, vector<4x128xf32>
    tpu.vector_store %arg18[%c0_556, %c1024], %360 {strides = array<i32>} : memref<32x3200xf32, #tpu.memory_space<vmem>>, vector<4x128xf32>,
    %c3_557 = arith.constant 3 : index
    %c1_558 = arith.constant 1 : index
    %c1_559 = arith.constant 1 : index
    %c0_560 = arith.constant 0 : index
    %362 = vector.load %arg17[%c3_557, %c1_558, %c1_559, %c0_560] : memref<8x6x6x128xf32, #tpu.memory_space<vmem>>, vector<1x1x4x128xf32>
    %363 = vector.shape_cast %362 : vector<1x1x4x128xf32> to vector<4x128xf32>
    %c4_561 = arith.constant 4 : index
    %c1024_562 = arith.constant 1024 : index
    %364 = vector.load %arg18[%c4_561, %c1024_562] : memref<32x3200xf32, #tpu.memory_space<vmem>>, vector<4x128xf32>
    tpu.vector_store %arg18[%c4_561, %c1024_562], %363 {strides = array<i32>} : memref<32x3200xf32, #tpu.memory_space<vmem>>, vector<4x128xf32>,
    %c3_563 = arith.constant 3 : index
    %c2_564 = arith.constant 2 : index
    %c1_565 = arith.constant 1 : index
    %c0_566 = arith.constant 0 : index
    %365 = vector.load %arg17[%c3_563, %c2_564, %c1_565, %c0_566] : memref<8x6x6x128xf32, #tpu.memory_space<vmem>>, vector<1x1x4x128xf32>
    %366 = vector.shape_cast %365 : vector<1x1x4x128xf32> to vector<4x128xf32>
    %c8_567 = arith.constant 8 : index
    %c1024_568 = arith.constant 1024 : index
    %367 = vector.load %arg18[%c8_567, %c1024_568] : memref<32x3200xf32, #tpu.memory_space<vmem>>, vector<4x128xf32>
    tpu.vector_store %arg18[%c8_567, %c1024_568], %366 {strides = array<i32>} : memref<32x3200xf32, #tpu.memory_space<vmem>>, vector<4x128xf32>,
    %c3_569 = arith.constant 3 : index
    %c3_570 = arith.constant 3 : index
    %c1_571 = arith.constant 1 : index
    %c0_572 = arith.constant 0 : index
    %368 = vector.load %arg17[%c3_569, %c3_570, %c1_571, %c0_572] : memref<8x6x6x128xf32, #tpu.memory_space<vmem>>, vector<1x1x4x128xf32>
    %369 = vector.shape_cast %368 : vector<1x1x4x128xf32> to vector<4x128xf32>
    %c12_573 = arith.constant 12 : index
    %c1024_574 = arith.constant 1024 : index
    %370 = vector.load %arg18[%c12_573, %c1024_574] : memref<32x3200xf32, #tpu.memory_space<vmem>>, vector<4x128xf32>
    tpu.vector_store %arg18[%c12_573, %c1024_574], %369 {strides = array<i32>} : memref<32x3200xf32, #tpu.memory_space<vmem>>, vector<4x128xf32>,
    %c7_575 = arith.constant 7 : index
    %c0_576 = arith.constant 0 : index
    %c1_577 = arith.constant 1 : index
    %c0_578 = arith.constant 0 : index
    %371 = vector.load %arg17[%c7_575, %c0_576, %c1_577, %c0_578] : memref<8x6x6x128xf32, #tpu.memory_space<vmem>>, vector<1x1x4x128xf32>
    %372 = vector.shape_cast %371 : vector<1x1x4x128xf32> to vector<4x128xf32>
    %c16_579 = arith.constant 16 : index
    %c1024_580 = arith.constant 1024 : index
    %373 = vector.load %arg18[%c16_579, %c1024_580] : memref<32x3200xf32, #tpu.memory_space<vmem>>, vector<4x128xf32>
    tpu.vector_store %arg18[%c16_579, %c1024_580], %372 {strides = array<i32>} : memref<32x3200xf32, #tpu.memory_space<vmem>>, vector<4x128xf32>,
    %c7_581 = arith.constant 7 : index
    %c1_582 = arith.constant 1 : index
    %c1_583 = arith.constant 1 : index
    %c0_584 = arith.constant 0 : index
    %374 = vector.load %arg17[%c7_581, %c1_582, %c1_583, %c0_584] : memref<8x6x6x128xf32, #tpu.memory_space<vmem>>, vector<1x1x4x128xf32>
    %375 = vector.shape_cast %374 : vector<1x1x4x128xf32> to vector<4x128xf32>
    %c20_585 = arith.constant 20 : index
    %c1024_586 = arith.constant 1024 : index
    %376 = vector.load %arg18[%c20_585, %c1024_586] : memref<32x3200xf32, #tpu.memory_space<vmem>>, vector<4x128xf32>
    tpu.vector_store %arg18[%c20_585, %c1024_586], %375 {strides = array<i32>} : memref<32x3200xf32, #tpu.memory_space<vmem>>, vector<4x128xf32>,
    %c7_587 = arith.constant 7 : index
    %c2_588 = arith.constant 2 : index
    %c1_589 = arith.constant 1 : index
    %c0_590 = arith.constant 0 : index
    %377 = vector.load %arg17[%c7_587, %c2_588, %c1_589, %c0_590] : memref<8x6x6x128xf32, #tpu.memory_space<vmem>>, vector<1x1x4x128xf32>
    %378 = vector.shape_cast %377 : vector<1x1x4x128xf32> to vector<4x128xf32>
    %c24_591 = arith.constant 24 : index
    %c1024_592 = arith.constant 1024 : index
    %379 = vector.load %arg18[%c24_591, %c1024_592] : memref<32x3200xf32, #tpu.memory_space<vmem>>, vector<4x128xf32>
    tpu.vector_store %arg18[%c24_591, %c1024_592], %378 {strides = array<i32>} : memref<32x3200xf32, #tpu.memory_space<vmem>>, vector<4x128xf32>,
    %c7_593 = arith.constant 7 : index
    %c3_594 = arith.constant 3 : index
    %c1_595 = arith.constant 1 : index
    %c0_596 = arith.constant 0 : index
    %380 = vector.load %arg17[%c7_593, %c3_594, %c1_595, %c0_596] : memref<8x6x6x128xf32, #tpu.memory_space<vmem>>, vector<1x1x4x128xf32>
    %381 = vector.shape_cast %380 : vector<1x1x4x128xf32> to vector<4x128xf32>
    %c28_597 = arith.constant 28 : index
    %c1024_598 = arith.constant 1024 : index
    %382 = vector.load %arg18[%c28_597, %c1024_598] : memref<32x3200xf32, #tpu.memory_space<vmem>>, vector<4x128xf32>
    tpu.vector_store %arg18[%c28_597, %c1024_598], %381 {strides = array<i32>} : memref<32x3200xf32, #tpu.memory_space<vmem>>, vector<4x128xf32>,
    %c2_599 = arith.constant 2 : index
    %c0_600 = arith.constant 0 : index
    %c2_601 = arith.constant 2 : index
    %c0_602 = arith.constant 0 : index
    %383 = vector.load %arg17[%c2_599, %c0_600, %c2_601, %c0_602] : memref<8x6x6x128xf32, #tpu.memory_space<vmem>>, vector<1x1x4x128xf32>
    %384 = vector.shape_cast %383 : vector<1x1x4x128xf32> to vector<4x128xf32>
    %c0_603 = arith.constant 0 : index
    %c1152 = arith.constant 1152 : index
    %385 = vector.load %arg18[%c0_603, %c1152] : memref<32x3200xf32, #tpu.memory_space<vmem>>, vector<4x128xf32>
    tpu.vector_store %arg18[%c0_603, %c1152], %384 {strides = array<i32>} : memref<32x3200xf32, #tpu.memory_space<vmem>>, vector<4x128xf32>,
    %c2_604 = arith.constant 2 : index
    %c1_605 = arith.constant 1 : index
    %c2_606 = arith.constant 2 : index
    %c0_607 = arith.constant 0 : index
    %386 = vector.load %arg17[%c2_604, %c1_605, %c2_606, %c0_607] : memref<8x6x6x128xf32, #tpu.memory_space<vmem>>, vector<1x1x4x128xf32>
    %387 = vector.shape_cast %386 : vector<1x1x4x128xf32> to vector<4x128xf32>
    %c4_608 = arith.constant 4 : index
    %c1152_609 = arith.constant 1152 : index
    %388 = vector.load %arg18[%c4_608, %c1152_609] : memref<32x3200xf32, #tpu.memory_space<vmem>>, vector<4x128xf32>
    tpu.vector_store %arg18[%c4_608, %c1152_609], %387 {strides = array<i32>} : memref<32x3200xf32, #tpu.memory_space<vmem>>, vector<4x128xf32>,
    %c2_610 = arith.constant 2 : index
    %c2_611 = arith.constant 2 : index
    %c2_612 = arith.constant 2 : index
    %c0_613 = arith.constant 0 : index
    %389 = vector.load %arg17[%c2_610, %c2_611, %c2_612, %c0_613] : memref<8x6x6x128xf32, #tpu.memory_space<vmem>>, vector<1x1x4x128xf32>
    %390 = vector.shape_cast %389 : vector<1x1x4x128xf32> to vector<4x128xf32>
    %c8_614 = arith.constant 8 : index
    %c1152_615 = arith.constant 1152 : index
    %391 = vector.load %arg18[%c8_614, %c1152_615] : memref<32x3200xf32, #tpu.memory_space<vmem>>, vector<4x128xf32>
    tpu.vector_store %arg18[%c8_614, %c1152_615], %390 {strides = array<i32>} : memref<32x3200xf32, #tpu.memory_space<vmem>>, vector<4x128xf32>,
    %c2_616 = arith.constant 2 : index
    %c3_617 = arith.constant 3 : index
    %c2_618 = arith.constant 2 : index
    %c0_619 = arith.constant 0 : index
    %392 = vector.load %arg17[%c2_616, %c3_617, %c2_618, %c0_619] : memref<8x6x6x128xf32, #tpu.memory_space<vmem>>, vector<1x1x4x128xf32>
    %393 = vector.shape_cast %392 : vector<1x1x4x128xf32> to vector<4x128xf32>
    %c12_620 = arith.constant 12 : index
    %c1152_621 = arith.constant 1152 : index
    %394 = vector.load %arg18[%c12_620, %c1152_621] : memref<32x3200xf32, #tpu.memory_space<vmem>>, vector<4x128xf32>
    tpu.vector_store %arg18[%c12_620, %c1152_621], %393 {strides = array<i32>} : memref<32x3200xf32, #tpu.memory_space<vmem>>, vector<4x128xf32>,
    %c6_622 = arith.constant 6 : index
    %c0_623 = arith.constant 0 : index
    %c2_624 = arith.constant 2 : index
    %c0_625 = arith.constant 0 : index
    %395 = vector.load %arg17[%c6_622, %c0_623, %c2_624, %c0_625] : memref<8x6x6x128xf32, #tpu.memory_space<vmem>>, vector<1x1x4x128xf32>
    %396 = vector.shape_cast %395 : vector<1x1x4x128xf32> to vector<4x128xf32>
    %c16_626 = arith.constant 16 : index
    %c1152_627 = arith.constant 1152 : index
    %397 = vector.load %arg18[%c16_626, %c1152_627] : memref<32x3200xf32, #tpu.memory_space<vmem>>, vector<4x128xf32>
    tpu.vector_store %arg18[%c16_626, %c1152_627], %396 {strides = array<i32>} : memref<32x3200xf32, #tpu.memory_space<vmem>>, vector<4x128xf32>,
    %c6_628 = arith.constant 6 : index
    %c1_629 = arith.constant 1 : index
    %c2_630 = arith.constant 2 : index
    %c0_631 = arith.constant 0 : index
    %398 = vector.load %arg17[%c6_628, %c1_629, %c2_630, %c0_631] : memref<8x6x6x128xf32, #tpu.memory_space<vmem>>, vector<1x1x4x128xf32>
    %399 = vector.shape_cast %398 : vector<1x1x4x128xf32> to vector<4x128xf32>
    %c20_632 = arith.constant 20 : index
    %c1152_633 = arith.constant 1152 : index
    %400 = vector.load %arg18[%c20_632, %c1152_633] : memref<32x3200xf32, #tpu.memory_space<vmem>>, vector<4x128xf32>
    tpu.vector_store %arg18[%c20_632, %c1152_633], %399 {strides = array<i32>} : memref<32x3200xf32, #tpu.memory_space<vmem>>, vector<4x128xf32>,
    %c6_634 = arith.constant 6 : index
    %c2_635 = arith.constant 2 : index
    %c2_636 = arith.constant 2 : index
    %c0_637 = arith.constant 0 : index
    %401 = vector.load %arg17[%c6_634, %c2_635, %c2_636, %c0_637] : memref<8x6x6x128xf32, #tpu.memory_space<vmem>>, vector<1x1x4x128xf32>
    %402 = vector.shape_cast %401 : vector<1x1x4x128xf32> to vector<4x128xf32>
    %c24_638 = arith.constant 24 : index
    %c1152_639 = arith.constant 1152 : index
    %403 = vector.load %arg18[%c24_638, %c1152_639] : memref<32x3200xf32, #tpu.memory_space<vmem>>, vector<4x128xf32>
    tpu.vector_store %arg18[%c24_638, %c1152_639], %402 {strides = array<i32>} : memref<32x3200xf32, #tpu.memory_space<vmem>>, vector<4x128xf32>,
    %c6_640 = arith.constant 6 : index
    %c3_641 = arith.constant 3 : index
    %c2_642 = arith.constant 2 : index
    %c0_643 = arith.constant 0 : index
    %404 = vector.load %arg17[%c6_640, %c3_641, %c2_642, %c0_643] : memref<8x6x6x128xf32, #tpu.memory_space<vmem>>, vector<1x1x4x128xf32>
    %405 = vector.shape_cast %404 : vector<1x1x4x128xf32> to vector<4x128xf32>
    %c28_644 = arith.constant 28 : index
    %c1152_645 = arith.constant 1152 : index
    %406 = vector.load %arg18[%c28_644, %c1152_645] : memref<32x3200xf32, #tpu.memory_space<vmem>>, vector<4x128xf32>
    tpu.vector_store %arg18[%c28_644, %c1152_645], %405 {strides = array<i32>} : memref<32x3200xf32, #tpu.memory_space<vmem>>, vector<4x128xf32>,
    %c0_646 = arith.constant 0 : index
    %c1_647 = arith.constant 1 : index
    %c0_648 = arith.constant 0 : index
    %c0_649 = arith.constant 0 : index
    %407 = vector.load %arg17[%c0_646, %c1_647, %c0_648, %c0_649] : memref<8x6x6x128xf32, #tpu.memory_space<vmem>>, vector<1x1x4x128xf32>
    %408 = vector.shape_cast %407 : vector<1x1x4x128xf32> to vector<4x128xf32>
    %c0_650 = arith.constant 0 : index
    %c1280 = arith.constant 1280 : index
    %409 = vector.load %arg18[%c0_650, %c1280] : memref<32x3200xf32, #tpu.memory_space<vmem>>, vector<4x128xf32>
    tpu.vector_store %arg18[%c0_650, %c1280], %408 {strides = array<i32>} : memref<32x3200xf32, #tpu.memory_space<vmem>>, vector<4x128xf32>,
    %c0_651 = arith.constant 0 : index
    %c2_652 = arith.constant 2 : index
    %c0_653 = arith.constant 0 : index
    %c0_654 = arith.constant 0 : index
    %410 = vector.load %arg17[%c0_651, %c2_652, %c0_653, %c0_654] : memref<8x6x6x128xf32, #tpu.memory_space<vmem>>, vector<1x1x4x128xf32>
    %411 = vector.shape_cast %410 : vector<1x1x4x128xf32> to vector<4x128xf32>
    %c4_655 = arith.constant 4 : index
    %c1280_656 = arith.constant 1280 : index
    %412 = vector.load %arg18[%c4_655, %c1280_656] : memref<32x3200xf32, #tpu.memory_space<vmem>>, vector<4x128xf32>
    tpu.vector_store %arg18[%c4_655, %c1280_656], %411 {strides = array<i32>} : memref<32x3200xf32, #tpu.memory_space<vmem>>, vector<4x128xf32>,
    %c0_657 = arith.constant 0 : index
    %c3_658 = arith.constant 3 : index
    %c0_659 = arith.constant 0 : index
    %c0_660 = arith.constant 0 : index
    %413 = vector.load %arg17[%c0_657, %c3_658, %c0_659, %c0_660] : memref<8x6x6x128xf32, #tpu.memory_space<vmem>>, vector<1x1x4x128xf32>
    %414 = vector.shape_cast %413 : vector<1x1x4x128xf32> to vector<4x128xf32>
    %c8_661 = arith.constant 8 : index
    %c1280_662 = arith.constant 1280 : index
    %415 = vector.load %arg18[%c8_661, %c1280_662] : memref<32x3200xf32, #tpu.memory_space<vmem>>, vector<4x128xf32>
    tpu.vector_store %arg18[%c8_661, %c1280_662], %414 {strides = array<i32>} : memref<32x3200xf32, #tpu.memory_space<vmem>>, vector<4x128xf32>,
    %c0_663 = arith.constant 0 : index
    %c4_664 = arith.constant 4 : index
    %c0_665 = arith.constant 0 : index
    %c0_666 = arith.constant 0 : index
    %416 = vector.load %arg17[%c0_663, %c4_664, %c0_665, %c0_666] : memref<8x6x6x128xf32, #tpu.memory_space<vmem>>, vector<1x1x4x128xf32>
    %417 = vector.shape_cast %416 : vector<1x1x4x128xf32> to vector<4x128xf32>
    %c12_667 = arith.constant 12 : index
    %c1280_668 = arith.constant 1280 : index
    %418 = vector.load %arg18[%c12_667, %c1280_668] : memref<32x3200xf32, #tpu.memory_space<vmem>>, vector<4x128xf32>
    tpu.vector_store %arg18[%c12_667, %c1280_668], %417 {strides = array<i32>} : memref<32x3200xf32, #tpu.memory_space<vmem>>, vector<4x128xf32>,
    %c4_669 = arith.constant 4 : index
    %c1_670 = arith.constant 1 : index
    %c0_671 = arith.constant 0 : index
    %c0_672 = arith.constant 0 : index
    %419 = vector.load %arg17[%c4_669, %c1_670, %c0_671, %c0_672] : memref<8x6x6x128xf32, #tpu.memory_space<vmem>>, vector<1x1x4x128xf32>
    %420 = vector.shape_cast %419 : vector<1x1x4x128xf32> to vector<4x128xf32>
    %c16_673 = arith.constant 16 : index
    %c1280_674 = arith.constant 1280 : index
    %421 = vector.load %arg18[%c16_673, %c1280_674] : memref<32x3200xf32, #tpu.memory_space<vmem>>, vector<4x128xf32>
    tpu.vector_store %arg18[%c16_673, %c1280_674], %420 {strides = array<i32>} : memref<32x3200xf32, #tpu.memory_space<vmem>>, vector<4x128xf32>,
    %c4_675 = arith.constant 4 : index
    %c2_676 = arith.constant 2 : index
    %c0_677 = arith.constant 0 : index
    %c0_678 = arith.constant 0 : index
    %422 = vector.load %arg17[%c4_675, %c2_676, %c0_677, %c0_678] : memref<8x6x6x128xf32, #tpu.memory_space<vmem>>, vector<1x1x4x128xf32>
    %423 = vector.shape_cast %422 : vector<1x1x4x128xf32> to vector<4x128xf32>
    %c20_679 = arith.constant 20 : index
    %c1280_680 = arith.constant 1280 : index
    %424 = vector.load %arg18[%c20_679, %c1280_680] : memref<32x3200xf32, #tpu.memory_space<vmem>>, vector<4x128xf32>
    tpu.vector_store %arg18[%c20_679, %c1280_680], %423 {strides = array<i32>} : memref<32x3200xf32, #tpu.memory_space<vmem>>, vector<4x128xf32>,
    %c4_681 = arith.constant 4 : index
    %c3_682 = arith.constant 3 : index
    %c0_683 = arith.constant 0 : index
    %c0_684 = arith.constant 0 : index
    %425 = vector.load %arg17[%c4_681, %c3_682, %c0_683, %c0_684] : memref<8x6x6x128xf32, #tpu.memory_space<vmem>>, vector<1x1x4x128xf32>
    %426 = vector.shape_cast %425 : vector<1x1x4x128xf32> to vector<4x128xf32>
    %c24_685 = arith.constant 24 : index
    %c1280_686 = arith.constant 1280 : index
    %427 = vector.load %arg18[%c24_685, %c1280_686] : memref<32x3200xf32, #tpu.memory_space<vmem>>, vector<4x128xf32>
    tpu.vector_store %arg18[%c24_685, %c1280_686], %426 {strides = array<i32>} : memref<32x3200xf32, #tpu.memory_space<vmem>>, vector<4x128xf32>,
    %c4_687 = arith.constant 4 : index
    %c4_688 = arith.constant 4 : index
    %c0_689 = arith.constant 0 : index
    %c0_690 = arith.constant 0 : index
    %428 = vector.load %arg17[%c4_687, %c4_688, %c0_689, %c0_690] : memref<8x6x6x128xf32, #tpu.memory_space<vmem>>, vector<1x1x4x128xf32>
    %429 = vector.shape_cast %428 : vector<1x1x4x128xf32> to vector<4x128xf32>
    %c28_691 = arith.constant 28 : index
    %c1280_692 = arith.constant 1280 : index
    %430 = vector.load %arg18[%c28_691, %c1280_692] : memref<32x3200xf32, #tpu.memory_space<vmem>>, vector<4x128xf32>
    tpu.vector_store %arg18[%c28_691, %c1280_692], %429 {strides = array<i32>} : memref<32x3200xf32, #tpu.memory_space<vmem>>, vector<4x128xf32>,
    %c1_693 = arith.constant 1 : index
    %c1_694 = arith.constant 1 : index
    %c0_695 = arith.constant 0 : index
    %c0_696 = arith.constant 0 : index
    %431 = vector.load %arg17[%c1_693, %c1_694, %c0_695, %c0_696] : memref<8x6x6x128xf32, #tpu.memory_space<vmem>>, vector<1x1x4x128xf32>
    %432 = vector.shape_cast %431 : vector<1x1x4x128xf32> to vector<4x128xf32>
    %c0_697 = arith.constant 0 : index
    %c1408 = arith.constant 1408 : index
    %433 = vector.load %arg18[%c0_697, %c1408] : memref<32x3200xf32, #tpu.memory_space<vmem>>, vector<4x128xf32>
    tpu.vector_store %arg18[%c0_697, %c1408], %432 {strides = array<i32>} : memref<32x3200xf32, #tpu.memory_space<vmem>>, vector<4x128xf32>,
    %c1_698 = arith.constant 1 : index
    %c2_699 = arith.constant 2 : index
    %c0_700 = arith.constant 0 : index
    %c0_701 = arith.constant 0 : index
    %434 = vector.load %arg17[%c1_698, %c2_699, %c0_700, %c0_701] : memref<8x6x6x128xf32, #tpu.memory_space<vmem>>, vector<1x1x4x128xf32>
    %435 = vector.shape_cast %434 : vector<1x1x4x128xf32> to vector<4x128xf32>
    %c4_702 = arith.constant 4 : index
    %c1408_703 = arith.constant 1408 : index
    %436 = vector.load %arg18[%c4_702, %c1408_703] : memref<32x3200xf32, #tpu.memory_space<vmem>>, vector<4x128xf32>
    tpu.vector_store %arg18[%c4_702, %c1408_703], %435 {strides = array<i32>} : memref<32x3200xf32, #tpu.memory_space<vmem>>, vector<4x128xf32>,
    %c1_704 = arith.constant 1 : index
    %c3_705 = arith.constant 3 : index
    %c0_706 = arith.constant 0 : index
    %c0_707 = arith.constant 0 : index
    %437 = vector.load %arg17[%c1_704, %c3_705, %c0_706, %c0_707] : memref<8x6x6x128xf32, #tpu.memory_space<vmem>>, vector<1x1x4x128xf32>
    %438 = vector.shape_cast %437 : vector<1x1x4x128xf32> to vector<4x128xf32>
    %c8_708 = arith.constant 8 : index
    %c1408_709 = arith.constant 1408 : index
    %439 = vector.load %arg18[%c8_708, %c1408_709] : memref<32x3200xf32, #tpu.memory_space<vmem>>, vector<4x128xf32>
    tpu.vector_store %arg18[%c8_708, %c1408_709], %438 {strides = array<i32>} : memref<32x3200xf32, #tpu.memory_space<vmem>>, vector<4x128xf32>,
    %c1_710 = arith.constant 1 : index
    %c4_711 = arith.constant 4 : index
    %c0_712 = arith.constant 0 : index
    %c0_713 = arith.constant 0 : index
    %440 = vector.load %arg17[%c1_710, %c4_711, %c0_712, %c0_713] : memref<8x6x6x128xf32, #tpu.memory_space<vmem>>, vector<1x1x4x128xf32>
    %441 = vector.shape_cast %440 : vector<1x1x4x128xf32> to vector<4x128xf32>
    %c12_714 = arith.constant 12 : index
    %c1408_715 = arith.constant 1408 : index
    %442 = vector.load %arg18[%c12_714, %c1408_715] : memref<32x3200xf32, #tpu.memory_space<vmem>>, vector<4x128xf32>
    tpu.vector_store %arg18[%c12_714, %c1408_715], %441 {strides = array<i32>} : memref<32x3200xf32, #tpu.memory_space<vmem>>, vector<4x128xf32>,
    %c5_716 = arith.constant 5 : index
    %c1_717 = arith.constant 1 : index
    %c0_718 = arith.constant 0 : index
    %c0_719 = arith.constant 0 : index
    %443 = vector.load %arg17[%c5_716, %c1_717, %c0_718, %c0_719] : memref<8x6x6x128xf32, #tpu.memory_space<vmem>>, vector<1x1x4x128xf32>
    %444 = vector.shape_cast %443 : vector<1x1x4x128xf32> to vector<4x128xf32>
    %c16_720 = arith.constant 16 : index
    %c1408_721 = arith.constant 1408 : index
    %445 = vector.load %arg18[%c16_720, %c1408_721] : memref<32x3200xf32, #tpu.memory_space<vmem>>, vector<4x128xf32>
    tpu.vector_store %arg18[%c16_720, %c1408_721], %444 {strides = array<i32>} : memref<32x3200xf32, #tpu.memory_space<vmem>>, vector<4x128xf32>,
    %c5_722 = arith.constant 5 : index
    %c2_723 = arith.constant 2 : index
    %c0_724 = arith.constant 0 : index
    %c0_725 = arith.constant 0 : index
    %446 = vector.load %arg17[%c5_722, %c2_723, %c0_724, %c0_725] : memref<8x6x6x128xf32, #tpu.memory_space<vmem>>, vector<1x1x4x128xf32>
    %447 = vector.shape_cast %446 : vector<1x1x4x128xf32> to vector<4x128xf32>
    %c20_726 = arith.constant 20 : index
    %c1408_727 = arith.constant 1408 : index
    %448 = vector.load %arg18[%c20_726, %c1408_727] : memref<32x3200xf32, #tpu.memory_space<vmem>>, vector<4x128xf32>
    tpu.vector_store %arg18[%c20_726, %c1408_727], %447 {strides = array<i32>} : memref<32x3200xf32, #tpu.memory_space<vmem>>, vector<4x128xf32>,
    %c5_728 = arith.constant 5 : index
    %c3_729 = arith.constant 3 : index
    %c0_730 = arith.constant 0 : index
    %c0_731 = arith.constant 0 : index
    %449 = vector.load %arg17[%c5_728, %c3_729, %c0_730, %c0_731] : memref<8x6x6x128xf32, #tpu.memory_space<vmem>>, vector<1x1x4x128xf32>
    %450 = vector.shape_cast %449 : vector<1x1x4x128xf32> to vector<4x128xf32>
    %c24_732 = arith.constant 24 : index
    %c1408_733 = arith.constant 1408 : index
    %451 = vector.load %arg18[%c24_732, %c1408_733] : memref<32x3200xf32, #tpu.memory_space<vmem>>, vector<4x128xf32>
    tpu.vector_store %arg18[%c24_732, %c1408_733], %450 {strides = array<i32>} : memref<32x3200xf32, #tpu.memory_space<vmem>>, vector<4x128xf32>,
    %c5_734 = arith.constant 5 : index
    %c4_735 = arith.constant 4 : index
    %c0_736 = arith.constant 0 : index
    %c0_737 = arith.constant 0 : index
    %452 = vector.load %arg17[%c5_734, %c4_735, %c0_736, %c0_737] : memref<8x6x6x128xf32, #tpu.memory_space<vmem>>, vector<1x1x4x128xf32>
    %453 = vector.shape_cast %452 : vector<1x1x4x128xf32> to vector<4x128xf32>
    %c28_738 = arith.constant 28 : index
    %c1408_739 = arith.constant 1408 : index
    %454 = vector.load %arg18[%c28_738, %c1408_739] : memref<32x3200xf32, #tpu.memory_space<vmem>>, vector<4x128xf32>
    tpu.vector_store %arg18[%c28_738, %c1408_739], %453 {strides = array<i32>} : memref<32x3200xf32, #tpu.memory_space<vmem>>, vector<4x128xf32>,
    %c0_740 = arith.constant 0 : index
    %c1_741 = arith.constant 1 : index
    %c1_742 = arith.constant 1 : index
    %c0_743 = arith.constant 0 : index
    %455 = vector.load %arg17[%c0_740, %c1_741, %c1_742, %c0_743] : memref<8x6x6x128xf32, #tpu.memory_space<vmem>>, vector<1x1x4x128xf32>
    %456 = vector.shape_cast %455 : vector<1x1x4x128xf32> to vector<4x128xf32>
    %c0_744 = arith.constant 0 : index
    %c1536 = arith.constant 1536 : index
    %457 = vector.load %arg18[%c0_744, %c1536] : memref<32x3200xf32, #tpu.memory_space<vmem>>, vector<4x128xf32>
    tpu.vector_store %arg18[%c0_744, %c1536], %456 {strides = array<i32>} : memref<32x3200xf32, #tpu.memory_space<vmem>>, vector<4x128xf32>,
    %c0_745 = arith.constant 0 : index
    %c2_746 = arith.constant 2 : index
    %c1_747 = arith.constant 1 : index
    %c0_748 = arith.constant 0 : index
    %458 = vector.load %arg17[%c0_745, %c2_746, %c1_747, %c0_748] : memref<8x6x6x128xf32, #tpu.memory_space<vmem>>, vector<1x1x4x128xf32>
    %459 = vector.shape_cast %458 : vector<1x1x4x128xf32> to vector<4x128xf32>
    %c4_749 = arith.constant 4 : index
    %c1536_750 = arith.constant 1536 : index
    %460 = vector.load %arg18[%c4_749, %c1536_750] : memref<32x3200xf32, #tpu.memory_space<vmem>>, vector<4x128xf32>
    tpu.vector_store %arg18[%c4_749, %c1536_750], %459 {strides = array<i32>} : memref<32x3200xf32, #tpu.memory_space<vmem>>, vector<4x128xf32>,
    %c0_751 = arith.constant 0 : index
    %c3_752 = arith.constant 3 : index
    %c1_753 = arith.constant 1 : index
    %c0_754 = arith.constant 0 : index
    %461 = vector.load %arg17[%c0_751, %c3_752, %c1_753, %c0_754] : memref<8x6x6x128xf32, #tpu.memory_space<vmem>>, vector<1x1x4x128xf32>
    %462 = vector.shape_cast %461 : vector<1x1x4x128xf32> to vector<4x128xf32>
    %c8_755 = arith.constant 8 : index
    %c1536_756 = arith.constant 1536 : index
    %463 = vector.load %arg18[%c8_755, %c1536_756] : memref<32x3200xf32, #tpu.memory_space<vmem>>, vector<4x128xf32>
    tpu.vector_store %arg18[%c8_755, %c1536_756], %462 {strides = array<i32>} : memref<32x3200xf32, #tpu.memory_space<vmem>>, vector<4x128xf32>,
    %c0_757 = arith.constant 0 : index
    %c4_758 = arith.constant 4 : index
    %c1_759 = arith.constant 1 : index
    %c0_760 = arith.constant 0 : index
    %464 = vector.load %arg17[%c0_757, %c4_758, %c1_759, %c0_760] : memref<8x6x6x128xf32, #tpu.memory_space<vmem>>, vector<1x1x4x128xf32>
    %465 = vector.shape_cast %464 : vector<1x1x4x128xf32> to vector<4x128xf32>
    %c12_761 = arith.constant 12 : index
    %c1536_762 = arith.constant 1536 : index
    %466 = vector.load %arg18[%c12_761, %c1536_762] : memref<32x3200xf32, #tpu.memory_space<vmem>>, vector<4x128xf32>
    tpu.vector_store %arg18[%c12_761, %c1536_762], %465 {strides = array<i32>} : memref<32x3200xf32, #tpu.memory_space<vmem>>, vector<4x128xf32>,
    %c4_763 = arith.constant 4 : index
    %c1_764 = arith.constant 1 : index
    %c1_765 = arith.constant 1 : index
    %c0_766 = arith.constant 0 : index
    %467 = vector.load %arg17[%c4_763, %c1_764, %c1_765, %c0_766] : memref<8x6x6x128xf32, #tpu.memory_space<vmem>>, vector<1x1x4x128xf32>
    %468 = vector.shape_cast %467 : vector<1x1x4x128xf32> to vector<4x128xf32>
    %c16_767 = arith.constant 16 : index
    %c1536_768 = arith.constant 1536 : index
    %469 = vector.load %arg18[%c16_767, %c1536_768] : memref<32x3200xf32, #tpu.memory_space<vmem>>, vector<4x128xf32>
    tpu.vector_store %arg18[%c16_767, %c1536_768], %468 {strides = array<i32>} : memref<32x3200xf32, #tpu.memory_space<vmem>>, vector<4x128xf32>,
    %c4_769 = arith.constant 4 : index
    %c2_770 = arith.constant 2 : index
    %c1_771 = arith.constant 1 : index
    %c0_772 = arith.constant 0 : index
    %470 = vector.load %arg17[%c4_769, %c2_770, %c1_771, %c0_772] : memref<8x6x6x128xf32, #tpu.memory_space<vmem>>, vector<1x1x4x128xf32>
    %471 = vector.shape_cast %470 : vector<1x1x4x128xf32> to vector<4x128xf32>
    %c20_773 = arith.constant 20 : index
    %c1536_774 = arith.constant 1536 : index
    %472 = vector.load %arg18[%c20_773, %c1536_774] : memref<32x3200xf32, #tpu.memory_space<vmem>>, vector<4x128xf32>
    tpu.vector_store %arg18[%c20_773, %c1536_774], %471 {strides = array<i32>} : memref<32x3200xf32, #tpu.memory_space<vmem>>, vector<4x128xf32>,
    %c4_775 = arith.constant 4 : index
    %c3_776 = arith.constant 3 : index
    %c1_777 = arith.constant 1 : index
    %c0_778 = arith.constant 0 : index
    %473 = vector.load %arg17[%c4_775, %c3_776, %c1_777, %c0_778] : memref<8x6x6x128xf32, #tpu.memory_space<vmem>>, vector<1x1x4x128xf32>
    %474 = vector.shape_cast %473 : vector<1x1x4x128xf32> to vector<4x128xf32>
    %c24_779 = arith.constant 24 : index
    %c1536_780 = arith.constant 1536 : index
    %475 = vector.load %arg18[%c24_779, %c1536_780] : memref<32x3200xf32, #tpu.memory_space<vmem>>, vector<4x128xf32>
    tpu.vector_store %arg18[%c24_779, %c1536_780], %474 {strides = array<i32>} : memref<32x3200xf32, #tpu.memory_space<vmem>>, vector<4x128xf32>,
    %c4_781 = arith.constant 4 : index
    %c4_782 = arith.constant 4 : index
    %c1_783 = arith.constant 1 : index
    %c0_784 = arith.constant 0 : index
    %476 = vector.load %arg17[%c4_781, %c4_782, %c1_783, %c0_784] : memref<8x6x6x128xf32, #tpu.memory_space<vmem>>, vector<1x1x4x128xf32>
    %477 = vector.shape_cast %476 : vector<1x1x4x128xf32> to vector<4x128xf32>
    %c28_785 = arith.constant 28 : index
    %c1536_786 = arith.constant 1536 : index
    %478 = vector.load %arg18[%c28_785, %c1536_786] : memref<32x3200xf32, #tpu.memory_space<vmem>>, vector<4x128xf32>
    tpu.vector_store %arg18[%c28_785, %c1536_786], %477 {strides = array<i32>} : memref<32x3200xf32, #tpu.memory_space<vmem>>, vector<4x128xf32>,
    %c1_787 = arith.constant 1 : index
    %c1_788 = arith.constant 1 : index
    %c1_789 = arith.constant 1 : index
    %c0_790 = arith.constant 0 : index
    %479 = vector.load %arg17[%c1_787, %c1_788, %c1_789, %c0_790] : memref<8x6x6x128xf32, #tpu.memory_space<vmem>>, vector<1x1x4x128xf32>
    %480 = vector.shape_cast %479 : vector<1x1x4x128xf32> to vector<4x128xf32>
    %c0_791 = arith.constant 0 : index
    %c1664 = arith.constant 1664 : index
    %481 = vector.load %arg18[%c0_791, %c1664] : memref<32x3200xf32, #tpu.memory_space<vmem>>, vector<4x128xf32>
    tpu.vector_store %arg18[%c0_791, %c1664], %480 {strides = array<i32>} : memref<32x3200xf32, #tpu.memory_space<vmem>>, vector<4x128xf32>,
    %c1_792 = arith.constant 1 : index
    %c2_793 = arith.constant 2 : index
    %c1_794 = arith.constant 1 : index
    %c0_795 = arith.constant 0 : index
    %482 = vector.load %arg17[%c1_792, %c2_793, %c1_794, %c0_795] : memref<8x6x6x128xf32, #tpu.memory_space<vmem>>, vector<1x1x4x128xf32>
    %483 = vector.shape_cast %482 : vector<1x1x4x128xf32> to vector<4x128xf32>
    %c4_796 = arith.constant 4 : index
    %c1664_797 = arith.constant 1664 : index
    %484 = vector.load %arg18[%c4_796, %c1664_797] : memref<32x3200xf32, #tpu.memory_space<vmem>>, vector<4x128xf32>
    tpu.vector_store %arg18[%c4_796, %c1664_797], %483 {strides = array<i32>} : memref<32x3200xf32, #tpu.memory_space<vmem>>, vector<4x128xf32>,
    %c1_798 = arith.constant 1 : index
    %c3_799 = arith.constant 3 : index
    %c1_800 = arith.constant 1 : index
    %c0_801 = arith.constant 0 : index
    %485 = vector.load %arg17[%c1_798, %c3_799, %c1_800, %c0_801] : memref<8x6x6x128xf32, #tpu.memory_space<vmem>>, vector<1x1x4x128xf32>
    %486 = vector.shape_cast %485 : vector<1x1x4x128xf32> to vector<4x128xf32>
    %c8_802 = arith.constant 8 : index
    %c1664_803 = arith.constant 1664 : index
    %487 = vector.load %arg18[%c8_802, %c1664_803] : memref<32x3200xf32, #tpu.memory_space<vmem>>, vector<4x128xf32>
    tpu.vector_store %arg18[%c8_802, %c1664_803], %486 {strides = array<i32>} : memref<32x3200xf32, #tpu.memory_space<vmem>>, vector<4x128xf32>,
    %c1_804 = arith.constant 1 : index
    %c4_805 = arith.constant 4 : index
    %c1_806 = arith.constant 1 : index
    %c0_807 = arith.constant 0 : index
    %488 = vector.load %arg17[%c1_804, %c4_805, %c1_806, %c0_807] : memref<8x6x6x128xf32, #tpu.memory_space<vmem>>, vector<1x1x4x128xf32>
    %489 = vector.shape_cast %488 : vector<1x1x4x128xf32> to vector<4x128xf32>
    %c12_808 = arith.constant 12 : index
    %c1664_809 = arith.constant 1664 : index
    %490 = vector.load %arg18[%c12_808, %c1664_809] : memref<32x3200xf32, #tpu.memory_space<vmem>>, vector<4x128xf32>
    tpu.vector_store %arg18[%c12_808, %c1664_809], %489 {strides = array<i32>} : memref<32x3200xf32, #tpu.memory_space<vmem>>, vector<4x128xf32>,
    %c5_810 = arith.constant 5 : index
    %c1_811 = arith.constant 1 : index
    %c1_812 = arith.constant 1 : index
    %c0_813 = arith.constant 0 : index
    %491 = vector.load %arg17[%c5_810, %c1_811, %c1_812, %c0_813] : memref<8x6x6x128xf32, #tpu.memory_space<vmem>>, vector<1x1x4x128xf32>
    %492 = vector.shape_cast %491 : vector<1x1x4x128xf32> to vector<4x128xf32>
    %c16_814 = arith.constant 16 : index
    %c1664_815 = arith.constant 1664 : index
    %493 = vector.load %arg18[%c16_814, %c1664_815] : memref<32x3200xf32, #tpu.memory_space<vmem>>, vector<4x128xf32>
    tpu.vector_store %arg18[%c16_814, %c1664_815], %492 {strides = array<i32>} : memref<32x3200xf32, #tpu.memory_space<vmem>>, vector<4x128xf32>,
    %c5_816 = arith.constant 5 : index
    %c2_817 = arith.constant 2 : index
    %c1_818 = arith.constant 1 : index
    %c0_819 = arith.constant 0 : index
    %494 = vector.load %arg17[%c5_816, %c2_817, %c1_818, %c0_819] : memref<8x6x6x128xf32, #tpu.memory_space<vmem>>, vector<1x1x4x128xf32>
    %495 = vector.shape_cast %494 : vector<1x1x4x128xf32> to vector<4x128xf32>
    %c20_820 = arith.constant 20 : index
    %c1664_821 = arith.constant 1664 : index
    %496 = vector.load %arg18[%c20_820, %c1664_821] : memref<32x3200xf32, #tpu.memory_space<vmem>>, vector<4x128xf32>
    tpu.vector_store %arg18[%c20_820, %c1664_821], %495 {strides = array<i32>} : memref<32x3200xf32, #tpu.memory_space<vmem>>, vector<4x128xf32>,
    %c5_822 = arith.constant 5 : index
    %c3_823 = arith.constant 3 : index
    %c1_824 = arith.constant 1 : index
    %c0_825 = arith.constant 0 : index
    %497 = vector.load %arg17[%c5_822, %c3_823, %c1_824, %c0_825] : memref<8x6x6x128xf32, #tpu.memory_space<vmem>>, vector<1x1x4x128xf32>
    %498 = vector.shape_cast %497 : vector<1x1x4x128xf32> to vector<4x128xf32>
    %c24_826 = arith.constant 24 : index
    %c1664_827 = arith.constant 1664 : index
    %499 = vector.load %arg18[%c24_826, %c1664_827] : memref<32x3200xf32, #tpu.memory_space<vmem>>, vector<4x128xf32>
    tpu.vector_store %arg18[%c24_826, %c1664_827], %498 {strides = array<i32>} : memref<32x3200xf32, #tpu.memory_space<vmem>>, vector<4x128xf32>,
    %c5_828 = arith.constant 5 : index
    %c4_829 = arith.constant 4 : index
    %c1_830 = arith.constant 1 : index
    %c0_831 = arith.constant 0 : index
    %500 = vector.load %arg17[%c5_828, %c4_829, %c1_830, %c0_831] : memref<8x6x6x128xf32, #tpu.memory_space<vmem>>, vector<1x1x4x128xf32>
    %501 = vector.shape_cast %500 : vector<1x1x4x128xf32> to vector<4x128xf32>
    %c28_832 = arith.constant 28 : index
    %c1664_833 = arith.constant 1664 : index
    %502 = vector.load %arg18[%c28_832, %c1664_833] : memref<32x3200xf32, #tpu.memory_space<vmem>>, vector<4x128xf32>
    tpu.vector_store %arg18[%c28_832, %c1664_833], %501 {strides = array<i32>} : memref<32x3200xf32, #tpu.memory_space<vmem>>, vector<4x128xf32>,
    %c0_834 = arith.constant 0 : index
    %c1_835 = arith.constant 1 : index
    %c2_836 = arith.constant 2 : index
    %c0_837 = arith.constant 0 : index
    %503 = vector.load %arg17[%c0_834, %c1_835, %c2_836, %c0_837] : memref<8x6x6x128xf32, #tpu.memory_space<vmem>>, vector<1x1x4x128xf32>
    %504 = vector.shape_cast %503 : vector<1x1x4x128xf32> to vector<4x128xf32>
    %c0_838 = arith.constant 0 : index
    %c1792 = arith.constant 1792 : index
    %505 = vector.load %arg18[%c0_838, %c1792] : memref<32x3200xf32, #tpu.memory_space<vmem>>, vector<4x128xf32>
    tpu.vector_store %arg18[%c0_838, %c1792], %504 {strides = array<i32>} : memref<32x3200xf32, #tpu.memory_space<vmem>>, vector<4x128xf32>,
    %c0_839 = arith.constant 0 : index
    %c2_840 = arith.constant 2 : index
    %c2_841 = arith.constant 2 : index
    %c0_842 = arith.constant 0 : index
    %506 = vector.load %arg17[%c0_839, %c2_840, %c2_841, %c0_842] : memref<8x6x6x128xf32, #tpu.memory_space<vmem>>, vector<1x1x4x128xf32>
    %507 = vector.shape_cast %506 : vector<1x1x4x128xf32> to vector<4x128xf32>
    %c4_843 = arith.constant 4 : index
    %c1792_844 = arith.constant 1792 : index
    %508 = vector.load %arg18[%c4_843, %c1792_844] : memref<32x3200xf32, #tpu.memory_space<vmem>>, vector<4x128xf32>
    tpu.vector_store %arg18[%c4_843, %c1792_844], %507 {strides = array<i32>} : memref<32x3200xf32, #tpu.memory_space<vmem>>, vector<4x128xf32>,
    %c0_845 = arith.constant 0 : index
    %c3_846 = arith.constant 3 : index
    %c2_847 = arith.constant 2 : index
    %c0_848 = arith.constant 0 : index
    %509 = vector.load %arg17[%c0_845, %c3_846, %c2_847, %c0_848] : memref<8x6x6x128xf32, #tpu.memory_space<vmem>>, vector<1x1x4x128xf32>
    %510 = vector.shape_cast %509 : vector<1x1x4x128xf32> to vector<4x128xf32>
    %c8_849 = arith.constant 8 : index
    %c1792_850 = arith.constant 1792 : index
    %511 = vector.load %arg18[%c8_849, %c1792_850] : memref<32x3200xf32, #tpu.memory_space<vmem>>, vector<4x128xf32>
    tpu.vector_store %arg18[%c8_849, %c1792_850], %510 {strides = array<i32>} : memref<32x3200xf32, #tpu.memory_space<vmem>>, vector<4x128xf32>,
    %c0_851 = arith.constant 0 : index
    %c4_852 = arith.constant 4 : index
    %c2_853 = arith.constant 2 : index
    %c0_854 = arith.constant 0 : index
    %512 = vector.load %arg17[%c0_851, %c4_852, %c2_853, %c0_854] : memref<8x6x6x128xf32, #tpu.memory_space<vmem>>, vector<1x1x4x128xf32>
    %513 = vector.shape_cast %512 : vector<1x1x4x128xf32> to vector<4x128xf32>
    %c12_855 = arith.constant 12 : index
    %c1792_856 = arith.constant 1792 : index
    %514 = vector.load %arg18[%c12_855, %c1792_856] : memref<32x3200xf32, #tpu.memory_space<vmem>>, vector<4x128xf32>
    tpu.vector_store %arg18[%c12_855, %c1792_856], %513 {strides = array<i32>} : memref<32x3200xf32, #tpu.memory_space<vmem>>, vector<4x128xf32>,
    %c4_857 = arith.constant 4 : index
    %c1_858 = arith.constant 1 : index
    %c2_859 = arith.constant 2 : index
    %c0_860 = arith.constant 0 : index
    %515 = vector.load %arg17[%c4_857, %c1_858, %c2_859, %c0_860] : memref<8x6x6x128xf32, #tpu.memory_space<vmem>>, vector<1x1x4x128xf32>
    %516 = vector.shape_cast %515 : vector<1x1x4x128xf32> to vector<4x128xf32>
    %c16_861 = arith.constant 16 : index
    %c1792_862 = arith.constant 1792 : index
    %517 = vector.load %arg18[%c16_861, %c1792_862] : memref<32x3200xf32, #tpu.memory_space<vmem>>, vector<4x128xf32>
    tpu.vector_store %arg18[%c16_861, %c1792_862], %516 {strides = array<i32>} : memref<32x3200xf32, #tpu.memory_space<vmem>>, vector<4x128xf32>,
    %c4_863 = arith.constant 4 : index
    %c2_864 = arith.constant 2 : index
    %c2_865 = arith.constant 2 : index
    %c0_866 = arith.constant 0 : index
    %518 = vector.load %arg17[%c4_863, %c2_864, %c2_865, %c0_866] : memref<8x6x6x128xf32, #tpu.memory_space<vmem>>, vector<1x1x4x128xf32>
    %519 = vector.shape_cast %518 : vector<1x1x4x128xf32> to vector<4x128xf32>
    %c20_867 = arith.constant 20 : index
    %c1792_868 = arith.constant 1792 : index
    %520 = vector.load %arg18[%c20_867, %c1792_868] : memref<32x3200xf32, #tpu.memory_space<vmem>>, vector<4x128xf32>
    tpu.vector_store %arg18[%c20_867, %c1792_868], %519 {strides = array<i32>} : memref<32x3200xf32, #tpu.memory_space<vmem>>, vector<4x128xf32>,
    %c4_869 = arith.constant 4 : index
    %c3_870 = arith.constant 3 : index
    %c2_871 = arith.constant 2 : index
    %c0_872 = arith.constant 0 : index
    %521 = vector.load %arg17[%c4_869, %c3_870, %c2_871, %c0_872] : memref<8x6x6x128xf32, #tpu.memory_space<vmem>>, vector<1x1x4x128xf32>
    %522 = vector.shape_cast %521 : vector<1x1x4x128xf32> to vector<4x128xf32>
    %c24_873 = arith.constant 24 : index
    %c1792_874 = arith.constant 1792 : index
    %523 = vector.load %arg18[%c24_873, %c1792_874] : memref<32x3200xf32, #tpu.memory_space<vmem>>, vector<4x128xf32>
    tpu.vector_store %arg18[%c24_873, %c1792_874], %522 {strides = array<i32>} : memref<32x3200xf32, #tpu.memory_space<vmem>>, vector<4x128xf32>,
    %c4_875 = arith.constant 4 : index
    %c4_876 = arith.constant 4 : index
    %c2_877 = arith.constant 2 : index
    %c0_878 = arith.constant 0 : index
    %524 = vector.load %arg17[%c4_875, %c4_876, %c2_877, %c0_878] : memref<8x6x6x128xf32, #tpu.memory_space<vmem>>, vector<1x1x4x128xf32>
    %525 = vector.shape_cast %524 : vector<1x1x4x128xf32> to vector<4x128xf32>
    %c28_879 = arith.constant 28 : index
    %c1792_880 = arith.constant 1792 : index
    %526 = vector.load %arg18[%c28_879, %c1792_880] : memref<32x3200xf32, #tpu.memory_space<vmem>>, vector<4x128xf32>
    tpu.vector_store %arg18[%c28_879, %c1792_880], %525 {strides = array<i32>} : memref<32x3200xf32, #tpu.memory_space<vmem>>, vector<4x128xf32>,
    %c2_881 = arith.constant 2 : index
    %c1_882 = arith.constant 1 : index
    %c0_883 = arith.constant 0 : index
    %c0_884 = arith.constant 0 : index
    %527 = vector.load %arg17[%c2_881, %c1_882, %c0_883, %c0_884] : memref<8x6x6x128xf32, #tpu.memory_space<vmem>>, vector<1x1x4x128xf32>
    %528 = vector.shape_cast %527 : vector<1x1x4x128xf32> to vector<4x128xf32>
    %c0_885 = arith.constant 0 : index
    %c1920 = arith.constant 1920 : index
    %529 = vector.load %arg18[%c0_885, %c1920] : memref<32x3200xf32, #tpu.memory_space<vmem>>, vector<4x128xf32>
    tpu.vector_store %arg18[%c0_885, %c1920], %528 {strides = array<i32>} : memref<32x3200xf32, #tpu.memory_space<vmem>>, vector<4x128xf32>,
    %c2_886 = arith.constant 2 : index
    %c2_887 = arith.constant 2 : index
    %c0_888 = arith.constant 0 : index
    %c0_889 = arith.constant 0 : index
    %530 = vector.load %arg17[%c2_886, %c2_887, %c0_888, %c0_889] : memref<8x6x6x128xf32, #tpu.memory_space<vmem>>, vector<1x1x4x128xf32>
    %531 = vector.shape_cast %530 : vector<1x1x4x128xf32> to vector<4x128xf32>
    %c4_890 = arith.constant 4 : index
    %c1920_891 = arith.constant 1920 : index
    %532 = vector.load %arg18[%c4_890, %c1920_891] : memref<32x3200xf32, #tpu.memory_space<vmem>>, vector<4x128xf32>
    tpu.vector_store %arg18[%c4_890, %c1920_891], %531 {strides = array<i32>} : memref<32x3200xf32, #tpu.memory_space<vmem>>, vector<4x128xf32>,
    %c2_892 = arith.constant 2 : index
    %c3_893 = arith.constant 3 : index
    %c0_894 = arith.constant 0 : index
    %c0_895 = arith.constant 0 : index
    %533 = vector.load %arg17[%c2_892, %c3_893, %c0_894, %c0_895] : memref<8x6x6x128xf32, #tpu.memory_space<vmem>>, vector<1x1x4x128xf32>
    %534 = vector.shape_cast %533 : vector<1x1x4x128xf32> to vector<4x128xf32>
    %c8_896 = arith.constant 8 : index
    %c1920_897 = arith.constant 1920 : index
    %535 = vector.load %arg18[%c8_896, %c1920_897] : memref<32x3200xf32, #tpu.memory_space<vmem>>, vector<4x128xf32>
    tpu.vector_store %arg18[%c8_896, %c1920_897], %534 {strides = array<i32>} : memref<32x3200xf32, #tpu.memory_space<vmem>>, vector<4x128xf32>,
    %c2_898 = arith.constant 2 : index
    %c4_899 = arith.constant 4 : index
    %c0_900 = arith.constant 0 : index
    %c0_901 = arith.constant 0 : index
    %536 = vector.load %arg17[%c2_898, %c4_899, %c0_900, %c0_901] : memref<8x6x6x128xf32, #tpu.memory_space<vmem>>, vector<1x1x4x128xf32>
    %537 = vector.shape_cast %536 : vector<1x1x4x128xf32> to vector<4x128xf32>
    %c12_902 = arith.constant 12 : index
    %c1920_903 = arith.constant 1920 : index
    %538 = vector.load %arg18[%c12_902, %c1920_903] : memref<32x3200xf32, #tpu.memory_space<vmem>>, vector<4x128xf32>
    tpu.vector_store %arg18[%c12_902, %c1920_903], %537 {strides = array<i32>} : memref<32x3200xf32, #tpu.memory_space<vmem>>, vector<4x128xf32>,
    %c6_904 = arith.constant 6 : index
    %c1_905 = arith.constant 1 : index
    %c0_906 = arith.constant 0 : index
    %c0_907 = arith.constant 0 : index
    %539 = vector.load %arg17[%c6_904, %c1_905, %c0_906, %c0_907] : memref<8x6x6x128xf32, #tpu.memory_space<vmem>>, vector<1x1x4x128xf32>
    %540 = vector.shape_cast %539 : vector<1x1x4x128xf32> to vector<4x128xf32>
    %c16_908 = arith.constant 16 : index
    %c1920_909 = arith.constant 1920 : index
    %541 = vector.load %arg18[%c16_908, %c1920_909] : memref<32x3200xf32, #tpu.memory_space<vmem>>, vector<4x128xf32>
    tpu.vector_store %arg18[%c16_908, %c1920_909], %540 {strides = array<i32>} : memref<32x3200xf32, #tpu.memory_space<vmem>>, vector<4x128xf32>,
    %c6_910 = arith.constant 6 : index
    %c2_911 = arith.constant 2 : index
    %c0_912 = arith.constant 0 : index
    %c0_913 = arith.constant 0 : index
    %542 = vector.load %arg17[%c6_910, %c2_911, %c0_912, %c0_913] : memref<8x6x6x128xf32, #tpu.memory_space<vmem>>, vector<1x1x4x128xf32>
    %543 = vector.shape_cast %542 : vector<1x1x4x128xf32> to vector<4x128xf32>
    %c20_914 = arith.constant 20 : index
    %c1920_915 = arith.constant 1920 : index
    %544 = vector.load %arg18[%c20_914, %c1920_915] : memref<32x3200xf32, #tpu.memory_space<vmem>>, vector<4x128xf32>
    tpu.vector_store %arg18[%c20_914, %c1920_915], %543 {strides = array<i32>} : memref<32x3200xf32, #tpu.memory_space<vmem>>, vector<4x128xf32>,
    %c6_916 = arith.constant 6 : index
    %c3_917 = arith.constant 3 : index
    %c0_918 = arith.constant 0 : index
    %c0_919 = arith.constant 0 : index
    %545 = vector.load %arg17[%c6_916, %c3_917, %c0_918, %c0_919] : memref<8x6x6x128xf32, #tpu.memory_space<vmem>>, vector<1x1x4x128xf32>
    %546 = vector.shape_cast %545 : vector<1x1x4x128xf32> to vector<4x128xf32>
    %c24_920 = arith.constant 24 : index
    %c1920_921 = arith.constant 1920 : index
    %547 = vector.load %arg18[%c24_920, %c1920_921] : memref<32x3200xf32, #tpu.memory_space<vmem>>, vector<4x128xf32>
    tpu.vector_store %arg18[%c24_920, %c1920_921], %546 {strides = array<i32>} : memref<32x3200xf32, #tpu.memory_space<vmem>>, vector<4x128xf32>,
    %c6_922 = arith.constant 6 : index
    %c4_923 = arith.constant 4 : index
    %c0_924 = arith.constant 0 : index
    %c0_925 = arith.constant 0 : index
    %548 = vector.load %arg17[%c6_922, %c4_923, %c0_924, %c0_925] : memref<8x6x6x128xf32, #tpu.memory_space<vmem>>, vector<1x1x4x128xf32>
    %549 = vector.shape_cast %548 : vector<1x1x4x128xf32> to vector<4x128xf32>
    %c28_926 = arith.constant 28 : index
    %c1920_927 = arith.constant 1920 : index
    %550 = vector.load %arg18[%c28_926, %c1920_927] : memref<32x3200xf32, #tpu.memory_space<vmem>>, vector<4x128xf32>
    tpu.vector_store %arg18[%c28_926, %c1920_927], %549 {strides = array<i32>} : memref<32x3200xf32, #tpu.memory_space<vmem>>, vector<4x128xf32>,
    %c3_928 = arith.constant 3 : index
    %c1_929 = arith.constant 1 : index
    %c0_930 = arith.constant 0 : index
    %c0_931 = arith.constant 0 : index
    %551 = vector.load %arg17[%c3_928, %c1_929, %c0_930, %c0_931] : memref<8x6x6x128xf32, #tpu.memory_space<vmem>>, vector<1x1x4x128xf32>
    %552 = vector.shape_cast %551 : vector<1x1x4x128xf32> to vector<4x128xf32>
    %c0_932 = arith.constant 0 : index
    %c2048 = arith.constant 2048 : index
    %553 = vector.load %arg18[%c0_932, %c2048] : memref<32x3200xf32, #tpu.memory_space<vmem>>, vector<4x128xf32>
    tpu.vector_store %arg18[%c0_932, %c2048], %552 {strides = array<i32>} : memref<32x3200xf32, #tpu.memory_space<vmem>>, vector<4x128xf32>,
    %c3_933 = arith.constant 3 : index
    %c2_934 = arith.constant 2 : index
    %c0_935 = arith.constant 0 : index
    %c0_936 = arith.constant 0 : index
    %554 = vector.load %arg17[%c3_933, %c2_934, %c0_935, %c0_936] : memref<8x6x6x128xf32, #tpu.memory_space<vmem>>, vector<1x1x4x128xf32>
    %555 = vector.shape_cast %554 : vector<1x1x4x128xf32> to vector<4x128xf32>
    %c4_937 = arith.constant 4 : index
    %c2048_938 = arith.constant 2048 : index
    %556 = vector.load %arg18[%c4_937, %c2048_938] : memref<32x3200xf32, #tpu.memory_space<vmem>>, vector<4x128xf32>
    tpu.vector_store %arg18[%c4_937, %c2048_938], %555 {strides = array<i32>} : memref<32x3200xf32, #tpu.memory_space<vmem>>, vector<4x128xf32>,
    %c3_939 = arith.constant 3 : index
    %c3_940 = arith.constant 3 : index
    %c0_941 = arith.constant 0 : index
    %c0_942 = arith.constant 0 : index
    %557 = vector.load %arg17[%c3_939, %c3_940, %c0_941, %c0_942] : memref<8x6x6x128xf32, #tpu.memory_space<vmem>>, vector<1x1x4x128xf32>
    %558 = vector.shape_cast %557 : vector<1x1x4x128xf32> to vector<4x128xf32>
    %c8_943 = arith.constant 8 : index
    %c2048_944 = arith.constant 2048 : index
    %559 = vector.load %arg18[%c8_943, %c2048_944] : memref<32x3200xf32, #tpu.memory_space<vmem>>, vector<4x128xf32>
    tpu.vector_store %arg18[%c8_943, %c2048_944], %558 {strides = array<i32>} : memref<32x3200xf32, #tpu.memory_space<vmem>>, vector<4x128xf32>,
    %c3_945 = arith.constant 3 : index
    %c4_946 = arith.constant 4 : index
    %c0_947 = arith.constant 0 : index
    %c0_948 = arith.constant 0 : index
    %560 = vector.load %arg17[%c3_945, %c4_946, %c0_947, %c0_948] : memref<8x6x6x128xf32, #tpu.memory_space<vmem>>, vector<1x1x4x128xf32>
    %561 = vector.shape_cast %560 : vector<1x1x4x128xf32> to vector<4x128xf32>
    %c12_949 = arith.constant 12 : index
    %c2048_950 = arith.constant 2048 : index
    %562 = vector.load %arg18[%c12_949, %c2048_950] : memref<32x3200xf32, #tpu.memory_space<vmem>>, vector<4x128xf32>
    tpu.vector_store %arg18[%c12_949, %c2048_950], %561 {strides = array<i32>} : memref<32x3200xf32, #tpu.memory_space<vmem>>, vector<4x128xf32>,
    %c7_951 = arith.constant 7 : index
    %c1_952 = arith.constant 1 : index
    %c0_953 = arith.constant 0 : index
    %c0_954 = arith.constant 0 : index
    %563 = vector.load %arg17[%c7_951, %c1_952, %c0_953, %c0_954] : memref<8x6x6x128xf32, #tpu.memory_space<vmem>>, vector<1x1x4x128xf32>
    %564 = vector.shape_cast %563 : vector<1x1x4x128xf32> to vector<4x128xf32>
    %c16_955 = arith.constant 16 : index
    %c2048_956 = arith.constant 2048 : index
    %565 = vector.load %arg18[%c16_955, %c2048_956] : memref<32x3200xf32, #tpu.memory_space<vmem>>, vector<4x128xf32>
    tpu.vector_store %arg18[%c16_955, %c2048_956], %564 {strides = array<i32>} : memref<32x3200xf32, #tpu.memory_space<vmem>>, vector<4x128xf32>,
    %c7_957 = arith.constant 7 : index
    %c2_958 = arith.constant 2 : index
    %c0_959 = arith.constant 0 : index
    %c0_960 = arith.constant 0 : index
    %566 = vector.load %arg17[%c7_957, %c2_958, %c0_959, %c0_960] : memref<8x6x6x128xf32, #tpu.memory_space<vmem>>, vector<1x1x4x128xf32>
    %567 = vector.shape_cast %566 : vector<1x1x4x128xf32> to vector<4x128xf32>
    %c20_961 = arith.constant 20 : index
    %c2048_962 = arith.constant 2048 : index
    %568 = vector.load %arg18[%c20_961, %c2048_962] : memref<32x3200xf32, #tpu.memory_space<vmem>>, vector<4x128xf32>
    tpu.vector_store %arg18[%c20_961, %c2048_962], %567 {strides = array<i32>} : memref<32x3200xf32, #tpu.memory_space<vmem>>, vector<4x128xf32>,
    %c7_963 = arith.constant 7 : index
    %c3_964 = arith.constant 3 : index
    %c0_965 = arith.constant 0 : index
    %c0_966 = arith.constant 0 : index
    %569 = vector.load %arg17[%c7_963, %c3_964, %c0_965, %c0_966] : memref<8x6x6x128xf32, #tpu.memory_space<vmem>>, vector<1x1x4x128xf32>
    %570 = vector.shape_cast %569 : vector<1x1x4x128xf32> to vector<4x128xf32>
    %c24_967 = arith.constant 24 : index
    %c2048_968 = arith.constant 2048 : index
    %571 = vector.load %arg18[%c24_967, %c2048_968] : memref<32x3200xf32, #tpu.memory_space<vmem>>, vector<4x128xf32>
    tpu.vector_store %arg18[%c24_967, %c2048_968], %570 {strides = array<i32>} : memref<32x3200xf32, #tpu.memory_space<vmem>>, vector<4x128xf32>,
    %c7_969 = arith.constant 7 : index
    %c4_970 = arith.constant 4 : index
    %c0_971 = arith.constant 0 : index
    %c0_972 = arith.constant 0 : index
    %572 = vector.load %arg17[%c7_969, %c4_970, %c0_971, %c0_972] : memref<8x6x6x128xf32, #tpu.memory_space<vmem>>, vector<1x1x4x128xf32>
    %573 = vector.shape_cast %572 : vector<1x1x4x128xf32> to vector<4x128xf32>
    %c28_973 = arith.constant 28 : index
    %c2048_974 = arith.constant 2048 : index
    %574 = vector.load %arg18[%c28_973, %c2048_974] : memref<32x3200xf32, #tpu.memory_space<vmem>>, vector<4x128xf32>
    tpu.vector_store %arg18[%c28_973, %c2048_974], %573 {strides = array<i32>} : memref<32x3200xf32, #tpu.memory_space<vmem>>, vector<4x128xf32>,
    %c2_975 = arith.constant 2 : index
    %c1_976 = arith.constant 1 : index
    %c1_977 = arith.constant 1 : index
    %c0_978 = arith.constant 0 : index
    %575 = vector.load %arg17[%c2_975, %c1_976, %c1_977, %c0_978] : memref<8x6x6x128xf32, #tpu.memory_space<vmem>>, vector<1x1x4x128xf32>
    %576 = vector.shape_cast %575 : vector<1x1x4x128xf32> to vector<4x128xf32>
    %c0_979 = arith.constant 0 : index
    %c2176 = arith.constant 2176 : index
    %577 = vector.load %arg18[%c0_979, %c2176] : memref<32x3200xf32, #tpu.memory_space<vmem>>, vector<4x128xf32>
    tpu.vector_store %arg18[%c0_979, %c2176], %576 {strides = array<i32>} : memref<32x3200xf32, #tpu.memory_space<vmem>>, vector<4x128xf32>,
    %c2_980 = arith.constant 2 : index
    %c2_981 = arith.constant 2 : index
    %c1_982 = arith.constant 1 : index
    %c0_983 = arith.constant 0 : index
    %578 = vector.load %arg17[%c2_980, %c2_981, %c1_982, %c0_983] : memref<8x6x6x128xf32, #tpu.memory_space<vmem>>, vector<1x1x4x128xf32>
    %579 = vector.shape_cast %578 : vector<1x1x4x128xf32> to vector<4x128xf32>
    %c4_984 = arith.constant 4 : index
    %c2176_985 = arith.constant 2176 : index
    %580 = vector.load %arg18[%c4_984, %c2176_985] : memref<32x3200xf32, #tpu.memory_space<vmem>>, vector<4x128xf32>
    tpu.vector_store %arg18[%c4_984, %c2176_985], %579 {strides = array<i32>} : memref<32x3200xf32, #tpu.memory_space<vmem>>, vector<4x128xf32>,
    %c2_986 = arith.constant 2 : index
    %c3_987 = arith.constant 3 : index
    %c1_988 = arith.constant 1 : index
    %c0_989 = arith.constant 0 : index
    %581 = vector.load %arg17[%c2_986, %c3_987, %c1_988, %c0_989] : memref<8x6x6x128xf32, #tpu.memory_space<vmem>>, vector<1x1x4x128xf32>
    %582 = vector.shape_cast %581 : vector<1x1x4x128xf32> to vector<4x128xf32>
    %c8_990 = arith.constant 8 : index
    %c2176_991 = arith.constant 2176 : index
    %583 = vector.load %arg18[%c8_990, %c2176_991] : memref<32x3200xf32, #tpu.memory_space<vmem>>, vector<4x128xf32>
    tpu.vector_store %arg18[%c8_990, %c2176_991], %582 {strides = array<i32>} : memref<32x3200xf32, #tpu.memory_space<vmem>>, vector<4x128xf32>,
    %c2_992 = arith.constant 2 : index
    %c4_993 = arith.constant 4 : index
    %c1_994 = arith.constant 1 : index
    %c0_995 = arith.constant 0 : index
    %584 = vector.load %arg17[%c2_992, %c4_993, %c1_994, %c0_995] : memref<8x6x6x128xf32, #tpu.memory_space<vmem>>, vector<1x1x4x128xf32>
    %585 = vector.shape_cast %584 : vector<1x1x4x128xf32> to vector<4x128xf32>
    %c12_996 = arith.constant 12 : index
    %c2176_997 = arith.constant 2176 : index
    %586 = vector.load %arg18[%c12_996, %c2176_997] : memref<32x3200xf32, #tpu.memory_space<vmem>>, vector<4x128xf32>
    tpu.vector_store %arg18[%c12_996, %c2176_997], %585 {strides = array<i32>} : memref<32x3200xf32, #tpu.memory_space<vmem>>, vector<4x128xf32>,
    %c6_998 = arith.constant 6 : index
    %c1_999 = arith.constant 1 : index
    %c1_1000 = arith.constant 1 : index
    %c0_1001 = arith.constant 0 : index
    %587 = vector.load %arg17[%c6_998, %c1_999, %c1_1000, %c0_1001] : memref<8x6x6x128xf32, #tpu.memory_space<vmem>>, vector<1x1x4x128xf32>
    %588 = vector.shape_cast %587 : vector<1x1x4x128xf32> to vector<4x128xf32>
    %c16_1002 = arith.constant 16 : index
    %c2176_1003 = arith.constant 2176 : index
    %589 = vector.load %arg18[%c16_1002, %c2176_1003] : memref<32x3200xf32, #tpu.memory_space<vmem>>, vector<4x128xf32>
    tpu.vector_store %arg18[%c16_1002, %c2176_1003], %588 {strides = array<i32>} : memref<32x3200xf32, #tpu.memory_space<vmem>>, vector<4x128xf32>,
    %c6_1004 = arith.constant 6 : index
    %c2_1005 = arith.constant 2 : index
    %c1_1006 = arith.constant 1 : index
    %c0_1007 = arith.constant 0 : index
    %590 = vector.load %arg17[%c6_1004, %c2_1005, %c1_1006, %c0_1007] : memref<8x6x6x128xf32, #tpu.memory_space<vmem>>, vector<1x1x4x128xf32>
    %591 = vector.shape_cast %590 : vector<1x1x4x128xf32> to vector<4x128xf32>
    %c20_1008 = arith.constant 20 : index
    %c2176_1009 = arith.constant 2176 : index
    %592 = vector.load %arg18[%c20_1008, %c2176_1009] : memref<32x3200xf32, #tpu.memory_space<vmem>>, vector<4x128xf32>
    tpu.vector_store %arg18[%c20_1008, %c2176_1009], %591 {strides = array<i32>} : memref<32x3200xf32, #tpu.memory_space<vmem>>, vector<4x128xf32>,
    %c6_1010 = arith.constant 6 : index
    %c3_1011 = arith.constant 3 : index
    %c1_1012 = arith.constant 1 : index
    %c0_1013 = arith.constant 0 : index
    %593 = vector.load %arg17[%c6_1010, %c3_1011, %c1_1012, %c0_1013] : memref<8x6x6x128xf32, #tpu.memory_space<vmem>>, vector<1x1x4x128xf32>
    %594 = vector.shape_cast %593 : vector<1x1x4x128xf32> to vector<4x128xf32>
    %c24_1014 = arith.constant 24 : index
    %c2176_1015 = arith.constant 2176 : index
    %595 = vector.load %arg18[%c24_1014, %c2176_1015] : memref<32x3200xf32, #tpu.memory_space<vmem>>, vector<4x128xf32>
    tpu.vector_store %arg18[%c24_1014, %c2176_1015], %594 {strides = array<i32>} : memref<32x3200xf32, #tpu.memory_space<vmem>>, vector<4x128xf32>,
    %c6_1016 = arith.constant 6 : index
    %c4_1017 = arith.constant 4 : index
    %c1_1018 = arith.constant 1 : index
    %c0_1019 = arith.constant 0 : index
    %596 = vector.load %arg17[%c6_1016, %c4_1017, %c1_1018, %c0_1019] : memref<8x6x6x128xf32, #tpu.memory_space<vmem>>, vector<1x1x4x128xf32>
    %597 = vector.shape_cast %596 : vector<1x1x4x128xf32> to vector<4x128xf32>
    %c28_1020 = arith.constant 28 : index
    %c2176_1021 = arith.constant 2176 : index
    %598 = vector.load %arg18[%c28_1020, %c2176_1021] : memref<32x3200xf32, #tpu.memory_space<vmem>>, vector<4x128xf32>
    tpu.vector_store %arg18[%c28_1020, %c2176_1021], %597 {strides = array<i32>} : memref<32x3200xf32, #tpu.memory_space<vmem>>, vector<4x128xf32>,
    %c3_1022 = arith.constant 3 : index
    %c1_1023 = arith.constant 1 : index
    %c1_1024 = arith.constant 1 : index
    %c0_1025 = arith.constant 0 : index
    %599 = vector.load %arg17[%c3_1022, %c1_1023, %c1_1024, %c0_1025] : memref<8x6x6x128xf32, #tpu.memory_space<vmem>>, vector<1x1x4x128xf32>
    %600 = vector.shape_cast %599 : vector<1x1x4x128xf32> to vector<4x128xf32>
    %c0_1026 = arith.constant 0 : index
    %c2304 = arith.constant 2304 : index
    %601 = vector.load %arg18[%c0_1026, %c2304] : memref<32x3200xf32, #tpu.memory_space<vmem>>, vector<4x128xf32>
    tpu.vector_store %arg18[%c0_1026, %c2304], %600 {strides = array<i32>} : memref<32x3200xf32, #tpu.memory_space<vmem>>, vector<4x128xf32>,
    %c3_1027 = arith.constant 3 : index
    %c2_1028 = arith.constant 2 : index
    %c1_1029 = arith.constant 1 : index
    %c0_1030 = arith.constant 0 : index
    %602 = vector.load %arg17[%c3_1027, %c2_1028, %c1_1029, %c0_1030] : memref<8x6x6x128xf32, #tpu.memory_space<vmem>>, vector<1x1x4x128xf32>
    %603 = vector.shape_cast %602 : vector<1x1x4x128xf32> to vector<4x128xf32>
    %c4_1031 = arith.constant 4 : index
    %c2304_1032 = arith.constant 2304 : index
    %604 = vector.load %arg18[%c4_1031, %c2304_1032] : memref<32x3200xf32, #tpu.memory_space<vmem>>, vector<4x128xf32>
    tpu.vector_store %arg18[%c4_1031, %c2304_1032], %603 {strides = array<i32>} : memref<32x3200xf32, #tpu.memory_space<vmem>>, vector<4x128xf32>,
    %c3_1033 = arith.constant 3 : index
    %c3_1034 = arith.constant 3 : index
    %c1_1035 = arith.constant 1 : index
    %c0_1036 = arith.constant 0 : index
    %605 = vector.load %arg17[%c3_1033, %c3_1034, %c1_1035, %c0_1036] : memref<8x6x6x128xf32, #tpu.memory_space<vmem>>, vector<1x1x4x128xf32>
    %606 = vector.shape_cast %605 : vector<1x1x4x128xf32> to vector<4x128xf32>
    %c8_1037 = arith.constant 8 : index
    %c2304_1038 = arith.constant 2304 : index
    %607 = vector.load %arg18[%c8_1037, %c2304_1038] : memref<32x3200xf32, #tpu.memory_space<vmem>>, vector<4x128xf32>
    tpu.vector_store %arg18[%c8_1037, %c2304_1038], %606 {strides = array<i32>} : memref<32x3200xf32, #tpu.memory_space<vmem>>, vector<4x128xf32>,
    %c3_1039 = arith.constant 3 : index
    %c4_1040 = arith.constant 4 : index
    %c1_1041 = arith.constant 1 : index
    %c0_1042 = arith.constant 0 : index
    %608 = vector.load %arg17[%c3_1039, %c4_1040, %c1_1041, %c0_1042] : memref<8x6x6x128xf32, #tpu.memory_space<vmem>>, vector<1x1x4x128xf32>
    %609 = vector.shape_cast %608 : vector<1x1x4x128xf32> to vector<4x128xf32>
    %c12_1043 = arith.constant 12 : index
    %c2304_1044 = arith.constant 2304 : index
    %610 = vector.load %arg18[%c12_1043, %c2304_1044] : memref<32x3200xf32, #tpu.memory_space<vmem>>, vector<4x128xf32>
    tpu.vector_store %arg18[%c12_1043, %c2304_1044], %609 {strides = array<i32>} : memref<32x3200xf32, #tpu.memory_space<vmem>>, vector<4x128xf32>,
    %c7_1045 = arith.constant 7 : index
    %c1_1046 = arith.constant 1 : index
    %c1_1047 = arith.constant 1 : index
    %c0_1048 = arith.constant 0 : index
    %611 = vector.load %arg17[%c7_1045, %c1_1046, %c1_1047, %c0_1048] : memref<8x6x6x128xf32, #tpu.memory_space<vmem>>, vector<1x1x4x128xf32>
    %612 = vector.shape_cast %611 : vector<1x1x4x128xf32> to vector<4x128xf32>
    %c16_1049 = arith.constant 16 : index
    %c2304_1050 = arith.constant 2304 : index
    %613 = vector.load %arg18[%c16_1049, %c2304_1050] : memref<32x3200xf32, #tpu.memory_space<vmem>>, vector<4x128xf32>
    tpu.vector_store %arg18[%c16_1049, %c2304_1050], %612 {strides = array<i32>} : memref<32x3200xf32, #tpu.memory_space<vmem>>, vector<4x128xf32>,
    %c7_1051 = arith.constant 7 : index
    %c2_1052 = arith.constant 2 : index
    %c1_1053 = arith.constant 1 : index
    %c0_1054 = arith.constant 0 : index
    %614 = vector.load %arg17[%c7_1051, %c2_1052, %c1_1053, %c0_1054] : memref<8x6x6x128xf32, #tpu.memory_space<vmem>>, vector<1x1x4x128xf32>
    %615 = vector.shape_cast %614 : vector<1x1x4x128xf32> to vector<4x128xf32>
    %c20_1055 = arith.constant 20 : index
    %c2304_1056 = arith.constant 2304 : index
    %616 = vector.load %arg18[%c20_1055, %c2304_1056] : memref<32x3200xf32, #tpu.memory_space<vmem>>, vector<4x128xf32>
    tpu.vector_store %arg18[%c20_1055, %c2304_1056], %615 {strides = array<i32>} : memref<32x3200xf32, #tpu.memory_space<vmem>>, vector<4x128xf32>,
    %c7_1057 = arith.constant 7 : index
    %c3_1058 = arith.constant 3 : index
    %c1_1059 = arith.constant 1 : index
    %c0_1060 = arith.constant 0 : index
    %617 = vector.load %arg17[%c7_1057, %c3_1058, %c1_1059, %c0_1060] : memref<8x6x6x128xf32, #tpu.memory_space<vmem>>, vector<1x1x4x128xf32>
    %618 = vector.shape_cast %617 : vector<1x1x4x128xf32> to vector<4x128xf32>
    %c24_1061 = arith.constant 24 : index
    %c2304_1062 = arith.constant 2304 : index
    %619 = vector.load %arg18[%c24_1061, %c2304_1062] : memref<32x3200xf32, #tpu.memory_space<vmem>>, vector<4x128xf32>
    tpu.vector_store %arg18[%c24_1061, %c2304_1062], %618 {strides = array<i32>} : memref<32x3200xf32, #tpu.memory_space<vmem>>, vector<4x128xf32>,
    %c7_1063 = arith.constant 7 : index
    %c4_1064 = arith.constant 4 : index
    %c1_1065 = arith.constant 1 : index
    %c0_1066 = arith.constant 0 : index
    %620 = vector.load %arg17[%c7_1063, %c4_1064, %c1_1065, %c0_1066] : memref<8x6x6x128xf32, #tpu.memory_space<vmem>>, vector<1x1x4x128xf32>
    %621 = vector.shape_cast %620 : vector<1x1x4x128xf32> to vector<4x128xf32>
    %c28_1067 = arith.constant 28 : index
    %c2304_1068 = arith.constant 2304 : index
    %622 = vector.load %arg18[%c28_1067, %c2304_1068] : memref<32x3200xf32, #tpu.memory_space<vmem>>, vector<4x128xf32>
    tpu.vector_store %arg18[%c28_1067, %c2304_1068], %621 {strides = array<i32>} : memref<32x3200xf32, #tpu.memory_space<vmem>>, vector<4x128xf32>,
    %c2_1069 = arith.constant 2 : index
    %c1_1070 = arith.constant 1 : index
    %c2_1071 = arith.constant 2 : index
    %c0_1072 = arith.constant 0 : index
    %623 = vector.load %arg17[%c2_1069, %c1_1070, %c2_1071, %c0_1072] : memref<8x6x6x128xf32, #tpu.memory_space<vmem>>, vector<1x1x4x128xf32>
    %624 = vector.shape_cast %623 : vector<1x1x4x128xf32> to vector<4x128xf32>
    %c0_1073 = arith.constant 0 : index
    %c2432 = arith.constant 2432 : index
    %625 = vector.load %arg18[%c0_1073, %c2432] : memref<32x3200xf32, #tpu.memory_space<vmem>>, vector<4x128xf32>
    tpu.vector_store %arg18[%c0_1073, %c2432], %624 {strides = array<i32>} : memref<32x3200xf32, #tpu.memory_space<vmem>>, vector<4x128xf32>,
    %c2_1074 = arith.constant 2 : index
    %c2_1075 = arith.constant 2 : index
    %c2_1076 = arith.constant 2 : index
    %c0_1077 = arith.constant 0 : index
    %626 = vector.load %arg17[%c2_1074, %c2_1075, %c2_1076, %c0_1077] : memref<8x6x6x128xf32, #tpu.memory_space<vmem>>, vector<1x1x4x128xf32>
    %627 = vector.shape_cast %626 : vector<1x1x4x128xf32> to vector<4x128xf32>
    %c4_1078 = arith.constant 4 : index
    %c2432_1079 = arith.constant 2432 : index
    %628 = vector.load %arg18[%c4_1078, %c2432_1079] : memref<32x3200xf32, #tpu.memory_space<vmem>>, vector<4x128xf32>
    tpu.vector_store %arg18[%c4_1078, %c2432_1079], %627 {strides = array<i32>} : memref<32x3200xf32, #tpu.memory_space<vmem>>, vector<4x128xf32>,
    %c2_1080 = arith.constant 2 : index
    %c3_1081 = arith.constant 3 : index
    %c2_1082 = arith.constant 2 : index
    %c0_1083 = arith.constant 0 : index
    %629 = vector.load %arg17[%c2_1080, %c3_1081, %c2_1082, %c0_1083] : memref<8x6x6x128xf32, #tpu.memory_space<vmem>>, vector<1x1x4x128xf32>
    %630 = vector.shape_cast %629 : vector<1x1x4x128xf32> to vector<4x128xf32>
    %c8_1084 = arith.constant 8 : index
    %c2432_1085 = arith.constant 2432 : index
    %631 = vector.load %arg18[%c8_1084, %c2432_1085] : memref<32x3200xf32, #tpu.memory_space<vmem>>, vector<4x128xf32>
    tpu.vector_store %arg18[%c8_1084, %c2432_1085], %630 {strides = array<i32>} : memref<32x3200xf32, #tpu.memory_space<vmem>>, vector<4x128xf32>,
    %c2_1086 = arith.constant 2 : index
    %c4_1087 = arith.constant 4 : index
    %c2_1088 = arith.constant 2 : index
    %c0_1089 = arith.constant 0 : index
    %632 = vector.load %arg17[%c2_1086, %c4_1087, %c2_1088, %c0_1089] : memref<8x6x6x128xf32, #tpu.memory_space<vmem>>, vector<1x1x4x128xf32>
    %633 = vector.shape_cast %632 : vector<1x1x4x128xf32> to vector<4x128xf32>
    %c12_1090 = arith.constant 12 : index
    %c2432_1091 = arith.constant 2432 : index
    %634 = vector.load %arg18[%c12_1090, %c2432_1091] : memref<32x3200xf32, #tpu.memory_space<vmem>>, vector<4x128xf32>
    tpu.vector_store %arg18[%c12_1090, %c2432_1091], %633 {strides = array<i32>} : memref<32x3200xf32, #tpu.memory_space<vmem>>, vector<4x128xf32>,
    %c6_1092 = arith.constant 6 : index
    %c1_1093 = arith.constant 1 : index
    %c2_1094 = arith.constant 2 : index
    %c0_1095 = arith.constant 0 : index
    %635 = vector.load %arg17[%c6_1092, %c1_1093, %c2_1094, %c0_1095] : memref<8x6x6x128xf32, #tpu.memory_space<vmem>>, vector<1x1x4x128xf32>
    %636 = vector.shape_cast %635 : vector<1x1x4x128xf32> to vector<4x128xf32>
    %c16_1096 = arith.constant 16 : index
    %c2432_1097 = arith.constant 2432 : index
    %637 = vector.load %arg18[%c16_1096, %c2432_1097] : memref<32x3200xf32, #tpu.memory_space<vmem>>, vector<4x128xf32>
    tpu.vector_store %arg18[%c16_1096, %c2432_1097], %636 {strides = array<i32>} : memref<32x3200xf32, #tpu.memory_space<vmem>>, vector<4x128xf32>,
    %c6_1098 = arith.constant 6 : index
    %c2_1099 = arith.constant 2 : index
    %c2_1100 = arith.constant 2 : index
    %c0_1101 = arith.constant 0 : index
    %638 = vector.load %arg17[%c6_1098, %c2_1099, %c2_1100, %c0_1101] : memref<8x6x6x128xf32, #tpu.memory_space<vmem>>, vector<1x1x4x128xf32>
    %639 = vector.shape_cast %638 : vector<1x1x4x128xf32> to vector<4x128xf32>
    %c20_1102 = arith.constant 20 : index
    %c2432_1103 = arith.constant 2432 : index
    %640 = vector.load %arg18[%c20_1102, %c2432_1103] : memref<32x3200xf32, #tpu.memory_space<vmem>>, vector<4x128xf32>
    tpu.vector_store %arg18[%c20_1102, %c2432_1103], %639 {strides = array<i32>} : memref<32x3200xf32, #tpu.memory_space<vmem>>, vector<4x128xf32>,
    %c6_1104 = arith.constant 6 : index
    %c3_1105 = arith.constant 3 : index
    %c2_1106 = arith.constant 2 : index
    %c0_1107 = arith.constant 0 : index
    %641 = vector.load %arg17[%c6_1104, %c3_1105, %c2_1106, %c0_1107] : memref<8x6x6x128xf32, #tpu.memory_space<vmem>>, vector<1x1x4x128xf32>
    %642 = vector.shape_cast %641 : vector<1x1x4x128xf32> to vector<4x128xf32>
    %c24_1108 = arith.constant 24 : index
    %c2432_1109 = arith.constant 2432 : index
    %643 = vector.load %arg18[%c24_1108, %c2432_1109] : memref<32x3200xf32, #tpu.memory_space<vmem>>, vector<4x128xf32>
    tpu.vector_store %arg18[%c24_1108, %c2432_1109], %642 {strides = array<i32>} : memref<32x3200xf32, #tpu.memory_space<vmem>>, vector<4x128xf32>,
    %c6_1110 = arith.constant 6 : index
    %c4_1111 = arith.constant 4 : index
    %c2_1112 = arith.constant 2 : index
    %c0_1113 = arith.constant 0 : index
    %644 = vector.load %arg17[%c6_1110, %c4_1111, %c2_1112, %c0_1113] : memref<8x6x6x128xf32, #tpu.memory_space<vmem>>, vector<1x1x4x128xf32>
    %645 = vector.shape_cast %644 : vector<1x1x4x128xf32> to vector<4x128xf32>
    %c28_1114 = arith.constant 28 : index
    %c2432_1115 = arith.constant 2432 : index
    %646 = vector.load %arg18[%c28_1114, %c2432_1115] : memref<32x3200xf32, #tpu.memory_space<vmem>>, vector<4x128xf32>
    tpu.vector_store %arg18[%c28_1114, %c2432_1115], %645 {strides = array<i32>} : memref<32x3200xf32, #tpu.memory_space<vmem>>, vector<4x128xf32>,
    %c0_1116 = arith.constant 0 : index
    %c2_1117 = arith.constant 2 : index
    %c0_1118 = arith.constant 0 : index
    %c0_1119 = arith.constant 0 : index
    %647 = vector.load %arg17[%c0_1116, %c2_1117, %c0_1118, %c0_1119] : memref<8x6x6x128xf32, #tpu.memory_space<vmem>>, vector<1x1x4x128xf32>
    %648 = vector.shape_cast %647 : vector<1x1x4x128xf32> to vector<4x128xf32>
    %c0_1120 = arith.constant 0 : index
    %c2560 = arith.constant 2560 : index
    %649 = vector.load %arg18[%c0_1120, %c2560] : memref<32x3200xf32, #tpu.memory_space<vmem>>, vector<4x128xf32>
    tpu.vector_store %arg18[%c0_1120, %c2560], %648 {strides = array<i32>} : memref<32x3200xf32, #tpu.memory_space<vmem>>, vector<4x128xf32>,
    %c0_1121 = arith.constant 0 : index
    %c3_1122 = arith.constant 3 : index
    %c0_1123 = arith.constant 0 : index
    %c0_1124 = arith.constant 0 : index
    %650 = vector.load %arg17[%c0_1121, %c3_1122, %c0_1123, %c0_1124] : memref<8x6x6x128xf32, #tpu.memory_space<vmem>>, vector<1x1x4x128xf32>
    %651 = vector.shape_cast %650 : vector<1x1x4x128xf32> to vector<4x128xf32>
    %c4_1125 = arith.constant 4 : index
    %c2560_1126 = arith.constant 2560 : index
    %652 = vector.load %arg18[%c4_1125, %c2560_1126] : memref<32x3200xf32, #tpu.memory_space<vmem>>, vector<4x128xf32>
    tpu.vector_store %arg18[%c4_1125, %c2560_1126], %651 {strides = array<i32>} : memref<32x3200xf32, #tpu.memory_space<vmem>>, vector<4x128xf32>,
    %c0_1127 = arith.constant 0 : index
    %c4_1128 = arith.constant 4 : index
    %c0_1129 = arith.constant 0 : index
    %c0_1130 = arith.constant 0 : index
    %653 = vector.load %arg17[%c0_1127, %c4_1128, %c0_1129, %c0_1130] : memref<8x6x6x128xf32, #tpu.memory_space<vmem>>, vector<1x1x4x128xf32>
    %654 = vector.shape_cast %653 : vector<1x1x4x128xf32> to vector<4x128xf32>
    %c8_1131 = arith.constant 8 : index
    %c2560_1132 = arith.constant 2560 : index
    %655 = vector.load %arg18[%c8_1131, %c2560_1132] : memref<32x3200xf32, #tpu.memory_space<vmem>>, vector<4x128xf32>
    tpu.vector_store %arg18[%c8_1131, %c2560_1132], %654 {strides = array<i32>} : memref<32x3200xf32, #tpu.memory_space<vmem>>, vector<4x128xf32>,
    %c0_1133 = arith.constant 0 : index
    %c5_1134 = arith.constant 5 : index
    %c0_1135 = arith.constant 0 : index
    %c0_1136 = arith.constant 0 : index
    %656 = vector.load %arg17[%c0_1133, %c5_1134, %c0_1135, %c0_1136] : memref<8x6x6x128xf32, #tpu.memory_space<vmem>>, vector<1x1x4x128xf32>
    %657 = vector.shape_cast %656 : vector<1x1x4x128xf32> to vector<4x128xf32>
    %c12_1137 = arith.constant 12 : index
    %c2560_1138 = arith.constant 2560 : index
    %658 = vector.load %arg18[%c12_1137, %c2560_1138] : memref<32x3200xf32, #tpu.memory_space<vmem>>, vector<4x128xf32>
    tpu.vector_store %arg18[%c12_1137, %c2560_1138], %657 {strides = array<i32>} : memref<32x3200xf32, #tpu.memory_space<vmem>>, vector<4x128xf32>,
    %c4_1139 = arith.constant 4 : index
    %c2_1140 = arith.constant 2 : index
    %c0_1141 = arith.constant 0 : index
    %c0_1142 = arith.constant 0 : index
    %659 = vector.load %arg17[%c4_1139, %c2_1140, %c0_1141, %c0_1142] : memref<8x6x6x128xf32, #tpu.memory_space<vmem>>, vector<1x1x4x128xf32>
    %660 = vector.shape_cast %659 : vector<1x1x4x128xf32> to vector<4x128xf32>
    %c16_1143 = arith.constant 16 : index
    %c2560_1144 = arith.constant 2560 : index
    %661 = vector.load %arg18[%c16_1143, %c2560_1144] : memref<32x3200xf32, #tpu.memory_space<vmem>>, vector<4x128xf32>
    tpu.vector_store %arg18[%c16_1143, %c2560_1144], %660 {strides = array<i32>} : memref<32x3200xf32, #tpu.memory_space<vmem>>, vector<4x128xf32>,
    %c4_1145 = arith.constant 4 : index
    %c3_1146 = arith.constant 3 : index
    %c0_1147 = arith.constant 0 : index
    %c0_1148 = arith.constant 0 : index
    %662 = vector.load %arg17[%c4_1145, %c3_1146, %c0_1147, %c0_1148] : memref<8x6x6x128xf32, #tpu.memory_space<vmem>>, vector<1x1x4x128xf32>
    %663 = vector.shape_cast %662 : vector<1x1x4x128xf32> to vector<4x128xf32>
    %c20_1149 = arith.constant 20 : index
    %c2560_1150 = arith.constant 2560 : index
    %664 = vector.load %arg18[%c20_1149, %c2560_1150] : memref<32x3200xf32, #tpu.memory_space<vmem>>, vector<4x128xf32>
    tpu.vector_store %arg18[%c20_1149, %c2560_1150], %663 {strides = array<i32>} : memref<32x3200xf32, #tpu.memory_space<vmem>>, vector<4x128xf32>,
    %c4_1151 = arith.constant 4 : index
    %c4_1152 = arith.constant 4 : index
    %c0_1153 = arith.constant 0 : index
    %c0_1154 = arith.constant 0 : index
    %665 = vector.load %arg17[%c4_1151, %c4_1152, %c0_1153, %c0_1154] : memref<8x6x6x128xf32, #tpu.memory_space<vmem>>, vector<1x1x4x128xf32>
    %666 = vector.shape_cast %665 : vector<1x1x4x128xf32> to vector<4x128xf32>
    %c24_1155 = arith.constant 24 : index
    %c2560_1156 = arith.constant 2560 : index
    %667 = vector.load %arg18[%c24_1155, %c2560_1156] : memref<32x3200xf32, #tpu.memory_space<vmem>>, vector<4x128xf32>
    tpu.vector_store %arg18[%c24_1155, %c2560_1156], %666 {strides = array<i32>} : memref<32x3200xf32, #tpu.memory_space<vmem>>, vector<4x128xf32>,
    %c4_1157 = arith.constant 4 : index
    %c5_1158 = arith.constant 5 : index
    %c0_1159 = arith.constant 0 : index
    %c0_1160 = arith.constant 0 : index
    %668 = vector.load %arg17[%c4_1157, %c5_1158, %c0_1159, %c0_1160] : memref<8x6x6x128xf32, #tpu.memory_space<vmem>>, vector<1x1x4x128xf32>
    %669 = vector.shape_cast %668 : vector<1x1x4x128xf32> to vector<4x128xf32>
    %c28_1161 = arith.constant 28 : index
    %c2560_1162 = arith.constant 2560 : index
    %670 = vector.load %arg18[%c28_1161, %c2560_1162] : memref<32x3200xf32, #tpu.memory_space<vmem>>, vector<4x128xf32>
    tpu.vector_store %arg18[%c28_1161, %c2560_1162], %669 {strides = array<i32>} : memref<32x3200xf32, #tpu.memory_space<vmem>>, vector<4x128xf32>,
    %c1_1163 = arith.constant 1 : index
    %c2_1164 = arith.constant 2 : index
    %c0_1165 = arith.constant 0 : index
    %c0_1166 = arith.constant 0 : index
    %671 = vector.load %arg17[%c1_1163, %c2_1164, %c0_1165, %c0_1166] : memref<8x6x6x128xf32, #tpu.memory_space<vmem>>, vector<1x1x4x128xf32>
    %672 = vector.shape_cast %671 : vector<1x1x4x128xf32> to vector<4x128xf32>
    %c0_1167 = arith.constant 0 : index
    %c2688 = arith.constant 2688 : index
    %673 = vector.load %arg18[%c0_1167, %c2688] : memref<32x3200xf32, #tpu.memory_space<vmem>>, vector<4x128xf32>
    tpu.vector_store %arg18[%c0_1167, %c2688], %672 {strides = array<i32>} : memref<32x3200xf32, #tpu.memory_space<vmem>>, vector<4x128xf32>,
    %c1_1168 = arith.constant 1 : index
    %c3_1169 = arith.constant 3 : index
    %c0_1170 = arith.constant 0 : index
    %c0_1171 = arith.constant 0 : index
    %674 = vector.load %arg17[%c1_1168, %c3_1169, %c0_1170, %c0_1171] : memref<8x6x6x128xf32, #tpu.memory_space<vmem>>, vector<1x1x4x128xf32>
    %675 = vector.shape_cast %674 : vector<1x1x4x128xf32> to vector<4x128xf32>
    %c4_1172 = arith.constant 4 : index
    %c2688_1173 = arith.constant 2688 : index
    %676 = vector.load %arg18[%c4_1172, %c2688_1173] : memref<32x3200xf32, #tpu.memory_space<vmem>>, vector<4x128xf32>
    tpu.vector_store %arg18[%c4_1172, %c2688_1173], %675 {strides = array<i32>} : memref<32x3200xf32, #tpu.memory_space<vmem>>, vector<4x128xf32>,
    %c1_1174 = arith.constant 1 : index
    %c4_1175 = arith.constant 4 : index
    %c0_1176 = arith.constant 0 : index
    %c0_1177 = arith.constant 0 : index
    %677 = vector.load %arg17[%c1_1174, %c4_1175, %c0_1176, %c0_1177] : memref<8x6x6x128xf32, #tpu.memory_space<vmem>>, vector<1x1x4x128xf32>
    %678 = vector.shape_cast %677 : vector<1x1x4x128xf32> to vector<4x128xf32>
    %c8_1178 = arith.constant 8 : index
    %c2688_1179 = arith.constant 2688 : index
    %679 = vector.load %arg18[%c8_1178, %c2688_1179] : memref<32x3200xf32, #tpu.memory_space<vmem>>, vector<4x128xf32>
    tpu.vector_store %arg18[%c8_1178, %c2688_1179], %678 {strides = array<i32>} : memref<32x3200xf32, #tpu.memory_space<vmem>>, vector<4x128xf32>,
    %c1_1180 = arith.constant 1 : index
    %c5_1181 = arith.constant 5 : index
    %c0_1182 = arith.constant 0 : index
    %c0_1183 = arith.constant 0 : index
    %680 = vector.load %arg17[%c1_1180, %c5_1181, %c0_1182, %c0_1183] : memref<8x6x6x128xf32, #tpu.memory_space<vmem>>, vector<1x1x4x128xf32>
    %681 = vector.shape_cast %680 : vector<1x1x4x128xf32> to vector<4x128xf32>
    %c12_1184 = arith.constant 12 : index
    %c2688_1185 = arith.constant 2688 : index
    %682 = vector.load %arg18[%c12_1184, %c2688_1185] : memref<32x3200xf32, #tpu.memory_space<vmem>>, vector<4x128xf32>
    tpu.vector_store %arg18[%c12_1184, %c2688_1185], %681 {strides = array<i32>} : memref<32x3200xf32, #tpu.memory_space<vmem>>, vector<4x128xf32>,
    %c5_1186 = arith.constant 5 : index
    %c2_1187 = arith.constant 2 : index
    %c0_1188 = arith.constant 0 : index
    %c0_1189 = arith.constant 0 : index
    %683 = vector.load %arg17[%c5_1186, %c2_1187, %c0_1188, %c0_1189] : memref<8x6x6x128xf32, #tpu.memory_space<vmem>>, vector<1x1x4x128xf32>
    %684 = vector.shape_cast %683 : vector<1x1x4x128xf32> to vector<4x128xf32>
    %c16_1190 = arith.constant 16 : index
    %c2688_1191 = arith.constant 2688 : index
    %685 = vector.load %arg18[%c16_1190, %c2688_1191] : memref<32x3200xf32, #tpu.memory_space<vmem>>, vector<4x128xf32>
    tpu.vector_store %arg18[%c16_1190, %c2688_1191], %684 {strides = array<i32>} : memref<32x3200xf32, #tpu.memory_space<vmem>>, vector<4x128xf32>,
    %c5_1192 = arith.constant 5 : index
    %c3_1193 = arith.constant 3 : index
    %c0_1194 = arith.constant 0 : index
    %c0_1195 = arith.constant 0 : index
    %686 = vector.load %arg17[%c5_1192, %c3_1193, %c0_1194, %c0_1195] : memref<8x6x6x128xf32, #tpu.memory_space<vmem>>, vector<1x1x4x128xf32>
    %687 = vector.shape_cast %686 : vector<1x1x4x128xf32> to vector<4x128xf32>
    %c20_1196 = arith.constant 20 : index
    %c2688_1197 = arith.constant 2688 : index
    %688 = vector.load %arg18[%c20_1196, %c2688_1197] : memref<32x3200xf32, #tpu.memory_space<vmem>>, vector<4x128xf32>
    tpu.vector_store %arg18[%c20_1196, %c2688_1197], %687 {strides = array<i32>} : memref<32x3200xf32, #tpu.memory_space<vmem>>, vector<4x128xf32>,
    %c5_1198 = arith.constant 5 : index
    %c4_1199 = arith.constant 4 : index
    %c0_1200 = arith.constant 0 : index
    %c0_1201 = arith.constant 0 : index
    %689 = vector.load %arg17[%c5_1198, %c4_1199, %c0_1200, %c0_1201] : memref<8x6x6x128xf32, #tpu.memory_space<vmem>>, vector<1x1x4x128xf32>
    %690 = vector.shape_cast %689 : vector<1x1x4x128xf32> to vector<4x128xf32>
    %c24_1202 = arith.constant 24 : index
    %c2688_1203 = arith.constant 2688 : index
    %691 = vector.load %arg18[%c24_1202, %c2688_1203] : memref<32x3200xf32, #tpu.memory_space<vmem>>, vector<4x128xf32>
    tpu.vector_store %arg18[%c24_1202, %c2688_1203], %690 {strides = array<i32>} : memref<32x3200xf32, #tpu.memory_space<vmem>>, vector<4x128xf32>,
    %c5_1204 = arith.constant 5 : index
    %c5_1205 = arith.constant 5 : index
    %c0_1206 = arith.constant 0 : index
    %c0_1207 = arith.constant 0 : index
    %692 = vector.load %arg17[%c5_1204, %c5_1205, %c0_1206, %c0_1207] : memref<8x6x6x128xf32, #tpu.memory_space<vmem>>, vector<1x1x4x128xf32>
    %693 = vector.shape_cast %692 : vector<1x1x4x128xf32> to vector<4x128xf32>
    %c28_1208 = arith.constant 28 : index
    %c2688_1209 = arith.constant 2688 : index
    %694 = vector.load %arg18[%c28_1208, %c2688_1209] : memref<32x3200xf32, #tpu.memory_space<vmem>>, vector<4x128xf32>
    tpu.vector_store %arg18[%c28_1208, %c2688_1209], %693 {strides = array<i32>} : memref<32x3200xf32, #tpu.memory_space<vmem>>, vector<4x128xf32>,
    %c0_1210 = arith.constant 0 : index
    %c2_1211 = arith.constant 2 : index
    %c1_1212 = arith.constant 1 : index
    %c0_1213 = arith.constant 0 : index
    %695 = vector.load %arg17[%c0_1210, %c2_1211, %c1_1212, %c0_1213] : memref<8x6x6x128xf32, #tpu.memory_space<vmem>>, vector<1x1x4x128xf32>
    %696 = vector.shape_cast %695 : vector<1x1x4x128xf32> to vector<4x128xf32>
    %c0_1214 = arith.constant 0 : index
    %c2816 = arith.constant 2816 : index
    %697 = vector.load %arg18[%c0_1214, %c2816] : memref<32x3200xf32, #tpu.memory_space<vmem>>, vector<4x128xf32>
    tpu.vector_store %arg18[%c0_1214, %c2816], %696 {strides = array<i32>} : memref<32x3200xf32, #tpu.memory_space<vmem>>, vector<4x128xf32>,
    %c0_1215 = arith.constant 0 : index
    %c3_1216 = arith.constant 3 : index
    %c1_1217 = arith.constant 1 : index
    %c0_1218 = arith.constant 0 : index
    %698 = vector.load %arg17[%c0_1215, %c3_1216, %c1_1217, %c0_1218] : memref<8x6x6x128xf32, #tpu.memory_space<vmem>>, vector<1x1x4x128xf32>
    %699 = vector.shape_cast %698 : vector<1x1x4x128xf32> to vector<4x128xf32>
    %c4_1219 = arith.constant 4 : index
    %c2816_1220 = arith.constant 2816 : index
    %700 = vector.load %arg18[%c4_1219, %c2816_1220] : memref<32x3200xf32, #tpu.memory_space<vmem>>, vector<4x128xf32>
    tpu.vector_store %arg18[%c4_1219, %c2816_1220], %699 {strides = array<i32>} : memref<32x3200xf32, #tpu.memory_space<vmem>>, vector<4x128xf32>,
    %c0_1221 = arith.constant 0 : index
    %c4_1222 = arith.constant 4 : index
    %c1_1223 = arith.constant 1 : index
    %c0_1224 = arith.constant 0 : index
    %701 = vector.load %arg17[%c0_1221, %c4_1222, %c1_1223, %c0_1224] : memref<8x6x6x128xf32, #tpu.memory_space<vmem>>, vector<1x1x4x128xf32>
    %702 = vector.shape_cast %701 : vector<1x1x4x128xf32> to vector<4x128xf32>
    %c8_1225 = arith.constant 8 : index
    %c2816_1226 = arith.constant 2816 : index
    %703 = vector.load %arg18[%c8_1225, %c2816_1226] : memref<32x3200xf32, #tpu.memory_space<vmem>>, vector<4x128xf32>
    tpu.vector_store %arg18[%c8_1225, %c2816_1226], %702 {strides = array<i32>} : memref<32x3200xf32, #tpu.memory_space<vmem>>, vector<4x128xf32>,
    %c0_1227 = arith.constant 0 : index
    %c5_1228 = arith.constant 5 : index
    %c1_1229 = arith.constant 1 : index
    %c0_1230 = arith.constant 0 : index
    %704 = vector.load %arg17[%c0_1227, %c5_1228, %c1_1229, %c0_1230] : memref<8x6x6x128xf32, #tpu.memory_space<vmem>>, vector<1x1x4x128xf32>
    %705 = vector.shape_cast %704 : vector<1x1x4x128xf32> to vector<4x128xf32>
    %c12_1231 = arith.constant 12 : index
    %c2816_1232 = arith.constant 2816 : index
    %706 = vector.load %arg18[%c12_1231, %c2816_1232] : memref<32x3200xf32, #tpu.memory_space<vmem>>, vector<4x128xf32>
    tpu.vector_store %arg18[%c12_1231, %c2816_1232], %705 {strides = array<i32>} : memref<32x3200xf32, #tpu.memory_space<vmem>>, vector<4x128xf32>,
    %c4_1233 = arith.constant 4 : index
    %c2_1234 = arith.constant 2 : index
    %c1_1235 = arith.constant 1 : index
    %c0_1236 = arith.constant 0 : index
    %707 = vector.load %arg17[%c4_1233, %c2_1234, %c1_1235, %c0_1236] : memref<8x6x6x128xf32, #tpu.memory_space<vmem>>, vector<1x1x4x128xf32>
    %708 = vector.shape_cast %707 : vector<1x1x4x128xf32> to vector<4x128xf32>
    %c16_1237 = arith.constant 16 : index
    %c2816_1238 = arith.constant 2816 : index
    %709 = vector.load %arg18[%c16_1237, %c2816_1238] : memref<32x3200xf32, #tpu.memory_space<vmem>>, vector<4x128xf32>
    tpu.vector_store %arg18[%c16_1237, %c2816_1238], %708 {strides = array<i32>} : memref<32x3200xf32, #tpu.memory_space<vmem>>, vector<4x128xf32>,
    %c4_1239 = arith.constant 4 : index
    %c3_1240 = arith.constant 3 : index
    %c1_1241 = arith.constant 1 : index
    %c0_1242 = arith.constant 0 : index
    %710 = vector.load %arg17[%c4_1239, %c3_1240, %c1_1241, %c0_1242] : memref<8x6x6x128xf32, #tpu.memory_space<vmem>>, vector<1x1x4x128xf32>
    %711 = vector.shape_cast %710 : vector<1x1x4x128xf32> to vector<4x128xf32>
    %c20_1243 = arith.constant 20 : index
    %c2816_1244 = arith.constant 2816 : index
    %712 = vector.load %arg18[%c20_1243, %c2816_1244] : memref<32x3200xf32, #tpu.memory_space<vmem>>, vector<4x128xf32>
    tpu.vector_store %arg18[%c20_1243, %c2816_1244], %711 {strides = array<i32>} : memref<32x3200xf32, #tpu.memory_space<vmem>>, vector<4x128xf32>,
    %c4_1245 = arith.constant 4 : index
    %c4_1246 = arith.constant 4 : index
    %c1_1247 = arith.constant 1 : index
    %c0_1248 = arith.constant 0 : index
    %713 = vector.load %arg17[%c4_1245, %c4_1246, %c1_1247, %c0_1248] : memref<8x6x6x128xf32, #tpu.memory_space<vmem>>, vector<1x1x4x128xf32>
    %714 = vector.shape_cast %713 : vector<1x1x4x128xf32> to vector<4x128xf32>
    %c24_1249 = arith.constant 24 : index
    %c2816_1250 = arith.constant 2816 : index
    %715 = vector.load %arg18[%c24_1249, %c2816_1250] : memref<32x3200xf32, #tpu.memory_space<vmem>>, vector<4x128xf32>
    tpu.vector_store %arg18[%c24_1249, %c2816_1250], %714 {strides = array<i32>} : memref<32x3200xf32, #tpu.memory_space<vmem>>, vector<4x128xf32>,
    %c4_1251 = arith.constant 4 : index
    %c5_1252 = arith.constant 5 : index
    %c1_1253 = arith.constant 1 : index
    %c0_1254 = arith.constant 0 : index
    %716 = vector.load %arg17[%c4_1251, %c5_1252, %c1_1253, %c0_1254] : memref<8x6x6x128xf32, #tpu.memory_space<vmem>>, vector<1x1x4x128xf32>
    %717 = vector.shape_cast %716 : vector<1x1x4x128xf32> to vector<4x128xf32>
    %c28_1255 = arith.constant 28 : index
    %c2816_1256 = arith.constant 2816 : index
    %718 = vector.load %arg18[%c28_1255, %c2816_1256] : memref<32x3200xf32, #tpu.memory_space<vmem>>, vector<4x128xf32>
    tpu.vector_store %arg18[%c28_1255, %c2816_1256], %717 {strides = array<i32>} : memref<32x3200xf32, #tpu.memory_space<vmem>>, vector<4x128xf32>,
    %c1_1257 = arith.constant 1 : index
    %c2_1258 = arith.constant 2 : index
    %c1_1259 = arith.constant 1 : index
    %c0_1260 = arith.constant 0 : index
    %719 = vector.load %arg17[%c1_1257, %c2_1258, %c1_1259, %c0_1260] : memref<8x6x6x128xf32, #tpu.memory_space<vmem>>, vector<1x1x4x128xf32>
    %720 = vector.shape_cast %719 : vector<1x1x4x128xf32> to vector<4x128xf32>
    %c0_1261 = arith.constant 0 : index
    %c2944 = arith.constant 2944 : index
    %721 = vector.load %arg18[%c0_1261, %c2944] : memref<32x3200xf32, #tpu.memory_space<vmem>>, vector<4x128xf32>
    tpu.vector_store %arg18[%c0_1261, %c2944], %720 {strides = array<i32>} : memref<32x3200xf32, #tpu.memory_space<vmem>>, vector<4x128xf32>,
    %c1_1262 = arith.constant 1 : index
    %c3_1263 = arith.constant 3 : index
    %c1_1264 = arith.constant 1 : index
    %c0_1265 = arith.constant 0 : index
    %722 = vector.load %arg17[%c1_1262, %c3_1263, %c1_1264, %c0_1265] : memref<8x6x6x128xf32, #tpu.memory_space<vmem>>, vector<1x1x4x128xf32>
    %723 = vector.shape_cast %722 : vector<1x1x4x128xf32> to vector<4x128xf32>
    %c4_1266 = arith.constant 4 : index
    %c2944_1267 = arith.constant 2944 : index
    %724 = vector.load %arg18[%c4_1266, %c2944_1267] : memref<32x3200xf32, #tpu.memory_space<vmem>>, vector<4x128xf32>
    tpu.vector_store %arg18[%c4_1266, %c2944_1267], %723 {strides = array<i32>} : memref<32x3200xf32, #tpu.memory_space<vmem>>, vector<4x128xf32>,
    %c1_1268 = arith.constant 1 : index
    %c4_1269 = arith.constant 4 : index
    %c1_1270 = arith.constant 1 : index
    %c0_1271 = arith.constant 0 : index
    %725 = vector.load %arg17[%c1_1268, %c4_1269, %c1_1270, %c0_1271] : memref<8x6x6x128xf32, #tpu.memory_space<vmem>>, vector<1x1x4x128xf32>
    %726 = vector.shape_cast %725 : vector<1x1x4x128xf32> to vector<4x128xf32>
    %c8_1272 = arith.constant 8 : index
    %c2944_1273 = arith.constant 2944 : index
    %727 = vector.load %arg18[%c8_1272, %c2944_1273] : memref<32x3200xf32, #tpu.memory_space<vmem>>, vector<4x128xf32>
    tpu.vector_store %arg18[%c8_1272, %c2944_1273], %726 {strides = array<i32>} : memref<32x3200xf32, #tpu.memory_space<vmem>>, vector<4x128xf32>,
    %c1_1274 = arith.constant 1 : index
    %c5_1275 = arith.constant 5 : index
    %c1_1276 = arith.constant 1 : index
    %c0_1277 = arith.constant 0 : index
    %728 = vector.load %arg17[%c1_1274, %c5_1275, %c1_1276, %c0_1277] : memref<8x6x6x128xf32, #tpu.memory_space<vmem>>, vector<1x1x4x128xf32>
    %729 = vector.shape_cast %728 : vector<1x1x4x128xf32> to vector<4x128xf32>
    %c12_1278 = arith.constant 12 : index
    %c2944_1279 = arith.constant 2944 : index
    %730 = vector.load %arg18[%c12_1278, %c2944_1279] : memref<32x3200xf32, #tpu.memory_space<vmem>>, vector<4x128xf32>
    tpu.vector_store %arg18[%c12_1278, %c2944_1279], %729 {strides = array<i32>} : memref<32x3200xf32, #tpu.memory_space<vmem>>, vector<4x128xf32>,
    %c5_1280 = arith.constant 5 : index
    %c2_1281 = arith.constant 2 : index
    %c1_1282 = arith.constant 1 : index
    %c0_1283 = arith.constant 0 : index
    %731 = vector.load %arg17[%c5_1280, %c2_1281, %c1_1282, %c0_1283] : memref<8x6x6x128xf32, #tpu.memory_space<vmem>>, vector<1x1x4x128xf32>
    %732 = vector.shape_cast %731 : vector<1x1x4x128xf32> to vector<4x128xf32>
    %c16_1284 = arith.constant 16 : index
    %c2944_1285 = arith.constant 2944 : index
    %733 = vector.load %arg18[%c16_1284, %c2944_1285] : memref<32x3200xf32, #tpu.memory_space<vmem>>, vector<4x128xf32>
    tpu.vector_store %arg18[%c16_1284, %c2944_1285], %732 {strides = array<i32>} : memref<32x3200xf32, #tpu.memory_space<vmem>>, vector<4x128xf32>,
    %c5_1286 = arith.constant 5 : index
    %c3_1287 = arith.constant 3 : index
    %c1_1288 = arith.constant 1 : index
    %c0_1289 = arith.constant 0 : index
    %734 = vector.load %arg17[%c5_1286, %c3_1287, %c1_1288, %c0_1289] : memref<8x6x6x128xf32, #tpu.memory_space<vmem>>, vector<1x1x4x128xf32>
    %735 = vector.shape_cast %734 : vector<1x1x4x128xf32> to vector<4x128xf32>
    %c20_1290 = arith.constant 20 : index
    %c2944_1291 = arith.constant 2944 : index
    %736 = vector.load %arg18[%c20_1290, %c2944_1291] : memref<32x3200xf32, #tpu.memory_space<vmem>>, vector<4x128xf32>
    tpu.vector_store %arg18[%c20_1290, %c2944_1291], %735 {strides = array<i32>} : memref<32x3200xf32, #tpu.memory_space<vmem>>, vector<4x128xf32>,
    %c5_1292 = arith.constant 5 : index
    %c4_1293 = arith.constant 4 : index
    %c1_1294 = arith.constant 1 : index
    %c0_1295 = arith.constant 0 : index
    %737 = vector.load %arg17[%c5_1292, %c4_1293, %c1_1294, %c0_1295] : memref<8x6x6x128xf32, #tpu.memory_space<vmem>>, vector<1x1x4x128xf32>
    %738 = vector.shape_cast %737 : vector<1x1x4x128xf32> to vector<4x128xf32>
    %c24_1296 = arith.constant 24 : index
    %c2944_1297 = arith.constant 2944 : index
    %739 = vector.load %arg18[%c24_1296, %c2944_1297] : memref<32x3200xf32, #tpu.memory_space<vmem>>, vector<4x128xf32>
    tpu.vector_store %arg18[%c24_1296, %c2944_1297], %738 {strides = array<i32>} : memref<32x3200xf32, #tpu.memory_space<vmem>>, vector<4x128xf32>,
    %c5_1298 = arith.constant 5 : index
    %c5_1299 = arith.constant 5 : index
    %c1_1300 = arith.constant 1 : index
    %c0_1301 = arith.constant 0 : index
    %740 = vector.load %arg17[%c5_1298, %c5_1299, %c1_1300, %c0_1301] : memref<8x6x6x128xf32, #tpu.memory_space<vmem>>, vector<1x1x4x128xf32>
    %741 = vector.shape_cast %740 : vector<1x1x4x128xf32> to vector<4x128xf32>
    %c28_1302 = arith.constant 28 : index
    %c2944_1303 = arith.constant 2944 : index
    %742 = vector.load %arg18[%c28_1302, %c2944_1303] : memref<32x3200xf32, #tpu.memory_space<vmem>>, vector<4x128xf32>
    tpu.vector_store %arg18[%c28_1302, %c2944_1303], %741 {strides = array<i32>} : memref<32x3200xf32, #tpu.memory_space<vmem>>, vector<4x128xf32>,
    %c0_1304 = arith.constant 0 : index
    %c2_1305 = arith.constant 2 : index
    %c2_1306 = arith.constant 2 : index
    %c0_1307 = arith.constant 0 : index
    %743 = vector.load %arg17[%c0_1304, %c2_1305, %c2_1306, %c0_1307] : memref<8x6x6x128xf32, #tpu.memory_space<vmem>>, vector<1x1x4x128xf32>
    %744 = vector.shape_cast %743 : vector<1x1x4x128xf32> to vector<4x128xf32>
    %c0_1308 = arith.constant 0 : index
    %c3072 = arith.constant 3072 : index
    %745 = vector.load %arg18[%c0_1308, %c3072] : memref<32x3200xf32, #tpu.memory_space<vmem>>, vector<4x128xf32>
    tpu.vector_store %arg18[%c0_1308, %c3072], %744 {strides = array<i32>} : memref<32x3200xf32, #tpu.memory_space<vmem>>, vector<4x128xf32>,
    %c0_1309 = arith.constant 0 : index
    %c3_1310 = arith.constant 3 : index
    %c2_1311 = arith.constant 2 : index
    %c0_1312 = arith.constant 0 : index
    %746 = vector.load %arg17[%c0_1309, %c3_1310, %c2_1311, %c0_1312] : memref<8x6x6x128xf32, #tpu.memory_space<vmem>>, vector<1x1x4x128xf32>
    %747 = vector.shape_cast %746 : vector<1x1x4x128xf32> to vector<4x128xf32>
    %c4_1313 = arith.constant 4 : index
    %c3072_1314 = arith.constant 3072 : index
    %748 = vector.load %arg18[%c4_1313, %c3072_1314] : memref<32x3200xf32, #tpu.memory_space<vmem>>, vector<4x128xf32>
    tpu.vector_store %arg18[%c4_1313, %c3072_1314], %747 {strides = array<i32>} : memref<32x3200xf32, #tpu.memory_space<vmem>>, vector<4x128xf32>,
    %c0_1315 = arith.constant 0 : index
    %c4_1316 = arith.constant 4 : index
    %c2_1317 = arith.constant 2 : index
    %c0_1318 = arith.constant 0 : index
    %749 = vector.load %arg17[%c0_1315, %c4_1316, %c2_1317, %c0_1318] : memref<8x6x6x128xf32, #tpu.memory_space<vmem>>, vector<1x1x4x128xf32>
    %750 = vector.shape_cast %749 : vector<1x1x4x128xf32> to vector<4x128xf32>
    %c8_1319 = arith.constant 8 : index
    %c3072_1320 = arith.constant 3072 : index
    %751 = vector.load %arg18[%c8_1319, %c3072_1320] : memref<32x3200xf32, #tpu.memory_space<vmem>>, vector<4x128xf32>
    tpu.vector_store %arg18[%c8_1319, %c3072_1320], %750 {strides = array<i32>} : memref<32x3200xf32, #tpu.memory_space<vmem>>, vector<4x128xf32>,
    %c0_1321 = arith.constant 0 : index
    %c5_1322 = arith.constant 5 : index
    %c2_1323 = arith.constant 2 : index
    %c0_1324 = arith.constant 0 : index
    %752 = vector.load %arg17[%c0_1321, %c5_1322, %c2_1323, %c0_1324] : memref<8x6x6x128xf32, #tpu.memory_space<vmem>>, vector<1x1x4x128xf32>
    %753 = vector.shape_cast %752 : vector<1x1x4x128xf32> to vector<4x128xf32>
    %c12_1325 = arith.constant 12 : index
    %c3072_1326 = arith.constant 3072 : index
    %754 = vector.load %arg18[%c12_1325, %c3072_1326] : memref<32x3200xf32, #tpu.memory_space<vmem>>, vector<4x128xf32>
    tpu.vector_store %arg18[%c12_1325, %c3072_1326], %753 {strides = array<i32>} : memref<32x3200xf32, #tpu.memory_space<vmem>>, vector<4x128xf32>,
    %c4_1327 = arith.constant 4 : index
    %c2_1328 = arith.constant 2 : index
    %c2_1329 = arith.constant 2 : index
    %c0_1330 = arith.constant 0 : index
    %755 = vector.load %arg17[%c4_1327, %c2_1328, %c2_1329, %c0_1330] : memref<8x6x6x128xf32, #tpu.memory_space<vmem>>, vector<1x1x4x128xf32>
    %756 = vector.shape_cast %755 : vector<1x1x4x128xf32> to vector<4x128xf32>
    %c16_1331 = arith.constant 16 : index
    %c3072_1332 = arith.constant 3072 : index
    %757 = vector.load %arg18[%c16_1331, %c3072_1332] : memref<32x3200xf32, #tpu.memory_space<vmem>>, vector<4x128xf32>
    tpu.vector_store %arg18[%c16_1331, %c3072_1332], %756 {strides = array<i32>} : memref<32x3200xf32, #tpu.memory_space<vmem>>, vector<4x128xf32>,
    %c4_1333 = arith.constant 4 : index
    %c3_1334 = arith.constant 3 : index
    %c2_1335 = arith.constant 2 : index
    %c0_1336 = arith.constant 0 : index
    %758 = vector.load %arg17[%c4_1333, %c3_1334, %c2_1335, %c0_1336] : memref<8x6x6x128xf32, #tpu.memory_space<vmem>>, vector<1x1x4x128xf32>
    %759 = vector.shape_cast %758 : vector<1x1x4x128xf32> to vector<4x128xf32>
    %c20_1337 = arith.constant 20 : index
    %c3072_1338 = arith.constant 3072 : index
    %760 = vector.load %arg18[%c20_1337, %c3072_1338] : memref<32x3200xf32, #tpu.memory_space<vmem>>, vector<4x128xf32>
    tpu.vector_store %arg18[%c20_1337, %c3072_1338], %759 {strides = array<i32>} : memref<32x3200xf32, #tpu.memory_space<vmem>>, vector<4x128xf32>,
    %c4_1339 = arith.constant 4 : index
    %c4_1340 = arith.constant 4 : index
    %c2_1341 = arith.constant 2 : index
    %c0_1342 = arith.constant 0 : index
    %761 = vector.load %arg17[%c4_1339, %c4_1340, %c2_1341, %c0_1342] : memref<8x6x6x128xf32, #tpu.memory_space<vmem>>, vector<1x1x4x128xf32>
    %762 = vector.shape_cast %761 : vector<1x1x4x128xf32> to vector<4x128xf32>
    %c24_1343 = arith.constant 24 : index
    %c3072_1344 = arith.constant 3072 : index
    %763 = vector.load %arg18[%c24_1343, %c3072_1344] : memref<32x3200xf32, #tpu.memory_space<vmem>>, vector<4x128xf32>
    tpu.vector_store %arg18[%c24_1343, %c3072_1344], %762 {strides = array<i32>} : memref<32x3200xf32, #tpu.memory_space<vmem>>, vector<4x128xf32>,
    %c4_1345 = arith.constant 4 : index
    %c5_1346 = arith.constant 5 : index
    %c2_1347 = arith.constant 2 : index
    %c0_1348 = arith.constant 0 : index
    %764 = vector.load %arg17[%c4_1345, %c5_1346, %c2_1347, %c0_1348] : memref<8x6x6x128xf32, #tpu.memory_space<vmem>>, vector<1x1x4x128xf32>
    %765 = vector.shape_cast %764 : vector<1x1x4x128xf32> to vector<4x128xf32>
    %c28_1349 = arith.constant 28 : index
    %c3072_1350 = arith.constant 3072 : index
    %766 = vector.load %arg18[%c28_1349, %c3072_1350] : memref<32x3200xf32, #tpu.memory_space<vmem>>, vector<4x128xf32>
    tpu.vector_store %arg18[%c28_1349, %c3072_1350], %765 {strides = array<i32>} : memref<32x3200xf32, #tpu.memory_space<vmem>>, vector<4x128xf32>,
    %c0_1351 = arith.constant 0 : index
    %c0_1352 = arith.constant 0 : index
    %767 = vector.load %arg18[%c0_1351, %c0_1352] : memref<32x3200xf32, #tpu.memory_space<vmem>>, vector<32x3200xf32>
    %768 = arith.truncf %767 : vector<32x3200xf32> to vector<32x3200xbf16>
    %c0_1353 = arith.constant 0 : index
    %c0_1354 = arith.constant 0 : index
    %769 = vector.load %arg4[%c0_1353, %c0_1354] : memref<3200x128xbf16, #tpu.memory_space<vmem>>, vector<3200x128xbf16>
    %cst_1355 = arith.constant dense<0.000000e+00> : vector<32x128xf32>
    %770 = tpu.matmul %768, %769, %cst_1355 {dimension_numbers = #tpu.dot_dimension_numbers<[1], [0], [0], [1], [0, 0, 1, 1], [], []>} : vector<32x3200xbf16>, vector<3200x128xbf16>, vector<32x128xf32> -> vector<32x128xf32>
    %c0_1356 = arith.constant 0 : index
    %c0_1357 = arith.constant 0 : index
    %771 = vector.load %arg5[%c0_1356, %c0_1357] : memref<1x128xf32, #tpu.memory_space<vmem>>, vector<1x128xf32>
    %c0_1358 = arith.constant 0 : index
    %c0_1359 = arith.constant 0 : index
    %772 = vector.load %arg6[%c0_1358, %c0_1359] : memref<1x128xf32, #tpu.memory_space<vmem>>, vector<1x128xf32>
    %cst_1360 = arith.constant dense<0.000000e+00> : vector<128xf32>
    %773 = vector.multi_reduction <add>, %770, %cst_1360 [0] : vector<32x128xf32> to vector<128xf32>
    %774 = vector.shape_cast %773 : vector<128xf32> to vector<1x128xf32>
    %cst_1361 = arith.constant 3.200000e+01 : f32
    %775 = vector.broadcast %cst_1361 : f32 to vector<1x128xf32>
    %776 = arith.divf %774, %775 : vector<1x128xf32>
    %777 = vector.broadcast %776 : vector<1x128xf32> to vector<32x128xf32>
    %778 = arith.subf %770, %777 : vector<32x128xf32>
    %779 = arith.mulf %778, %778 : vector<32x128xf32>
    %cst_1362 = arith.constant dense<0.000000e+00> : vector<128xf32>
    %780 = vector.multi_reduction <add>, %779, %cst_1362 [0] : vector<32x128xf32> to vector<128xf32>
    %781 = vector.shape_cast %780 : vector<128xf32> to vector<1x128xf32>
    %cst_1363 = arith.constant 3.200000e+01 : f32
    %782 = vector.broadcast %cst_1363 : f32 to vector<1x128xf32>
    %783 = arith.divf %781, %782 : vector<1x128xf32>
    %784 = vector.broadcast %776 : vector<1x128xf32> to vector<32x128xf32>
    %785 = arith.subf %770, %784 : vector<32x128xf32>
    %cst_1364 = arith.constant 9.99999974E-6 : f32
    %786 = vector.broadcast %cst_1364 : f32 to vector<1x128xf32>
    %787 = arith.addf %783, %786 : vector<1x128xf32>
    %788 = math.rsqrt %787 : vector<1x128xf32>
    %789 = vector.broadcast %788 : vector<1x128xf32> to vector<32x128xf32>
    %790 = arith.mulf %785, %789 : vector<32x128xf32>
    %791 = vector.broadcast %771 : vector<1x128xf32> to vector<32x128xf32>
    %792 = arith.mulf %790, %791 : vector<32x128xf32>
    %793 = vector.broadcast %772 : vector<1x128xf32> to vector<32x128xf32>
    %794 = arith.addf %792, %793 : vector<32x128xf32>
    %cst_1365 = arith.constant 0.000000e+00 : f32
    %795 = vector.broadcast %cst_1365 : f32 to vector<32x128xf32>
    %796 = arith.maximumf %794, %795 : vector<32x128xf32>
    %c0_1366 = arith.constant 0 : index
    %c0_1367 = arith.constant 0 : index
    %797 = vector.load %arg19[%c0_1366, %c0_1367] : memref<32x128xf32, #tpu.memory_space<vmem>>, vector<32x128xf32>
    tpu.vector_store %arg19[%c0_1366, %c0_1367], %796 {strides = array<i32>} : memref<32x128xf32, #tpu.memory_space<vmem>>, vector<32x128xf32>,
    %cst_1368 = arith.constant 0.000000e+00 : f32
    %798 = vector.broadcast %cst_1368 : f32 to vector<2x4x4x128xf32>
    %c0_1369 = arith.constant 0 : index
    %c0_1370 = arith.constant 0 : index
    %c0_1371 = arith.constant 0 : index
    %c0_1372 = arith.constant 0 : index
    %799 = vector.load %arg20[%c0_1369, %c0_1370, %c0_1371, %c0_1372] : memref<2x4x4x128xf32, #tpu.memory_space<vmem>>, vector<2x4x4x128xf32>
    tpu.vector_store %arg20[%c0_1369, %c0_1370, %c0_1371, %c0_1372], %798 {strides = array<i32>} : memref<2x4x4x128xf32, #tpu.memory_space<vmem>>, vector<2x4x4x128xf32>,
    %c0_1373 = arith.constant 0 : index
    %c0_1374 = arith.constant 0 : index
    %800 = vector.load %arg19[%c0_1373, %c0_1374] : memref<32x128xf32, #tpu.memory_space<vmem>>, vector<1x128xf32>
    %c1_1375 = arith.constant 1 : index
    %c0_1376 = arith.constant 0 : index
    %801 = vector.load %arg19[%c1_1375, %c0_1376] : memref<32x128xf32, #tpu.memory_space<vmem>>, vector<1x128xf32>
    %802 = arith.maximumf %800, %801 : vector<1x128xf32>
    %c4_1377 = arith.constant 4 : index
    %c0_1378 = arith.constant 0 : index
    %803 = vector.load %arg19[%c4_1377, %c0_1378] : memref<32x128xf32, #tpu.memory_space<vmem>>, vector<1x128xf32>
    %c5_1379 = arith.constant 5 : index
    %c0_1380 = arith.constant 0 : index
    %804 = vector.load %arg19[%c5_1379, %c0_1380] : memref<32x128xf32, #tpu.memory_space<vmem>>, vector<1x128xf32>
    %805 = arith.maximumf %803, %804 : vector<1x128xf32>
    %806 = arith.maximumf %802, %805 : vector<1x128xf32>
    %c0_1381 = arith.constant 0 : index
    %c1_1382 = arith.constant 1 : index
    %c1_1383 = arith.constant 1 : index
    %c0_1384 = arith.constant 0 : index
    %807 = vector.load %arg20[%c0_1381, %c1_1382, %c1_1383, %c0_1384] : memref<2x4x4x128xf32, #tpu.memory_space<vmem>>, vector<1x1x1x128xf32>
    %808 = vector.shape_cast %807 : vector<1x1x1x128xf32> to vector<1x128xf32>
    %809 = vector.shape_cast %806 : vector<1x128xf32> to vector<1x1x1x128xf32>
    tpu.vector_store %arg20[%c0_1381, %c1_1382, %c1_1383, %c0_1384], %809 {strides = array<i32>} : memref<2x4x4x128xf32, #tpu.memory_space<vmem>>, vector<1x1x1x128xf32>,
    %c2_1385 = arith.constant 2 : index
    %c0_1386 = arith.constant 0 : index
    %810 = vector.load %arg19[%c2_1385, %c0_1386] : memref<32x128xf32, #tpu.memory_space<vmem>>, vector<1x128xf32>
    %c3_1387 = arith.constant 3 : index
    %c0_1388 = arith.constant 0 : index
    %811 = vector.load %arg19[%c3_1387, %c0_1388] : memref<32x128xf32, #tpu.memory_space<vmem>>, vector<1x128xf32>
    %812 = arith.maximumf %810, %811 : vector<1x128xf32>
    %c6_1389 = arith.constant 6 : index
    %c0_1390 = arith.constant 0 : index
    %813 = vector.load %arg19[%c6_1389, %c0_1390] : memref<32x128xf32, #tpu.memory_space<vmem>>, vector<1x128xf32>
    %c7_1391 = arith.constant 7 : index
    %c0_1392 = arith.constant 0 : index
    %814 = vector.load %arg19[%c7_1391, %c0_1392] : memref<32x128xf32, #tpu.memory_space<vmem>>, vector<1x128xf32>
    %815 = arith.maximumf %813, %814 : vector<1x128xf32>
    %816 = arith.maximumf %812, %815 : vector<1x128xf32>
    %c0_1393 = arith.constant 0 : index
    %c1_1394 = arith.constant 1 : index
    %c2_1395 = arith.constant 2 : index
    %c0_1396 = arith.constant 0 : index
    %817 = vector.load %arg20[%c0_1393, %c1_1394, %c2_1395, %c0_1396] : memref<2x4x4x128xf32, #tpu.memory_space<vmem>>, vector<1x1x1x128xf32>
    %818 = vector.shape_cast %817 : vector<1x1x1x128xf32> to vector<1x128xf32>
    %819 = vector.shape_cast %816 : vector<1x128xf32> to vector<1x1x1x128xf32>
    tpu.vector_store %arg20[%c0_1393, %c1_1394, %c2_1395, %c0_1396], %819 {strides = array<i32>} : memref<2x4x4x128xf32, #tpu.memory_space<vmem>>, vector<1x1x1x128xf32>,
    %c8_1397 = arith.constant 8 : index
    %c0_1398 = arith.constant 0 : index
    %820 = vector.load %arg19[%c8_1397, %c0_1398] : memref<32x128xf32, #tpu.memory_space<vmem>>, vector<1x128xf32>
    %c9 = arith.constant 9 : index
    %c0_1399 = arith.constant 0 : index
    %821 = vector.load %arg19[%c9, %c0_1399] : memref<32x128xf32, #tpu.memory_space<vmem>>, vector<1x128xf32>
    %822 = arith.maximumf %820, %821 : vector<1x128xf32>
    %c12_1400 = arith.constant 12 : index
    %c0_1401 = arith.constant 0 : index
    %823 = vector.load %arg19[%c12_1400, %c0_1401] : memref<32x128xf32, #tpu.memory_space<vmem>>, vector<1x128xf32>
    %c13 = arith.constant 13 : index
    %c0_1402 = arith.constant 0 : index
    %824 = vector.load %arg19[%c13, %c0_1402] : memref<32x128xf32, #tpu.memory_space<vmem>>, vector<1x128xf32>
    %825 = arith.maximumf %823, %824 : vector<1x128xf32>
    %826 = arith.maximumf %822, %825 : vector<1x128xf32>
    %c0_1403 = arith.constant 0 : index
    %c2_1404 = arith.constant 2 : index
    %c1_1405 = arith.constant 1 : index
    %c0_1406 = arith.constant 0 : index
    %827 = vector.load %arg20[%c0_1403, %c2_1404, %c1_1405, %c0_1406] : memref<2x4x4x128xf32, #tpu.memory_space<vmem>>, vector<1x1x1x128xf32>
    %828 = vector.shape_cast %827 : vector<1x1x1x128xf32> to vector<1x128xf32>
    %829 = vector.shape_cast %826 : vector<1x128xf32> to vector<1x1x1x128xf32>
    tpu.vector_store %arg20[%c0_1403, %c2_1404, %c1_1405, %c0_1406], %829 {strides = array<i32>} : memref<2x4x4x128xf32, #tpu.memory_space<vmem>>, vector<1x1x1x128xf32>,
    %c10 = arith.constant 10 : index
    %c0_1407 = arith.constant 0 : index
    %830 = vector.load %arg19[%c10, %c0_1407] : memref<32x128xf32, #tpu.memory_space<vmem>>, vector<1x128xf32>
    %c11 = arith.constant 11 : index
    %c0_1408 = arith.constant 0 : index
    %831 = vector.load %arg19[%c11, %c0_1408] : memref<32x128xf32, #tpu.memory_space<vmem>>, vector<1x128xf32>
    %832 = arith.maximumf %830, %831 : vector<1x128xf32>
    %c14 = arith.constant 14 : index
    %c0_1409 = arith.constant 0 : index
    %833 = vector.load %arg19[%c14, %c0_1409] : memref<32x128xf32, #tpu.memory_space<vmem>>, vector<1x128xf32>
    %c15 = arith.constant 15 : index
    %c0_1410 = arith.constant 0 : index
    %834 = vector.load %arg19[%c15, %c0_1410] : memref<32x128xf32, #tpu.memory_space<vmem>>, vector<1x128xf32>
    %835 = arith.maximumf %833, %834 : vector<1x128xf32>
    %836 = arith.maximumf %832, %835 : vector<1x128xf32>
    %c0_1411 = arith.constant 0 : index
    %c2_1412 = arith.constant 2 : index
    %c2_1413 = arith.constant 2 : index
    %c0_1414 = arith.constant 0 : index
    %837 = vector.load %arg20[%c0_1411, %c2_1412, %c2_1413, %c0_1414] : memref<2x4x4x128xf32, #tpu.memory_space<vmem>>, vector<1x1x1x128xf32>
    %838 = vector.shape_cast %837 : vector<1x1x1x128xf32> to vector<1x128xf32>
    %839 = vector.shape_cast %836 : vector<1x128xf32> to vector<1x1x1x128xf32>
    tpu.vector_store %arg20[%c0_1411, %c2_1412, %c2_1413, %c0_1414], %839 {strides = array<i32>} : memref<2x4x4x128xf32, #tpu.memory_space<vmem>>, vector<1x1x1x128xf32>,
    %c16_1415 = arith.constant 16 : index
    %c0_1416 = arith.constant 0 : index
    %840 = vector.load %arg19[%c16_1415, %c0_1416] : memref<32x128xf32, #tpu.memory_space<vmem>>, vector<1x128xf32>
    %c17 = arith.constant 17 : index
    %c0_1417 = arith.constant 0 : index
    %841 = vector.load %arg19[%c17, %c0_1417] : memref<32x128xf32, #tpu.memory_space<vmem>>, vector<1x128xf32>
    %842 = arith.maximumf %840, %841 : vector<1x128xf32>
    %c20_1418 = arith.constant 20 : index
    %c0_1419 = arith.constant 0 : index
    %843 = vector.load %arg19[%c20_1418, %c0_1419] : memref<32x128xf32, #tpu.memory_space<vmem>>, vector<1x128xf32>
    %c21 = arith.constant 21 : index
    %c0_1420 = arith.constant 0 : index
    %844 = vector.load %arg19[%c21, %c0_1420] : memref<32x128xf32, #tpu.memory_space<vmem>>, vector<1x128xf32>
    %845 = arith.maximumf %843, %844 : vector<1x128xf32>
    %846 = arith.maximumf %842, %845 : vector<1x128xf32>
    %c1_1421 = arith.constant 1 : index
    %c1_1422 = arith.constant 1 : index
    %c1_1423 = arith.constant 1 : index
    %c0_1424 = arith.constant 0 : index
    %847 = vector.load %arg20[%c1_1421, %c1_1422, %c1_1423, %c0_1424] : memref<2x4x4x128xf32, #tpu.memory_space<vmem>>, vector<1x1x1x128xf32>
    %848 = vector.shape_cast %847 : vector<1x1x1x128xf32> to vector<1x128xf32>
    %849 = vector.shape_cast %846 : vector<1x128xf32> to vector<1x1x1x128xf32>
    tpu.vector_store %arg20[%c1_1421, %c1_1422, %c1_1423, %c0_1424], %849 {strides = array<i32>} : memref<2x4x4x128xf32, #tpu.memory_space<vmem>>, vector<1x1x1x128xf32>,
    %c18 = arith.constant 18 : index
    %c0_1425 = arith.constant 0 : index
    %850 = vector.load %arg19[%c18, %c0_1425] : memref<32x128xf32, #tpu.memory_space<vmem>>, vector<1x128xf32>
    %c19 = arith.constant 19 : index
    %c0_1426 = arith.constant 0 : index
    %851 = vector.load %arg19[%c19, %c0_1426] : memref<32x128xf32, #tpu.memory_space<vmem>>, vector<1x128xf32>
    %852 = arith.maximumf %850, %851 : vector<1x128xf32>
    %c22 = arith.constant 22 : index
    %c0_1427 = arith.constant 0 : index
    %853 = vector.load %arg19[%c22, %c0_1427] : memref<32x128xf32, #tpu.memory_space<vmem>>, vector<1x128xf32>
    %c23 = arith.constant 23 : index
    %c0_1428 = arith.constant 0 : index
    %854 = vector.load %arg19[%c23, %c0_1428] : memref<32x128xf32, #tpu.memory_space<vmem>>, vector<1x128xf32>
    %855 = arith.maximumf %853, %854 : vector<1x128xf32>
    %856 = arith.maximumf %852, %855 : vector<1x128xf32>
    %c1_1429 = arith.constant 1 : index
    %c1_1430 = arith.constant 1 : index
    %c2_1431 = arith.constant 2 : index
    %c0_1432 = arith.constant 0 : index
    %857 = vector.load %arg20[%c1_1429, %c1_1430, %c2_1431, %c0_1432] : memref<2x4x4x128xf32, #tpu.memory_space<vmem>>, vector<1x1x1x128xf32>
    %858 = vector.shape_cast %857 : vector<1x1x1x128xf32> to vector<1x128xf32>
    %859 = vector.shape_cast %856 : vector<1x128xf32> to vector<1x1x1x128xf32>
    tpu.vector_store %arg20[%c1_1429, %c1_1430, %c2_1431, %c0_1432], %859 {strides = array<i32>} : memref<2x4x4x128xf32, #tpu.memory_space<vmem>>, vector<1x1x1x128xf32>,
    %c24_1433 = arith.constant 24 : index
    %c0_1434 = arith.constant 0 : index
    %860 = vector.load %arg19[%c24_1433, %c0_1434] : memref<32x128xf32, #tpu.memory_space<vmem>>, vector<1x128xf32>
    %c25 = arith.constant 25 : index
    %c0_1435 = arith.constant 0 : index
    %861 = vector.load %arg19[%c25, %c0_1435] : memref<32x128xf32, #tpu.memory_space<vmem>>, vector<1x128xf32>
    %862 = arith.maximumf %860, %861 : vector<1x128xf32>
    %c28_1436 = arith.constant 28 : index
    %c0_1437 = arith.constant 0 : index
    %863 = vector.load %arg19[%c28_1436, %c0_1437] : memref<32x128xf32, #tpu.memory_space<vmem>>, vector<1x128xf32>
    %c29 = arith.constant 29 : index
    %c0_1438 = arith.constant 0 : index
    %864 = vector.load %arg19[%c29, %c0_1438] : memref<32x128xf32, #tpu.memory_space<vmem>>, vector<1x128xf32>
    %865 = arith.maximumf %863, %864 : vector<1x128xf32>
    %866 = arith.maximumf %862, %865 : vector<1x128xf32>
    %c1_1439 = arith.constant 1 : index
    %c2_1440 = arith.constant 2 : index
    %c1_1441 = arith.constant 1 : index
    %c0_1442 = arith.constant 0 : index
    %867 = vector.load %arg20[%c1_1439, %c2_1440, %c1_1441, %c0_1442] : memref<2x4x4x128xf32, #tpu.memory_space<vmem>>, vector<1x1x1x128xf32>
    %868 = vector.shape_cast %867 : vector<1x1x1x128xf32> to vector<1x128xf32>
    %869 = vector.shape_cast %866 : vector<1x128xf32> to vector<1x1x1x128xf32>
    tpu.vector_store %arg20[%c1_1439, %c2_1440, %c1_1441, %c0_1442], %869 {strides = array<i32>} : memref<2x4x4x128xf32, #tpu.memory_space<vmem>>, vector<1x1x1x128xf32>,
    %c26 = arith.constant 26 : index
    %c0_1443 = arith.constant 0 : index
    %870 = vector.load %arg19[%c26, %c0_1443] : memref<32x128xf32, #tpu.memory_space<vmem>>, vector<1x128xf32>
    %c27 = arith.constant 27 : index
    %c0_1444 = arith.constant 0 : index
    %871 = vector.load %arg19[%c27, %c0_1444] : memref<32x128xf32, #tpu.memory_space<vmem>>, vector<1x128xf32>
    %872 = arith.maximumf %870, %871 : vector<1x128xf32>
    %c30 = arith.constant 30 : index
    %c0_1445 = arith.constant 0 : index
    %873 = vector.load %arg19[%c30, %c0_1445] : memref<32x128xf32, #tpu.memory_space<vmem>>, vector<1x128xf32>
    %c31 = arith.constant 31 : index
    %c0_1446 = arith.constant 0 : index
    %874 = vector.load %arg19[%c31, %c0_1446] : memref<32x128xf32, #tpu.memory_space<vmem>>, vector<1x128xf32>
    %875 = arith.maximumf %873, %874 : vector<1x128xf32>
    %876 = arith.maximumf %872, %875 : vector<1x128xf32>
    %c1_1447 = arith.constant 1 : index
    %c2_1448 = arith.constant 2 : index
    %c2_1449 = arith.constant 2 : index
    %c0_1450 = arith.constant 0 : index
    %877 = vector.load %arg20[%c1_1447, %c2_1448, %c2_1449, %c0_1450] : memref<2x4x4x128xf32, #tpu.memory_space<vmem>>, vector<1x1x1x128xf32>
    %878 = vector.shape_cast %877 : vector<1x1x1x128xf32> to vector<1x128xf32>
    %879 = vector.shape_cast %876 : vector<1x128xf32> to vector<1x1x1x128xf32>
    tpu.vector_store %arg20[%c1_1447, %c2_1448, %c2_1449, %c0_1450], %879 {strides = array<i32>} : memref<2x4x4x128xf32, #tpu.memory_space<vmem>>, vector<1x1x1x128xf32>,
    %c0_1451 = arith.constant 0 : index
    %c0_1452 = arith.constant 0 : index
    %c0_1453 = arith.constant 0 : index
    %c0_1454 = arith.constant 0 : index
    %880 = vector.load %arg20[%c0_1451, %c0_1452, %c0_1453, %c0_1454] : memref<2x4x4x128xf32, #tpu.memory_space<vmem>>, vector<1x1x2x128xf32>
    %881 = vector.shape_cast %880 : vector<1x1x2x128xf32> to vector<2x128xf32>
    %c0_1455 = arith.constant 0 : index
    %c0_1456 = arith.constant 0 : index
    %882 = vector.load %arg21[%c0_1455, %c0_1456] : memref<8x1152xf32, #tpu.memory_space<vmem>>, vector<2x128xf32>
    tpu.vector_store %arg21[%c0_1455, %c0_1456], %881 {strides = array<i32>} : memref<8x1152xf32, #tpu.memory_space<vmem>>, vector<2x128xf32>,
    %c0_1457 = arith.constant 0 : index
    %c1_1458 = arith.constant 1 : index
    %c0_1459 = arith.constant 0 : index
    %c0_1460 = arith.constant 0 : index
    %883 = vector.load %arg20[%c0_1457, %c1_1458, %c0_1459, %c0_1460] : memref<2x4x4x128xf32, #tpu.memory_space<vmem>>, vector<1x1x2x128xf32>
    %884 = vector.shape_cast %883 : vector<1x1x2x128xf32> to vector<2x128xf32>
    %c2_1461 = arith.constant 2 : index
    %c0_1462 = arith.constant 0 : index
    %885 = vector.load %arg21[%c2_1461, %c0_1462] : memref<8x1152xf32, #tpu.memory_space<vmem>>, vector<2x128xf32>
    tpu.vector_store %arg21[%c2_1461, %c0_1462], %884 {strides = array<i32>} : memref<8x1152xf32, #tpu.memory_space<vmem>>, vector<2x128xf32>,
    %c1_1463 = arith.constant 1 : index
    %c0_1464 = arith.constant 0 : index
    %c0_1465 = arith.constant 0 : index
    %c0_1466 = arith.constant 0 : index
    %886 = vector.load %arg20[%c1_1463, %c0_1464, %c0_1465, %c0_1466] : memref<2x4x4x128xf32, #tpu.memory_space<vmem>>, vector<1x1x2x128xf32>
    %887 = vector.shape_cast %886 : vector<1x1x2x128xf32> to vector<2x128xf32>
    %c4_1467 = arith.constant 4 : index
    %c0_1468 = arith.constant 0 : index
    %888 = vector.load %arg21[%c4_1467, %c0_1468] : memref<8x1152xf32, #tpu.memory_space<vmem>>, vector<2x128xf32>
    tpu.vector_store %arg21[%c4_1467, %c0_1468], %887 {strides = array<i32>} : memref<8x1152xf32, #tpu.memory_space<vmem>>, vector<2x128xf32>,
    %c1_1469 = arith.constant 1 : index
    %c1_1470 = arith.constant 1 : index
    %c0_1471 = arith.constant 0 : index
    %c0_1472 = arith.constant 0 : index
    %889 = vector.load %arg20[%c1_1469, %c1_1470, %c0_1471, %c0_1472] : memref<2x4x4x128xf32, #tpu.memory_space<vmem>>, vector<1x1x2x128xf32>
    %890 = vector.shape_cast %889 : vector<1x1x2x128xf32> to vector<2x128xf32>
    %c6_1473 = arith.constant 6 : index
    %c0_1474 = arith.constant 0 : index
    %891 = vector.load %arg21[%c6_1473, %c0_1474] : memref<8x1152xf32, #tpu.memory_space<vmem>>, vector<2x128xf32>
    tpu.vector_store %arg21[%c6_1473, %c0_1474], %890 {strides = array<i32>} : memref<8x1152xf32, #tpu.memory_space<vmem>>, vector<2x128xf32>,
    %c0_1475 = arith.constant 0 : index
    %c0_1476 = arith.constant 0 : index
    %c1_1477 = arith.constant 1 : index
    %c0_1478 = arith.constant 0 : index
    %892 = vector.load %arg20[%c0_1475, %c0_1476, %c1_1477, %c0_1478] : memref<2x4x4x128xf32, #tpu.memory_space<vmem>>, vector<1x1x2x128xf32>
    %893 = vector.shape_cast %892 : vector<1x1x2x128xf32> to vector<2x128xf32>
    %c0_1479 = arith.constant 0 : index
    %c128_1480 = arith.constant 128 : index
    %894 = vector.load %arg21[%c0_1479, %c128_1480] : memref<8x1152xf32, #tpu.memory_space<vmem>>, vector<2x128xf32>
    tpu.vector_store %arg21[%c0_1479, %c128_1480], %893 {strides = array<i32>} : memref<8x1152xf32, #tpu.memory_space<vmem>>, vector<2x128xf32>,
    %c0_1481 = arith.constant 0 : index
    %c1_1482 = arith.constant 1 : index
    %c1_1483 = arith.constant 1 : index
    %c0_1484 = arith.constant 0 : index
    %895 = vector.load %arg20[%c0_1481, %c1_1482, %c1_1483, %c0_1484] : memref<2x4x4x128xf32, #tpu.memory_space<vmem>>, vector<1x1x2x128xf32>
    %896 = vector.shape_cast %895 : vector<1x1x2x128xf32> to vector<2x128xf32>
    %c2_1485 = arith.constant 2 : index
    %c128_1486 = arith.constant 128 : index
    %897 = vector.load %arg21[%c2_1485, %c128_1486] : memref<8x1152xf32, #tpu.memory_space<vmem>>, vector<2x128xf32>
    tpu.vector_store %arg21[%c2_1485, %c128_1486], %896 {strides = array<i32>} : memref<8x1152xf32, #tpu.memory_space<vmem>>, vector<2x128xf32>,
    %c1_1487 = arith.constant 1 : index
    %c0_1488 = arith.constant 0 : index
    %c1_1489 = arith.constant 1 : index
    %c0_1490 = arith.constant 0 : index
    %898 = vector.load %arg20[%c1_1487, %c0_1488, %c1_1489, %c0_1490] : memref<2x4x4x128xf32, #tpu.memory_space<vmem>>, vector<1x1x2x128xf32>
    %899 = vector.shape_cast %898 : vector<1x1x2x128xf32> to vector<2x128xf32>
    %c4_1491 = arith.constant 4 : index
    %c128_1492 = arith.constant 128 : index
    %900 = vector.load %arg21[%c4_1491, %c128_1492] : memref<8x1152xf32, #tpu.memory_space<vmem>>, vector<2x128xf32>
    tpu.vector_store %arg21[%c4_1491, %c128_1492], %899 {strides = array<i32>} : memref<8x1152xf32, #tpu.memory_space<vmem>>, vector<2x128xf32>,
    %c1_1493 = arith.constant 1 : index
    %c1_1494 = arith.constant 1 : index
    %c1_1495 = arith.constant 1 : index
    %c0_1496 = arith.constant 0 : index
    %901 = vector.load %arg20[%c1_1493, %c1_1494, %c1_1495, %c0_1496] : memref<2x4x4x128xf32, #tpu.memory_space<vmem>>, vector<1x1x2x128xf32>
    %902 = vector.shape_cast %901 : vector<1x1x2x128xf32> to vector<2x128xf32>
    %c6_1497 = arith.constant 6 : index
    %c128_1498 = arith.constant 128 : index
    %903 = vector.load %arg21[%c6_1497, %c128_1498] : memref<8x1152xf32, #tpu.memory_space<vmem>>, vector<2x128xf32>
    tpu.vector_store %arg21[%c6_1497, %c128_1498], %902 {strides = array<i32>} : memref<8x1152xf32, #tpu.memory_space<vmem>>, vector<2x128xf32>,
    %c0_1499 = arith.constant 0 : index
    %c0_1500 = arith.constant 0 : index
    %c2_1501 = arith.constant 2 : index
    %c0_1502 = arith.constant 0 : index
    %904 = vector.load %arg20[%c0_1499, %c0_1500, %c2_1501, %c0_1502] : memref<2x4x4x128xf32, #tpu.memory_space<vmem>>, vector<1x1x2x128xf32>
    %905 = vector.shape_cast %904 : vector<1x1x2x128xf32> to vector<2x128xf32>
    %c0_1503 = arith.constant 0 : index
    %c256_1504 = arith.constant 256 : index
    %906 = vector.load %arg21[%c0_1503, %c256_1504] : memref<8x1152xf32, #tpu.memory_space<vmem>>, vector<2x128xf32>
    tpu.vector_store %arg21[%c0_1503, %c256_1504], %905 {strides = array<i32>} : memref<8x1152xf32, #tpu.memory_space<vmem>>, vector<2x128xf32>,
    %c0_1505 = arith.constant 0 : index
    %c1_1506 = arith.constant 1 : index
    %c2_1507 = arith.constant 2 : index
    %c0_1508 = arith.constant 0 : index
    %907 = vector.load %arg20[%c0_1505, %c1_1506, %c2_1507, %c0_1508] : memref<2x4x4x128xf32, #tpu.memory_space<vmem>>, vector<1x1x2x128xf32>
    %908 = vector.shape_cast %907 : vector<1x1x2x128xf32> to vector<2x128xf32>
    %c2_1509 = arith.constant 2 : index
    %c256_1510 = arith.constant 256 : index
    %909 = vector.load %arg21[%c2_1509, %c256_1510] : memref<8x1152xf32, #tpu.memory_space<vmem>>, vector<2x128xf32>
    tpu.vector_store %arg21[%c2_1509, %c256_1510], %908 {strides = array<i32>} : memref<8x1152xf32, #tpu.memory_space<vmem>>, vector<2x128xf32>,
    %c1_1511 = arith.constant 1 : index
    %c0_1512 = arith.constant 0 : index
    %c2_1513 = arith.constant 2 : index
    %c0_1514 = arith.constant 0 : index
    %910 = vector.load %arg20[%c1_1511, %c0_1512, %c2_1513, %c0_1514] : memref<2x4x4x128xf32, #tpu.memory_space<vmem>>, vector<1x1x2x128xf32>
    %911 = vector.shape_cast %910 : vector<1x1x2x128xf32> to vector<2x128xf32>
    %c4_1515 = arith.constant 4 : index
    %c256_1516 = arith.constant 256 : index
    %912 = vector.load %arg21[%c4_1515, %c256_1516] : memref<8x1152xf32, #tpu.memory_space<vmem>>, vector<2x128xf32>
    tpu.vector_store %arg21[%c4_1515, %c256_1516], %911 {strides = array<i32>} : memref<8x1152xf32, #tpu.memory_space<vmem>>, vector<2x128xf32>,
    %c1_1517 = arith.constant 1 : index
    %c1_1518 = arith.constant 1 : index
    %c2_1519 = arith.constant 2 : index
    %c0_1520 = arith.constant 0 : index
    %913 = vector.load %arg20[%c1_1517, %c1_1518, %c2_1519, %c0_1520] : memref<2x4x4x128xf32, #tpu.memory_space<vmem>>, vector<1x1x2x128xf32>
    %914 = vector.shape_cast %913 : vector<1x1x2x128xf32> to vector<2x128xf32>
    %c6_1521 = arith.constant 6 : index
    %c256_1522 = arith.constant 256 : index
    %915 = vector.load %arg21[%c6_1521, %c256_1522] : memref<8x1152xf32, #tpu.memory_space<vmem>>, vector<2x128xf32>
    tpu.vector_store %arg21[%c6_1521, %c256_1522], %914 {strides = array<i32>} : memref<8x1152xf32, #tpu.memory_space<vmem>>, vector<2x128xf32>,
    %c0_1523 = arith.constant 0 : index
    %c1_1524 = arith.constant 1 : index
    %c0_1525 = arith.constant 0 : index
    %c0_1526 = arith.constant 0 : index
    %916 = vector.load %arg20[%c0_1523, %c1_1524, %c0_1525, %c0_1526] : memref<2x4x4x128xf32, #tpu.memory_space<vmem>>, vector<1x1x2x128xf32>
    %917 = vector.shape_cast %916 : vector<1x1x2x128xf32> to vector<2x128xf32>
    %c0_1527 = arith.constant 0 : index
    %c384_1528 = arith.constant 384 : index
    %918 = vector.load %arg21[%c0_1527, %c384_1528] : memref<8x1152xf32, #tpu.memory_space<vmem>>, vector<2x128xf32>
    tpu.vector_store %arg21[%c0_1527, %c384_1528], %917 {strides = array<i32>} : memref<8x1152xf32, #tpu.memory_space<vmem>>, vector<2x128xf32>,
    %c0_1529 = arith.constant 0 : index
    %c2_1530 = arith.constant 2 : index
    %c0_1531 = arith.constant 0 : index
    %c0_1532 = arith.constant 0 : index
    %919 = vector.load %arg20[%c0_1529, %c2_1530, %c0_1531, %c0_1532] : memref<2x4x4x128xf32, #tpu.memory_space<vmem>>, vector<1x1x2x128xf32>
    %920 = vector.shape_cast %919 : vector<1x1x2x128xf32> to vector<2x128xf32>
    %c2_1533 = arith.constant 2 : index
    %c384_1534 = arith.constant 384 : index
    %921 = vector.load %arg21[%c2_1533, %c384_1534] : memref<8x1152xf32, #tpu.memory_space<vmem>>, vector<2x128xf32>
    tpu.vector_store %arg21[%c2_1533, %c384_1534], %920 {strides = array<i32>} : memref<8x1152xf32, #tpu.memory_space<vmem>>, vector<2x128xf32>,
    %c1_1535 = arith.constant 1 : index
    %c1_1536 = arith.constant 1 : index
    %c0_1537 = arith.constant 0 : index
    %c0_1538 = arith.constant 0 : index
    %922 = vector.load %arg20[%c1_1535, %c1_1536, %c0_1537, %c0_1538] : memref<2x4x4x128xf32, #tpu.memory_space<vmem>>, vector<1x1x2x128xf32>
    %923 = vector.shape_cast %922 : vector<1x1x2x128xf32> to vector<2x128xf32>
    %c4_1539 = arith.constant 4 : index
    %c384_1540 = arith.constant 384 : index
    %924 = vector.load %arg21[%c4_1539, %c384_1540] : memref<8x1152xf32, #tpu.memory_space<vmem>>, vector<2x128xf32>
    tpu.vector_store %arg21[%c4_1539, %c384_1540], %923 {strides = array<i32>} : memref<8x1152xf32, #tpu.memory_space<vmem>>, vector<2x128xf32>,
    %c1_1541 = arith.constant 1 : index
    %c2_1542 = arith.constant 2 : index
    %c0_1543 = arith.constant 0 : index
    %c0_1544 = arith.constant 0 : index
    %925 = vector.load %arg20[%c1_1541, %c2_1542, %c0_1543, %c0_1544] : memref<2x4x4x128xf32, #tpu.memory_space<vmem>>, vector<1x1x2x128xf32>
    %926 = vector.shape_cast %925 : vector<1x1x2x128xf32> to vector<2x128xf32>
    %c6_1545 = arith.constant 6 : index
    %c384_1546 = arith.constant 384 : index
    %927 = vector.load %arg21[%c6_1545, %c384_1546] : memref<8x1152xf32, #tpu.memory_space<vmem>>, vector<2x128xf32>
    tpu.vector_store %arg21[%c6_1545, %c384_1546], %926 {strides = array<i32>} : memref<8x1152xf32, #tpu.memory_space<vmem>>, vector<2x128xf32>,
    %c0_1547 = arith.constant 0 : index
    %c1_1548 = arith.constant 1 : index
    %c1_1549 = arith.constant 1 : index
    %c0_1550 = arith.constant 0 : index
    %928 = vector.load %arg20[%c0_1547, %c1_1548, %c1_1549, %c0_1550] : memref<2x4x4x128xf32, #tpu.memory_space<vmem>>, vector<1x1x2x128xf32>
    %929 = vector.shape_cast %928 : vector<1x1x2x128xf32> to vector<2x128xf32>
    %c0_1551 = arith.constant 0 : index
    %c512_1552 = arith.constant 512 : index
    %930 = vector.load %arg21[%c0_1551, %c512_1552] : memref<8x1152xf32, #tpu.memory_space<vmem>>, vector<2x128xf32>
    tpu.vector_store %arg21[%c0_1551, %c512_1552], %929 {strides = array<i32>} : memref<8x1152xf32, #tpu.memory_space<vmem>>, vector<2x128xf32>,
    %c0_1553 = arith.constant 0 : index
    %c2_1554 = arith.constant 2 : index
    %c1_1555 = arith.constant 1 : index
    %c0_1556 = arith.constant 0 : index
    %931 = vector.load %arg20[%c0_1553, %c2_1554, %c1_1555, %c0_1556] : memref<2x4x4x128xf32, #tpu.memory_space<vmem>>, vector<1x1x2x128xf32>
    %932 = vector.shape_cast %931 : vector<1x1x2x128xf32> to vector<2x128xf32>
    %c2_1557 = arith.constant 2 : index
    %c512_1558 = arith.constant 512 : index
    %933 = vector.load %arg21[%c2_1557, %c512_1558] : memref<8x1152xf32, #tpu.memory_space<vmem>>, vector<2x128xf32>
    tpu.vector_store %arg21[%c2_1557, %c512_1558], %932 {strides = array<i32>} : memref<8x1152xf32, #tpu.memory_space<vmem>>, vector<2x128xf32>,
    %c1_1559 = arith.constant 1 : index
    %c1_1560 = arith.constant 1 : index
    %c1_1561 = arith.constant 1 : index
    %c0_1562 = arith.constant 0 : index
    %934 = vector.load %arg20[%c1_1559, %c1_1560, %c1_1561, %c0_1562] : memref<2x4x4x128xf32, #tpu.memory_space<vmem>>, vector<1x1x2x128xf32>
    %935 = vector.shape_cast %934 : vector<1x1x2x128xf32> to vector<2x128xf32>
    %c4_1563 = arith.constant 4 : index
    %c512_1564 = arith.constant 512 : index
    %936 = vector.load %arg21[%c4_1563, %c512_1564] : memref<8x1152xf32, #tpu.memory_space<vmem>>, vector<2x128xf32>
    tpu.vector_store %arg21[%c4_1563, %c512_1564], %935 {strides = array<i32>} : memref<8x1152xf32, #tpu.memory_space<vmem>>, vector<2x128xf32>,
    %c1_1565 = arith.constant 1 : index
    %c2_1566 = arith.constant 2 : index
    %c1_1567 = arith.constant 1 : index
    %c0_1568 = arith.constant 0 : index
    %937 = vector.load %arg20[%c1_1565, %c2_1566, %c1_1567, %c0_1568] : memref<2x4x4x128xf32, #tpu.memory_space<vmem>>, vector<1x1x2x128xf32>
    %938 = vector.shape_cast %937 : vector<1x1x2x128xf32> to vector<2x128xf32>
    %c6_1569 = arith.constant 6 : index
    %c512_1570 = arith.constant 512 : index
    %939 = vector.load %arg21[%c6_1569, %c512_1570] : memref<8x1152xf32, #tpu.memory_space<vmem>>, vector<2x128xf32>
    tpu.vector_store %arg21[%c6_1569, %c512_1570], %938 {strides = array<i32>} : memref<8x1152xf32, #tpu.memory_space<vmem>>, vector<2x128xf32>,
    %c0_1571 = arith.constant 0 : index
    %c1_1572 = arith.constant 1 : index
    %c2_1573 = arith.constant 2 : index
    %c0_1574 = arith.constant 0 : index
    %940 = vector.load %arg20[%c0_1571, %c1_1572, %c2_1573, %c0_1574] : memref<2x4x4x128xf32, #tpu.memory_space<vmem>>, vector<1x1x2x128xf32>
    %941 = vector.shape_cast %940 : vector<1x1x2x128xf32> to vector<2x128xf32>
    %c0_1575 = arith.constant 0 : index
    %c640_1576 = arith.constant 640 : index
    %942 = vector.load %arg21[%c0_1575, %c640_1576] : memref<8x1152xf32, #tpu.memory_space<vmem>>, vector<2x128xf32>
    tpu.vector_store %arg21[%c0_1575, %c640_1576], %941 {strides = array<i32>} : memref<8x1152xf32, #tpu.memory_space<vmem>>, vector<2x128xf32>,
    %c0_1577 = arith.constant 0 : index
    %c2_1578 = arith.constant 2 : index
    %c2_1579 = arith.constant 2 : index
    %c0_1580 = arith.constant 0 : index
    %943 = vector.load %arg20[%c0_1577, %c2_1578, %c2_1579, %c0_1580] : memref<2x4x4x128xf32, #tpu.memory_space<vmem>>, vector<1x1x2x128xf32>
    %944 = vector.shape_cast %943 : vector<1x1x2x128xf32> to vector<2x128xf32>
    %c2_1581 = arith.constant 2 : index
    %c640_1582 = arith.constant 640 : index
    %945 = vector.load %arg21[%c2_1581, %c640_1582] : memref<8x1152xf32, #tpu.memory_space<vmem>>, vector<2x128xf32>
    tpu.vector_store %arg21[%c2_1581, %c640_1582], %944 {strides = array<i32>} : memref<8x1152xf32, #tpu.memory_space<vmem>>, vector<2x128xf32>,
    %c1_1583 = arith.constant 1 : index
    %c1_1584 = arith.constant 1 : index
    %c2_1585 = arith.constant 2 : index
    %c0_1586 = arith.constant 0 : index
    %946 = vector.load %arg20[%c1_1583, %c1_1584, %c2_1585, %c0_1586] : memref<2x4x4x128xf32, #tpu.memory_space<vmem>>, vector<1x1x2x128xf32>
    %947 = vector.shape_cast %946 : vector<1x1x2x128xf32> to vector<2x128xf32>
    %c4_1587 = arith.constant 4 : index
    %c640_1588 = arith.constant 640 : index
    %948 = vector.load %arg21[%c4_1587, %c640_1588] : memref<8x1152xf32, #tpu.memory_space<vmem>>, vector<2x128xf32>
    tpu.vector_store %arg21[%c4_1587, %c640_1588], %947 {strides = array<i32>} : memref<8x1152xf32, #tpu.memory_space<vmem>>, vector<2x128xf32>,
    %c1_1589 = arith.constant 1 : index
    %c2_1590 = arith.constant 2 : index
    %c2_1591 = arith.constant 2 : index
    %c0_1592 = arith.constant 0 : index
    %949 = vector.load %arg20[%c1_1589, %c2_1590, %c2_1591, %c0_1592] : memref<2x4x4x128xf32, #tpu.memory_space<vmem>>, vector<1x1x2x128xf32>
    %950 = vector.shape_cast %949 : vector<1x1x2x128xf32> to vector<2x128xf32>
    %c6_1593 = arith.constant 6 : index
    %c640_1594 = arith.constant 640 : index
    %951 = vector.load %arg21[%c6_1593, %c640_1594] : memref<8x1152xf32, #tpu.memory_space<vmem>>, vector<2x128xf32>
    tpu.vector_store %arg21[%c6_1593, %c640_1594], %950 {strides = array<i32>} : memref<8x1152xf32, #tpu.memory_space<vmem>>, vector<2x128xf32>,
    %c0_1595 = arith.constant 0 : index
    %c2_1596 = arith.constant 2 : index
    %c0_1597 = arith.constant 0 : index
    %c0_1598 = arith.constant 0 : index
    %952 = vector.load %arg20[%c0_1595, %c2_1596, %c0_1597, %c0_1598] : memref<2x4x4x128xf32, #tpu.memory_space<vmem>>, vector<1x1x2x128xf32>
    %953 = vector.shape_cast %952 : vector<1x1x2x128xf32> to vector<2x128xf32>
    %c0_1599 = arith.constant 0 : index
    %c768_1600 = arith.constant 768 : index
    %954 = vector.load %arg21[%c0_1599, %c768_1600] : memref<8x1152xf32, #tpu.memory_space<vmem>>, vector<2x128xf32>
    tpu.vector_store %arg21[%c0_1599, %c768_1600], %953 {strides = array<i32>} : memref<8x1152xf32, #tpu.memory_space<vmem>>, vector<2x128xf32>,
    %c0_1601 = arith.constant 0 : index
    %c3_1602 = arith.constant 3 : index
    %c0_1603 = arith.constant 0 : index
    %c0_1604 = arith.constant 0 : index
    %955 = vector.load %arg20[%c0_1601, %c3_1602, %c0_1603, %c0_1604] : memref<2x4x4x128xf32, #tpu.memory_space<vmem>>, vector<1x1x2x128xf32>
    %956 = vector.shape_cast %955 : vector<1x1x2x128xf32> to vector<2x128xf32>
    %c2_1605 = arith.constant 2 : index
    %c768_1606 = arith.constant 768 : index
    %957 = vector.load %arg21[%c2_1605, %c768_1606] : memref<8x1152xf32, #tpu.memory_space<vmem>>, vector<2x128xf32>
    tpu.vector_store %arg21[%c2_1605, %c768_1606], %956 {strides = array<i32>} : memref<8x1152xf32, #tpu.memory_space<vmem>>, vector<2x128xf32>,
    %c1_1607 = arith.constant 1 : index
    %c2_1608 = arith.constant 2 : index
    %c0_1609 = arith.constant 0 : index
    %c0_1610 = arith.constant 0 : index
    %958 = vector.load %arg20[%c1_1607, %c2_1608, %c0_1609, %c0_1610] : memref<2x4x4x128xf32, #tpu.memory_space<vmem>>, vector<1x1x2x128xf32>
    %959 = vector.shape_cast %958 : vector<1x1x2x128xf32> to vector<2x128xf32>
    %c4_1611 = arith.constant 4 : index
    %c768_1612 = arith.constant 768 : index
    %960 = vector.load %arg21[%c4_1611, %c768_1612] : memref<8x1152xf32, #tpu.memory_space<vmem>>, vector<2x128xf32>
    tpu.vector_store %arg21[%c4_1611, %c768_1612], %959 {strides = array<i32>} : memref<8x1152xf32, #tpu.memory_space<vmem>>, vector<2x128xf32>,
    %c1_1613 = arith.constant 1 : index
    %c3_1614 = arith.constant 3 : index
    %c0_1615 = arith.constant 0 : index
    %c0_1616 = arith.constant 0 : index
    %961 = vector.load %arg20[%c1_1613, %c3_1614, %c0_1615, %c0_1616] : memref<2x4x4x128xf32, #tpu.memory_space<vmem>>, vector<1x1x2x128xf32>
    %962 = vector.shape_cast %961 : vector<1x1x2x128xf32> to vector<2x128xf32>
    %c6_1617 = arith.constant 6 : index
    %c768_1618 = arith.constant 768 : index
    %963 = vector.load %arg21[%c6_1617, %c768_1618] : memref<8x1152xf32, #tpu.memory_space<vmem>>, vector<2x128xf32>
    tpu.vector_store %arg21[%c6_1617, %c768_1618], %962 {strides = array<i32>} : memref<8x1152xf32, #tpu.memory_space<vmem>>, vector<2x128xf32>,
    %c0_1619 = arith.constant 0 : index
    %c2_1620 = arith.constant 2 : index
    %c1_1621 = arith.constant 1 : index
    %c0_1622 = arith.constant 0 : index
    %964 = vector.load %arg20[%c0_1619, %c2_1620, %c1_1621, %c0_1622] : memref<2x4x4x128xf32, #tpu.memory_space<vmem>>, vector<1x1x2x128xf32>
    %965 = vector.shape_cast %964 : vector<1x1x2x128xf32> to vector<2x128xf32>
    %c0_1623 = arith.constant 0 : index
    %c896_1624 = arith.constant 896 : index
    %966 = vector.load %arg21[%c0_1623, %c896_1624] : memref<8x1152xf32, #tpu.memory_space<vmem>>, vector<2x128xf32>
    tpu.vector_store %arg21[%c0_1623, %c896_1624], %965 {strides = array<i32>} : memref<8x1152xf32, #tpu.memory_space<vmem>>, vector<2x128xf32>,
    %c0_1625 = arith.constant 0 : index
    %c3_1626 = arith.constant 3 : index
    %c1_1627 = arith.constant 1 : index
    %c0_1628 = arith.constant 0 : index
    %967 = vector.load %arg20[%c0_1625, %c3_1626, %c1_1627, %c0_1628] : memref<2x4x4x128xf32, #tpu.memory_space<vmem>>, vector<1x1x2x128xf32>
    %968 = vector.shape_cast %967 : vector<1x1x2x128xf32> to vector<2x128xf32>
    %c2_1629 = arith.constant 2 : index
    %c896_1630 = arith.constant 896 : index
    %969 = vector.load %arg21[%c2_1629, %c896_1630] : memref<8x1152xf32, #tpu.memory_space<vmem>>, vector<2x128xf32>
    tpu.vector_store %arg21[%c2_1629, %c896_1630], %968 {strides = array<i32>} : memref<8x1152xf32, #tpu.memory_space<vmem>>, vector<2x128xf32>,
    %c1_1631 = arith.constant 1 : index
    %c2_1632 = arith.constant 2 : index
    %c1_1633 = arith.constant 1 : index
    %c0_1634 = arith.constant 0 : index
    %970 = vector.load %arg20[%c1_1631, %c2_1632, %c1_1633, %c0_1634] : memref<2x4x4x128xf32, #tpu.memory_space<vmem>>, vector<1x1x2x128xf32>
    %971 = vector.shape_cast %970 : vector<1x1x2x128xf32> to vector<2x128xf32>
    %c4_1635 = arith.constant 4 : index
    %c896_1636 = arith.constant 896 : index
    %972 = vector.load %arg21[%c4_1635, %c896_1636] : memref<8x1152xf32, #tpu.memory_space<vmem>>, vector<2x128xf32>
    tpu.vector_store %arg21[%c4_1635, %c896_1636], %971 {strides = array<i32>} : memref<8x1152xf32, #tpu.memory_space<vmem>>, vector<2x128xf32>,
    %c1_1637 = arith.constant 1 : index
    %c3_1638 = arith.constant 3 : index
    %c1_1639 = arith.constant 1 : index
    %c0_1640 = arith.constant 0 : index
    %973 = vector.load %arg20[%c1_1637, %c3_1638, %c1_1639, %c0_1640] : memref<2x4x4x128xf32, #tpu.memory_space<vmem>>, vector<1x1x2x128xf32>
    %974 = vector.shape_cast %973 : vector<1x1x2x128xf32> to vector<2x128xf32>
    %c6_1641 = arith.constant 6 : index
    %c896_1642 = arith.constant 896 : index
    %975 = vector.load %arg21[%c6_1641, %c896_1642] : memref<8x1152xf32, #tpu.memory_space<vmem>>, vector<2x128xf32>
    tpu.vector_store %arg21[%c6_1641, %c896_1642], %974 {strides = array<i32>} : memref<8x1152xf32, #tpu.memory_space<vmem>>, vector<2x128xf32>,
    %c0_1643 = arith.constant 0 : index
    %c2_1644 = arith.constant 2 : index
    %c2_1645 = arith.constant 2 : index
    %c0_1646 = arith.constant 0 : index
    %976 = vector.load %arg20[%c0_1643, %c2_1644, %c2_1645, %c0_1646] : memref<2x4x4x128xf32, #tpu.memory_space<vmem>>, vector<1x1x2x128xf32>
    %977 = vector.shape_cast %976 : vector<1x1x2x128xf32> to vector<2x128xf32>
    %c0_1647 = arith.constant 0 : index
    %c1024_1648 = arith.constant 1024 : index
    %978 = vector.load %arg21[%c0_1647, %c1024_1648] : memref<8x1152xf32, #tpu.memory_space<vmem>>, vector<2x128xf32>
    tpu.vector_store %arg21[%c0_1647, %c1024_1648], %977 {strides = array<i32>} : memref<8x1152xf32, #tpu.memory_space<vmem>>, vector<2x128xf32>,
    %c0_1649 = arith.constant 0 : index
    %c3_1650 = arith.constant 3 : index
    %c2_1651 = arith.constant 2 : index
    %c0_1652 = arith.constant 0 : index
    %979 = vector.load %arg20[%c0_1649, %c3_1650, %c2_1651, %c0_1652] : memref<2x4x4x128xf32, #tpu.memory_space<vmem>>, vector<1x1x2x128xf32>
    %980 = vector.shape_cast %979 : vector<1x1x2x128xf32> to vector<2x128xf32>
    %c2_1653 = arith.constant 2 : index
    %c1024_1654 = arith.constant 1024 : index
    %981 = vector.load %arg21[%c2_1653, %c1024_1654] : memref<8x1152xf32, #tpu.memory_space<vmem>>, vector<2x128xf32>
    tpu.vector_store %arg21[%c2_1653, %c1024_1654], %980 {strides = array<i32>} : memref<8x1152xf32, #tpu.memory_space<vmem>>, vector<2x128xf32>,
    %c1_1655 = arith.constant 1 : index
    %c2_1656 = arith.constant 2 : index
    %c2_1657 = arith.constant 2 : index
    %c0_1658 = arith.constant 0 : index
    %982 = vector.load %arg20[%c1_1655, %c2_1656, %c2_1657, %c0_1658] : memref<2x4x4x128xf32, #tpu.memory_space<vmem>>, vector<1x1x2x128xf32>
    %983 = vector.shape_cast %982 : vector<1x1x2x128xf32> to vector<2x128xf32>
    %c4_1659 = arith.constant 4 : index
    %c1024_1660 = arith.constant 1024 : index
    %984 = vector.load %arg21[%c4_1659, %c1024_1660] : memref<8x1152xf32, #tpu.memory_space<vmem>>, vector<2x128xf32>
    tpu.vector_store %arg21[%c4_1659, %c1024_1660], %983 {strides = array<i32>} : memref<8x1152xf32, #tpu.memory_space<vmem>>, vector<2x128xf32>,
    %c1_1661 = arith.constant 1 : index
    %c3_1662 = arith.constant 3 : index
    %c2_1663 = arith.constant 2 : index
    %c0_1664 = arith.constant 0 : index
    %985 = vector.load %arg20[%c1_1661, %c3_1662, %c2_1663, %c0_1664] : memref<2x4x4x128xf32, #tpu.memory_space<vmem>>, vector<1x1x2x128xf32>
    %986 = vector.shape_cast %985 : vector<1x1x2x128xf32> to vector<2x128xf32>
    %c6_1665 = arith.constant 6 : index
    %c1024_1666 = arith.constant 1024 : index
    %987 = vector.load %arg21[%c6_1665, %c1024_1666] : memref<8x1152xf32, #tpu.memory_space<vmem>>, vector<2x128xf32>
    tpu.vector_store %arg21[%c6_1665, %c1024_1666], %986 {strides = array<i32>} : memref<8x1152xf32, #tpu.memory_space<vmem>>, vector<2x128xf32>,
    %c0_1667 = arith.constant 0 : index
    %c0_1668 = arith.constant 0 : index
    %988 = vector.load %arg21[%c0_1667, %c0_1668] : memref<8x1152xf32, #tpu.memory_space<vmem>>, vector<8x1152xf32>
    %989 = arith.truncf %988 : vector<8x1152xf32> to vector<8x1152xbf16>
    %c0_1669 = arith.constant 0 : index
    %c0_1670 = arith.constant 0 : index
    %990 = vector.load %arg7[%c0_1669, %c0_1670] : memref<1152x256xbf16, #tpu.memory_space<vmem>>, vector<1152x256xbf16>
    %cst_1671 = arith.constant dense<0.000000e+00> : vector<8x256xf32>
    %991 = tpu.matmul %989, %990, %cst_1671 {dimension_numbers = #tpu.dot_dimension_numbers<[1], [0], [0], [1], [0, 0, 1, 1], [], []>} : vector<8x1152xbf16>, vector<1152x256xbf16>, vector<8x256xf32> -> vector<8x256xf32>
    %c0_1672 = arith.constant 0 : index
    %c0_1673 = arith.constant 0 : index
    %992 = vector.load %arg8[%c0_1672, %c0_1673] : memref<1x256xf32, #tpu.memory_space<vmem>>, vector<1x256xf32>
    %c0_1674 = arith.constant 0 : index
    %c0_1675 = arith.constant 0 : index
    %993 = vector.load %arg9[%c0_1674, %c0_1675] : memref<1x256xf32, #tpu.memory_space<vmem>>, vector<1x256xf32>
    %cst_1676 = arith.constant dense<0.000000e+00> : vector<256xf32>
    %994 = vector.multi_reduction <add>, %991, %cst_1676 [0] : vector<8x256xf32> to vector<256xf32>
    %995 = vector.shape_cast %994 : vector<256xf32> to vector<1x256xf32>
    %cst_1677 = arith.constant 8.000000e+00 : f32
    %996 = vector.broadcast %cst_1677 : f32 to vector<1x256xf32>
    %997 = arith.divf %995, %996 : vector<1x256xf32>
    %998 = vector.broadcast %997 : vector<1x256xf32> to vector<8x256xf32>
    %999 = arith.subf %991, %998 : vector<8x256xf32>
    %1000 = arith.mulf %999, %999 : vector<8x256xf32>
    %cst_1678 = arith.constant dense<0.000000e+00> : vector<256xf32>
    %1001 = vector.multi_reduction <add>, %1000, %cst_1678 [0] : vector<8x256xf32> to vector<256xf32>
    %1002 = vector.shape_cast %1001 : vector<256xf32> to vector<1x256xf32>
    %cst_1679 = arith.constant 8.000000e+00 : f32
    %1003 = vector.broadcast %cst_1679 : f32 to vector<1x256xf32>
    %1004 = arith.divf %1002, %1003 : vector<1x256xf32>
    %1005 = vector.broadcast %997 : vector<1x256xf32> to vector<8x256xf32>
    %1006 = arith.subf %991, %1005 : vector<8x256xf32>
    %cst_1680 = arith.constant 9.99999974E-6 : f32
    %1007 = vector.broadcast %cst_1680 : f32 to vector<1x256xf32>
    %1008 = arith.addf %1004, %1007 : vector<1x256xf32>
    %1009 = math.rsqrt %1008 : vector<1x256xf32>
    %1010 = vector.broadcast %1009 : vector<1x256xf32> to vector<8x256xf32>
    %1011 = arith.mulf %1006, %1010 : vector<8x256xf32>
    %1012 = vector.broadcast %992 : vector<1x256xf32> to vector<8x256xf32>
    %1013 = arith.mulf %1011, %1012 : vector<8x256xf32>
    %1014 = vector.broadcast %993 : vector<1x256xf32> to vector<8x256xf32>
    %1015 = arith.addf %1013, %1014 : vector<8x256xf32>
    %cst_1681 = arith.constant 0.000000e+00 : f32
    %1016 = vector.broadcast %cst_1681 : f32 to vector<8x256xf32>
    %1017 = arith.maximumf %1015, %1016 : vector<8x256xf32>
    %c0_1682 = arith.constant 0 : index
    %c0_1683 = arith.constant 0 : index
    %1018 = vector.load %arg10[%c0_1682, %c0_1683] : memref<2x8xf32, #tpu.memory_space<vmem>>, vector<2x8xf32>
    %cst_1684 = arith.constant dense<0.000000e+00> : vector<2x256xf32>
    %1019 = tpu.matmul %1018, %1017, %cst_1684 {dimension_numbers = #tpu.dot_dimension_numbers<[1], [0], [0], [1], [0, 0, 1, 1], [], []>} : vector<2x8xf32>, vector<8x256xf32>, vector<2x256xf32> -> vector<2x256xf32>
    %1020 = arith.truncf %1019 : vector<2x256xf32> to vector<2x256xbf16>
    %c0_1685 = arith.constant 0 : index
    %c0_1686 = arith.constant 0 : index
    %1021 = vector.load %arg11[%c0_1685, %c0_1686] : memref<256x512xbf16, #tpu.memory_space<vmem>>, vector<256x512xbf16>
    %cst_1687 = arith.constant dense<0.000000e+00> : vector<2x512xf32>
    %1022 = tpu.matmul %1020, %1021, %cst_1687 {dimension_numbers = #tpu.dot_dimension_numbers<[1], [0], [0], [1], [0, 0, 1, 1], [], []>} : vector<2x256xbf16>, vector<256x512xbf16>, vector<2x512xf32> -> vector<2x512xf32>
    %c0_1688 = arith.constant 0 : index
    %c0_1689 = arith.constant 0 : index
    %1023 = vector.load %arg12[%c0_1688, %c0_1689] : memref<1x512xf32, #tpu.memory_space<vmem>>, vector<1x512xf32>
    %1024 = vector.broadcast %1023 : vector<1x512xf32> to vector<2x512xf32>
    %1025 = arith.addf %1022, %1024 : vector<2x512xf32>
    %cst_1690 = arith.constant 0.000000e+00 : f32
    %1026 = vector.broadcast %cst_1690 : f32 to vector<2x512xf32>
    %1027 = arith.maximumf %1025, %1026 : vector<2x512xf32>
    %1028 = arith.truncf %1027 : vector<2x512xf32> to vector<2x512xbf16>
    %c0_1691 = arith.constant 0 : index
    %c0_1692 = arith.constant 0 : index
    %1029 = vector.load %arg13[%c0_1691, %c0_1692] : memref<512x128xbf16, #tpu.memory_space<vmem>>, vector<512x128xbf16>
    %cst_1693 = arith.constant dense<0.000000e+00> : vector<2x128xf32>
    %1030 = tpu.matmul %1028, %1029, %cst_1693 {dimension_numbers = #tpu.dot_dimension_numbers<[1], [0], [0], [1], [0, 0, 1, 1], [], []>} : vector<2x512xbf16>, vector<512x128xbf16>, vector<2x128xf32> -> vector<2x128xf32>
    %c0_1694 = arith.constant 0 : index
    %c0_1695 = arith.constant 0 : index
    %1031 = vector.load %arg14[%c0_1694, %c0_1695] : memref<1x128xf32, #tpu.memory_space<vmem>>, vector<1x128xf32>
    %1032 = vector.broadcast %1031 : vector<1x128xf32> to vector<2x128xf32>
    %1033 = arith.addf %1030, %1032 : vector<2x128xf32>
    %c0_1696 = arith.constant 0 : index
    %c0_1697 = arith.constant 0 : index
    %1034 = vector.load %arg15[%c0_1696, %c0_1697] : memref<2x128xf32, #tpu.memory_space<vmem>>, vector<2x128xf32>
    tpu.vector_store %arg15[%c0_1696, %c0_1697], %1033 {strides = array<i32>} : memref<2x128xf32, #tpu.memory_space<vmem>>, vector<2x128xf32>,
    return
  }
}

</mosaic_0001>

<bundles_post_ra>
// kernel: tps_stn_forward.1
= control target key start
LH: loop header
LB: loop body
LE: loop exit
PB: predicated region body
PF: predicated region fallthrough
CT: control target
= control target key end

     0   :  { %v11709_v0 = vmov 0   ;;  %vm6153_vm0 = vcmask 64512   ;;  %s11693_s1 = inlined_call_operand.vmem [shape: bf16[256,128], index: 1, kind: input, shape index: {}]   ;;  %s11694_s0 = inlined_call_operand.vmem [shape: bf16[512,256], index: 0, kind: input, shape index: {}]   ;;  %s11695_s4 = inlined_call_operand.vmem [shape: bf16[3200,128], index: 4, kind: input, shape index: {}]   ;;  %s11696_s2 = inlined_call_operand.vmem [shape: f32[1,128], index: 2, kind: input, shape index: {}]   ;;  %s11697_s3 = inlined_call_operand.vmem [shape: f32[1,128], index: 3, kind: input, shape index: {}]   ;;  %s11698_s7 = inlined_call_operand.vmem [shape: bf16[1152,256], index: 7, kind: input, shape index: {}]   ;;  %s11699_s5 = inlined_call_operand.vmem [shape: f32[1,128], index: 5, kind: input, shape index: {}]   ;;  %s11700_s6 = inlined_call_operand.vmem [shape: f32[1,128], index: 6, kind: input, shape index: {}]   ;;  %s11701_s11 = inlined_call_operand.vmem [shape: bf16[256,512], index: 11, kind: input, shape index: {}]   ;;  %s11702_s8 = inlined_call_operand.vmem [shape: f32[1,256], index: 8, kind: input, shape index: {}]   ;;  %s11703_s9 = inlined_call_operand.vmem [shape: f32[1,256], index: 9, kind: input, shape index: {}]   ;;  %s11704_s10 = inlined_call_operand.vmem [shape: f32[2,8], index: 10, kind: input, shape index: {}]   ;;  %s11705_s13 = inlined_call_operand.vmem [shape: bf16[512,128], index: 13, kind: input, shape index: {}]   ;;  %s11706_s12 = inlined_call_operand.vmem [shape: f32[1,512], index: 12, kind: input, shape index: {}]   ;;  %s11707_s14 = inlined_call_operand.vmem [shape: f32[1,128], index: 14, kind: input, shape index: {}]   ;;  %s11708_s15 = inlined_call_operand.vmem [shape: f32[2,128], index: 15, kind: output, shape index: {}]  }
   0x1   :  { %563 = vmatprep.subr.bf16.mxu0 %v11709_v0  ;;  %v8028_v1 = vld [vmem:[%s11693_s1] sm:$0xff]   ;;  %v8029_v2 = vld [vmem:[%s11693_s1 + $0x8] sm:$0xff]   ;;  %v8030_v3 = vld [vmem:[%s11693_s1 + $0x10] sm:$0xff]  }
   0x2   :  { %564 = vmatpush1.bf16.msra.mxu0 %v8028_v1  ;;  %v8031_v4 = vld [vmem:[%s11693_s1 + $0x18] sm:$0xff]   ;;  %v8032_v5 = vld [vmem:[%s11693_s1 + $0x20] sm:$0xff]   ;;  %v8033_v7 = vld [vmem:[%s11693_s1 + $0x28] sm:$0xff]  }
   0x3   :  { %565 = vmatprep.subr.bf16.mxu0 %v11709_v0  ;;  %v8046_v6 = vld [vmem:[%s11694_s0 + $0x4] ss:$8 sps:$4 sm:$0xff]   ;;  %v8034_v8 = vld [vmem:[%s11693_s1 + $0x30] sm:$0xff]   ;;  %v8035_v9 = vld [vmem:[%s11693_s1 + $0x38] sm:$0xff]  }
   0x4   :  { %595 = vmatprep.mubr.bf16.mxu0 %v8046_v6  ;;  %v8036_v10 = vld [vmem:[%s11693_s1 + $0x40] sm:$0xff]   ;;  %v8037_v11 = vld [vmem:[%s11693_s1 + $0x48] sm:$0xff]   ;;  %v8038_v12 = vld [vmem:[%s11693_s1 + $0x50] sm:$0xff]  }
   0x5   :  { %v8039_v13 = vld [vmem:[%s11693_s1 + $0x58] sm:$0xff]   ;;  %v8040_v14 = vld [vmem:[%s11693_s1 + $0x60] sm:$0xff]   ;;  %v8041_v15 = vld [vmem:[%s11693_s1 + $0x68] sm:$0xff]  }
   0x6   :  { %566 = vmatpush1.bf16.msra.mxu0 %v8029_v2  ;;  %v8042_v16 = vld [vmem:[%s11693_s1 + $0x70] sm:$0xff]   ;;  %v8043_v17 = vld [vmem:[%s11693_s1 + $0x78] sm:$0xff]   ;;  %v8044_v18 = vld [vmem:[%s11694_s0] ss:$8 sps:$4 sm:$0xff]  }
   0x7   :  { %567 = vmatprep.subr.bf16.mxu0 %v11709_v0  ;;  %v8047_v19 = vld [vmem:[%s11694_s0 + $0x14] ss:$8 sps:$4 sm:$0xff]   ;;  %v8049_v20 = vld [vmem:[%s11694_s0 + $0x10] ss:$8 sps:$4 sm:$0xff]   ;;  %v8050_v21 = vld [vmem:[%s11694_s0 + $0x24] ss:$8 sps:$4 sm:$0xff]  }
   0x8   :  { %v8052_v22 = vld [vmem:[%s11694_s0 + $0x20] ss:$8 sps:$4 sm:$0xff]   ;;  %v8053_v23 = vld [vmem:[%s11694_s0 + $0x34] ss:$8 sps:$4 sm:$0xff]   ;;  %v8055_v24 = vld [vmem:[%s11694_s0 + $0x30] ss:$8 sps:$4 sm:$0xff]  }
   0x9   :  { %v8056_v25 = vld [vmem:[%s11694_s0 + $0x44] ss:$8 sps:$4 sm:$0xff]   ;;  %v8058_v26 = vld [vmem:[%s11694_s0 + $0x40] ss:$8 sps:$4 sm:$0xff]   ;;  %v8059_v27 = vld [vmem:[%s11694_s0 + $0x54] ss:$8 sps:$4 sm:$0xff]  }
   0xa   :  { %568 = vmatpush1.bf16.msra.mxu0 %v8030_v3  ;;  %v8061_v28 = vld [vmem:[%s11694_s0 + $0x50] ss:$8 sps:$4 sm:$0xff]   ;;  %v8062_v29 = vld [vmem:[%s11694_s0 + $0x64] ss:$8 sps:$4 sm:$0xff]   ;;  %v8064_v30 = vld [vmem:[%s11694_s0 + $0x60] ss:$8 sps:$4 sm:$0xff]  }
   0xb   :  { %569 = vmatprep.subr.bf16.mxu0 %v11709_v0  ;;  %v8065_v31 = vld [vmem:[%s11694_s0 + $0x74] ss:$8 sps:$4 sm:$0xff]   ;;  %v8067_v32 = vld [vmem:[%s11694_s0 + $0x70] ss:$8 sps:$4 sm:$0xff]   ;;  %v8068_v33 = vld [vmem:[%s11694_s0 + $0x84] ss:$8 sps:$4 sm:$0xff]  }
   0xc   :  { %v8070_v34 = vld [vmem:[%s11694_s0 + $0x80] ss:$8 sps:$4 sm:$0xff]   ;;  %v8071_v35 = vld [vmem:[%s11694_s0 + $0x94] ss:$8 sps:$4 sm:$0xff]   ;;  %v8073_v36 = vld [vmem:[%s11694_s0 + $0x90] ss:$8 sps:$4 sm:$0xff]  }
   0xd   :  { %v8074_v37 = vld [vmem:[%s11694_s0 + $0xa4] ss:$8 sps:$4 sm:$0xff]   ;;  %v8076_v38 = vld [vmem:[%s11694_s0 + $0xa0] ss:$8 sps:$4 sm:$0xff]   ;;  %v8077_v39 = vld [vmem:[%s11694_s0 + $0xb4] ss:$8 sps:$4 sm:$0xff]  }
   0xe   :  { %570 = vmatpush1.bf16.msra.mxu0 %v8031_v4  ;;  %v8079_v40 = vld [vmem:[%s11694_s0 + $0xb0] ss:$8 sps:$4 sm:$0xff]   ;;  %v8080_v41 = vld [vmem:[%s11694_s0 + $0xc4] ss:$8 sps:$4 sm:$0xff]   ;;  %v8082_v42 = vld [vmem:[%s11694_s0 + $0xc0] ss:$8 sps:$4 sm:$0xff]  }
   0xf   :  { %571 = vmatprep.subr.bf16.mxu0 %v11709_v0  ;;  %v8083_v43 = vld [vmem:[%s11694_s0 + $0xd4] ss:$8 sps:$4 sm:$0xff]   ;;  %v8085_v44 = vld [vmem:[%s11694_s0 + $0xd0] ss:$8 sps:$4 sm:$0xff]   ;;  %v8086_v45 = vld [vmem:[%s11694_s0 + $0xe4] ss:$8 sps:$4 sm:$0xff]  }
  0x10   :  { %v8088_v46 = vld [vmem:[%s11694_s0 + $0xe0] ss:$8 sps:$4 sm:$0xff]   ;;  %v8089_v47 = vld [vmem:[%s11694_s0 + $0xf4] ss:$8 sps:$4 sm:$0xff]   ;;  %v8091_v48 = vld [vmem:[%s11694_s0 + $0xf0] ss:$8 sps:$4 sm:$0xff]  }
  0x11   :  { %v8092_v49 = vld [vmem:[%s11694_s0 + $0x104] ss:$8 sps:$4 sm:$0xff]   ;;  %v8094_v50 = vld [vmem:[%s11694_s0 + $0x100] ss:$8 sps:$4 sm:$0xff]   ;;  %v8095_v51 = vld [vmem:[%s11694_s0 + $0x114] ss:$8 sps:$4 sm:$0xff]  }
  0x12   :  { %572 = vmatpush1.bf16.msra.mxu0 %v8032_v5  ;;  %v8097_v52 = vld [vmem:[%s11694_s0 + $0x110] ss:$8 sps:$4 sm:$0xff]   ;;  %v8098_v53 = vld [vmem:[%s11694_s0 + $0x124] ss:$8 sps:$4 sm:$0xff]   ;;  %v8100_v54 = vld [vmem:[%s11694_s0 + $0x120] ss:$8 sps:$4 sm:$0xff]  }
  0x13   :  { %573 = vmatprep.subr.bf16.mxu0 %v11709_v0  ;;  %v8101_v55 = vld [vmem:[%s11694_s0 + $0x134] ss:$8 sps:$4 sm:$0xff]   ;;  %v8103_v56 = vld [vmem:[%s11694_s0 + $0x130] ss:$8 sps:$4 sm:$0xff]   ;;  %v8104_v57 = vld [vmem:[%s11694_s0 + $0x144] ss:$8 sps:$4 sm:$0xff]  }
  0x14   :  { %v8106_v58 = vld [vmem:[%s11694_s0 + $0x140] ss:$8 sps:$4 sm:$0xff]   ;;  %v8107_v59 = vld [vmem:[%s11694_s0 + $0x154] ss:$8 sps:$4 sm:$0xff]   ;;  %v8109_v60 = vld [vmem:[%s11694_s0 + $0x150] ss:$8 sps:$4 sm:$0xff]  }
  0x15   :  { %v8110_v61 = vld [vmem:[%s11694_s0 + $0x164] ss:$8 sps:$4 sm:$0xff]   ;;  %v8112_v62 = vld [vmem:[%s11694_s0 + $0x160] ss:$8 sps:$4 sm:$0xff]   ;;  %v8113_v63 = vld [vmem:[%s11694_s0 + $0x174] ss:$8 sps:$4 sm:$0xff]  }
  0x16   :  { %574 = vmatpush1.bf16.msra.mxu0 %v8033_v7  ;;  %v8115_v1 = vld [vmem:[%s11694_s0 + $0x170] ss:$8 sps:$4 sm:$0xff]   ;;  %v8116_v2 = vld [vmem:[%s11694_s0 + $0x184] ss:$8 sps:$4 sm:$0xff]   ;;  %v8118_v3 = vld [vmem:[%s11694_s0 + $0x180] ss:$8 sps:$4 sm:$0xff]  }
  0x17   :  { %575 = vmatprep.subr.bf16.mxu0 %v11709_v0  ;;  %v8119_v4 = vld [vmem:[%s11694_s0 + $0x194] ss:$8 sps:$4 sm:$0xff]   ;;  %v8121_v5 = vld [vmem:[%s11694_s0 + $0x190] ss:$8 sps:$4 sm:$0xff]   ;;  %v8122_v6 = vld [vmem:[%s11694_s0 + $0x1a4] ss:$8 sps:$4 sm:$0xff]  }
  0x18   :  { %v8124_v7 = vld [vmem:[%s11694_s0 + $0x1a0] ss:$8 sps:$4 sm:$0xff]  }
  0x1a   :  { %576 = vmatpush1.bf16.msra.mxu0 %v8034_v8  ;;  %v8125_v8 = vld [vmem:[%s11694_s0 + $0x1b4] ss:$8 sps:$4 sm:$0xff]  }
  0x1b   :  { %577 = vmatprep.subr.bf16.mxu0 %v11709_v0 }
  0x1e   :  { %578 = vmatpush1.bf16.msra.mxu0 %v8035_v9 }
  0x1f   :  { %579 = vmatprep.subr.bf16.mxu0 %v11709_v0 }
  0x22   :  { %580 = vmatpush1.bf16.msra.mxu0 %v8036_v10 }
  0x23   :  { %581 = vmatprep.subr.bf16.mxu0 %v11709_v0 }
  0x26   :  { %582 = vmatpush1.bf16.msra.mxu0 %v8037_v11  ;;  %v8127_v11 = vld [vmem:[%s11694_s0 + $0x1b0] ss:$8 sps:$4 sm:$0xff]  }
  0x27   :  { %583 = vmatprep.subr.bf16.mxu0 %v11709_v0 }
  0x2a   :  { %584 = vmatpush1.bf16.msra.mxu0 %v8038_v12 }
  0x2b   :  { %585 = vmatprep.subr.bf16.mxu0 %v11709_v0 }
  0x2e   :  { %586 = vmatpush1.bf16.msra.mxu0 %v8039_v13  ;;  %v8128_v13 = vld [vmem:[%s11694_s0 + $0x1c4] ss:$8 sps:$4 sm:$0xff]  }
  0x2f   :  { %587 = vmatprep.subr.bf16.mxu0 %v11709_v0 }
  0x32   :  { %588 = vmatpush1.bf16.msra.mxu0 %v8040_v14 }
  0x33   :  { %589 = vmatprep.subr.bf16.mxu0 %v11709_v0 }
  0x36   :  { %590 = vmatpush1.bf16.msra.mxu0 %v8041_v15 }
  0x37   :  { %591 = vmatprep.subr.bf16.mxu0 %v11709_v0 }
  0x3a   :  { %592 = vmatpush1.bf16.msra.mxu0 %v8042_v16 }
  0x3b   :  { %593 = vmatprep.subr.bf16.mxu0 %v11709_v0 }
  0x3e   :  { %594 = vmatpush1.bf16.msra.mxu0 %v8043_v17 }
  0x41   :  { %596 = vmatmul.mubr.bf16.vlgmr.msra.gmra.mrb[0].mxu0 %v8044_v18 }
  0x42   :  { %603 = vmatprep.mubr.bf16.mxu0 %v8047_v19  ;;  %v8130_v19 = vld [vmem:[%s11694_s0 + $0x1c0] ss:$8 sps:$4 sm:$0xff]  }
  0x49   :  { %604 = vmatmul.mubr.bf16.gmra.mrb[4].mxu0 %v8049_v20 }
  0x4a   :  { %611 = vmatprep.mubr.bf16.mxu0 %v8050_v21  ;;  %v8131_v21 = vld [vmem:[%s11694_s0 + $0x1d4] ss:$8 sps:$4 sm:$0xff]  }
  0x51   :  { %612 = vmatmul.mubr.bf16.gmra.mrb[8].mxu0 %v8052_v22 }
  0x52   :  { %619 = vmatprep.mubr.bf16.mxu0 %v8053_v23 }
  0x59   :  { %620 = vmatmul.mubr.bf16.gmra.mrb[12].mxu0 %v8055_v24 }
  0x5a   :  { %627 = vmatprep.mubr.bf16.mxu0 %v8056_v25 }
  0x61   :  { %628 = vmatmul.mubr.bf16.gmra.mrb[16].mxu0 %v8058_v26 }
  0x62   :  { %635 = vmatprep.mubr.bf16.mxu0 %v8059_v27  ;;  %v8133_v27 = vld [vmem:[%s11694_s0 + $0x1d0] ss:$8 sps:$4 sm:$0xff]  }
  0x69   :  { %636 = vmatmul.mubr.bf16.gmra.mrb[20].mxu0 %v8061_v28 }
  0x6a   :  { %643 = vmatprep.mubr.bf16.mxu0 %v8062_v29  ;;  %v8134_v29 = vld [vmem:[%s11694_s0 + $0x1e4] ss:$8 sps:$4 sm:$0xff]  }
  0x71   :  { %644 = vmatmul.mubr.bf16.gmra.mrb[24].mxu0 %v8064_v30 }
  0x72   :  { %651 = vmatprep.mubr.bf16.mxu0 %v8065_v31 }
  0x79   :  { %652 = vmatmul.mubr.bf16.gmra.mrb[28].mxu0 %v8067_v32 }
  0x7a   :  { %659 = vmatprep.mubr.bf16.mxu0 %v8068_v33 }
  0x81   :  { %660 = vmatmul.mubr.bf16.gmra.mrb[32].mxu0 %v8070_v34 }
  0x82   :  { %667 = vmatprep.mubr.bf16.mxu0 %v8071_v35  ;;  %v8136_v35 = vld [vmem:[%s11694_s0 + $0x1e0] ss:$8 sps:$4 sm:$0xff]  }
  0x89   :  { %668 = vmatmul.mubr.bf16.gmra.mrb[36].mxu0 %v8073_v36 }
  0x8a   :  { %675 = vmatprep.mubr.bf16.mxu0 %v8074_v37  ;;  %v8137_v37 = vld [vmem:[%s11694_s0 + $0x1f4] ss:$8 sps:$4 sm:$0xff]  }
  0x91   :  { %676 = vmatmul.mubr.bf16.gmra.mrb[40].mxu0 %v8076_v38 }
  0x92   :  { %683 = vmatprep.mubr.bf16.mxu0 %v8077_v39 }
  0x99   :  { %684 = vmatmul.mubr.bf16.gmra.mrb[44].mxu0 %v8079_v40 }
  0x9a   :  { %691 = vmatprep.mubr.bf16.mxu0 %v8080_v41 }
  0xa1   :  { %692 = vmatmul.mubr.bf16.gmra.mrb[48].mxu0 %v8082_v42 }
  0xa2   :  { %699 = vmatprep.mubr.bf16.mxu0 %v8083_v43  ;;  %v8139_v43 = vld [vmem:[%s11694_s0 + $0x1f0] ss:$8 sps:$4 sm:$0xff]  }
  0xa9   :  { %700 = vmatmul.mubr.bf16.gmra.mrb[52].mxu0 %v8085_v44 }
  0xaa   :  { %707 = vmatprep.mubr.bf16.mxu0 %v8086_v45 }
  0xb1   :  { %708 = vmatmul.mubr.bf16.gmra.mrb[56].mxu0 %v8088_v46 }
  0xb2   :  { %715 = vmatprep.mubr.bf16.mxu0 %v8089_v47 }
  0xb9   :  { %716 = vmatmul.mubr.bf16.gmra.mrb[60].mxu0 %v8091_v48 }
  0xba   :  { %723 = vmatprep.mubr.bf16.mxu0 %v8092_v49 }
  0xc1   :  { %724 = vmatmul.mubr.bf16.gmra.mrb[64].mxu0 %v8094_v50 }
  0xc2   :  { %731 = vmatprep.mubr.bf16.mxu0 %v8095_v51 }
  0xc9   :  { %732 = vmatmul.mubr.bf16.gmra.mrb[68].mxu0 %v8097_v52 }
  0xca   :  { %739 = vmatprep.mubr.bf16.mxu0 %v8098_v53 }
  0xd1   :  { %740 = vmatmul.mubr.bf16.gmra.mrb[72].mxu0 %v8100_v54 }
  0xd2   :  { %747 = vmatprep.mubr.bf16.mxu0 %v8101_v55 }
  0xd9   :  { %748 = vmatmul.mubr.bf16.gmra.mrb[76].mxu0 %v8103_v56 }
  0xda   :  { %755 = vmatprep.mubr.bf16.mxu0 %v8104_v57 }
  0xe1   :  { %756 = vmatmul.mubr.bf16.gmra.mrb[80].mxu0 %v8106_v58 }
  0xe2   :  { %763 = vmatprep.mubr.bf16.mxu0 %v8107_v59 }
  0xe9   :  { %764 = vmatmul.mubr.bf16.gmra.mrb[84].mxu0 %v8109_v60 }
  0xea   :  { %771 = vmatprep.mubr.bf16.mxu0 %v8110_v61 }
  0xf1   :  { %772 = vmatmul.mubr.bf16.gmra.mrb[88].mxu0 %v8112_v62 }
  0xf2   :  { %779 = vmatprep.mubr.bf16.mxu0 %v8113_v63 }
  0xf9   :  { %780 = vmatmul.mubr.bf16.gmra.mrb[92].mxu0 %v8115_v1 }
  0xfa   :  { %787 = vmatprep.mubr.bf16.mxu0 %v8116_v2 }
 0x101   :  { %788 = vmatmul.mubr.bf16.gmra.mrb[96].mxu0 %v8118_v3 }
 0x102   :  { %795 = vmatprep.mubr.bf16.mxu0 %v8119_v4 }
 0x109   :  { %796 = vmatmul.mubr.bf16.gmra.mrb[100].mxu0 %v8121_v5 }
 0x10a   :  { %803 = vmatprep.mubr.bf16.mxu0 %v8122_v6  ;;  %v11710_v6 = vmov 0.0  }
 0x10b   :  { %1458 = vst [vmem:[#allocation3 + $0x8] sm:$0x3f] %v11710_v6  ;;  %1459 = vst [vmem:[#allocation3 + $0x10] sm:$0x3f] %v11710_v6 }
 0x10c   :  { %1457 = vst [vmem:[#allocation3] sm:$0x3f] %v11710_v6  ;;  %1460 = vst [vmem:[#allocation3 + $0x18] sm:$0x3f] %v11710_v6 }
 0x10d   :  { %1461 = vst [vmem:[#allocation3 + $0x20] sm:$0x3f] %v11710_v6  ;;  %1462 = vst [vmem:[#allocation3 + $0x28] sm:$0x3f] %v11710_v6 }
 0x10e   :  { %1463 = vst [vmem:[#allocation3 + $0x30] sm:$0x3f] %v11710_v6  ;;  %1464 = vst [vmem:[#allocation3 + $0x38] sm:$0x3f] %v11710_v6 }
 0x10f   :  { %1465 = vst [vmem:[#allocation3 + $0x40] sm:$0x3f] %v11710_v6  ;;  %1466 = vst [vmem:[#allocation3 + $0x48] sm:$0x3f] %v11710_v6 }
 0x110   :  { %1467 = vst [vmem:[#allocation3 + $0x50] sm:$0x3f] %v11710_v6  ;;  %1468 = vst [vmem:[#allocation3 + $0x58] sm:$0x3f] %v11710_v6 }
 0x111   :  { %804 = vmatmul.mubr.bf16.gmra.mrb[104].mxu0 %v8124_v7  ;;  %1469 = vst [vmem:[#allocation3 + $0x60] sm:$0x3f] %v11710_v6  ;;  %1470 = vst [vmem:[#allocation3 + $0x68] sm:$0x3f] %v11710_v6 }
 0x112   :  { %811 = vmatprep.mubr.bf16.mxu0 %v8125_v8  ;;  %1471 = vst [vmem:[#allocation3 + $0x70] sm:$0x3f] %v11710_v6  ;;  %1472 = vst [vmem:[#allocation3 + $0x78] sm:$0x3f] %v11710_v6 }
 0x113   :  { %1473 = vst [vmem:[#allocation3 + $0x80] sm:$0x3f] %v11710_v6  ;;  %1475 = vst [vmem:[#allocation3 + $0x90] sm:$0x3f] %v11710_v6 }
 0x114   :  { %v9003_v9 = vpop.f32.mrb[0].mxu0  ;;  %1476 = vst [vmem:[#allocation3 + $0x98] sm:$0x3f] %v11710_v6  ;;  %1477 = vst [vmem:[#allocation3 + $0xa0] sm:$0x3f] %v11710_v6 }
 0x115   :  { %v599_v10 = vpop.f32.mrb[1].mxu0  ;;  %1478 = vst [vmem:[#allocation3 + $0xa8] sm:$0x3f] %v11710_v6  ;;  %1479 = vst [vmem:[#allocation3 + $0xb0] sm:$0x3f] %v11710_v6 }
 0x116   :  { %v9008_v12 = vpop.f32.mrb[2].mxu0  ;;  %1481 = vst [vmem:[#allocation3 + $0xc0] sm:$0x3f] %v11710_v6  ;;  %1482 = vst [vmem:[#allocation3 + $0xc8] sm:$0x3f] %v11710_v6 }
 0x117   :  { %v854_v14 = vadd.f32 %v9008_v12, %v9003_v9  ;;  %v602_v15 = vpop.f32.mrb[3].mxu0  ;;  %1483 = vst [vmem:[#allocation3 + $0xd0] sm:$0x3f] %v11710_v6  ;;  %1484 = vst [vmem:[#allocation3 + $0xd8] sm:$0x3f] %v11710_v6 }
 0x118   :  { %1485 = vst [vmem:[#allocation3 + $0xe0] sm:$0x3f] %v11710_v6  ;;  %1486 = vst [vmem:[#allocation3 + $0xe8] sm:$0x3f] %v11710_v6 }
 0x119   :  { %812 = vmatmul.mubr.bf16.gmra.mrb[108].mxu0 %v8127_v11  ;;  %1487 = vst [vmem:[#allocation3 + $0xf0] sm:$0x3f] %v11710_v6  ;;  %1488 = vst [vmem:[#allocation3 + $0xf8] sm:$0x3f] %v11710_v6 }
 0x11a   :  { %819 = vmatprep.mubr.bf16.mxu0 %v8128_v13  ;;  %1489 = vst [vmem:[#allocation3 + $0x100] sm:$0x3f] %v11710_v6  ;;  %1490 = vst [vmem:[#allocation3 + $0x108] sm:$0x3f] %v11710_v6 }
 0x11b   :  { %1491 = vst [vmem:[#allocation3 + $0x110] sm:$0x3f] %v11710_v6  ;;  %1492 = vst [vmem:[#allocation3 + $0x118] sm:$0x3f] %v11710_v6 }
 0x11c   :  { %v9015_v16 = vpop.f32.mrb[4].mxu0  ;;  %1493 = vst [vmem:[#allocation3 + $0x120] sm:$0x3f] %v11710_v6  ;;  %1494 = vst [vmem:[#allocation3 + $0x128] sm:$0x3f] %v11710_v6 }
 0x11d   :  { %v855_v17 = vadd.f32 %v854_v14, %v9015_v16  ;;  %v607_v18 = vpop.f32.mrb[5].mxu0  ;;  %1495 = vst [vmem:[#allocation3 + $0x130] sm:$0x3f] %v11710_v6  ;;  %1496 = vst [vmem:[#allocation3 + $0x138] sm:$0x3f] %v11710_v6 }
 0x11e   :  { %v9021_v20 = vpop.f32.mrb[6].mxu0  ;;  %1497 = vst [vmem:[#allocation3 + $0x140] sm:$0x3f] %v11710_v6  ;;  %1499 = vst [vmem:[#allocation3 + $0x150] sm:$0x3f] %v11710_v6 }
 0x11f   :  { %v856_v22 = vadd.f32 %v855_v17, %v9021_v20  ;;  %v610_v23 = vpop.f32.mrb[7].mxu0  ;;  %1500 = vst [vmem:[#allocation3 + $0x158] sm:$0x3f] %v11710_v6  ;;  %1501 = vst [vmem:[#allocation3 + $0x160] sm:$0x3f] %v11710_v6 }
 0x120   :  { %1502 = vst [vmem:[#allocation3 + $0x168] sm:$0x3f] %v11710_v6  ;;  %1503 = vst [vmem:[#allocation3 + $0x170] sm:$0x3f] %v11710_v6 }
 0x121   :  { %820 = vmatmul.mubr.bf16.gmra.mrb[112].mxu0 %v8130_v19  ;;  %4764 = vst [vmem:[#allocation6] sm:$0xf] %v11710_v6  ;;  %4765 = vst [vmem:[#allocation6 + $0x4] sm:$0xf] %v11710_v6 }
 0x122   :  { %827 = vmatprep.mubr.bf16.mxu0 %v8131_v21  ;;  %4766 = vst [vmem:[#allocation6 + $0x8] sm:$0xf] %v11710_v6  ;;  %4767 = vst [vmem:[#allocation6 + $0xc] sm:$0xf] %v11710_v6 }
 0x123   :  { %4768 = vst [vmem:[#allocation6 + $0x10] sm:$0xf] %v11710_v6  ;;  %4769 = vst [vmem:[#allocation6 + $0x14] sm:$0xf] %v11710_v6 }
 0x124   :  { %v9027_v24 = vpop.f32.mrb[8].mxu0  ;;  %4770 = vst [vmem:[#allocation6 + $0x18] sm:$0xf] %v11710_v6  ;;  %4771 = vst [vmem:[#allocation6 + $0x1c] sm:$0xf] %v11710_v6 }
 0x125   :  { %v857_v25 = vadd.f32 %v856_v22, %v9027_v24  ;;  %v615_v26 = vpop.f32.mrb[9].mxu0 }
 0x126   :  { %v9033_v28 = vpop.f32.mrb[10].mxu0 }
 0x127   :  { %v858_v30 = vadd.f32 %v857_v25, %v9033_v28  ;;  %v618_v31 = vpop.f32.mrb[11].mxu0 }
 0x129   :  { %828 = vmatmul.mubr.bf16.gmra.mrb[116].mxu0 %v8133_v27 }
 0x12a   :  { %835 = vmatprep.mubr.bf16.mxu0 %v8134_v29 }
 0x12c   :  { %v9039_v32 = vpop.f32.mrb[12].mxu0 }
 0x12d   :  { %v859_v33 = vadd.f32 %v858_v30, %v9039_v32  ;;  %v623_v34 = vpop.f32.mrb[13].mxu0 }
 0x12e   :  { %v9045_v36 = vpop.f32.mrb[14].mxu0 }
 0x12f   :  { %v860_v38 = vadd.f32 %v859_v33, %v9045_v36  ;;  %v626_v39 = vpop.f32.mrb[15].mxu0 }
 0x131   :  { %836 = vmatmul.mubr.bf16.gmra.mrb[120].mxu0 %v8136_v35 }
 0x132   :  { %843 = vmatprep.mubr.bf16.mxu0 %v8137_v37 }
 0x134   :  { %v9051_v40 = vpop.f32.mrb[16].mxu0 }
 0x135   :  { %v861_v41 = vadd.f32 %v860_v38, %v9051_v40  ;;  %v631_v42 = vpop.f32.mrb[17].mxu0 }
 0x136   :  { %v9057_v44 = vpop.f32.mrb[18].mxu0 }
 0x137   :  { %v862_v45 = vadd.f32 %v861_v41, %v9057_v44  ;;  %v634_v46 = vpop.f32.mrb[19].mxu0 }
 0x139   :  { %844 = vmatmul.mubr.bf16.gmra.mrb[124].mxu0 %v8139_v43 }
 0x13c   :  { %v9060_v47 = vpop.f32.mrb[20].mxu0 }
 0x13d   :  { %v863_v48 = vadd.f32 %v862_v45, %v9060_v47  ;;  %v639_v49 = vpop.f32.mrb[21].mxu0 }
 0x13e   :  { %v9063_v50 = vpop.f32.mrb[22].mxu0 }
 0x13f   :  { %v864_v51 = vadd.f32 %v863_v48, %v9063_v50  ;;  %v642_v52 = vpop.f32.mrb[23].mxu0 }
 0x144   :  { %v9066_v53 = vpop.f32.mrb[24].mxu0 }
 0x145   :  { %v865_v54 = vadd.f32 %v864_v51, %v9066_v53  ;;  %v647_v55 = vpop.f32.mrb[25].mxu0 }
 0x146   :  { %v9069_v56 = vpop.f32.mrb[26].mxu0 }
 0x147   :  { %v866_v57 = vadd.f32 %v865_v54, %v9069_v56  ;;  %v650_v58 = vpop.f32.mrb[27].mxu0 }
 0x14c   :  { %v9072_v59 = vpop.f32.mrb[28].mxu0 }
 0x14d   :  { %v867_v60 = vadd.f32 %v866_v57, %v9072_v59  ;;  %v655_v61 = vpop.f32.mrb[29].mxu0 }
 0x14e   :  { %v9075_v62 = vpop.f32.mrb[30].mxu0 }
 0x14f   :  { %v868_v63 = vadd.f32 %v867_v60, %v9075_v62  ;;  %v658_v1 = vpop.f32.mrb[31].mxu0 }
 0x154   :  { %v9078_v2 = vpop.f32.mrb[32].mxu0 }
 0x155   :  { %v869_v3 = vadd.f32 %v868_v63, %v9078_v2  ;;  %v663_v4 = vpop.f32.mrb[33].mxu0 }
 0x156   :  { %v9081_v5 = vpop.f32.mrb[34].mxu0 }
 0x157   :  { %v870_v7 = vadd.f32 %v869_v3, %v9081_v5  ;;  %v666_v8 = vpop.f32.mrb[35].mxu0 }
 0x15c   :  { %v9136_v10 = vpop.f32.mrb[36].mxu0 }
 0x15d   :  { %v871_v11 = vadd.f32 %v870_v7, %v9136_v10  ;;  %v671_v13 = vpop.f32.mrb[37].mxu0 }
 0x15e   :  { %v9139_v14 = vpop.f32.mrb[38].mxu0 }
 0x15f   :  { %v872_v15 = vadd.f32 %v871_v11, %v9139_v14  ;;  %v674_v17 = vpop.f32.mrb[39].mxu0 }
 0x164   :  { %v9142_v18 = vpop.f32.mrb[40].mxu0 }
 0x165   :  { %v873_v19 = vadd.f32 %v872_v15, %v9142_v18  ;;  %v679_v21 = vpop.f32.mrb[41].mxu0 }
 0x166   :  { %v9145_v22 = vpop.f32.mrb[42].mxu0 }
 0x167   :  { %v874_v23 = vadd.f32 %v873_v19, %v9145_v22  ;;  %v682_v25 = vpop.f32.mrb[43].mxu0 }
 0x16c   :  { %v9148_v26 = vpop.f32.mrb[44].mxu0 }
 0x16d   :  { %v875_v27 = vadd.f32 %v874_v23, %v9148_v26  ;;  %v687_v29 = vpop.f32.mrb[45].mxu0 }
 0x16e   :  { %v9151_v30 = vpop.f32.mrb[46].mxu0 }
 0x16f   :  { %v876_v31 = vadd.f32 %v875_v27, %v9151_v30  ;;  %v690_v33 = vpop.f32.mrb[47].mxu0 }
 0x174   :  { %v9154_v34 = vpop.f32.mrb[48].mxu0 }
 0x175   :  { %v877_v35 = vadd.f32 %v876_v31, %v9154_v34  ;;  %v695_v37 = vpop.f32.mrb[49].mxu0 }
 0x176   :  { %v9157_v38 = vpop.f32.mrb[50].mxu0 }
 0x177   :  { %v878_v39 = vadd.f32 %v877_v35, %v9157_v38  ;;  %v698_v41 = vpop.f32.mrb[51].mxu0 }
 0x17c   :  { %v9160_v42 = vpop.f32.mrb[52].mxu0 }
 0x17d   :  { %v879_v43 = vadd.f32 %v878_v39, %v9160_v42  ;;  %v703_v45 = vpop.f32.mrb[53].mxu0 }
 0x17e   :  { %v9163_v46 = vpop.f32.mrb[54].mxu0 }
 0x17f   :  { %v880_v48 = vadd.f32 %v879_v43, %v9163_v46  ;;  %v706_v49 = vpop.f32.mrb[55].mxu0 }
 0x184   :  { %v9166_v51 = vpop.f32.mrb[56].mxu0 }
 0x185   :  { %v881_v52 = vadd.f32 %v880_v48, %v9166_v51  ;;  %v711_v54 = vpop.f32.mrb[57].mxu0 }
 0x186   :  { %v9169_v55 = vpop.f32.mrb[58].mxu0 }
 0x187   :  { %v882_v57 = vadd.f32 %v881_v52, %v9169_v55  ;;  %v714_v58 = vpop.f32.mrb[59].mxu0 }
 0x18c   :  { %v9172_v60 = vpop.f32.mrb[60].mxu0 }
 0x18d   :  { %v883_v61 = vadd.f32 %v882_v57, %v9172_v60  ;;  %v719_v63 = vpop.f32.mrb[61].mxu0 }
 0x18e   :  { %v9175_v1 = vpop.f32.mrb[62].mxu0 }
 0x18f   :  { %v884_v3 = vadd.f32 %v883_v61, %v9175_v1  ;;  %v722_v4 = vpop.f32.mrb[63].mxu0 }
 0x194   :  { %v9178_v7 = vpop.f32.mrb[64].mxu0 }
 0x195   :  { %v885_v8 = vadd.f32 %v884_v3, %v9178_v7  ;;  %v727_v11 = vpop.f32.mrb[65].mxu0 }
 0x196   :  { %v9181_v13 = vpop.f32.mrb[66].mxu0 }
 0x197   :  { %v886_v15 = vadd.f32 %v885_v8, %v9181_v13  ;;  %v730_v17 = vpop.f32.mrb[67].mxu0 }
 0x19c   :  { %v9184_v19 = vpop.f32.mrb[68].mxu0 }
 0x19d   :  { %v887_v21 = vadd.f32 %v886_v15, %v9184_v19  ;;  %v735_v23 = vpop.f32.mrb[69].mxu0 }
 0x19e   :  { %v9187_v25 = vpop.f32.mrb[70].mxu0 }
 0x19f   :  { %v888_v27 = vadd.f32 %v887_v21, %v9187_v25  ;;  %v738_v29 = vpop.f32.mrb[71].mxu0 }
 0x1a4   :  { %v9190_v31 = vpop.f32.mrb[72].mxu0 }
 0x1a5   :  { %v889_v33 = vadd.f32 %v888_v27, %v9190_v31  ;;  %v743_v35 = vpop.f32.mrb[73].mxu0 }
 0x1a6   :  { %v9193_v37 = vpop.f32.mrb[74].mxu0 }
 0x1a7   :  { %v890_v39 = vadd.f32 %v889_v33, %v9193_v37  ;;  %v746_v41 = vpop.f32.mrb[75].mxu0 }
 0x1ac   :  { %v9196_v43 = vpop.f32.mrb[76].mxu0 }
 0x1ad   :  { %v891_v45 = vadd.f32 %v890_v39, %v9196_v43  ;;  %v751_v48 = vpop.f32.mrb[77].mxu0 }
 0x1ae   :  { %v9199_v49 = vpop.f32.mrb[78].mxu0 }
 0x1af   :  { %v892_v52 = vadd.f32 %v891_v45, %v9199_v49  ;;  %v754_v54 = vpop.f32.mrb[79].mxu0 }
 0x1b4   :  { %v9202_v57 = vpop.f32.mrb[80].mxu0 }
 0x1b5   :  { %v893_v58 = vadd.f32 %v892_v52, %v9202_v57  ;;  %v759_v61 = vpop.f32.mrb[81].mxu0 }
 0x1b6   :  { %v9205_v63 = vpop.f32.mrb[82].mxu0 }
 0x1b7   :  { %v894_v3 = vadd.f32 %v893_v58, %v9205_v63  ;;  %v762_v4 = vpop.f32.mrb[83].mxu0 }
 0x1bc   :  { %v9208_v8 = vpop.f32.mrb[84].mxu0 }
 0x1bd   :  { %v895_v11 = vadd.f32 %v894_v3, %v9208_v8  ;;  %v767_v15 = vpop.f32.mrb[85].mxu0 }
 0x1be   :  { %v9211_v17 = vpop.f32.mrb[86].mxu0 }
 0x1bf   :  { %v896_v21 = vadd.f32 %v895_v11, %v9211_v17  ;;  %v770_v23 = vpop.f32.mrb[87].mxu0 }
 0x1c4   :  { %v9214_v27 = vpop.f32.mrb[88].mxu0 }
 0x1c5   :  { %v897_v29 = vadd.f32 %v896_v21, %v9214_v27  ;;  %v775_v33 = vpop.f32.mrb[89].mxu0 }
 0x1c6   :  { %v9217_v35 = vpop.f32.mrb[90].mxu0 }
 0x1c7   :  { %v898_v39 = vadd.f32 %v897_v29, %v9217_v35  ;;  %v778_v41 = vpop.f32.mrb[91].mxu0 }
 0x1cc   :  { %v9220_v45 = vpop.f32.mrb[92].mxu0 }
 0x1cd   :  { %v899_v48 = vadd.f32 %v898_v39, %v9220_v45  ;;  %v783_v52 = vpop.f32.mrb[93].mxu0 }
 0x1ce   :  { %v9223_v54 = vpop.f32.mrb[94].mxu0 }
 0x1cf   :  { %11749 = vst [vmem:[#allocation8_spill] sm:$0xff] %v9223_v54  ;;  %v900_v58 = vadd.f32 %v899_v48, %v9223_v54  ;;  %v786_v61 = vpop.f32.mrb[95].mxu0 }
 0x1d4   :  { %v9226_v3 = vpop.f32.mrb[96].mxu0 }
 0x1d5   :  { %11750 = vst [vmem:[#allocation9_spill] sm:$0xff] %v9226_v3  ;;  %v901_v4 = vadd.f32 %v900_v58, %v9226_v3  ;;  %v791_v11 = vpop.f32.mrb[97].mxu0 }
 0x1d6   :  { %v9229_v15 = vpop.f32.mrb[98].mxu0 }
 0x1d7   :  { %11751 = vst [vmem:[#allocation10_spill] sm:$0xff] %v9229_v15  ;;  %v902_v21 = vadd.f32 %v901_v4, %v9229_v15  ;;  %v794_v23 = vpop.f32.mrb[99].mxu0 }
 0x1dc   :  { %v9232_v29 = vpop.f32.mrb[100].mxu0 }
 0x1dd   :  { %11752 = vst [vmem:[#allocation11_spill] sm:$0xff] %v9232_v29  ;;  %v903_v33 = vadd.f32 %v902_v21, %v9232_v29  ;;  %v799_v39 = vpop.f32.mrb[101].mxu0 }
 0x1de   :  { %v9235_v41 = vpop.f32.mrb[102].mxu0 }
 0x1df   :  { %11753 = vst [vmem:[#allocation12_spill] sm:$0xff] %v9235_v41  ;;  %v904_v48 = vadd.f32 %v903_v33, %v9235_v41  ;;  %v802_v52 = vpop.f32.mrb[103].mxu0 }
 0x1e4   :  { %v9238_v61 = vpop.f32.mrb[104].mxu0 }
 0x1e5   :  { %11754 = vst [vmem:[#allocation13_spill] sm:$0xff] %v9238_v61  ;;  %v905_v58 = vadd.f32 %v904_v48, %v9238_v61  ;;  %v807_v11 = vpop.f32.mrb[105].mxu0 }
 0x1e6   :  { %v9241_v0 = vpop.f32.mrb[106].mxu0 }
 0x1e7   :  { %11755 = vst [vmem:[#allocation14_spill] sm:$0xff] %v9241_v0  ;;  %v906_v4 = vadd.f32 %v905_v58, %v9241_v0  ;;  %v810_v23 = vpop.f32.mrb[107].mxu0 }
 0x1ec   :  { %v9244_v6 = vpop.f32.mrb[108].mxu0 }
 0x1ed   :  { %11756 = vst [vmem:[#allocation15_spill] sm:$0xff] %v9244_v6  ;;  %v907_v21 = vadd.f32 %v906_v4, %v9244_v6  ;;  %v815_v39 = vpop.f32.mrb[109].mxu0 }
 0x1ee   :  { %v9247_v29 = vpop.f32.mrb[110].mxu0 }
 0x1ef   :  { %11757 = vst [vmem:[#allocation16_spill] sm:$0xff] %v9247_v29  ;;  %v908_v33 = vadd.f32 %v907_v21, %v9247_v29  ;;  %v818_v52 = vpop.f32.mrb[111].mxu0 }
 0x1f4   :  { %v9250_v41 = vpop.f32.mrb[112].mxu0 }
 0x1f5   :  { %11758 = vst [vmem:[#allocation17_spill] sm:$0xff] %v9250_v41  ;;  %v909_v48 = vadd.f32 %v908_v33, %v9250_v41  ;;  %v823_v11 = vpop.f32.mrb[113].mxu0 }
 0x1f6   :  { %v9253_v61 = vpop.f32.mrb[114].mxu0 }
 0x1f7   :  { %11759 = vst [vmem:[#allocation18_spill] sm:$0xff] %v9253_v61  ;;  %v910_v58 = vadd.f32 %v909_v48, %v9253_v61  ;;  %v826_v23 = vpop.f32.mrb[115].mxu0 }
 0x1fc   :  { %v9256_v0 = vpop.f32.mrb[116].mxu0 }
 0x1fd   :  { %11760 = vst [vmem:[#allocation19_spill] sm:$0xff] %v9256_v0  ;;  %v911_v4 = vadd.f32 %v910_v58, %v9256_v0  ;;  %v831_v39 = vpop.f32.mrb[117].mxu0 }
 0x1fe   :  { %v9259_v6 = vpop.f32.mrb[118].mxu0 }
 0x1ff   :  { %11761 = vst [vmem:[#allocation20_spill] sm:$0xff] %v9259_v6  ;;  %v912_v21 = vadd.f32 %v911_v4, %v9259_v6  ;;  %v834_v52 = vpop.f32.mrb[119].mxu0 }
 0x204   :  { %v9262_v29 = vpop.f32.mrb[120].mxu0 }
 0x205   :  { %11762 = vst [vmem:[#allocation21_spill] sm:$0xff] %v9262_v29  ;;  %v913_v33 = vadd.f32 %v912_v21, %v9262_v29  ;;  %v839_v11 = vpop.f32.mrb[121].mxu0 }
 0x206   :  { %v9265_v41 = vpop.f32.mrb[122].mxu0 }
 0x207   :  { %v914_v48 = vadd.f32 %v913_v33, %v9265_v41  ;;  %v842_v23 = vpop.f32.mrb[123].mxu0 }
 0x20c   :  { %v9268_v61 = vpop.f32.mrb[124].mxu0 }
 0x20d   :  { %v915_v58 = vadd.f32 %v914_v48, %v9268_v61  ;;  %v847_v39 = vpop.f32.mrb[125].mxu0 }
 0x20e   :  { %v9271_v0 = vpop.f32.mrb[126].mxu0  ;;  %v11775_v39 = vld [vmem:[#allocation11_spill] sm:$0xff] }
 0x20f   :  { %v916_v4 = vadd.f32 %v915_v58, %v9271_v0  ;;  %v850_v52 = vpop.f32.mrb[127].mxu0  ;;  %v11773_v58 = vld [vmem:[#allocation10_spill] sm:$0xff] }
 0x210   :  { %v11779_v52 = vld [vmem:[#allocation13_spill] sm:$0xff] }
 0x211   :  { %v917_v6 = vrot.slane %v916_v4, 4 }
 0x213   :  { %v918_v15 = vadd.f32 %v917_v6, %v916_v4  ;;  %v11777_v4 = vld [vmem:[#allocation12_spill] sm:$0xff] }
 0x215   :  { %v919_v3 = vrot.slane %v918_v15, 2 }
 0x217   :  { %v920_v21 = vadd.f32 %v919_v3, %v918_v15  ;;  %v11770_v15 = vld [vmem:[#allocation8_spill] sm:$0xff] }
 0x219   :  { %v921_v11 = vrot.slane %v920_v21, 1 }
 0x21b   :  { %v922_v29 = vadd.f32 %v921_v11, %v920_v21  ;;  %v11781_v11 = vld [vmem:[#allocation14_spill] sm:$0xff] }
 0x21d   :  { %v9274_v54 = vmul.f32 0.001953125, %v922_v29  ;;  %v11771_v29 = vld [vmem:[#allocation9_spill] sm:$0xff] }
 0x21f   :  { %v9278_v33 = vsub.f32 %v9003_v9, %v9274_v54  ;;  %v9282_v48 = vsub.f32 %v9008_v12, %v9274_v54  ;;  %v9286_v23 = vsub.f32 %v9015_v16, %v9274_v54  ;;  %v9290_v6 = vsub.f32 %v9021_v20, %v9274_v54 }
 0x220   :  { %v9294_v3 = vsub.f32 %v9027_v24, %v9274_v54  ;;  %v9298_v9 = vsub.f32 %v9033_v28, %v9274_v54  ;;  %v9302_v12 = vsub.f32 %v9039_v32, %v9274_v54  ;;  %v9306_v16 = vsub.f32 %v9045_v36, %v9274_v54 }
 0x221   :  { %11763 = vst [vmem:[#allocation22_spill] sm:$0xff] %v9278_v33  ;;  %11764 = vst [vmem:[#allocation23_spill] sm:$0xff] %v9282_v48  ;;  %v9310_v20 = vsub.f32 %v9051_v40, %v9274_v54  ;;  %v9314_v24 = vsub.f32 %v9057_v44, %v9274_v54  ;;  %v9318_v28 = vsub.f32 %v9060_v47, %v9274_v54 }
 0x222   :  { %11765 = vst [vmem:[#allocation24_spill] sm:$0xff] %v9286_v23  ;;  %v9322_v32 = vsub.f32 %v9063_v50, %v9274_v54  ;;  %v9326_v36 = vsub.f32 %v9066_v53, %v9274_v54  ;;  %v9330_v40 = vsub.f32 %v9069_v56, %v9274_v54  ;;  %v9334_v44 = vsub.f32 %v9072_v59, %v9274_v54 }
 0x223   :  { %v9338_v47 = vsub.f32 %v9075_v62, %v9274_v54  ;;  %v9342_v50 = vsub.f32 %v9078_v2, %v9274_v54  ;;  %v9346_v53 = vsub.f32 %v9081_v5, %v9274_v54  ;;  %v9350_v56 = vsub.f32 %v9136_v10, %v9274_v54 }
 0x224   :  { %v9354_v59 = vsub.f32 %v9139_v14, %v9274_v54  ;;  %v9358_v62 = vsub.f32 %v9142_v18, %v9274_v54  ;;  %v9362_v2 = vsub.f32 %v9145_v22, %v9274_v54  ;;  %v9366_v5 = vsub.f32 %v9148_v26, %v9274_v54 }
 0x225   :  { %v9370_v10 = vsub.f32 %v9151_v30, %v9274_v54  ;;  %v9374_v14 = vsub.f32 %v9154_v34, %v9274_v54  ;;  %v9378_v18 = vsub.f32 %v9157_v38, %v9274_v54  ;;  %v9382_v22 = vsub.f32 %v9160_v42, %v9274_v54 }
 0x226   :  { %v9386_v26 = vsub.f32 %v9163_v46, %v9274_v54  ;;  %v9390_v30 = vsub.f32 %v9166_v51, %v9274_v54  ;;  %v9394_v34 = vsub.f32 %v9169_v55, %v9274_v54  ;;  %v9398_v38 = vsub.f32 %v9172_v60, %v9274_v54 }
 0x227   :  { %v9402_v42 = vsub.f32 %v9175_v1, %v9274_v54  ;;  %v9406_v46 = vsub.f32 %v9178_v7, %v9274_v54  ;;  %v9410_v51 = vsub.f32 %v9181_v13, %v9274_v54  ;;  %v9414_v55 = vsub.f32 %v9184_v19, %v9274_v54 }
 0x228   :  { %v9418_v60 = vsub.f32 %v9187_v25, %v9274_v54  ;;  %v9422_v1 = vsub.f32 %v9190_v31, %v9274_v54  ;;  %v9426_v7 = vsub.f32 %v9193_v37, %v9274_v54  ;;  %v9430_v13 = vsub.f32 %v9196_v43, %v9274_v54 }
 0x229   :  { %v9434_v19 = vsub.f32 %v9199_v49, %v9274_v54  ;;  %v9438_v25 = vsub.f32 %v9202_v57, %v9274_v54  ;;  %v9442_v31 = vsub.f32 %v9205_v63, %v9274_v54  ;;  %v9446_v37 = vsub.f32 %v9208_v8, %v9274_v54 }
 0x22a   :  { %v9450_v43 = vsub.f32 %v9211_v17, %v9274_v54  ;;  %v9454_v49 = vsub.f32 %v9214_v27, %v9274_v54  ;;  %v9458_v57 = vsub.f32 %v9217_v35, %v9274_v54  ;;  %v9462_v63 = vsub.f32 %v9220_v45, %v9274_v54 }
 0x22b   :  { %v9466_v8 = vsub.f32 %v11770_v15, %v9274_v54  ;;  %v9470_v17 = vsub.f32 %v11771_v29, %v9274_v54  ;;  %v9474_v27 = vsub.f32 %v11773_v58, %v9274_v54  ;;  %v9478_v35 = vsub.f32 %v11775_v39, %v9274_v54  ;;  %v11783_v29 = vld [vmem:[#allocation15_spill] sm:$0xff] }
 0x22c   :  { %11766 = vst [vmem:[#allocation25_spill] sm:$0xff] %v9450_v43  ;;  %11767 = vst [vmem:[#allocation26_spill] sm:$0xff] %v9454_v49  ;;  %v9482_v45 = vsub.f32 %v11777_v4, %v9274_v54  ;;  %v9486_v21 = vsub.f32 %v11779_v52, %v9274_v54  ;;  %v9490_v15 = vsub.f32 %v11781_v11, %v9274_v54 }
 0x22d   :  { %11768 = vst [vmem:[#allocation27_spill] sm:$0xff] %v9458_v57  ;;  %11769 = vst [vmem:[#allocation28_spill] sm:$0xff] %v9462_v63  ;;  %v9494_v58 = vsub.f32 %v11783_v29, %v9274_v54 }
 0x22e   :  { %11772 = vst [vmem:[#allocation8_spill] sm:$0xff] %v9470_v17  ;;  %11774 = vst [vmem:[#allocation9_spill] sm:$0xff] %v9474_v27  ;;  %v11785_v27 = vld [vmem:[#allocation16_spill] sm:$0xff] }
 0x22f   :  { %11776 = vst [vmem:[#allocation10_spill] sm:$0xff] %v9478_v35  ;;  %11778 = vst [vmem:[#allocation11_spill] sm:$0xff] %v9482_v45  ;;  %v9498_v39 = vsub.f32 %v11785_v27, %v9274_v54  ;;  %v11787_v35 = vld [vmem:[#allocation17_spill] sm:$0xff]  ;;  %v11789_v45 = vld [vmem:[#allocation18_spill] sm:$0xff] }
 0x230   :  { %11780 = vst [vmem:[#allocation12_spill] sm:$0xff] %v9486_v21  ;;  %11782 = vst [vmem:[#allocation13_spill] sm:$0xff] %v9490_v15  ;;  %v9502_v4 = vsub.f32 %v11787_v35, %v9274_v54  ;;  %v9506_v52 = vsub.f32 %v11789_v45, %v9274_v54  ;;  %v11791_v21 = vld [vmem:[#allocation19_spill] sm:$0xff]  ;;  %v11793_v15 = vld [vmem:[#allocation20_spill] sm:$0xff]  ;;  %v9522_v35 = vsub.f32 %v9265_v41, %v9274_v54 }
 0x231   :  { %11784 = vst [vmem:[#allocation14_spill] sm:$0xff] %v9494_v58  ;;  %11786 = vst [vmem:[#allocation15_spill] sm:$0xff] %v9498_v39  ;;  %v9510_v11 = vsub.f32 %v11791_v21, %v9274_v54  ;;  %v9514_v29 = vsub.f32 %v11793_v15, %v9274_v54  ;;  %v11795_v58 = vld [vmem:[#allocation21_spill] sm:$0xff]  ;;  %v9526_v45 = vsub.f32 %v9268_v61, %v9274_v54 }
 0x232   :  { %11788 = vst [vmem:[#allocation16_spill] sm:$0xff] %v9502_v4  ;;  %11790 = vst [vmem:[#allocation17_spill] sm:$0xff] %v9506_v52  ;;  %v9518_v27 = vsub.f32 %v11795_v58, %v9274_v54  ;;  %v9530_v21 = vsub.f32 %v9271_v0, %v9274_v54  ;;  %v989_v15 = vmul.f32 %v9278_v33, %v9278_v33 }
 0x233   :  { %11792 = vst [vmem:[#allocation18_spill] sm:$0xff] %v9510_v11  ;;  %11794 = vst [vmem:[#allocation19_spill] sm:$0xff] %v9514_v29  ;;  %v990_v29 = vmul.f32 %v9282_v48, %v9282_v48  ;;  %v991_v58 = vmul.f32 %v9286_v23, %v9286_v23  ;;  %v992_v41 = vmul.f32 %v9290_v6, %v9290_v6 }
 0x234   :  { %11796 = vst [vmem:[#allocation20_spill] sm:$0xff] %v9518_v27  ;;  %11797 = vst [vmem:[#allocation21_spill] sm:$0xff] %v9522_v35  ;;  %v993_v61 = vmul.f32 %v9294_v3, %v9294_v3  ;;  %v994_v0 = vmul.f32 %v9298_v9, %v9298_v9  ;;  %v995_v33 = vmul.f32 %v9302_v12, %v9302_v12 }
 0x235   :  { %11798 = vst [vmem:[#allocation29_spill] sm:$0xff] %v9526_v45  ;;  %v1053_v27 = vadd.f32 %v990_v29, %v989_v15  ;;  %v996_v23 = vmul.f32 %v9306_v16, %v9306_v16  ;;  %v997_v15 = vmul.f32 %v9310_v20, %v9310_v20 }
 0x237   :  { %v1054_v35 = vadd.f32 %v1053_v27, %v991_v58  ;;  %v998_v58 = vmul.f32 %v9314_v24, %v9314_v24 }
 0x239   :  { %v1055_v45 = vadd.f32 %v1054_v35, %v992_v41  ;;  %v999_v41 = vmul.f32 %v9318_v28, %v9318_v28 }
 0x23b   :  { %v1056_v54 = vadd.f32 %v1055_v45, %v993_v61  ;;  %v1000_v61 = vmul.f32 %v9322_v32, %v9322_v32 }
 0x23d   :  { %v1057_v48 = vadd.f32 %v1056_v54, %v994_v0  ;;  %v1001_v54 = vmul.f32 %v9326_v36, %v9326_v36 }
 0x23f   :  { %v1058_v29 = vadd.f32 %v1057_v48, %v995_v33  ;;  %v1002_v48 = vmul.f32 %v9330_v40, %v9330_v40 }
 0x241   :  { %v1059_v27 = vadd.f32 %v1058_v29, %v996_v23  ;;  %v1003_v29 = vmul.f32 %v9334_v44, %v9334_v44 }
 0x243   :  { %v1060_v35 = vadd.f32 %v1059_v27, %v997_v15  ;;  %v1004_v27 = vmul.f32 %v9338_v47, %v9338_v47 }
 0x245   :  { %v1061_v45 = vadd.f32 %v1060_v35, %v998_v58  ;;  %v1005_v35 = vmul.f32 %v9342_v50, %v9342_v50 }
 0x247   :  { %v1062_v0 = vadd.f32 %v1061_v45, %v999_v41  ;;  %v1006_v45 = vmul.f32 %v9346_v53, %v9346_v53 }
 0x249   :  { %v1063_v33 = vadd.f32 %v1062_v0, %v1000_v61  ;;  %v1007_v0 = vmul.f32 %v9350_v56, %v9350_v56 }
 0x24b   :  { %v1064_v23 = vadd.f32 %v1063_v33, %v1001_v54  ;;  %v1008_v33 = vmul.f32 %v9354_v59, %v9354_v59 }
 0x24d   :  { %v1065_v15 = vadd.f32 %v1064_v23, %v1002_v48  ;;  %v1009_v23 = vmul.f32 %v9358_v62, %v9358_v62 }
 0x24f   :  { %v1066_v58 = vadd.f32 %v1065_v15, %v1003_v29  ;;  %v1010_v15 = vmul.f32 %v9362_v2, %v9362_v2 }
 0x251   :  { %v1067_v41 = vadd.f32 %v1066_v58, %v1004_v27  ;;  %v1011_v58 = vmul.f32 %v9366_v5, %v9366_v5 }
 0x253   :  { %v1068_v61 = vadd.f32 %v1067_v41, %v1005_v35  ;;  %v1012_v41 = vmul.f32 %v9370_v10, %v9370_v10 }
 0x255   :  { %v1069_v54 = vadd.f32 %v1068_v61, %v1006_v45  ;;  %v1013_v61 = vmul.f32 %v9374_v14, %v9374_v14 }
 0x257   :  { %v1070_v48 = vadd.f32 %v1069_v54, %v1007_v0  ;;  %v1014_v54 = vmul.f32 %v9378_v18, %v9378_v18 }
 0x259   :  { %v1071_v29 = vadd.f32 %v1070_v48, %v1008_v33  ;;  %v1015_v48 = vmul.f32 %v9382_v22, %v9382_v22 }
 0x25b   :  { %v1072_v27 = vadd.f32 %v1071_v29, %v1009_v23  ;;  %v1016_v29 = vmul.f32 %v9386_v26, %v9386_v26 }
 0x25d   :  { %v1073_v35 = vadd.f32 %v1072_v27, %v1010_v15  ;;  %v1017_v27 = vmul.f32 %v9390_v30, %v9390_v30 }
 0x25f   :  { %v1074_v45 = vadd.f32 %v1073_v35, %v1011_v58  ;;  %v1018_v35 = vmul.f32 %v9394_v34, %v9394_v34 }
 0x261   :  { %v1075_v0 = vadd.f32 %v1074_v45, %v1012_v41  ;;  %v1019_v45 = vmul.f32 %v9398_v38, %v9398_v38 }
 0x263   :  { %v1076_v33 = vadd.f32 %v1075_v0, %v1013_v61  ;;  %v1020_v0 = vmul.f32 %v9402_v42, %v9402_v42 }
 0x265   :  { %v1077_v23 = vadd.f32 %v1076_v33, %v1014_v54  ;;  %v1021_v33 = vmul.f32 %v9406_v46, %v9406_v46 }
 0x267   :  { %v1078_v15 = vadd.f32 %v1077_v23, %v1015_v48  ;;  %v1022_v23 = vmul.f32 %v9410_v51, %v9410_v51 }
 0x269   :  { %v1079_v58 = vadd.f32 %v1078_v15, %v1016_v29  ;;  %v1023_v15 = vmul.f32 %v9414_v55, %v9414_v55 }
 0x26b   :  { %v1080_v41 = vadd.f32 %v1079_v58, %v1017_v27  ;;  %v1024_v58 = vmul.f32 %v9418_v60, %v9418_v60 }
 0x26d   :  { %v1081_v61 = vadd.f32 %v1080_v41, %v1018_v35  ;;  %v1025_v41 = vmul.f32 %v9422_v1, %v9422_v1 }
 0x26f   :  { %v1082_v54 = vadd.f32 %v1081_v61, %v1019_v45  ;;  %v1026_v61 = vmul.f32 %v9426_v7, %v9426_v7 }
 0x271   :  { %v1083_v48 = vadd.f32 %v1082_v54, %v1020_v0  ;;  %v1027_v54 = vmul.f32 %v9430_v13, %v9430_v13 }
 0x273   :  { %v1084_v29 = vadd.f32 %v1083_v48, %v1021_v33  ;;  %v1028_v48 = vmul.f32 %v9434_v19, %v9434_v19 }
 0x275   :  { %v1085_v27 = vadd.f32 %v1084_v29, %v1022_v23  ;;  %v1029_v29 = vmul.f32 %v9438_v25, %v9438_v25 }
 0x277   :  { %v1086_v35 = vadd.f32 %v1085_v27, %v1023_v15  ;;  %v1030_v27 = vmul.f32 %v9442_v31, %v9442_v31 }
 0x279   :  { %v1087_v45 = vadd.f32 %v1086_v35, %v1024_v58  ;;  %v1031_v35 = vmul.f32 %v9446_v37, %v9446_v37 }
 0x27b   :  { %v1088_v0 = vadd.f32 %v1087_v45, %v1025_v41  ;;  %v1032_v45 = vmul.f32 %v9450_v43, %v9450_v43 }
 0x27d   :  { %v1089_v33 = vadd.f32 %v1088_v0, %v1026_v61  ;;  %v1033_v0 = vmul.f32 %v9454_v49, %v9454_v49 }
 0x27f   :  { %v1090_v23 = vadd.f32 %v1089_v33, %v1027_v54  ;;  %v1034_v33 = vmul.f32 %v9458_v57, %v9458_v57 }
 0x281   :  { %v1091_v15 = vadd.f32 %v1090_v23, %v1028_v48  ;;  %v1035_v23 = vmul.f32 %v9462_v63, %v9462_v63 }
 0x283   :  { %v1092_v58 = vadd.f32 %v1091_v15, %v1029_v29  ;;  %v1036_v15 = vmul.f32 %v9466_v8, %v9466_v8 }
 0x285   :  { %v1093_v41 = vadd.f32 %v1092_v58, %v1030_v27  ;;  %v1037_v58 = vmul.f32 %v9470_v17, %v9470_v17 }
 0x287   :  { %v1094_v61 = vadd.f32 %v1093_v41, %v1031_v35  ;;  %v11799_v41 = vld [vmem:[#allocation9_spill] sm:$0xff] }
 0x288   :  { %v1038_v49 = vmul.f32 %v11799_v41, %v11799_v41 }
 0x289   :  { %v1095_v54 = vadd.f32 %v1094_v61, %v1032_v45  ;;  %v11800_v61 = vld [vmem:[#allocation10_spill] sm:$0xff] }
 0x28a   :  { %v1039_v57 = vmul.f32 %v11800_v61, %v11800_v61 }
 0x28b   :  { %v1096_v48 = vadd.f32 %v1095_v54, %v1033_v0  ;;  %v11801_v54 = vld [vmem:[#allocation11_spill] sm:$0xff] }
 0x28c   :  { %v1040_v63 = vmul.f32 %v11801_v54, %v11801_v54 }
 0x28d   :  { %v1097_v29 = vadd.f32 %v1096_v48, %v1034_v33  ;;  %v11802_v48 = vld [vmem:[#allocation12_spill] sm:$0xff] }
 0x28e   :  { %v1041_v43 = vmul.f32 %v11802_v48, %v11802_v48 }
 0x28f   :  { %v1098_v27 = vadd.f32 %v1097_v29, %v1035_v23  ;;  %v11803_v29 = vld [vmem:[#allocation13_spill] sm:$0xff] }
 0x290   :  { %v1042_v17 = vmul.f32 %v11803_v29, %v11803_v29 }
 0x291   :  { %v1099_v35 = vadd.f32 %v1098_v27, %v1036_v15  ;;  %v8140_v27 = vld [vmem:[%s11695_s4 + $0x40] sm:$0xff]  }
 0x292   :  { %7600 = vmatprep.subr.bf16.mxu1 %v8140_v27 }
 0x293   :  { %v1100_v45 = vadd.f32 %v1099_v35, %v1037_v58  ;;  %v11804_v58 = vld [vmem:[#allocation14_spill] sm:$0xff] }
 0x294   :  { %v1043_v35 = vmul.f32 %v11804_v58, %v11804_v58 }
 0x295   :  { %v1101_v0 = vadd.f32 %v1100_v45, %v1038_v49  ;;  %v8141_v49 = vld [vmem:[%s11695_s4] sm:$0xff]   ;;  %v1044_v45 = vmul.f32 %v9498_v39, %v9498_v39  ;;  %v8166_v39 = vld [vmem:[%s11695_s4 + $0x5f0] sm:$0xff]  }
 0x296   :  { %7601 = vmatpush3.bf16.msra.mxu1 %v8141_v49  ;;  %v8147_v49 = vld [vmem:[%s11695_s4 + $0x588] sm:$0xff]  }
 0x297   :  { %v1102_v33 = vadd.f32 %v1101_v0, %v1039_v57  ;;  %v8142_v57 = vld [vmem:[%s11695_s4 + $0x5c0] sm:$0xff]  }
 0x298   :  { %7908 = vmatprep.subr.bf16.mxu0 %v8142_v57  ;;  %v1046_v57 = vmul.f32 %v9506_v52, %v9506_v52 }
 0x299   :  { %v1103_v23 = vadd.f32 %v1102_v33, %v1040_v63  ;;  %v8144_v33 = vld [vmem:[%s11695_s4 + $0x48] sm:$0xff]  }
 0x29a   :  { %7602 = vmatprep.subr.bf16.mxu1 %v8144_v33 }
 0x29b   :  { %v1104_v15 = vadd.f32 %v1103_v23, %v1041_v43  ;;  %v8143_v43 = vld [vmem:[%s11695_s4 + $0x580] sm:$0xff]   ;;  %v8146_v23 = vld [vmem:[%s11695_s4 + $0x5c8] sm:$0xff]  }
 0x29c   :  { %7909 = vmatpush3.bf16.msra.mxu0 %v8143_v43  ;;  %v8149_v43 = vld [vmem:[%s11695_s4 + $0x10] sm:$0xff]  }
 0x29d   :  { %v1105_v63 = vadd.f32 %v1104_v15, %v1042_v17  ;;  %v8145_v17 = vld [vmem:[%s11695_s4 + $0x8] sm:$0xff]   ;;  %v1045_v15 = vmul.f32 %v9502_v4, %v9502_v4  ;;  %7910 = vmatprep.subr.bf16.mxu0 %v8146_v23  ;;  %v11805_v23 = vld [vmem:[#allocation19_spill] sm:$0xff] }
 0x29e   :  { %7603 = vmatpush3.bf16.msra.mxu1 %v8145_v17  ;;  %v8151_v17 = vld [vmem:[%s11695_s4 + $0x590] sm:$0xff]  }
 0x29f   :  { %v1106_v0 = vadd.f32 %v1105_v63, %v1043_v35  ;;  %v8148_v63 = vld [vmem:[%s11695_s4 + $0x50] sm:$0xff]  }
 0x2a0   :  { %7911 = vmatpush3.bf16.msra.mxu0 %v8147_v49  ;;  %7604 = vmatprep.subr.bf16.mxu1 %v8148_v63  ;;  %v8152_v49 = vld [vmem:[%s11695_s4 + $0x58] sm:$0xff]   ;;  %v11806_v63 = vld [vmem:[#allocation20_spill] sm:$0xff] }
 0x2a1   :  { %v1107_v27 = vadd.f32 %v1106_v0, %v1044_v45  ;;  %v8150_v45 = vld [vmem:[%s11695_s4 + $0x5d0] sm:$0xff]   ;;  %v1047_v0 = vmul.f32 %v9510_v11, %v9510_v11 }
 0x2a2   :  { %7605 = vmatpush3.bf16.msra.mxu1 %v8149_v43  ;;  %7912 = vmatprep.subr.bf16.mxu0 %v8150_v45  ;;  %v1049_v43 = vmul.f32 %v11806_v63, %v11806_v63  ;;  %v8158_v63 = vld [vmem:[%s11695_s4 + $0x5e0] sm:$0xff]   ;;  %v11808_v11 = vld [vmem:[#allocation29_spill] sm:$0xff] }
 0x2a3   :  { %v1108_v35 = vadd.f32 %v1107_v27, %v1045_v15  ;;  %v1048_v15 = vmul.f32 %v11805_v23, %v11805_v23  ;;  %7606 = vmatprep.subr.bf16.mxu1 %v8152_v49  ;;  %v8159_v23 = vld [vmem:[%s11695_s4 + $0x5a0] sm:$0xff]   ;;  %v1051_v52 = vmul.f32 %v11808_v11, %v11808_v11  ;;  %v2279_v11 = vld [vmem:[#allocation3 + $0x119] sm:$0xf] }
 0x2a4   :  { %7913 = vmatpush3.bf16.msra.mxu0 %v8151_v17  ;;  %v8157_v17 = vld [vmem:[%s11695_s4 + $0x20] sm:$0xff]   ;;  %v2281_v48 = vrot.slane %v2279_v11, 4  ;;  %v2251_v11 = vld [vmem:[#allocation3 + $0xe9] sm:$0xf] }
 0x2a5   :  { %v1109_v33 = vadd.f32 %v1108_v35, %v1046_v57  ;;  %v8153_v57 = vld [vmem:[%s11695_s4 + $0x18] sm:$0xff]  }
 0x2a6   :  { %v8154_v35 = vld [vmem:[%s11695_s4 + $0x5d8] sm:$0xff]   ;;  %7607 = vmatpush3.bf16.msra.mxu1 %v8153_v57  ;;  %v8160_v57 = vld [vmem:[%s11695_s4 + $0x68] sm:$0xff]   ;;  %2283 = vst [vmem:[#allocation4 + $0x310] sm:$0xf0] %v2281_v48 }
 0x2a7   :  { %v1110_v27 = vadd.f32 %v1109_v33, %v1047_v0  ;;  %v8155_v0 = vld [vmem:[%s11695_s4 + $0x598] sm:$0xff]   ;;  %v8156_v33 = vld [vmem:[%s11695_s4 + $0x60] sm:$0xff]   ;;  %7914 = vmatprep.subr.bf16.mxu0 %v8154_v35  ;;  %v8162_v35 = vld [vmem:[%s11695_s4 + $0x5e8] sm:$0xff]  }
 0x2a8   :  { %7915 = vmatpush3.bf16.msra.mxu0 %v8155_v0  ;;  %7608 = vmatprep.subr.bf16.mxu1 %v8156_v33  ;;  %v1631_v0 = vld [vmem:[#allocation3 + $0x30] sm:$0xf]  ;;  %v1052_v33 = vmul.f32 %v9530_v21, %v9530_v21  ;;  %v8170_v48 = vld [vmem:[%s11695_s4 + $0x5f8] sm:$0xff]  }
 0x2a9   :  { %v1111_v45 = vadd.f32 %v1110_v27, %v1048_v15  ;;  %v11807_v15 = vld [vmem:[#allocation21_spill] sm:$0xff]  ;;  %7916 = vmatprep.subr.bf16.mxu0 %v8158_v63  ;;  %1632 = vst [vmem:[#allocation4 + $0x8] sm:$0xf] %v1631_v0 }
 0x2aa   :  { %v1050_v27 = vmul.f32 %v11807_v15, %v11807_v15  ;;  %7609 = vmatpush3.bf16.msra.mxu1 %v8157_v17  ;;  %v8164_v63 = vld [vmem:[%s11695_s4 + $0x70] sm:$0xff]  }
 0x2ab   :  { %v1112_v49 = vadd.f32 %v1111_v45, %v1049_v43  ;;  %v8161_v43 = vld [vmem:[%s11695_s4 + $0x28] sm:$0xff]   ;;  %7610 = vmatprep.subr.bf16.mxu1 %v8160_v57  ;;  %v8165_v17 = vld [vmem:[%s11695_s4 + $0x30] sm:$0xff]  }
 0x2ac   :  { %v8163_v45 = vld [vmem:[%s11695_s4 + $0x5a8] sm:$0xff]   ;;  %7917 = vmatpush3.bf16.msra.mxu0 %v8159_v23  ;;  %v1601_v23 = vld [vmem:[#allocation3] sm:$0xf]  ;;  %v1688_v0 = vld [vmem:[#allocation3 + $0x31] sm:$0xf] }
 0x2ad   :  { %v1113_v15 = vadd.f32 %v1112_v49, %v1050_v27  ;;  %v2265_v27 = vld [vmem:[#allocation3 + $0x59] sm:$0xf]  ;;  %v2237_v49 = vld [vmem:[#allocation3 + $0x29] sm:$0xf]  ;;  %7918 = vmatprep.subr.bf16.mxu0 %v8162_v35  ;;  %1602 = vst [vmem:[#allocation4] sm:$0xf] %v1601_v23 }
 0x2ae   :  { %v2267_v58 = vrot.slane %v2265_v27, 4  ;;  %v2239_v29 = vrot.slane %v2237_v49, 4  ;;  %7611 = vmatpush3.bf16.msra.mxu1 %v8161_v43  ;;  %v8168_v35 = vld [vmem:[%s11695_s4 + $0x78] sm:$0xff]   ;;  %1689 = vst [vmem:[#allocation4 + $0x18] sm:$0xf] %v1688_v0 }
 0x2af   :  { %v1114_v4 = vadd.f32 %v1113_v15, %v1051_v52  ;;  %v8167_v52 = vld [vmem:[%s11695_s4 + $0x5b0] sm:$0xff]   ;;  %7612 = vmatprep.subr.bf16.mxu1 %v8164_v63  ;;  %v1660_v27 = vld [vmem:[#allocation3 + $0x1] sm:$0xf] }
 0x2b0   :  { %2269 = vst [vmem:[#allocation4 + $0x180] sm:$0xf0] %v2267_v58  ;;  %2241 = vst [vmem:[#allocation4 + $0x178] sm:$0xf0] %v2239_v29  ;;  %v1646_v15 = vld [vmem:[#allocation3 + $0xf0] sm:$0xf]  ;;  %7919 = vmatpush3.bf16.msra.mxu0 %v8163_v45 }
 0x2b1   :  { %v1115_v54 = vadd.f32 %v1114_v4, %v1052_v33  ;;  %1647 = vst [vmem:[#allocation4 + $0x198] sm:$0xf] %v1646_v15  ;;  %v1616_v4 = vld [vmem:[#allocation3 + $0xc0] sm:$0xf]  ;;  %7920 = vmatprep.subr.bf16.mxu0 %v8166_v39  ;;  %v8169_v58 = vld [vmem:[%s11695_s4 + $0x38] sm:$0xff]   ;;  %v2253_v29 = vrot.slane %v2251_v11, 4 }
 0x2b2   :  { %1617 = vst [vmem:[#allocation4 + $0x190] sm:$0xf] %v1616_v4  ;;  %7613 = vmatpush3.bf16.msra.mxu1 %v8165_v17  ;;  %v8171_v45 = vld [vmem:[%s11695_s4 + $0x5b8] sm:$0xff]   ;;  %v8172_v39 = vld [vmem:[%s11695_s4 + $0xc0] sm:$0xff]   ;;  %1661 = vst [vmem:[#allocation4 + $0x10] sm:$0xf] %v1660_v27 }
 0x2b3   :  { %v1116_v57 = vrot.slane %v1115_v54, 4  ;;  %2255 = vst [vmem:[#allocation4 + $0x308] sm:$0xf0] %v2253_v29  ;;  %7614 = vmatprep.subr.bf16.mxu1 %v8168_v35  ;;  %v1702_v49 = vld [vmem:[#allocation3 + $0xf1] sm:$0xf] }
 0x2b4   :  { %7921 = vmatpush3.bf16.msra.mxu0 %v8167_v52  ;;  %1703 = vst [vmem:[#allocation4 + $0x1a8] sm:$0xf] %v1702_v49  ;;  %v1674_v23 = vld [vmem:[#allocation3 + $0xc1] sm:$0xf]  ;;  %v1832_v49 = vld [vmem:[#allocation3 + $0x91] sm:$0xf] }
 0x2b5   :  { %v1117_v43 = vadd.f32 %v1116_v57, %v1115_v54  ;;  %7922 = vmatprep.subr.bf16.mxu0 %v8170_v48  ;;  %1675 = vst [vmem:[#allocation4 + $0x1a0] sm:$0xf] %v1674_v23  ;;  %v1745_v15 = vld [vmem:[#allocation3 + $0x60] sm:$0xf]  ;;  %v1775_v48 = vld [vmem:[#allocation3 + $0x90] sm:$0xf] }
 0x2b6   :  { %7615 = vmatpush3.bf16.msra.mxu1 %v8169_v58  ;;  %1746 = vst [vmem:[#allocation4 + $0x28] sm:$0xf] %v1745_v15  ;;  %v1716_v35 = vld [vmem:[#allocation3 + $0x2] sm:$0xf]  ;;  %1776 = vst [vmem:[#allocation4 + $0x30] sm:$0xf] %v1775_v48 }
 0x2b7   :  { %v1118_v63 = vrot.slane %v1117_v43, 2  ;;  %7628 = vmatprep.subr.bf16.mxu1 %v8172_v39  ;;  %1717 = vst [vmem:[#allocation4 + $0x20] sm:$0xf] %v1716_v35  ;;  %v1760_v4 = vld [vmem:[#allocation3 + $0x120] sm:$0xf]  ;;  %v11810_v23 = vld [vmem:[#allocation22_spill] sm:$0xff] }
 0x2b8   :  { %7923 = vmatpush3.bf16.msra.mxu0 %v8171_v45  ;;  %1761 = vst [vmem:[#allocation4 + $0x1b8] sm:$0xf] %v1760_v4  ;;  %v1730_v11 = vld [vmem:[#allocation3 + $0xc2] sm:$0xf]  ;;  %v1790_v45 = vld [vmem:[#allocation3 + $0x150] sm:$0xf] }
 0x2b9   :  { %v1119_v33 = vadd.f32 %v1118_v63, %v1117_v43  ;;  %1731 = vst [vmem:[#allocation4 + $0x1b0] sm:$0xf] %v1730_v11  ;;  %v1804_v58 = vld [vmem:[#allocation3 + $0x61] sm:$0xf]  ;;  %v9762_v43 = vld [vmem:[%s11696_s2] ss:$0 sm:$0xff] }
 0x2ba   :  { %1805 = vst [vmem:[#allocation4 + $0x38] sm:$0xf] %v1804_v58  ;;  %v1818_v29 = vld [vmem:[#allocation3 + $0x121] sm:$0xf]  ;;  %1791 = vst [vmem:[#allocation4 + $0x1c0] sm:$0xf] %v1790_v45 }
 0x2bb   :  { %v1120_v54 = vrot.slane %v1119_v33, 1  ;;  %1819 = vst [vmem:[#allocation4 + $0x1c8] sm:$0xf] %v1818_v29  ;;  %v1860_v63 = vld [vmem:[#allocation3 + $0x62] sm:$0xf] }
 0x2bc   :  { %1861 = vst [vmem:[#allocation4 + $0x48] sm:$0xf] %v1860_v63  ;;  %1833 = vst [vmem:[#allocation4 + $0x40] sm:$0xf] %v1832_v49  ;;  %v1874_v58 = vld [vmem:[#allocation3 + $0x122] sm:$0xf] }
 0x2bd   :  { %v1121_v17 = vadd.f32 %v1120_v54, %v1119_v33  ;;  %1875 = vst [vmem:[#allocation4 + $0x1d8] sm:$0xf] %v1874_v58  ;;  %v11813_v58 = vld [vmem:[#allocation25_spill] sm:$0xff] }
 0x2bf   :  { %v1122_v52 = vmul.f32 0.001953125, %v1121_v17  ;;  %v9777_v17 = vld [vmem:[%s11697_s3] ss:$0 sm:$0xff] }
 0x2c0   :  { %11809 = vst [vmem:[#allocation9_spill] sm:$0xff] %v9777_v17 }
 0x2c1   :  { %v1123_v57 = vadd.f32 1e-05, %v1122_v52 }
 0x2c3   :  { %8684 = vrsqrt.f32 %v1123_v57 }
 0x2cd   :  { %v9764_v39 = vpop.eup %8684 }
 0x2ce   :  { %v1140_v0 = vmul.f32 %v9764_v39, %v9338_v47  ;;  %v1156_v33 = vmul.f32 %v9764_v39, %v9402_v42  ;;  %v1172_v27 = vmul.f32 %v9764_v39, %v9466_v8  ;;  %v1188_v54 = vmul.f32 %v9764_v39, %v9530_v21  ;;  %v11811_v47 = vld [vmem:[#allocation23_spill] sm:$0xff]  ;;  %v11812_v42 = vld [vmem:[#allocation24_spill] sm:$0xff] }
 0x2cf   :  { %v9781_v52 = vmul.f32 %v9764_v39, %v11810_v23  ;;  %v9785_v15 = vmul.f32 %v9764_v39, %v11811_v47  ;;  %v9789_v8 = vmul.f32 %v9764_v39, %v11812_v42  ;;  %v9793_v21 = vmul.f32 %v9764_v39, %v9290_v6 }
 0x2d0   :  { %v1210_v57 = vmul.f32 %v9762_v43, %v1140_v0  ;;  %v1226_v35 = vmul.f32 %v9762_v43, %v1156_v33  ;;  %v1242_v4 = vmul.f32 %v9762_v43, %v1172_v27  ;;  %v1258_v11 = vmul.f32 %v9762_v43, %v1188_v54  ;;  %v1846_v27 = vld [vmem:[#allocation3 + $0x151] sm:$0xf] }
 0x2d1   :  { %v9801_v48 = vmul.f32 %v9764_v39, %v9294_v3  ;;  %v9805_v29 = vmul.f32 %v9764_v39, %v9298_v9  ;;  %v9809_v6 = vmul.f32 %v9764_v39, %v9302_v12  ;;  %v9813_v45 = vmul.f32 %v9764_v39, %v9306_v16  ;;  %1847 = vst [vmem:[#allocation4 + $0x1d0] sm:$0xf] %v1846_v27 }
 0x2d2   :  { %v1280_v63 = vadd.f32 %v9777_v17, %v1210_v57  ;;  %v1296_v0 = vadd.f32 %v9777_v17, %v1226_v35  ;;  %v1312_v3 = vadd.f32 %v9777_v17, %v1242_v4  ;;  %v1328_v33 = vadd.f32 %v9777_v17, %v1258_v11  ;;  %v11833_v17 = vld [vmem:[#allocation19_spill] sm:$0xff] }
 0x2d3   :  { %v9821_v9 = vmul.f32 %v9764_v39, %v9310_v20  ;;  %v9825_v12 = vmul.f32 %v9764_v39, %v9314_v24  ;;  %v9829_v16 = vmul.f32 %v9764_v39, %v9318_v28  ;;  %v9833_v54 = vmul.f32 %v9764_v39, %v9322_v32 }
 0x2d4   :  { %v1344_v49 = vmax.f32 %v1280_v63, 0.0  ;;  %v1360_v23 = vmax.f32 %v1296_v0, 0.0  ;;  %v1376_v47 = vmax.f32 %v1312_v3, 0.0  ;;  %v1392_v42 = vmax.f32 %v1328_v33, 0.0  ;;  %v11814_v63 = vld [vmem:[#allocation26_spill] sm:$0xff]  ;;  %v11815_v0 = vld [vmem:[#allocation27_spill] sm:$0xff] }
 0x2d5   :  { %v9837_v20 = vmul.f32 %v9764_v39, %v9326_v36  ;;  %v9841_v24 = vmul.f32 %v9764_v39, %v9330_v40  ;;  %v9845_v28 = vmul.f32 %v9764_v39, %v9334_v44  ;;  %v9849_v32 = vmul.f32 %v9764_v39, %v9342_v50  ;;  %v11816_v3 = vld [vmem:[#allocation28_spill] sm:$0xff] }
 0x2d6   :  { %v1408_v57 = vmax.f32 %v1344_v49, %v1360_v23  ;;  %v1424_v35 = vmax.f32 %v1376_v47, %v1392_v42  ;;  %v9853_v4 = vmul.f32 %v9764_v39, %v9346_v53  ;;  %v9857_v36 = vmul.f32 %v9764_v39, %v9350_v56  ;;  %v11817_v33 = vld [vmem:[#allocation8_spill] sm:$0xff]  ;;  %v11818_v23 = vld [vmem:[#allocation11_spill] sm:$0xff] }
 0x2d7   :  { %v9861_v40 = vmul.f32 %v9764_v39, %v9354_v59  ;;  %v9865_v44 = vmul.f32 %v9764_v39, %v9358_v62  ;;  %v9869_v50 = vmul.f32 %v9764_v39, %v9362_v2  ;;  %v9873_v53 = vmul.f32 %v9764_v39, %v9366_v5  ;;  %v11819_v42 = vld [vmem:[#allocation12_spill] sm:$0xff] }
 0x2d8   :  { %v1440_v11 = vmax.f32 %v1408_v57, %v1424_v35  ;;  %v9877_v56 = vmul.f32 %v9764_v39, %v9370_v10  ;;  %v9881_v59 = vmul.f32 %v9764_v39, %v9374_v14  ;;  %v9885_v62 = vmul.f32 %v9764_v39, %v9378_v18  ;;  %v11821_v35 = vld [vmem:[#allocation13_spill] sm:$0xff] }
 0x2d9   :  { %v9889_v2 = vmul.f32 %v9764_v39, %v9382_v22  ;;  %v9893_v5 = vmul.f32 %v9764_v39, %v9386_v26  ;;  %v9897_v10 = vmul.f32 %v9764_v39, %v9390_v30  ;;  %v9901_v14 = vmul.f32 %v9764_v39, %v9394_v34 }
 0x2da   :  { %1456 = vst [vmem:[#allocation2 + $0x78] sm:$0xff] %v1440_v11  ;;  %v9905_v18 = vmul.f32 %v9764_v39, %v9398_v38  ;;  %v9909_v22 = vmul.f32 %v9764_v39, %v9406_v46  ;;  %v9913_v26 = vmul.f32 %v9764_v39, %v9410_v51  ;;  %v9917_v30 = vmul.f32 %v9764_v39, %v9414_v55 }
 0x2db   :  { %v9921_v34 = vmul.f32 %v9764_v39, %v9418_v60  ;;  %v9925_v38 = vmul.f32 %v9764_v39, %v9422_v1  ;;  %v9929_v46 = vmul.f32 %v9764_v39, %v9426_v7  ;;  %v9933_v51 = vmul.f32 %v9764_v39, %v9430_v13 }
 0x2dc   :  { %v9937_v55 = vmul.f32 %v9764_v39, %v9434_v19  ;;  %v9941_v60 = vmul.f32 %v9764_v39, %v9438_v25  ;;  %v9945_v1 = vmul.f32 %v9764_v39, %v9442_v31  ;;  %v9949_v7 = vmul.f32 %v9764_v39, %v9446_v37 }
 0x2dd   :  { %v9953_v13 = vmul.f32 %v9764_v39, %v11813_v58  ;;  %v9957_v19 = vmul.f32 %v9764_v39, %v11814_v63  ;;  %v9961_v25 = vmul.f32 %v9764_v39, %v11815_v0  ;;  %v9965_v31 = vmul.f32 %v9764_v39, %v11816_v3  ;;  %v11823_v58 = vld [vmem:[#allocation14_spill] sm:$0xff]  ;;  %v11825_v63 = vld [vmem:[#allocation15_spill] sm:$0xff]  ;;  %v11827_v0 = vld [vmem:[#allocation16_spill] sm:$0xff] }
 0x2de   :  { %v9969_v37 = vmul.f32 %v9764_v39, %v11817_v33  ;;  %v9973_v27 = vmul.f32 %v9764_v39, %v11799_v41  ;;  %v9977_v49 = vmul.f32 %v9764_v39, %v11800_v61  ;;  %v9981_v47 = vmul.f32 %v9764_v39, %v11818_v23  ;;  %v11829_v33 = vld [vmem:[#allocation17_spill] sm:$0xff] }
 0x2df   :  { %v9985_v57 = vmul.f32 %v9764_v39, %v11819_v42  ;;  %v9989_v11 = vmul.f32 %v9764_v39, %v11821_v35  ;;  %v9993_v41 = vmul.f32 %v9764_v39, %v11823_v58  ;;  %v9997_v61 = vmul.f32 %v9764_v39, %v11825_v63  ;;  %v11831_v42 = vld [vmem:[#allocation18_spill] sm:$0xff]  ;;  %v11835_v63 = vld [vmem:[#allocation20_spill] sm:$0xff] }
 0x2e0   :  { %v10001_v3 = vmul.f32 %v9764_v39, %v11827_v0  ;;  %v10005_v23 = vmul.f32 %v9764_v39, %v11829_v33  ;;  %v10009_v35 = vmul.f32 %v9764_v39, %v11831_v42  ;;  %v10013_v58 = vmul.f32 %v9764_v39, %v11833_v17 }
 0x2e1   :  { %11820 = vst [vmem:[#allocation10_spill] sm:$0xff] %v9985_v57  ;;  %11822 = vst [vmem:[#allocation22_spill] sm:$0xff] %v9989_v11  ;;  %v1598_v11 = vld [vmem:[#allocation2 + $0x7c] sm:$0xf]  ;;  %v11836_v57 = vld [vmem:[#allocation21_spill] sm:$0xff]  ;;  %v1196_v17 = vmul.f32 %v9762_v43, %v9785_v15  ;;  %v1197_v42 = vmul.f32 %v9762_v43, %v9789_v8  ;;  %v1203_v15 = vmul.f32 %v9762_v43, %v9821_v9 }
 0x2e2   :  { %11824 = vst [vmem:[#allocation23_spill] sm:$0xff] %v9993_v41  ;;  %11826 = vst [vmem:[#allocation24_spill] sm:$0xff] %v9997_v61  ;;  %v1595_v41 = vld [vmem:[#allocation2 + $0x78] sm:$0xf]  ;;  %v1185_v61 = vmul.f32 %v9764_v39, %v11835_v63  ;;  %v1186_v0 = vmul.f32 %v9764_v39, %v11836_v57  ;;  %v1198_v63 = vmul.f32 %v9762_v43, %v9793_v21 }
 0x2e3   :  { %11828 = vst [vmem:[#allocation25_spill] sm:$0xff] %v10001_v3  ;;  %11830 = vst [vmem:[#allocation26_spill] sm:$0xff] %v10005_v23  ;;  %v11837_v3 = vld [vmem:[#allocation29_spill] sm:$0xff]  ;;  %v1195_v23 = vmul.f32 %v9762_v43, %v9781_v52  ;;  %v1199_v57 = vmul.f32 %v9762_v43, %v9801_v48  ;;  %v1201_v52 = vmul.f32 %v9762_v43, %v9809_v6 }
 0x2e4   :  { %11832 = vst [vmem:[#allocation27_spill] sm:$0xff] %v10009_v35  ;;  %11834 = vst [vmem:[#allocation28_spill] sm:$0xff] %v10013_v58  ;;  %v1187_v33 = vmul.f32 %v9764_v39, %v11837_v3  ;;  %v1200_v39 = vmul.f32 %v9762_v43, %v9805_v29  ;;  %v1204_v8 = vmul.f32 %v9762_v43, %v9825_v12 }
 0x2e5   :  { %1597 = vst [vmem:[#allocation3 + $0x169] sm:$0xf] %v1595_v41  ;;  %1600 = vst [vmem:[#allocation3 + $0x171] sm:$0xf] %v1598_v11  ;;  %v1202_v11 = vmul.f32 %v9762_v43, %v9813_v45  ;;  %v1205_v21 = vmul.f32 %v9762_v43, %v9829_v16  ;;  %v1206_v48 = vmul.f32 %v9762_v43, %v9833_v54 }
 0x2e6   :  { %v1207_v29 = vmul.f32 %v9762_v43, %v9837_v20  ;;  %v1208_v6 = vmul.f32 %v9762_v43, %v9841_v24  ;;  %v1209_v45 = vmul.f32 %v9762_v43, %v9845_v28  ;;  %v1211_v9 = vmul.f32 %v9762_v43, %v9849_v32 }
 0x2e7   :  { %v1212_v12 = vmul.f32 %v9762_v43, %v9853_v4  ;;  %v1213_v16 = vmul.f32 %v9762_v43, %v9857_v36  ;;  %v1214_v54 = vmul.f32 %v9762_v43, %v9861_v40  ;;  %v1215_v20 = vmul.f32 %v9762_v43, %v9865_v44 }
 0x2e8   :  { %v1216_v24 = vmul.f32 %v9762_v43, %v9869_v50  ;;  %v1217_v28 = vmul.f32 %v9762_v43, %v9873_v53  ;;  %v1218_v32 = vmul.f32 %v9762_v43, %v9877_v56  ;;  %v1219_v4 = vmul.f32 %v9762_v43, %v9881_v59  ;;  %v11838_v41 = vld [vmem:[#allocation10_spill] sm:$0xff] }
 0x2e9   :  { %v1220_v36 = vmul.f32 %v9762_v43, %v9885_v62  ;;  %v1221_v40 = vmul.f32 %v9762_v43, %v9889_v2  ;;  %v1222_v44 = vmul.f32 %v9762_v43, %v9893_v5  ;;  %v1223_v50 = vmul.f32 %v9762_v43, %v9897_v10  ;;  %v11839_v3 = vld [vmem:[#allocation22_spill] sm:$0xff]  ;;  %v11840_v58 = vld [vmem:[#allocation23_spill] sm:$0xff]  ;;  %v11841_v35 = vld [vmem:[#allocation24_spill] sm:$0xff] }
 0x2ea   :  { %v1224_v53 = vmul.f32 %v9762_v43, %v9901_v14  ;;  %v1225_v56 = vmul.f32 %v9762_v43, %v9905_v18  ;;  %v1227_v59 = vmul.f32 %v9762_v43, %v9909_v22  ;;  %v1228_v62 = vmul.f32 %v9762_v43, %v9913_v26 }
 0x2eb   :  { %v1229_v2 = vmul.f32 %v9762_v43, %v9917_v30  ;;  %v1230_v5 = vmul.f32 %v9762_v43, %v9921_v34  ;;  %v1231_v10 = vmul.f32 %v9762_v43, %v9925_v38  ;;  %v1232_v14 = vmul.f32 %v9762_v43, %v9929_v46 }
 0x2ec   :  { %v1233_v18 = vmul.f32 %v9762_v43, %v9933_v51  ;;  %v1234_v22 = vmul.f32 %v9762_v43, %v9937_v55  ;;  %v1235_v26 = vmul.f32 %v9762_v43, %v9941_v60  ;;  %v1236_v30 = vmul.f32 %v9762_v43, %v9945_v1 }
 0x2ed   :  { %v1237_v34 = vmul.f32 %v9762_v43, %v9949_v7  ;;  %v1238_v38 = vmul.f32 %v9762_v43, %v9953_v13  ;;  %v1239_v46 = vmul.f32 %v9762_v43, %v9957_v19  ;;  %v1240_v51 = vmul.f32 %v9762_v43, %v9961_v25 }
 0x2ee   :  { %v1241_v55 = vmul.f32 %v9762_v43, %v9965_v31  ;;  %v1243_v60 = vmul.f32 %v9762_v43, %v9969_v37  ;;  %v1244_v1 = vmul.f32 %v9762_v43, %v9973_v27  ;;  %v1245_v7 = vmul.f32 %v9762_v43, %v9977_v49  ;;  %v11842_v27 = vld [vmem:[#allocation25_spill] sm:$0xff] }
 0x2ef   :  { %v1246_v13 = vmul.f32 %v9762_v43, %v9981_v47  ;;  %v1247_v19 = vmul.f32 %v9762_v43, %v11838_v41  ;;  %v1248_v25 = vmul.f32 %v9762_v43, %v11839_v3  ;;  %v1249_v31 = vmul.f32 %v9762_v43, %v11840_v58  ;;  %v11843_v47 = vld [vmem:[#allocation26_spill] sm:$0xff]  ;;  %v11844_v3 = vld [vmem:[#allocation27_spill] sm:$0xff] }
 0x2f0   :  { %v1250_v37 = vmul.f32 %v9762_v43, %v11841_v35  ;;  %v1251_v49 = vmul.f32 %v9762_v43, %v11842_v27  ;;  %v1252_v41 = vmul.f32 %v9762_v43, %v11843_v47  ;;  %v1253_v58 = vmul.f32 %v9762_v43, %v11844_v3  ;;  %v11845_v35 = vld [vmem:[#allocation28_spill] sm:$0xff] }
 0x2f1   :  { %v1254_v27 = vmul.f32 %v9762_v43, %v11845_v35  ;;  %v1255_v47 = vmul.f32 %v9762_v43, %v1185_v61  ;;  %v1256_v3 = vmul.f32 %v9762_v43, %v1186_v0  ;;  %v1257_v35 = vmul.f32 %v9762_v43, %v1187_v33  ;;  %v11846_v61 = vld [vmem:[#allocation9_spill] sm:$0xff] }
 0x2f2   :  { %v10139_v0 = vadd.f32 %v11846_v61, %v1195_v23  ;;  %v10142_v33 = vadd.f32 %v11846_v61, %v1196_v17  ;;  %v10145_v43 = vadd.f32 %v11846_v61, %v1197_v42  ;;  %v10148_v23 = vadd.f32 %v11846_v61, %v1198_v63 }
 0x2f3   :  { %v10154_v17 = vadd.f32 %v11846_v61, %v1200_v39  ;;  %v10160_v42 = vadd.f32 %v11846_v61, %v1202_v11  ;;  %v10166_v63 = vadd.f32 %v11846_v61, %v1204_v8  ;;  %v10175_v39 = vadd.f32 %v11846_v61, %v1207_v29 }
 0x2f4   :  { %11847 = vst [vmem:[#allocation8_spill] sm:$0xff] %v10139_v0  ;;  %11848 = vst [vmem:[#allocation11_spill] sm:$0xff] %v10142_v33  ;;  %v10151_v0 = vadd.f32 %v11846_v61, %v1199_v57  ;;  %v10157_v33 = vadd.f32 %v11846_v61, %v1201_v52  ;;  %v10172_v57 = vadd.f32 %v11846_v61, %v1206_v48 }
 0x2f5   :  { %11849 = vst [vmem:[#allocation12_spill] sm:$0xff] %v10145_v43  ;;  %11850 = vst [vmem:[#allocation13_spill] sm:$0xff] %v10148_v23  ;;  %v10163_v43 = vadd.f32 %v11846_v61, %v1203_v15  ;;  %v10169_v23 = vadd.f32 %v11846_v61, %v1205_v21  ;;  %v10178_v52 = vadd.f32 %v11846_v61, %v1208_v6 }
 0x2f6   :  { %v10181_v11 = vadd.f32 %v11846_v61, %v1209_v45  ;;  %v10184_v15 = vadd.f32 %v11846_v61, %v1211_v9  ;;  %v10187_v8 = vadd.f32 %v11846_v61, %v1212_v12  ;;  %v10190_v21 = vadd.f32 %v11846_v61, %v1213_v16 }
 0x2f7   :  { %v10193_v48 = vadd.f32 %v11846_v61, %v1214_v54  ;;  %v10196_v29 = vadd.f32 %v11846_v61, %v1215_v20  ;;  %v10199_v6 = vadd.f32 %v11846_v61, %v1216_v24  ;;  %v10202_v45 = vadd.f32 %v11846_v61, %v1217_v28 }
 0x2f8   :  { %v10205_v9 = vadd.f32 %v11846_v61, %v1218_v32  ;;  %v10208_v12 = vadd.f32 %v11846_v61, %v1219_v4  ;;  %v10211_v16 = vadd.f32 %v11846_v61, %v1220_v36  ;;  %v10214_v54 = vadd.f32 %v11846_v61, %v1221_v40 }
 0x2f9   :  { %v10217_v20 = vadd.f32 %v11846_v61, %v1222_v44  ;;  %v10220_v24 = vadd.f32 %v11846_v61, %v1223_v50  ;;  %v10223_v28 = vadd.f32 %v11846_v61, %v1224_v53  ;;  %v10226_v32 = vadd.f32 %v11846_v61, %v1225_v56 }
 0x2fa   :  { %v10229_v4 = vadd.f32 %v11846_v61, %v1227_v59  ;;  %v10232_v36 = vadd.f32 %v11846_v61, %v1228_v62  ;;  %v10235_v40 = vadd.f32 %v11846_v61, %v1229_v2  ;;  %v10238_v44 = vadd.f32 %v11846_v61, %v1230_v5 }
 0x2fb   :  { %v10241_v50 = vadd.f32 %v11846_v61, %v1231_v10  ;;  %v10244_v53 = vadd.f32 %v11846_v61, %v1232_v14  ;;  %v10247_v56 = vadd.f32 %v11846_v61, %v1233_v18  ;;  %v10250_v59 = vadd.f32 %v11846_v61, %v1234_v22 }
 0x2fc   :  { %v10253_v62 = vadd.f32 %v11846_v61, %v1235_v26  ;;  %v10256_v2 = vadd.f32 %v11846_v61, %v1236_v30  ;;  %v10259_v5 = vadd.f32 %v11846_v61, %v1237_v34  ;;  %v10262_v10 = vadd.f32 %v11846_v61, %v1238_v38 }
 0x2fd   :  { %v10265_v14 = vadd.f32 %v11846_v61, %v1239_v46  ;;  %v10268_v18 = vadd.f32 %v11846_v61, %v1240_v51  ;;  %v10271_v22 = vadd.f32 %v11846_v61, %v1241_v55  ;;  %v10274_v26 = vadd.f32 %v11846_v61, %v1243_v60 }
 0x2fe   :  { %v10277_v30 = vadd.f32 %v11846_v61, %v1244_v1  ;;  %v10280_v34 = vadd.f32 %v11846_v61, %v1245_v7  ;;  %v10283_v38 = vadd.f32 %v11846_v61, %v1246_v13  ;;  %v10286_v46 = vadd.f32 %v11846_v61, %v1247_v19 }
 0x2ff   :  { %v10289_v51 = vadd.f32 %v11846_v61, %v1248_v25  ;;  %v10292_v55 = vadd.f32 %v11846_v61, %v1249_v31  ;;  %v10295_v60 = vadd.f32 %v11846_v61, %v1250_v37  ;;  %v10298_v1 = vadd.f32 %v11846_v61, %v1251_v49  ;;  %v11860_v49 = vld [vmem:[#allocation8_spill] sm:$0xff] }
 0x300   :  { %v10301_v7 = vadd.f32 %v11846_v61, %v1252_v41  ;;  %v10304_v13 = vadd.f32 %v11846_v61, %v1253_v58  ;;  %v10307_v19 = vadd.f32 %v11846_v61, %v1254_v27  ;;  %v10310_v25 = vadd.f32 %v11846_v61, %v1255_v47  ;;  %v11863_v58 = vld [vmem:[#allocation13_spill] sm:$0xff] }
 0x301   :  { %11851 = vst [vmem:[#allocation14_spill] sm:$0xff] %v10292_v55  ;;  %11852 = vst [vmem:[#allocation15_spill] sm:$0xff] %v10295_v60  ;;  %v10313_v31 = vadd.f32 %v11846_v61, %v1256_v3  ;;  %v10316_v37 = vadd.f32 %v11846_v61, %v1257_v35  ;;  %v11861_v60 = vld [vmem:[#allocation11_spill] sm:$0xff]  ;;  %v1333_v27 = vmax.f32 %v10151_v0, 0.0  ;;  %v1335_v47 = vmax.f32 %v10157_v33, 0.0 }
 0x302   :  { %11853 = vst [vmem:[#allocation16_spill] sm:$0xff] %v10298_v1  ;;  %11854 = vst [vmem:[#allocation17_spill] sm:$0xff] %v10301_v7  ;;  %v1329_v1 = vmax.f32 %v11860_v49, 0.0  ;;  %v1330_v41 = vmax.f32 %v11861_v60, 0.0  ;;  %v11862_v7 = vld [vmem:[#allocation12_spill] sm:$0xff]  ;;  %v1336_v3 = vmax.f32 %v10160_v42, 0.0 }
 0x303   :  { %11855 = vst [vmem:[#allocation18_spill] sm:$0xff] %v10304_v13  ;;  %11856 = vst [vmem:[#allocation19_spill] sm:$0xff] %v10307_v19  ;;  %v1331_v55 = vmax.f32 %v11862_v7, 0.0  ;;  %v1332_v13 = vmax.f32 %v11863_v58, 0.0  ;;  %v1334_v19 = vmax.f32 %v10154_v17, 0.0  ;;  %v1338_v35 = vmax.f32 %v10166_v63, 0.0 }
 0x304   :  { %11857 = vst [vmem:[#allocation20_spill] sm:$0xff] %v10310_v25  ;;  %11858 = vst [vmem:[#allocation21_spill] sm:$0xff] %v10313_v31  ;;  %v1337_v31 = vmax.f32 %v10163_v43, 0.0  ;;  %v1339_v61 = vmax.f32 %v10169_v23, 0.0  ;;  %v1340_v60 = vmax.f32 %v10172_v57, 0.0  ;;  %v1341_v7 = vmax.f32 %v10175_v39, 0.0 }
 0x305   :  { %11859 = vst [vmem:[#allocation29_spill] sm:$0xff] %v10316_v37  ;;  %v1342_v49 = vmax.f32 %v10178_v52, 0.0  ;;  %v1343_v0 = vmax.f32 %v10181_v11, 0.0  ;;  %v1345_v17 = vmax.f32 %v10184_v15, 0.0  ;;  %v1346_v33 = vmax.f32 %v10187_v8, 0.0 }
 0x306   :  { %v1347_v42 = vmax.f32 %v10190_v21, 0.0  ;;  %v1348_v43 = vmax.f32 %v10193_v48, 0.0  ;;  %v1349_v63 = vmax.f32 %v10196_v29, 0.0  ;;  %v1350_v23 = vmax.f32 %v10199_v6, 0.0 }
 0x307   :  { %v1351_v57 = vmax.f32 %v10202_v45, 0.0  ;;  %v1352_v39 = vmax.f32 %v10205_v9, 0.0  ;;  %v1353_v52 = vmax.f32 %v10208_v12, 0.0  ;;  %v1354_v11 = vmax.f32 %v10211_v16, 0.0 }
 0x308   :  { %v1355_v15 = vmax.f32 %v10214_v54, 0.0  ;;  %v1356_v8 = vmax.f32 %v10217_v20, 0.0  ;;  %v1357_v21 = vmax.f32 %v10220_v24, 0.0  ;;  %v1358_v48 = vmax.f32 %v10223_v28, 0.0  ;;  %v11864_v58 = vld [vmem:[#allocation14_spill] sm:$0xff]  ;;  %v11865_v37 = vld [vmem:[#allocation15_spill] sm:$0xff] }
 0x309   :  { %v1359_v29 = vmax.f32 %v10226_v32, 0.0  ;;  %v1361_v6 = vmax.f32 %v10229_v4, 0.0  ;;  %v1362_v45 = vmax.f32 %v10232_v36, 0.0  ;;  %v1363_v9 = vmax.f32 %v10235_v40, 0.0  ;;  %v11866_v25 = vld [vmem:[#allocation16_spill] sm:$0xff] }
 0x30a   :  { %v1364_v12 = vmax.f32 %v10238_v44, 0.0  ;;  %v1365_v16 = vmax.f32 %v10241_v50, 0.0  ;;  %v1366_v54 = vmax.f32 %v10244_v53, 0.0  ;;  %v1367_v20 = vmax.f32 %v10247_v56, 0.0 }
 0x30b   :  { %v1368_v24 = vmax.f32 %v10250_v59, 0.0  ;;  %v1369_v28 = vmax.f32 %v10253_v62, 0.0  ;;  %v1370_v32 = vmax.f32 %v10256_v2, 0.0  ;;  %v1371_v4 = vmax.f32 %v10259_v5, 0.0 }
 0x30c   :  { %v1372_v36 = vmax.f32 %v10262_v10, 0.0  ;;  %v1373_v40 = vmax.f32 %v10265_v14, 0.0  ;;  %v1374_v44 = vmax.f32 %v10268_v18, 0.0  ;;  %v1375_v50 = vmax.f32 %v10271_v22, 0.0  ;;  %v11867_v22 = vld [vmem:[#allocation17_spill] sm:$0xff] }
 0x30d   :  { %v1377_v53 = vmax.f32 %v10274_v26, 0.0  ;;  %v1378_v56 = vmax.f32 %v10277_v30, 0.0  ;;  %v1379_v59 = vmax.f32 %v10280_v34, 0.0  ;;  %v1380_v62 = vmax.f32 %v10283_v38, 0.0  ;;  %v11868_v30 = vld [vmem:[#allocation18_spill] sm:$0xff]  ;;  %v11869_v38 = vld [vmem:[#allocation19_spill] sm:$0xff] }
 0x30e   :  { %v1381_v2 = vmax.f32 %v10286_v46, 0.0  ;;  %v1382_v5 = vmax.f32 %v10289_v51, 0.0  ;;  %v1383_v10 = vmax.f32 %v11864_v58, 0.0  ;;  %v1384_v14 = vmax.f32 %v11865_v37, 0.0  ;;  %v2077_v51 = vld [vmem:[#allocation3 + $0x168] sm:$0xf] }
 0x30f   :  { %v1385_v18 = vmax.f32 %v11866_v25, 0.0  ;;  %v1386_v26 = vmax.f32 %v11867_v22, 0.0  ;;  %v1387_v34 = vmax.f32 %v11868_v30, 0.0  ;;  %v1388_v46 = vmax.f32 %v11869_v38, 0.0  ;;  %v11870_v58 = vld [vmem:[#allocation20_spill] sm:$0xff]  ;;  %v11871_v25 = vld [vmem:[#allocation21_spill] sm:$0xff] }
 0x310   :  { %v1389_v37 = vmax.f32 %v11870_v58, 0.0  ;;  %v1390_v22 = vmax.f32 %v11871_v25, 0.0  ;;  %v11872_v30 = vld [vmem:[#allocation29_spill] sm:$0xff]  ;;  %v1393_v58 = vmax.f32 %v1329_v1, %v1345_v17  ;;  %2078 = vst [vmem:[#allocation4 + $0x2d8] sm:$0xf] %v2077_v51  ;;  %v1394_v25 = vmax.f32 %v1330_v41, %v1346_v33 }
 0x311   :  { %v1391_v38 = vmax.f32 %v11872_v30, 0.0  ;;  %v1395_v30 = vmax.f32 %v1331_v55, %v1347_v42  ;;  %v1396_v1 = vmax.f32 %v1332_v13, %v1348_v43  ;;  %v1397_v17 = vmax.f32 %v1333_v27, %v1349_v63 }
 0x312   :  { %v1398_v51 = vmax.f32 %v1334_v19, %v1350_v23  ;;  %v1399_v33 = vmax.f32 %v1335_v47, %v1351_v57  ;;  %v1400_v41 = vmax.f32 %v1336_v3, %v1352_v39  ;;  %v1401_v42 = vmax.f32 %v1337_v31, %v1353_v52 }
 0x313   :  { %v1402_v55 = vmax.f32 %v1338_v35, %v1354_v11  ;;  %v1403_v13 = vmax.f32 %v1339_v61, %v1355_v15  ;;  %v1404_v43 = vmax.f32 %v1340_v60, %v1356_v8  ;;  %v1405_v27 = vmax.f32 %v1341_v7, %v1357_v21  ;;  %v1799_v21 = vld [vmem:[#allocation3 + $0x168] sm:$0xf] }
 0x314   :  { %v1406_v63 = vmax.f32 %v1342_v49, %v1358_v48  ;;  %v1407_v19 = vmax.f32 %v1343_v0, %v1359_v29  ;;  %v1409_v23 = vmax.f32 %v1361_v6, %v1377_v53  ;;  %v1410_v47 = vmax.f32 %v1362_v45, %v1378_v56  ;;  %v1855_v48 = vld [vmem:[#allocation3 + $0x169] sm:$0xf]  ;;  %v2079_v49 = vld [vmem:[#allocation3 + $0x170] sm:$0xf] }
 0x315   :  { %v1411_v57 = vmax.f32 %v1363_v9, %v1379_v59  ;;  %v1412_v3 = vmax.f32 %v1364_v12, %v1380_v62  ;;  %v1413_v39 = vmax.f32 %v1365_v16, %v1381_v2  ;;  %v1414_v31 = vmax.f32 %v1366_v54, %v1382_v5  ;;  %v2133_v59 = vld [vmem:[#allocation3 + $0x169] sm:$0xf]  ;;  %v2135_v62 = vld [vmem:[#allocation3 + $0x171] sm:$0xf] }
 0x316   :  { %v1415_v52 = vmax.f32 %v1367_v20, %v1383_v10  ;;  %v1416_v11 = vmax.f32 %v1368_v24, %v1384_v14  ;;  %v1417_v35 = vmax.f32 %v1369_v28, %v1385_v18  ;;  %v1418_v15 = vmax.f32 %v1370_v32, %v1386_v26  ;;  %2134 = vst [vmem:[#allocation4 + $0x2e8] sm:$0xf] %v2133_v59 }
 0x317   :  { %v1419_v61 = vmax.f32 %v1371_v4, %v1387_v34  ;;  %v1420_v8 = vmax.f32 %v1372_v36, %v1388_v46  ;;  %v1421_v60 = vmax.f32 %v1373_v40, %v1389_v37  ;;  %v1422_v7 = vmax.f32 %v1374_v44, %v1390_v22 }
 0x318   :  { %v1423_v0 = vmax.f32 %v1375_v50, %v1391_v38  ;;  %v1425_v29 = vmax.f32 %v1393_v58, %v1409_v23  ;;  %v1426_v6 = vmax.f32 %v1394_v25, %v1410_v47  ;;  %v1427_v53 = vmax.f32 %v1395_v30, %v1411_v57 }
 0x319   :  { %v1428_v45 = vmax.f32 %v1396_v1, %v1412_v3  ;;  %v1429_v9 = vmax.f32 %v1397_v17, %v1413_v39  ;;  %v1430_v12 = vmax.f32 %v1398_v51, %v1414_v31  ;;  %v1431_v16 = vmax.f32 %v1399_v33, %v1415_v52 }
 0x31a   :  { %v1432_v54 = vmax.f32 %v1400_v41, %v1416_v11  ;;  %v1433_v20 = vmax.f32 %v1401_v42, %v1417_v35  ;;  %v1434_v24 = vmax.f32 %v1402_v55, %v1418_v15  ;;  %v1435_v28 = vmax.f32 %v1403_v13, %v1419_v61  ;;  %1441 = vst [vmem:[#allocation2] sm:$0xff] %v1425_v29 }
 0x31b   :  { %1442 = vst [vmem:[#allocation2 + $0x8] sm:$0xff] %v1426_v6  ;;  %1443 = vst [vmem:[#allocation2 + $0x10] sm:$0xff] %v1427_v53  ;;  %v1436_v32 = vmax.f32 %v1404_v43, %v1420_v8  ;;  %v1437_v4 = vmax.f32 %v1405_v27, %v1421_v60  ;;  %v1438_v36 = vmax.f32 %v1406_v63, %v1422_v7  ;;  %v1801_v44 = vrot.slane %v1799_v21, 4 }
 0x31c   :  { %v1439_v40 = vmax.f32 %v1407_v19, %v1423_v0  ;;  %1444 = vst [vmem:[#allocation2 + $0x18] sm:$0xff] %v1428_v45  ;;  %1445 = vst [vmem:[#allocation2 + $0x20] sm:$0xff] %v1429_v9  ;;  %v1857_v50 = vrot.slane %v1855_v48, 4  ;;  %v2081_v56 = vrot.slane %v2079_v49, 4  ;;  %v2137_v2 = vrot.slane %v2135_v62, 4 }
 0x31d   :  { %1446 = vst [vmem:[#allocation2 + $0x28] sm:$0xff] %v1430_v12  ;;  %1447 = vst [vmem:[#allocation2 + $0x30] sm:$0xff] %v1431_v16  ;;  %v2208_v16 = vld [vmem:[#allocation3 + $0x58] sm:$0xf] }
 0x31e   :  { %1448 = vst [vmem:[#allocation2 + $0x38] sm:$0xff] %v1432_v54  ;;  %1449 = vst [vmem:[#allocation2 + $0x40] sm:$0xff] %v1433_v20 }
 0x31f   :  { %1450 = vst [vmem:[#allocation2 + $0x48] sm:$0xff] %v1434_v24  ;;  %1451 = vst [vmem:[#allocation2 + $0x50] sm:$0xff] %v1435_v28 }
 0x320   :  { %1452 = vst [vmem:[#allocation2 + $0x58] sm:$0xff] %v1436_v32  ;;  %1453 = vst [vmem:[#allocation2 + $0x60] sm:$0xff] %v1437_v4 }
 0x321   :  { %1454 = vst [vmem:[#allocation2 + $0x68] sm:$0xff] %v1438_v36  ;;  %1455 = vst [vmem:[#allocation2 + $0x70] sm:$0xff] %v1439_v40  ;;  %v1505_v5 = vld [vmem:[#allocation2] sm:$0xf]  ;;  %v1508_v10 = vld [vmem:[#allocation2 + $0x4] sm:$0xf] }
 0x322   :  { %1803 = vst [vmem:[#allocation4 + $0x288] sm:$0xf0] %v1801_v44  ;;  %1859 = vst [vmem:[#allocation4 + $0x298] sm:$0xf0] %v1857_v50  ;;  %v1511_v14 = vld [vmem:[#allocation2 + $0x8] sm:$0xf] }
 0x323   :  { %2083 = vst [vmem:[#allocation4 + $0x2d8] sm:$0xf0] %v2081_v56  ;;  %2139 = vst [vmem:[#allocation4 + $0x2e8] sm:$0xf0] %v2137_v2  ;;  %v1514_v18 = vld [vmem:[#allocation2 + $0xc] sm:$0xf] }
 0x324   :  { %1507 = vst [vmem:[#allocation3 + $0x9] sm:$0xf] %v1505_v5  ;;  %1510 = vst [vmem:[#allocation3 + $0x11] sm:$0xf] %v1508_v10  ;;  %v1517_v26 = vld [vmem:[#allocation2 + $0x10] sm:$0xf] }
 0x325   :  { %1513 = vst [vmem:[#allocation3 + $0x19] sm:$0xf] %v1511_v14  ;;  %v1520_v34 = vld [vmem:[#allocation2 + $0x14] sm:$0xf]  ;;  %1516 = vst [vmem:[#allocation3 + $0x21] sm:$0xf] %v1514_v18 }
 0x326   :  { %1519 = vst [vmem:[#allocation3 + $0x39] sm:$0xf] %v1517_v26  ;;  %1522 = vst [vmem:[#allocation3 + $0x41] sm:$0xf] %v1520_v34  ;;  %v1523_v46 = vld [vmem:[#allocation2 + $0x18] sm:$0xf] }
 0x327   :  { %v1526_v37 = vld [vmem:[#allocation2 + $0x1c] sm:$0xf]  ;;  %v1529_v22 = vld [vmem:[#allocation2 + $0x20] sm:$0xf]  ;;  %1525 = vst [vmem:[#allocation3 + $0x49] sm:$0xf] %v1523_v46 }
 0x328   :  { %1528 = vst [vmem:[#allocation3 + $0x51] sm:$0xf] %v1526_v37  ;;  %1531 = vst [vmem:[#allocation3 + $0x69] sm:$0xf] %v1529_v22  ;;  %v1532_v38 = vld [vmem:[#allocation2 + $0x24] sm:$0xf] }
 0x329   :  { %v1535_v58 = vld [vmem:[#allocation2 + $0x28] sm:$0xf]  ;;  %v1538_v25 = vld [vmem:[#allocation2 + $0x2c] sm:$0xf]  ;;  %1534 = vst [vmem:[#allocation3 + $0x71] sm:$0xf] %v1532_v38 }
 0x32a   :  { %1537 = vst [vmem:[#allocation3 + $0x79] sm:$0xf] %v1535_v58  ;;  %1540 = vst [vmem:[#allocation3 + $0x81] sm:$0xf] %v1538_v25  ;;  %v1541_v30 = vld [vmem:[#allocation2 + $0x30] sm:$0xf] }
 0x32b   :  { %v1544_v1 = vld [vmem:[#allocation2 + $0x34] sm:$0xf]  ;;  %v1547_v17 = vld [vmem:[#allocation2 + $0x38] sm:$0xf]  ;;  %1543 = vst [vmem:[#allocation3 + $0x99] sm:$0xf] %v1541_v30 }
 0x32c   :  { %1546 = vst [vmem:[#allocation3 + $0xa1] sm:$0xf] %v1544_v1  ;;  %1549 = vst [vmem:[#allocation3 + $0xa9] sm:$0xf] %v1547_v17  ;;  %v1550_v51 = vld [vmem:[#allocation2 + $0x3c] sm:$0xf] }
 0x32d   :  { %v1553_v33 = vld [vmem:[#allocation2 + $0x40] sm:$0xf]  ;;  %v1556_v41 = vld [vmem:[#allocation2 + $0x44] sm:$0xf]  ;;  %1552 = vst [vmem:[#allocation3 + $0xb1] sm:$0xf] %v1550_v51 }
 0x32e   :  { %1555 = vst [vmem:[#allocation3 + $0xc9] sm:$0xf] %v1553_v33  ;;  %1558 = vst [vmem:[#allocation3 + $0xd1] sm:$0xf] %v1556_v41  ;;  %v1559_v42 = vld [vmem:[#allocation2 + $0x48] sm:$0xf] }
 0x32f   :  { %v1562_v55 = vld [vmem:[#allocation2 + $0x4c] sm:$0xf]  ;;  %v1565_v13 = vld [vmem:[#allocation2 + $0x50] sm:$0xf]  ;;  %1561 = vst [vmem:[#allocation3 + $0xd9] sm:$0xf] %v1559_v42 }
 0x330   :  { %1564 = vst [vmem:[#allocation3 + $0xe1] sm:$0xf] %v1562_v55  ;;  %1567 = vst [vmem:[#allocation3 + $0xf9] sm:$0xf] %v1565_v13  ;;  %v1568_v43 = vld [vmem:[#allocation2 + $0x54] sm:$0xf] }
 0x331   :  { %v1571_v27 = vld [vmem:[#allocation2 + $0x58] sm:$0xf]  ;;  %v1574_v63 = vld [vmem:[#allocation2 + $0x5c] sm:$0xf]  ;;  %1570 = vst [vmem:[#allocation3 + $0x101] sm:$0xf] %v1568_v43 }
 0x332   :  { %1573 = vst [vmem:[#allocation3 + $0x109] sm:$0xf] %v1571_v27  ;;  %1576 = vst [vmem:[#allocation3 + $0x111] sm:$0xf] %v1574_v63  ;;  %v1577_v19 = vld [vmem:[#allocation2 + $0x60] sm:$0xf] }
 0x333   :  { %v1580_v23 = vld [vmem:[#allocation2 + $0x64] sm:$0xf]  ;;  %v1583_v47 = vld [vmem:[#allocation2 + $0x68] sm:$0xf]  ;;  %1579 = vst [vmem:[#allocation3 + $0x129] sm:$0xf] %v1577_v19 }
 0x334   :  { %1582 = vst [vmem:[#allocation3 + $0x131] sm:$0xf] %v1580_v23  ;;  %1585 = vst [vmem:[#allocation3 + $0x139] sm:$0xf] %v1583_v47  ;;  %v1586_v57 = vld [vmem:[#allocation2 + $0x6c] sm:$0xf] }
 0x335   :  { %v1589_v3 = vld [vmem:[#allocation2 + $0x70] sm:$0xf]  ;;  %v1592_v39 = vld [vmem:[#allocation2 + $0x74] sm:$0xf]  ;;  %1588 = vst [vmem:[#allocation3 + $0x141] sm:$0xf] %v1586_v57 }
 0x336   :  { %1591 = vst [vmem:[#allocation3 + $0x159] sm:$0xf] %v1589_v3  ;;  %1594 = vst [vmem:[#allocation3 + $0x161] sm:$0xf] %v1592_v39  ;;  %v1633_v31 = vld [vmem:[#allocation3 + $0x38] sm:$0xf] }
 0x337   :  { %v1638_v52 = vld [vmem:[#allocation3 + $0x40] sm:$0xf]  ;;  %v1640_v11 = vld [vmem:[#allocation3 + $0x48] sm:$0xf]  ;;  %v1635_v35 = vrot.slane %v1633_v31, 4  ;;  %v2210_v14 = vrot.slane %v2208_v16, 4 }
 0x338   :  { %1639 = vst [vmem:[#allocation4 + $0xd0] sm:$0xf] %v1638_v52  ;;  %v1642_v15 = vrot.slane %v1640_v11, 4  ;;  %v2256_v61 = vld [vmem:[#allocation3 + $0x41] sm:$0xf]  ;;  %v8174_v58 = vld [vmem:[%s11695_s4 + $0xc8] sm:$0xff]  }
 0x339   :  { %v2258_v8 = vld [vmem:[#allocation3 + $0x49] sm:$0xf]  ;;  %2257 = vst [vmem:[#allocation4 + $0xb8] sm:$0xf] %v2256_v61  ;;  %v2263_v7 = vld [vmem:[#allocation3 + $0x51] sm:$0xf] }
 0x33a   :  { %v2260_v60 = vrot.slane %v2258_v8, 4  ;;  %v1603_v21 = vld [vmem:[#allocation3 + $0x8] sm:$0xf]  ;;  %1637 = vst [vmem:[#allocation4 + $0x8] sm:$0xf0] %v1635_v35  ;;  %v8173_v34 = vld [vmem:[%s11695_s4 + $0x80] sm:$0xff]  }
 0x33b   :  { %1644 = vst [vmem:[#allocation4 + $0xd0] sm:$0xf0] %v1642_v15  ;;  %2264 = vst [vmem:[#allocation4 + $0x180] sm:$0xf] %v2263_v7  ;;  %v1605_v48 = vrot.slane %v1603_v21, 4  ;;  %v8175_v19 = vld [vmem:[%s11695_s4 + $0x88] sm:$0xff]  }
 0x33c   :  { %v1608_v49 = vld [vmem:[#allocation3 + $0x10] sm:$0xf]  ;;  %v1610_v0 = vld [vmem:[#allocation3 + $0x18] sm:$0xf]  ;;  %2262 = vst [vmem:[#allocation4 + $0xb8] sm:$0xf0] %v2260_v60 }
 0x33d   :  { %1609 = vst [vmem:[#allocation4 + $0xc8] sm:$0xf] %v1608_v49  ;;  %v1612_v29 = vrot.slane %v1610_v0, 4  ;;  %v2228_v6 = vld [vmem:[#allocation3 + $0x11] sm:$0xf] }
 0x33e   :  { %v2230_v53 = vld [vmem:[#allocation3 + $0x19] sm:$0xf]  ;;  %1607 = vst [vmem:[#allocation4] sm:$0xf0] %v1605_v48  ;;  %2229 = vst [vmem:[#allocation4 + $0xb0] sm:$0xf] %v2228_v6 }
 0x33f   :  { %v2232_v45 = vrot.slane %v2230_v53, 4  ;;  %v2235_v9 = vld [vmem:[#allocation3 + $0x21] sm:$0xf]  ;;  %v1648_v12 = vld [vmem:[#allocation3 + $0xf8] sm:$0xf]  ;;  %v8176_v60 = vld [vmem:[%s11695_s4 + $0xd0] sm:$0xff]  }
 0x340   :  { %1614 = vst [vmem:[#allocation4 + $0xc8] sm:$0xf0] %v1612_v29  ;;  %2236 = vst [vmem:[#allocation4 + $0x178] sm:$0xf] %v2235_v9  ;;  %v1650_v54 = vrot.slane %v1648_v12, 4  ;;  %v8177_v29 = vld [vmem:[%s11695_s4 + $0x90] sm:$0xff]  }
 0x341   :  { %v1653_v20 = vld [vmem:[#allocation3 + $0x100] sm:$0xf]  ;;  %v1655_v24 = vld [vmem:[#allocation3 + $0x108] sm:$0xf]  ;;  %2234 = vst [vmem:[#allocation4 + $0xb0] sm:$0xf0] %v2232_v45 }
 0x342   :  { %1654 = vst [vmem:[#allocation4 + $0x260] sm:$0xf] %v1653_v20  ;;  %v1657_v28 = vrot.slane %v1655_v24, 4  ;;  %v2270_v32 = vld [vmem:[#allocation3 + $0x101] sm:$0xf]  ;;  %v2313_v62 = vld [vmem:[#allocation4 + $0x8] sm:$0xff] }
 0x343   :  { %v2272_v4 = vld [vmem:[#allocation3 + $0x109] sm:$0xf]  ;;  %1652 = vst [vmem:[#allocation4 + $0x198] sm:$0xf0] %v1650_v54  ;;  %2271 = vst [vmem:[#allocation4 + $0x248] sm:$0xf] %v2270_v32 }
 0x344   :  { %v2274_v36 = vrot.slane %v2272_v4, 4  ;;  %v2277_v40 = vld [vmem:[#allocation3 + $0x111] sm:$0xf]  ;;  %v1618_v44 = vld [vmem:[#allocation3 + $0xc8] sm:$0xf]  ;;  %v2360_v5 = vld [vmem:[#allocation4 + $0x180] sm:$0xff] }
 0x345   :  { %1659 = vst [vmem:[#allocation4 + $0x260] sm:$0xf0] %v1657_v28  ;;  %2278 = vst [vmem:[#allocation4 + $0x310] sm:$0xf] %v2277_v40  ;;  %v1620_v50 = vrot.slane %v1618_v44, 4  ;;  %v2338_v2 = vld [vmem:[#allocation4 + $0xd0] sm:$0xff] }
 0x346   :  { %v1623_v56 = vld [vmem:[#allocation3 + $0xd0] sm:$0xf]  ;;  %v1625_v59 = vld [vmem:[#allocation3 + $0xd8] sm:$0xf]  ;;  %2276 = vst [vmem:[#allocation4 + $0x248] sm:$0xf0] %v2274_v36  ;;  %v2413_v18 = vpack.c.bf16 %v2338_v2, %v2313_v62 }
 0x347   :  { %1624 = vst [vmem:[#allocation4 + $0x258] sm:$0xf] %v1623_v56  ;;  %v1627_v10 = vrot.slane %v1625_v59, 4  ;;  %v2335_v26 = vld [vmem:[#allocation4 + $0xb8] sm:$0xff]  ;;  %1622 = vst [vmem:[#allocation4 + $0x190] sm:$0xf0] %v1620_v50 }
 0x348   :  { %v2242_v46 = vld [vmem:[#allocation3 + $0xd1] sm:$0xf]  ;;  %v2244_v37 = vld [vmem:[#allocation3 + $0xd9] sm:$0xf]  ;;  %v2435_v22 = vpack.c.bf16 %v2360_v5, %v2335_v26  ;;  %v2312_v38 = vld [vmem:[#allocation4] sm:$0xff]  ;;  %4094 = vmatprep.mubr.bf16.mxu1 %v2413_v18 }
 0x349   :  { %1629 = vst [vmem:[#allocation4 + $0x258] sm:$0xf0] %v1627_v10  ;;  %2243 = vst [vmem:[#allocation4 + $0x240] sm:$0xf] %v2242_v46  ;;  %v2246_v25 = vrot.slane %v2244_v37, 4  ;;  %v2337_v17 = vld [vmem:[#allocation4 + $0xc8] sm:$0xff] }
 0x34a   :  { %v2249_v30 = vld [vmem:[#allocation3 + $0xe1] sm:$0xf]  ;;  %v1690_v1 = vld [vmem:[#allocation3 + $0x39] sm:$0xf]  ;;  %2212 = vst [vmem:[#allocation4 + $0x170] sm:$0xf0] %v2210_v14  ;;  %4633 = vmatprep.mubr.bf16.mxu0 %v2435_v22  ;;  %v2412_v42 = vpack.c.bf16 %v2337_v17, %v2312_v38 }
 0x34b   :  { %v2359_v51 = vld [vmem:[#allocation4 + $0x178] sm:$0xff]  ;;  %2250 = vst [vmem:[#allocation4 + $0x308] sm:$0xf] %v2249_v30  ;;  %v1692_v33 = vrot.slane %v1690_v1, 4  ;;  %v1695_v41 = vld [vmem:[#allocation3 + $0x41] sm:$0xf] }
 0x34c   :  { %v2334_v55 = vld [vmem:[#allocation4 + $0xb0] sm:$0xff]  ;;  %2248 = vst [vmem:[#allocation4 + $0x240] sm:$0xf0] %v2246_v25  ;;  %1696 = vst [vmem:[#allocation4 + $0xe0] sm:$0xf] %v1695_v41  ;;  %v2363_v63 = vld [vmem:[#allocation4 + $0x198] sm:$0xff]  ;;  %4095 = vmatmul.mubr.bf16.vlgmr.msra.gmra.mrb[0].mxu1 %v2412_v42 }
 0x34d   :  { %v1697_v13 = vld [vmem:[#allocation3 + $0x49] sm:$0xf]  ;;  %v2434_v27 = vpack.c.bf16 %v2359_v51, %v2334_v55  ;;  %1694 = vst [vmem:[#allocation4 + $0x18] sm:$0xf0] %v1692_v33  ;;  %v1667_v57 = vld [vmem:[#allocation3 + $0x11] sm:$0xf]  ;;  %7629 = vmatpush3.bf16.msra.mxu1 %v8173_v34 }
 0x34e   :  { %v1662_v43 = vld [vmem:[#allocation3 + $0x9] sm:$0xf]  ;;  %v1699_v23 = vrot.slane %v1697_v13, 4  ;;  %v2388_v3 = vld [vmem:[#allocation4 + $0x260] sm:$0xff]  ;;  %v2410_v39 = vld [vmem:[#allocation4 + $0x310] sm:$0xff]  ;;  %7630 = vmatprep.subr.bf16.mxu1 %v8174_v58 }
 0x34f   :  { %v1664_v47 = vrot.slane %v1662_v43, 4  ;;  %1668 = vst [vmem:[#allocation4 + $0xd8] sm:$0xf] %v1667_v57  ;;  %v1669_v31 = vld [vmem:[#allocation3 + $0x19] sm:$0xf]  ;;  %4634 = vmatmul.mubr.bf16.vlgmr.msra.gmra.mrb[128].mxu0 %v2434_v27  ;;  %v2438_v52 = vpack.c.bf16 %v2388_v3, %v2363_v63  ;;  %v2385_v11 = vld [vmem:[#allocation4 + $0x248] sm:$0xff] }
 0x350   :  { %1701 = vst [vmem:[#allocation4 + $0xe0] sm:$0xf0] %v1699_v23  ;;  %v1671_v35 = vrot.slane %v1669_v31, 4  ;;  %v1704_v15 = vld [vmem:[#allocation3 + $0xf9] sm:$0xf]  ;;  %v2460_v8 = vpack.c.bf16 %v2410_v39, %v2385_v11  ;;  %v2362_v49 = vld [vmem:[#allocation4 + $0x190] sm:$0xff] }
 0x351   :  { %1666 = vst [vmem:[#allocation4 + $0x10] sm:$0xf0] %v1664_v47  ;;  %v1709_v61 = vld [vmem:[#allocation3 + $0x101] sm:$0xf]  ;;  %v1706_v7 = vrot.slane %v1704_v15, 4  ;;  %4102 = vmatprep.mubr.bf16.mxu1 %v2438_v52  ;;  %v2387_v0 = vld [vmem:[#allocation4 + $0x258] sm:$0xff]  ;;  %7631 = vmatpush3.bf16.msra.mxu1 %v8175_v19 }
 0x352   :  { %1710 = vst [vmem:[#allocation4 + $0x270] sm:$0xf] %v1709_v61  ;;  %v1711_v21 = vld [vmem:[#allocation3 + $0x109] sm:$0xf]  ;;  %1673 = vst [vmem:[#allocation4 + $0xd8] sm:$0xf0] %v1671_v35  ;;  %4641 = vmatprep.mubr.bf16.mxu0 %v2460_v8  ;;  %7632 = vmatprep.subr.bf16.mxu1 %v8176_v60  ;;  %v2437_v4 = vpack.c.bf16 %v2387_v0, %v2362_v49 }
 0x353   :  { %v1676_v48 = vld [vmem:[#allocation3 + $0xc9] sm:$0xf]  ;;  %v1713_v6 = vrot.slane %v1711_v21, 4  ;;  %v1681_v45 = vld [vmem:[#allocation3 + $0xd1] sm:$0xf]  ;;  %v8178_v9 = vld [vmem:[%s11695_s4 + $0xd8] sm:$0xff]  }
 0x354   :  { %v1678_v53 = vrot.slane %v1676_v48, 4  ;;  %1708 = vst [vmem:[#allocation4 + $0x1a8] sm:$0xf0] %v1706_v7  ;;  %1682 = vst [vmem:[#allocation4 + $0x268] sm:$0xf] %v1681_v45  ;;  %v2384_v54 = vld [vmem:[#allocation4 + $0x240] sm:$0xff]  ;;  %4103 = vmatmul.mubr.bf16.gmra.mrb[4].mxu1 %v2437_v4 }
 0x355   :  { %v1683_v12 = vld [vmem:[#allocation3 + $0xd9] sm:$0xf]  ;;  %v1747_v16 = vld [vmem:[#allocation3 + $0x68] sm:$0xf]  ;;  %1715 = vst [vmem:[#allocation4 + $0x270] sm:$0xf0] %v1713_v6  ;;  %7633 = vmatpush3.bf16.msra.mxu1 %v8177_v29 }
 0x356   :  { %v2409_v20 = vld [vmem:[#allocation4 + $0x308] sm:$0xff]  ;;  %1680 = vst [vmem:[#allocation4 + $0x1a0] sm:$0xf0] %v1678_v53  ;;  %v1685_v24 = vrot.slane %v1683_v12, 4  ;;  %v1749_v28 = vrot.slane %v1747_v16, 4  ;;  %v2315_v36 = vld [vmem:[#allocation4 + $0x18] sm:$0xff]  ;;  %7634 = vmatprep.subr.bf16.mxu1 %v8178_v9 }
 0x357   :  { %v1752_v32 = vld [vmem:[#allocation3 + $0x70] sm:$0xf]  ;;  %v1754_v40 = vld [vmem:[#allocation3 + $0x78] sm:$0xf]  ;;  %v1718_v44 = vld [vmem:[#allocation3 + $0xa] sm:$0xf]  ;;  %v2459_v50 = vpack.c.bf16 %v2409_v20, %v2384_v54 }
 0x358   :  { %1753 = vst [vmem:[#allocation4 + $0xf0] sm:$0xf] %v1752_v32  ;;  %1687 = vst [vmem:[#allocation4 + $0x268] sm:$0xf0] %v1685_v24  ;;  %v1756_v56 = vrot.slane %v1754_v40, 4  ;;  %v1720_v59 = vrot.slane %v1718_v44, 4 }
 0x359   :  { %1751 = vst [vmem:[#allocation4 + $0x28] sm:$0xf0] %v1749_v28  ;;  %v1723_v62 = vld [vmem:[#allocation3 + $0x12] sm:$0xf]  ;;  %v1725_v2 = vld [vmem:[#allocation3 + $0x1a] sm:$0xf]  ;;  %4642 = vmatmul.mubr.bf16.gmra.mrb[132].mxu0 %v2459_v50 }
 0x35a   :  { %v2340_v5 = vld [vmem:[#allocation4 + $0xe0] sm:$0xff]  ;;  %1724 = vst [vmem:[#allocation4 + $0xe8] sm:$0xf] %v1723_v62  ;;  %v1727_v10 = vrot.slane %v1725_v2, 4  ;;  %v1762_v14 = vld [vmem:[#allocation3 + $0x128] sm:$0xf] }
 0x35b   :  { %v2415_v18 = vpack.c.bf16 %v2340_v5, %v2315_v36  ;;  %v8179_v26 = vld [vmem:[%s11695_s4 + $0x98] sm:$0xff]   ;;  %1758 = vst [vmem:[#allocation4 + $0xf0] sm:$0xf0] %v1756_v56  ;;  %1722 = vst [vmem:[#allocation4 + $0x20] sm:$0xf0] %v1720_v59  ;;  %v1764_v34 = vrot.slane %v1762_v14, 4 }
 0x35c   :  { %v1767_v46 = vld [vmem:[#allocation3 + $0x130] sm:$0xf]  ;;  %v1769_v37 = vld [vmem:[#allocation3 + $0x138] sm:$0xf]  ;;  %v8180_v22 = vld [vmem:[%s11695_s4 + $0xe0] sm:$0xff]   ;;  %7635 = vmatpush3.bf16.msra.mxu1 %v8179_v26 }
 0x35d   :  { %1729 = vst [vmem:[#allocation4 + $0xe8] sm:$0xf0] %v1727_v10  ;;  %1768 = vst [vmem:[#allocation4 + $0x280] sm:$0xf] %v1767_v46  ;;  %v1771_v38 = vrot.slane %v1769_v37, 4  ;;  %4143 = vmatprep.mubr.bf16.mxu1 %v2415_v18  ;;  %v8181_v51 = vld [vmem:[%s11695_s4 + $0xa0] sm:$0xff]   ;;  %7636 = vmatprep.subr.bf16.mxu1 %v8180_v22 }
 0x35e   :  { %v1732_v58 = vld [vmem:[#allocation3 + $0xca] sm:$0xf]  ;;  %v1737_v25 = vld [vmem:[#allocation3 + $0xd2] sm:$0xf]  ;;  %1766 = vst [vmem:[#allocation4 + $0x1b8] sm:$0xf0] %v1764_v34 }
 0x35f   :  { %v1734_v30 = vrot.slane %v1732_v58, 4  ;;  %1738 = vst [vmem:[#allocation4 + $0x278] sm:$0xf] %v1737_v25  ;;  %v1739_v1 = vld [vmem:[#allocation3 + $0xda] sm:$0xf]  ;;  %v8182_v27 = vld [vmem:[%s11695_s4 + $0xe8] sm:$0xff]  }
 0x360   :  { %v1806_v17 = vld [vmem:[#allocation3 + $0x69] sm:$0xf]  ;;  %1773 = vst [vmem:[#allocation4 + $0x280] sm:$0xf0] %v1771_v38  ;;  %v1741_v33 = vrot.slane %v1739_v1, 4  ;;  %7637 = vmatpush3.bf16.msra.mxu1 %v8181_v51  ;;  %v8184_v61 = vld [vmem:[%s11695_s4 + $0xf0] sm:$0xff]  }
 0x361   :  { %v1808_v41 = vrot.slane %v1806_v17, 4  ;;  %v1811_v42 = vld [vmem:[#allocation3 + $0x71] sm:$0xf]  ;;  %1736 = vst [vmem:[#allocation4 + $0x1b0] sm:$0xf0] %v1734_v30  ;;  %v8183_v52 = vld [vmem:[%s11695_s4 + $0xa8] sm:$0xff]   ;;  %7638 = vmatprep.subr.bf16.mxu1 %v8182_v27 }
 0x362   :  { %1812 = vst [vmem:[#allocation4 + $0x100] sm:$0xf] %v1811_v42  ;;  %v1813_v55 = vld [vmem:[#allocation3 + $0x79] sm:$0xf]  ;;  %v1782_v43 = vld [vmem:[#allocation3 + $0xa0] sm:$0xf] }
 0x363   :  { %v1777_v13 = vld [vmem:[#allocation3 + $0x98] sm:$0xf]  ;;  %1743 = vst [vmem:[#allocation4 + $0x278] sm:$0xf0] %v1741_v33  ;;  %1810 = vst [vmem:[#allocation4 + $0x38] sm:$0xf0] %v1808_v41 }
 0x364   :  { %v1815_v63 = vrot.slane %v1813_v55, 4  ;;  %v1779_v19 = vrot.slane %v1777_v13, 4  ;;  %1783 = vst [vmem:[#allocation4 + $0xf8] sm:$0xf] %v1782_v43  ;;  %v1784_v23 = vld [vmem:[#allocation3 + $0xa8] sm:$0xf]  ;;  %7639 = vmatpush3.bf16.msra.mxu1 %v8183_v52 }
 0x365   :  { %v1786_v47 = vrot.slane %v1784_v23, 4  ;;  %v1820_v57 = vld [vmem:[#allocation3 + $0x129] sm:$0xf]  ;;  %v1825_v3 = vld [vmem:[#allocation3 + $0x131] sm:$0xf]  ;;  %7640 = vmatprep.subr.bf16.mxu1 %v8184_v61  ;;  %v8186_v9 = vld [vmem:[%s11695_s4 + $0xf8] sm:$0xff]  }
 0x366   :  { %1817 = vst [vmem:[#allocation4 + $0x100] sm:$0xf0] %v1815_v63  ;;  %1781 = vst [vmem:[#allocation4 + $0x30] sm:$0xf0] %v1779_v19  ;;  %v1822_v39 = vrot.slane %v1820_v57, 4  ;;  %v8185_v53 = vld [vmem:[%s11695_s4 + $0xb0] sm:$0xff]  }
 0x367   :  { %1826 = vst [vmem:[#allocation4 + $0x290] sm:$0xf] %v1825_v3  ;;  %v1827_v31 = vld [vmem:[#allocation3 + $0x139] sm:$0xf]  ;;  %1788 = vst [vmem:[#allocation4 + $0xf8] sm:$0xf0] %v1786_v47 }
 0x368   :  { %v1829_v11 = vrot.slane %v1827_v31, 4  ;;  %v1792_v35 = vld [vmem:[#allocation3 + $0x158] sm:$0xf]  ;;  %v1797_v15 = vld [vmem:[#allocation3 + $0x160] sm:$0xf]  ;;  %7641 = vmatpush3.bf16.msra.mxu1 %v8185_v53  ;;  %v2314_v44 = vld [vmem:[#allocation4 + $0x10] sm:$0xff] }
 0x369   :  { %1824 = vst [vmem:[#allocation4 + $0x1c8] sm:$0xf0] %v1822_v39  ;;  %v1794_v8 = vrot.slane %v1792_v35, 4  ;;  %1798 = vst [vmem:[#allocation4 + $0x288] sm:$0xf] %v1797_v15  ;;  %v8187_v4 = vld [vmem:[%s11695_s4 + $0xb8] sm:$0xff]   ;;  %7642 = vmatprep.subr.bf16.mxu1 %v8186_v9 }
 0x36a   :  { %v1862_v60 = vld [vmem:[#allocation3 + $0x6a] sm:$0xf]  ;;  %v1867_v7 = vld [vmem:[#allocation3 + $0x72] sm:$0xf]  ;;  %1831 = vst [vmem:[#allocation4 + $0x290] sm:$0xf0] %v1829_v11 }
 0x36b   :  { %v1864_v21 = vrot.slane %v1862_v60, 4  ;;  %1868 = vst [vmem:[#allocation4 + $0x110] sm:$0xf] %v1867_v7  ;;  %v1869_v48 = vld [vmem:[#allocation3 + $0x7a] sm:$0xf]  ;;  %v8188_v56 = vld [vmem:[%s11695_s4 + $0x140] sm:$0xff]  }
 0x36c   :  { %v1834_v49 = vld [vmem:[#allocation3 + $0x99] sm:$0xf]  ;;  %1796 = vst [vmem:[#allocation4 + $0x1c0] sm:$0xf0] %v1794_v8  ;;  %v1871_v0 = vrot.slane %v1869_v48, 4  ;;  %v2365_v59 = vld [vmem:[#allocation4 + $0x1a8] sm:$0xff]  ;;  %7643 = vmatpush3.bf16.msra.mxu1 %v8187_v4 }
 0x36d   :  { %v1836_v29 = vrot.slane %v1834_v49, 4  ;;  %v1839_v6 = vld [vmem:[#allocation3 + $0xa1] sm:$0xf]  ;;  %1866 = vst [vmem:[#allocation4 + $0x48] sm:$0xf0] %v1864_v21  ;;  %v2339_v50 = vld [vmem:[#allocation4 + $0xd8] sm:$0xff]  ;;  %7656 = vmatprep.subr.bf16.mxu1 %v8188_v56 }
 0x36e   :  { %1840 = vst [vmem:[#allocation4 + $0x108] sm:$0xf] %v1839_v6  ;;  %v1841_v45 = vld [vmem:[#allocation3 + $0xa9] sm:$0xf]  ;;  %1873 = vst [vmem:[#allocation4 + $0x110] sm:$0xf0] %v1871_v0  ;;  %v2414_v46 = vpack.c.bf16 %v2339_v50, %v2314_v44 }
 0x36f   :  { %1838 = vst [vmem:[#allocation4 + $0x40] sm:$0xf0] %v1836_v29  ;;  %v1843_v12 = vrot.slane %v1841_v45, 4  ;;  %v1876_v16 = vld [vmem:[#allocation3 + $0x12a] sm:$0xf]  ;;  %v2390_v5 = vld [vmem:[#allocation4 + $0x270] sm:$0xff] }
 0x370   :  { %v1881_v54 = vld [vmem:[#allocation3 + $0x132] sm:$0xf]  ;;  %v1878_v20 = vrot.slane %v1876_v16, 4  ;;  %v1883_v24 = vld [vmem:[#allocation3 + $0x13a] sm:$0xf]  ;;  %v8189_v26 = vld [vmem:[%s11695_s4 + $0x100] sm:$0xff]   ;;  %v2440_v22 = vpack.c.bf16 %v2390_v5, %v2365_v59  ;;  %4144 = vmatmul.mubr.bf16.vlgmr.msra.gmra.mrb[8].mxu1 %v2414_v46 }
 0x371   :  { %1882 = vst [vmem:[#allocation4 + $0x2a0] sm:$0xf] %v1881_v54  ;;  %1845 = vst [vmem:[#allocation4 + $0x108] sm:$0xf0] %v1843_v12  ;;  %v1885_v28 = vrot.slane %v1883_v24, 4  ;;  %v8190_v37 = vld [vmem:[%s11695_s4 + $0x148] sm:$0xff]   ;;  %7657 = vmatpush3.bf16.msra.mxu1 %v8189_v26 }
 0x372   :  { %v1848_v32 = vld [vmem:[#allocation3 + $0x159] sm:$0xf]  ;;  %1880 = vst [vmem:[#allocation4 + $0x1d8] sm:$0xf0] %v1878_v20  ;;  %v1853_v40 = vld [vmem:[#allocation3 + $0x161] sm:$0xf]  ;;  %4151 = vmatprep.mubr.bf16.mxu1 %v2440_v22  ;;  %7658 = vmatprep.subr.bf16.mxu1 %v8190_v37 }
 0x373   :  { %v1850_v36 = vrot.slane %v1848_v32, 4  ;;  %1887 = vst [vmem:[#allocation4 + $0x2a0] sm:$0xf0] %v1885_v28  ;;  %1854 = vst [vmem:[#allocation4 + $0x298] sm:$0xf] %v1853_v40  ;;  %v8191_v38 = vld [vmem:[%s11695_s4 + $0x108] sm:$0xff]  }
 0x374   :  { %v1916_v62 = vld [vmem:[#allocation3 + $0x38] sm:$0xf]  ;;  %v1918_v2 = vld [vmem:[#allocation3 + $0x40] sm:$0xf]  ;;  %v1923_v14 = vld [vmem:[#allocation3 + $0x48] sm:$0xf] }
 0x375   :  { %1852 = vst [vmem:[#allocation4 + $0x1d0] sm:$0xf0] %v1850_v36  ;;  %1917 = vst [vmem:[#allocation4 + $0x58] sm:$0xf] %v1916_v62  ;;  %v1920_v10 = vrot.slane %v1918_v2, 4  ;;  %v8192_v58 = vld [vmem:[%s11695_s4 + $0x150] sm:$0xff]   ;;  %7659 = vmatpush3.bf16.msra.mxu1 %v8191_v38 }
 0x376   :  { %v1925_v18 = vld [vmem:[#allocation3 + $0x50] sm:$0xf]  ;;  %1924 = vst [vmem:[#allocation4 + $0x120] sm:$0xf] %v1923_v14  ;;  %v2364_v25 = vld [vmem:[#allocation4 + $0x1a0] sm:$0xff]  ;;  %v2389_v30 = vld [vmem:[#allocation4 + $0x268] sm:$0xff]  ;;  %7660 = vmatprep.subr.bf16.mxu1 %v8192_v58 }
 0x377   :  { %v1927_v34 = vrot.slane %v1925_v18, 4  ;;  %1922 = vst [vmem:[#allocation4 + $0x58] sm:$0xf0] %v1920_v10  ;;  %v1888_v1 = vld [vmem:[#allocation3 + $0x8] sm:$0xf]  ;;  %v2342_v42 = vld [vmem:[#allocation4 + $0xf0] sm:$0xff]  ;;  %v2439_v23 = vpack.c.bf16 %v2389_v30, %v2364_v25 }
 0x378   :  { %1889 = vst [vmem:[#allocation4 + $0x50] sm:$0xf] %v1888_v1  ;;  %v1890_v17 = vld [vmem:[#allocation3 + $0x10] sm:$0xf]  ;;  %v1895_v51 = vld [vmem:[#allocation3 + $0x18] sm:$0xf] }
 0x379   :  { %1929 = vst [vmem:[#allocation4 + $0x120] sm:$0xf0] %v1927_v34  ;;  %v1897_v33 = vld [vmem:[#allocation3 + $0x20] sm:$0xf]  ;;  %v2317_v41 = vld [vmem:[#allocation4 + $0x28] sm:$0xff]  ;;  %v1892_v55 = vrot.slane %v1890_v17, 4  ;;  %4152 = vmatmul.mubr.bf16.gmra.mrb[12].mxu1 %v2439_v23 }
 0x37a   :  { %1896 = vst [vmem:[#allocation4 + $0x118] sm:$0xf] %v1895_v51  ;;  %v1899_v13 = vrot.slane %v1897_v33, 4  ;;  %v1930_v43 = vld [vmem:[#allocation3 + $0xf8] sm:$0xf]  ;;  %v8193_v27 = vld [vmem:[%s11695_s4 + $0x110] sm:$0xff]   ;;  %v2417_v39 = vpack.c.bf16 %v2342_v42, %v2317_v41 }
 0x37b   :  { %1931 = vst [vmem:[#allocation4 + $0x1e8] sm:$0xf] %v1930_v43  ;;  %v1932_v63 = vld [vmem:[#allocation3 + $0x100] sm:$0xf]  ;;  %v1937_v19 = vld [vmem:[#allocation3 + $0x108] sm:$0xf]  ;;  %7661 = vmatpush3.bf16.msra.mxu1 %v8193_v27 }
 0x37c   :  { %v8194_v47 = vld [vmem:[%s11695_s4 + $0x158] sm:$0xff]   ;;  %1894 = vst [vmem:[#allocation4 + $0x50] sm:$0xf0] %v1892_v55  ;;  %1901 = vst [vmem:[#allocation4 + $0x118] sm:$0xf0] %v1899_v13  ;;  %v1934_v57 = vrot.slane %v1932_v63, 4  ;;  %4192 = vmatprep.mubr.bf16.mxu1 %v2417_v39 }
 0x37d   :  { %1938 = vst [vmem:[#allocation4 + $0x2b0] sm:$0xf] %v1937_v19  ;;  %v1939_v3 = vld [vmem:[#allocation3 + $0x110] sm:$0xf]  ;;  %v1902_v52 = vld [vmem:[#allocation3 + $0xc8] sm:$0xf]  ;;  %7662 = vmatprep.subr.bf16.mxu1 %v8194_v47 }
 0x37e   :  { %v1941_v31 = vrot.slane %v1939_v3, 4  ;;  %v1904_v11 = vld [vmem:[#allocation3 + $0xd0] sm:$0xf]  ;;  %1936 = vst [vmem:[#allocation4 + $0x1e8] sm:$0xf0] %v1934_v57  ;;  %v8195_v8 = vld [vmem:[%s11695_s4 + $0x118] sm:$0xff]  }
 0x37f   :  { %1903 = vst [vmem:[#allocation4 + $0x1e0] sm:$0xf] %v1902_v52  ;;  %v1906_v35 = vrot.slane %v1904_v11, 4  ;;  %v1909_v15 = vld [vmem:[#allocation3 + $0xd8] sm:$0xf]  ;;  %v8196_v48 = vld [vmem:[%s11695_s4 + $0x160] sm:$0xff]   ;;  %7663 = vmatpush3.bf16.msra.mxu1 %v8195_v8 }
 0x380   :  { %v1911_v61 = vld [vmem:[#allocation3 + $0xe0] sm:$0xf]  ;;  %1943 = vst [vmem:[#allocation4 + $0x2b0] sm:$0xf0] %v1941_v31  ;;  %1910 = vst [vmem:[#allocation4 + $0x2a8] sm:$0xf] %v1909_v15  ;;  %7664 = vmatprep.subr.bf16.mxu1 %v8196_v48 }
 0x381   :  { %v1913_v60 = vrot.slane %v1911_v61, 4  ;;  %v1972_v7 = vld [vmem:[#allocation3 + $0x39] sm:$0xf]  ;;  %v1974_v21 = vld [vmem:[#allocation3 + $0x41] sm:$0xf]  ;;  %v8198_v24 = vld [vmem:[%s11695_s4 + $0x168] sm:$0xff]  }
 0x382   :  { %1908 = vst [vmem:[#allocation4 + $0x1e0] sm:$0xf0] %v1906_v35  ;;  %1973 = vst [vmem:[#allocation4 + $0x68] sm:$0xf] %v1972_v7  ;;  %v1976_v49 = vrot.slane %v1974_v21, 4  ;;  %v8197_v54 = vld [vmem:[%s11695_s4 + $0x120] sm:$0xff]  }
 0x383   :  { %v1979_v0 = vld [vmem:[#allocation3 + $0x49] sm:$0xf]  ;;  %v1981_v29 = vld [vmem:[#allocation3 + $0x51] sm:$0xf]  ;;  %1915 = vst [vmem:[#allocation4 + $0x2a8] sm:$0xf0] %v1913_v60  ;;  %7665 = vmatpush3.bf16.msra.mxu1 %v8197_v54 }
 0x384   :  { %1980 = vst [vmem:[#allocation4 + $0x130] sm:$0xf] %v1979_v0  ;;  %v1983_v6 = vrot.slane %v1981_v29, 4  ;;  %v1944_v53 = vld [vmem:[#allocation3 + $0x9] sm:$0xf]  ;;  %7666 = vmatprep.subr.bf16.mxu1 %v8198_v24  ;;  %v8200_v5 = vld [vmem:[%s11695_s4 + $0x170] sm:$0xff]  }
 0x385   :  { %v1946_v45 = vld [vmem:[#allocation3 + $0x11] sm:$0xf]  ;;  %1978 = vst [vmem:[#allocation4 + $0x68] sm:$0xf0] %v1976_v49  ;;  %1945 = vst [vmem:[#allocation4 + $0x60] sm:$0xf] %v1944_v53 }
 0x386   :  { %v1948_v9 = vrot.slane %v1946_v45, 4  ;;  %v1951_v12 = vld [vmem:[#allocation3 + $0x19] sm:$0xf]  ;;  %v1953_v16 = vld [vmem:[#allocation3 + $0x21] sm:$0xf]  ;;  %v8199_v59 = vld [vmem:[%s11695_s4 + $0x128] sm:$0xff]  }
 0x387   :  { %1985 = vst [vmem:[#allocation4 + $0x130] sm:$0xf0] %v1983_v6  ;;  %1952 = vst [vmem:[#allocation4 + $0x128] sm:$0xf] %v1951_v12  ;;  %v1955_v20 = vrot.slane %v1953_v16, 4  ;;  %7667 = vmatpush3.bf16.msra.mxu1 %v8199_v59  ;;  %v8201_v22 = vld [vmem:[%s11695_s4 + $0x130] sm:$0xff]  }
 0x388   :  { %1950 = vst [vmem:[#allocation4 + $0x60] sm:$0xf0] %v1948_v9  ;;  %v1986_v28 = vld [vmem:[#allocation3 + $0xf9] sm:$0xf]  ;;  %v1988_v32 = vld [vmem:[#allocation3 + $0x101] sm:$0xf]  ;;  %7668 = vmatprep.subr.bf16.mxu1 %v8200_v5 }
 0x389   :  { %1957 = vst [vmem:[#allocation4 + $0x128] sm:$0xf0] %v1955_v20  ;;  %1987 = vst [vmem:[#allocation4 + $0x1f8] sm:$0xf] %v1986_v28  ;;  %v1990_v4 = vrot.slane %v1988_v32, 4  ;;  %v8202_v25 = vld [vmem:[%s11695_s4 + $0x178] sm:$0xff]  }
 0x38a   :  { %v1993_v36 = vld [vmem:[#allocation3 + $0x109] sm:$0xf]  ;;  %v1995_v40 = vld [vmem:[#allocation3 + $0x111] sm:$0xf]  ;;  %v1965_v2 = vld [vmem:[#allocation3 + $0xd9] sm:$0xf] }
 0x38b   :  { %1994 = vst [vmem:[#allocation4 + $0x2c0] sm:$0xf] %v1993_v36  ;;  %v1997_v44 = vrot.slane %v1995_v40, 4  ;;  %v1958_v50 = vld [vmem:[#allocation3 + $0xc9] sm:$0xf]  ;;  %7669 = vmatpush3.bf16.msra.mxu1 %v8201_v22  ;;  %v8203_v55 = vld [vmem:[%s11695_s4 + $0x138] sm:$0xff]  }
 0x38c   :  { %v1960_v56 = vld [vmem:[#allocation3 + $0xd1] sm:$0xf]  ;;  %1992 = vst [vmem:[#allocation4 + $0x1f8] sm:$0xf0] %v1990_v4  ;;  %1959 = vst [vmem:[#allocation4 + $0x1f0] sm:$0xf] %v1958_v50  ;;  %7670 = vmatprep.subr.bf16.mxu1 %v8202_v25 }
 0x38d   :  { %v1962_v62 = vrot.slane %v1960_v56, 4  ;;  %1999 = vst [vmem:[#allocation4 + $0x2c0] sm:$0xf0] %v1997_v44  ;;  %1966 = vst [vmem:[#allocation4 + $0x2b8] sm:$0xf] %v1965_v2  ;;  %v8204_v13 = vld [vmem:[%s11695_s4 + $0x1c0] sm:$0xff]  }
 0x38e   :  { %v1967_v10 = vld [vmem:[#allocation3 + $0xe1] sm:$0xf]  ;;  %v2028_v18 = vld [vmem:[#allocation3 + $0x68] sm:$0xf]  ;;  %v2030_v26 = vld [vmem:[#allocation3 + $0x70] sm:$0xf] }
 0x38f   :  { %1964 = vst [vmem:[#allocation4 + $0x1f0] sm:$0xf0] %v1962_v62  ;;  %v1969_v14 = vrot.slane %v1967_v10, 4  ;;  %2029 = vst [vmem:[#allocation4 + $0x78] sm:$0xf] %v2028_v18  ;;  %v2032_v34 = vrot.slane %v2030_v26, 4  ;;  %7671 = vmatpush3.bf16.msra.mxu1 %v8203_v55 }
 0x390   :  { %v2035_v46 = vld [vmem:[#allocation3 + $0x78] sm:$0xf]  ;;  %v2037_v37 = vld [vmem:[#allocation3 + $0x80] sm:$0xf]  ;;  %v2000_v58 = vld [vmem:[#allocation3 + $0xa] sm:$0xf]  ;;  %7684 = vmatprep.subr.bf16.mxu1 %v8204_v13 }
 0x391   :  { %1971 = vst [vmem:[#allocation4 + $0x2b8] sm:$0xf0] %v1969_v14  ;;  %2036 = vst [vmem:[#allocation4 + $0x140] sm:$0xf] %v2035_v46  ;;  %v2039_v38 = vrot.slane %v2037_v37, 4  ;;  %v2316_v63 = vld [vmem:[#allocation4 + $0x20] sm:$0xff] }
 0x392   :  { %2034 = vst [vmem:[#allocation4 + $0x78] sm:$0xf0] %v2032_v34  ;;  %2001 = vst [vmem:[#allocation4 + $0x70] sm:$0xf] %v2000_v58  ;;  %v2002_v30 = vld [vmem:[#allocation3 + $0x12] sm:$0xf] }
 0x393   :  { %2041 = vst [vmem:[#allocation4 + $0x140] sm:$0xf0] %v2039_v38  ;;  %v2004_v1 = vrot.slane %v2002_v30, 4  ;;  %v2007_v17 = vld [vmem:[#allocation3 + $0x1a] sm:$0xf]  ;;  %v2341_v19 = vld [vmem:[#allocation4 + $0xe8] sm:$0xff] }
 0x394   :  { %v2009_v51 = vld [vmem:[#allocation3 + $0x22] sm:$0xf]  ;;  %2008 = vst [vmem:[#allocation4 + $0x138] sm:$0xf] %v2007_v17  ;;  %v2042_v41 = vld [vmem:[#allocation3 + $0x128] sm:$0xf]  ;;  %v2416_v7 = vpack.c.bf16 %v2341_v19, %v2316_v63 }
 0x395   :  { %v2011_v33 = vrot.slane %v2009_v51, 4  ;;  %v2044_v42 = vld [vmem:[#allocation3 + $0x130] sm:$0xf]  ;;  %2006 = vst [vmem:[#allocation4 + $0x70] sm:$0xf0] %v2004_v1  ;;  %v2367_v47 = vld [vmem:[#allocation4 + $0x1b8] sm:$0xff] }
 0x396   :  { %2043 = vst [vmem:[#allocation4 + $0x208] sm:$0xf] %v2042_v41  ;;  %v2046_v43 = vrot.slane %v2044_v42, 4  ;;  %v2049_v27 = vld [vmem:[#allocation3 + $0x138] sm:$0xf]  ;;  %v2392_v31 = vld [vmem:[#allocation4 + $0x280] sm:$0xff]  ;;  %4193 = vmatmul.mubr.bf16.vlgmr.msra.gmra.mrb[16].mxu1 %v2416_v7 }
 0x397   :  { %2013 = vst [vmem:[#allocation4 + $0x138] sm:$0xf0] %v2011_v33  ;;  %2050 = vst [vmem:[#allocation4 + $0x2d0] sm:$0xf] %v2049_v27  ;;  %v2051_v23 = vld [vmem:[#allocation3 + $0x140] sm:$0xf]  ;;  %v2442_v29 = vpack.c.bf16 %v2392_v31, %v2367_v47 }
 0x398   :  { %2048 = vst [vmem:[#allocation4 + $0x208] sm:$0xf0] %v2046_v43  ;;  %v2053_v57 = vrot.slane %v2051_v23, 4  ;;  %v2014_v3 = vld [vmem:[#allocation3 + $0xca] sm:$0xf]  ;;  %v8205_v15 = vld [vmem:[%s11695_s4 + $0x180] sm:$0xff]  }
 0x399   :  { %v2016_v39 = vld [vmem:[#allocation3 + $0xd2] sm:$0xf]  ;;  %2015 = vst [vmem:[#allocation4 + $0x200] sm:$0xf] %v2014_v3  ;;  %v2021_v11 = vld [vmem:[#allocation3 + $0xda] sm:$0xf]  ;;  %4200 = vmatprep.mubr.bf16.mxu1 %v2442_v29  ;;  %7685 = vmatpush3.bf16.msra.mxu1 %v8205_v15 }
 0x39a   :  { %v2018_v52 = vrot.slane %v2016_v39, 4  ;;  %v2023_v35 = vld [vmem:[#allocation3 + $0xe2] sm:$0xf]  ;;  %2055 = vst [vmem:[#allocation4 + $0x2d0] sm:$0xf0] %v2053_v57  ;;  %v8206_v21 = vld [vmem:[%s11695_s4 + $0x1c8] sm:$0xff]  }
 0x39b   :  { %2022 = vst [vmem:[#allocation4 + $0x2c8] sm:$0xf] %v2021_v11  ;;  %v2025_v61 = vrot.slane %v2023_v35, 4  ;;  %v2084_v8 = vld [vmem:[#allocation3 + $0x69] sm:$0xf]  ;;  %v8208_v54 = vld [vmem:[%s11695_s4 + $0x1d0] sm:$0xff]   ;;  %7686 = vmatprep.subr.bf16.mxu1 %v8206_v21 }
 0x39c   :  { %v2086_v60 = vld [vmem:[#allocation3 + $0x71] sm:$0xf]  ;;  %2020 = vst [vmem:[#allocation4 + $0x200] sm:$0xf0] %v2018_v52  ;;  %2085 = vst [vmem:[#allocation4 + $0x88] sm:$0xf] %v2084_v8 }
 0x39d   :  { %v2088_v48 = vrot.slane %v2086_v60, 4  ;;  %v2091_v49 = vld [vmem:[#allocation3 + $0x79] sm:$0xf]  ;;  %v2093_v0 = vld [vmem:[#allocation3 + $0x81] sm:$0xf]  ;;  %v8207_v16 = vld [vmem:[%s11695_s4 + $0x188] sm:$0xff]  }
 0x39e   :  { %2027 = vst [vmem:[#allocation4 + $0x2c8] sm:$0xf0] %v2025_v61  ;;  %2092 = vst [vmem:[#allocation4 + $0x150] sm:$0xf] %v2091_v49  ;;  %v2095_v6 = vrot.slane %v2093_v0, 4  ;;  %v2366_v20 = vld [vmem:[#allocation4 + $0x1b0] sm:$0xff]  ;;  %7687 = vmatpush3.bf16.msra.mxu1 %v8207_v16 }
 0x39f   :  { %v2056_v53 = vld [vmem:[#allocation3 + $0x98] sm:$0xf]  ;;  %v2058_v45 = vld [vmem:[#allocation3 + $0xa0] sm:$0xf]  ;;  %2090 = vst [vmem:[#allocation4 + $0x88] sm:$0xf0] %v2088_v48  ;;  %7688 = vmatprep.subr.bf16.mxu1 %v8208_v54 }
 0x3a0   :  { %2057 = vst [vmem:[#allocation4 + $0x80] sm:$0xf] %v2056_v53  ;;  %v2060_v9 = vrot.slane %v2058_v45, 4  ;;  %v2063_v12 = vld [vmem:[#allocation3 + $0xa8] sm:$0xf]  ;;  %v2391_v24 = vld [vmem:[#allocation4 + $0x278] sm:$0xff] }
 0x3a1   :  { %2097 = vst [vmem:[#allocation4 + $0x150] sm:$0xf0] %v2095_v6  ;;  %2064 = vst [vmem:[#allocation4 + $0x148] sm:$0xf] %v2063_v12  ;;  %v2065_v28 = vld [vmem:[#allocation3 + $0xb0] sm:$0xf]  ;;  %v2441_v14 = vpack.c.bf16 %v2391_v24, %v2366_v20 }
 0x3a2   :  { %2062 = vst [vmem:[#allocation4 + $0x80] sm:$0xf0] %v2060_v9  ;;  %v2319_v32 = vld [vmem:[#allocation4 + $0x38] sm:$0xff]  ;;  %v2067_v4 = vrot.slane %v2065_v28, 4  ;;  %v2098_v36 = vld [vmem:[#allocation3 + $0x129] sm:$0xf] }
 0x3a3   :  { %v2100_v40 = vld [vmem:[#allocation3 + $0x131] sm:$0xf]  ;;  %v2344_v44 = vld [vmem:[#allocation4 + $0x100] sm:$0xff]  ;;  %2099 = vst [vmem:[#allocation4 + $0x218] sm:$0xf] %v2098_v36  ;;  %v8210_v18 = vld [vmem:[%s11695_s4 + $0x1d8] sm:$0xff]   ;;  %4201 = vmatmul.mubr.bf16.gmra.mrb[20].mxu1 %v2441_v14 }
 0x3a4   :  { %v2102_v50 = vrot.slane %v2100_v40, 4  ;;  %v2105_v56 = vld [vmem:[#allocation3 + $0x139] sm:$0xf]  ;;  %v2107_v59 = vld [vmem:[#allocation3 + $0x141] sm:$0xf]  ;;  %v8209_v62 = vld [vmem:[%s11695_s4 + $0x190] sm:$0xff]   ;;  %v2419_v37 = vpack.c.bf16 %v2344_v44, %v2319_v32 }
 0x3a5   :  { %2069 = vst [vmem:[#allocation4 + $0x148] sm:$0xf0] %v2067_v4  ;;  %2106 = vst [vmem:[#allocation4 + $0x2e0] sm:$0xf] %v2105_v56  ;;  %v2109_v2 = vrot.slane %v2107_v59, 4  ;;  %7689 = vmatpush3.bf16.msra.mxu1 %v8209_v62  ;;  %v8211_v30 = vld [vmem:[%s11695_s4 + $0x198] sm:$0xff]  }
 0x3a6   :  { %v2070_v5 = vld [vmem:[#allocation3 + $0x158] sm:$0xf]  ;;  %v2072_v10 = vld [vmem:[#allocation3 + $0x160] sm:$0xf]  ;;  %2104 = vst [vmem:[#allocation4 + $0x218] sm:$0xf0] %v2102_v50  ;;  %4241 = vmatprep.mubr.bf16.mxu1 %v2419_v37  ;;  %7690 = vmatprep.subr.bf16.mxu1 %v8210_v18 }
 0x3a7   :  { %2071 = vst [vmem:[#allocation4 + $0x210] sm:$0xf] %v2070_v5  ;;  %v2074_v26 = vrot.slane %v2072_v10, 4  ;;  %v2140_v34 = vld [vmem:[#allocation3 + $0x6a] sm:$0xf]  ;;  %v8212_v17 = vld [vmem:[%s11695_s4 + $0x1e0] sm:$0xff]  }
 0x3a8   :  { %v2142_v46 = vld [vmem:[#allocation3 + $0x72] sm:$0xf]  ;;  %2111 = vst [vmem:[#allocation4 + $0x2e0] sm:$0xf0] %v2109_v2  ;;  %2141 = vst [vmem:[#allocation4 + $0x98] sm:$0xf] %v2140_v34 }
 0x3a9   :  { %v2144_v22 = vrot.slane %v2142_v46, 4  ;;  %v2147_v38 = vld [vmem:[#allocation3 + $0x7a] sm:$0xf]  ;;  %v2149_v58 = vld [vmem:[#allocation3 + $0x82] sm:$0xf]  ;;  %7691 = vmatpush3.bf16.msra.mxu1 %v8211_v30  ;;  %v8214_v47 = vld [vmem:[%s11695_s4 + $0x1e8] sm:$0xff]  }
 0x3aa   :  { %2076 = vst [vmem:[#allocation4 + $0x210] sm:$0xf0] %v2074_v26  ;;  %2148 = vst [vmem:[#allocation4 + $0x160] sm:$0xf] %v2147_v38  ;;  %v2151_v25 = vrot.slane %v2149_v58, 4  ;;  %v8213_v63 = vld [vmem:[%s11695_s4 + $0x1a0] sm:$0xff]   ;;  %7692 = vmatprep.subr.bf16.mxu1 %v8212_v17 }
 0x3ab   :  { %2146 = vst [vmem:[#allocation4 + $0x98] sm:$0xf0] %v2144_v22  ;;  %v2112_v1 = vld [vmem:[#allocation3 + $0x99] sm:$0xf]  ;;  %v2114_v51 = vld [vmem:[#allocation3 + $0xa1] sm:$0xf] }
 0x3ac   :  { %2153 = vst [vmem:[#allocation4 + $0x160] sm:$0xf0] %v2151_v25  ;;  %2113 = vst [vmem:[#allocation4 + $0x90] sm:$0xf] %v2112_v1  ;;  %v2119_v33 = vld [vmem:[#allocation3 + $0xa9] sm:$0xf] }
 0x3ad   :  { %v2116_v41 = vrot.slane %v2114_v51, 4  ;;  %2120 = vst [vmem:[#allocation4 + $0x158] sm:$0xf] %v2119_v33  ;;  %v2121_v42 = vld [vmem:[#allocation3 + $0xb1] sm:$0xf]  ;;  %v8215_v52 = vld [vmem:[%s11695_s4 + $0x1a8] sm:$0xff]   ;;  %7693 = vmatpush3.bf16.msra.mxu1 %v8213_v63 }
 0x3ae   :  { %v2154_v55 = vld [vmem:[#allocation3 + $0x12a] sm:$0xf]  ;;  %v2123_v13 = vrot.slane %v2121_v42, 4  ;;  %v2156_v43 = vld [vmem:[#allocation3 + $0x132] sm:$0xf]  ;;  %7694 = vmatprep.subr.bf16.mxu1 %v8214_v47  ;;  %v8218_v7 = vld [vmem:[%s11695_s4 + $0x1f8] sm:$0xff]  }
 0x3af   :  { %2155 = vst [vmem:[#allocation4 + $0x228] sm:$0xf] %v2154_v55  ;;  %v2161_v27 = vld [vmem:[#allocation3 + $0x13a] sm:$0xf]  ;;  %2118 = vst [vmem:[#allocation4 + $0x90] sm:$0xf0] %v2116_v41 }
 0x3b0   :  { %v2158_v19 = vrot.slane %v2156_v43, 4  ;;  %2162 = vst [vmem:[#allocation4 + $0x2f0] sm:$0xf] %v2161_v27  ;;  %v2163_v23 = vld [vmem:[#allocation3 + $0x142] sm:$0xf]  ;;  %v8216_v61 = vld [vmem:[%s11695_s4 + $0x1f0] sm:$0xff]  }
 0x3b1   :  { %2125 = vst [vmem:[#allocation4 + $0x158] sm:$0xf0] %v2123_v13  ;;  %v2165_v57 = vrot.slane %v2163_v23, 4  ;;  %v2126_v3 = vld [vmem:[#allocation3 + $0x159] sm:$0xf]  ;;  %7695 = vmatpush3.bf16.msra.mxu1 %v8215_v52  ;;  %v8217_v60 = vld [vmem:[%s11695_s4 + $0x1b0] sm:$0xff]  }
 0x3b2   :  { %2160 = vst [vmem:[#allocation4 + $0x228] sm:$0xf0] %v2158_v19  ;;  %2127 = vst [vmem:[#allocation4 + $0x220] sm:$0xf] %v2126_v3  ;;  %v2128_v39 = vld [vmem:[#allocation3 + $0x161] sm:$0xf]  ;;  %7696 = vmatprep.subr.bf16.mxu1 %v8216_v61 }
 0x3b3   :  { %v2198_v31 = vld [vmem:[#allocation3 + $0x40] sm:$0xf]  ;;  %2167 = vst [vmem:[#allocation4 + $0x2f0] sm:$0xf0] %v2165_v57  ;;  %v2130_v11 = vrot.slane %v2128_v39, 4  ;;  %v8219_v21 = vld [vmem:[%s11695_s4 + $0x1b8] sm:$0xff]  }
 0x3b4   :  { %2199 = vst [vmem:[#allocation4 + $0xa8] sm:$0xf] %v2198_v31  ;;  %v2200_v35 = vld [vmem:[#allocation3 + $0x48] sm:$0xf]  ;;  %v2205_v15 = vld [vmem:[#allocation3 + $0x50] sm:$0xf] }
 0x3b5   :  { %v2202_v8 = vrot.slane %v2200_v35, 4  ;;  %2206 = vst [vmem:[#allocation4 + $0x170] sm:$0xf] %v2205_v15  ;;  %2132 = vst [vmem:[#allocation4 + $0x220] sm:$0xf0] %v2130_v11  ;;  %v8220_v48 = vld [vmem:[%s11695_s4 + $0x240] sm:$0xff]   ;;  %7697 = vmatpush3.bf16.msra.mxu1 %v8217_v60 }
 0x3b6   :  { %v2318_v49 = vld [vmem:[#allocation4 + $0x30] sm:$0xff]  ;;  %v2343_v0 = vld [vmem:[#allocation4 + $0xf8] sm:$0xff]  ;;  %7698 = vmatprep.subr.bf16.mxu1 %v8218_v7  ;;  %v2369_v29 = vld [vmem:[#allocation4 + $0x1c8] sm:$0xff] }
 0x3b7   :  { %2204 = vst [vmem:[#allocation4 + $0xa8] sm:$0xf0] %v2202_v8  ;;  %v2394_v6 = vld [vmem:[#allocation4 + $0x290] sm:$0xff]  ;;  %v2170_v45 = vld [vmem:[#allocation3 + $0x18] sm:$0xf]  ;;  %v8221_v12 = vld [vmem:[%s11695_s4 + $0x200] sm:$0xff]   ;;  %v2418_v20 = vpack.c.bf16 %v2343_v0, %v2318_v49 }
 0x3b8   :  { %v2168_v53 = vld [vmem:[#allocation3 + $0x10] sm:$0xf]  ;;  %v2175_v9 = vld [vmem:[#allocation3 + $0x20] sm:$0xf]  ;;  %v2172_v16 = vrot.slane %v2170_v45, 4  ;;  %v8222_v24 = vld [vmem:[%s11695_s4 + $0x248] sm:$0xff]   ;;  %v2444_v4 = vpack.c.bf16 %v2394_v6, %v2369_v29 }
 0x3b9   :  { %7699 = vmatpush3.bf16.msra.mxu1 %v8219_v21  ;;  %2169 = vst [vmem:[#allocation4 + $0xa0] sm:$0xf] %v2168_v53  ;;  %2176 = vst [vmem:[#allocation4 + $0x168] sm:$0xf] %v2175_v9  ;;  %v2178_v54 = vld [vmem:[#allocation3 + $0x28] sm:$0xf] }
 0x3ba   :  { %7712 = vmatprep.subr.bf16.mxu1 %v8220_v48  ;;  %v2180_v28 = vrot.slane %v2178_v54, 4  ;;  %v2213_v32 = vld [vmem:[#allocation3 + $0x100] sm:$0xf]  ;;  %2174 = vst [vmem:[#allocation4 + $0xa0] sm:$0xf0] %v2172_v16  ;;  %v8223_v50 = vld [vmem:[%s11695_s4 + $0x208] sm:$0xff]  }
 0x3bb   :  { %2214 = vst [vmem:[#allocation4 + $0x238] sm:$0xf] %v2213_v32  ;;  %v2215_v36 = vld [vmem:[#allocation3 + $0x108] sm:$0xf]  ;;  %v2220_v40 = vld [vmem:[#allocation3 + $0x110] sm:$0xf] }
 0x3bc   :  { %v2223_v44 = vld [vmem:[#allocation3 + $0x118] sm:$0xf]  ;;  %4242 = vmatmul.mubr.bf16.vlgmr.msra.gmra.mrb[24].mxu1 %v2418_v20  ;;  %2182 = vst [vmem:[#allocation4 + $0x168] sm:$0xf0] %v2180_v28  ;;  %v2217_v56 = vrot.slane %v2215_v36, 4  ;;  %v2393_v62 = vld [vmem:[#allocation4 + $0x288] sm:$0xff] }
 0x3bd   :  { %2221 = vst [vmem:[#allocation4 + $0x300] sm:$0xf] %v2220_v40  ;;  %v2225_v59 = vrot.slane %v2223_v44, 4  ;;  %4249 = vmatprep.mubr.bf16.mxu1 %v2444_v4  ;;  %7713 = vmatpush3.bf16.msra.mxu1 %v8221_v12  ;;  %v8224_v2 = vld [vmem:[%s11695_s4 + $0x250] sm:$0xff]   ;;  %v2368_v5 = vld [vmem:[#allocation4 + $0x1c0] sm:$0xff]  ;;  %v2321_v26 = vld [vmem:[#allocation4 + $0x48] sm:$0xff] }
 0x3be   :  { %7714 = vmatprep.subr.bf16.mxu1 %v8222_v24  ;;  %2219 = vst [vmem:[#allocation4 + $0x238] sm:$0xf0] %v2217_v56  ;;  %v2183_v10 = vld [vmem:[#allocation3 + $0xd0] sm:$0xf]  ;;  %v2185_v14 = vld [vmem:[#allocation3 + $0xd8] sm:$0xf]  ;;  %v2443_v1 = vpack.c.bf16 %v2393_v62, %v2368_v5 }
 0x3bf   :  { %2227 = vst [vmem:[#allocation4 + $0x300] sm:$0xf0] %v2225_v59  ;;  %v8225_v18 = vld [vmem:[%s11695_s4 + $0x210] sm:$0xff]   ;;  %2184 = vst [vmem:[#allocation4 + $0x230] sm:$0xf] %v2183_v10  ;;  %v2187_v34 = vrot.slane %v2185_v14, 4 }
 0x3c0   :  { %v2190_v46 = vld [vmem:[#allocation3 + $0xe0] sm:$0xf]  ;;  %v2193_v37 = vld [vmem:[#allocation3 + $0xe8] sm:$0xf]  ;;  %v2346_v22 = vld [vmem:[#allocation4 + $0x110] sm:$0xff] }
 0x3c1   :  { %2191 = vst [vmem:[#allocation4 + $0x2f8] sm:$0xf] %v2190_v46  ;;  %v2195_v38 = vrot.slane %v2193_v37, 4  ;;  %7715 = vmatpush3.bf16.msra.mxu1 %v8223_v50  ;;  %2189 = vst [vmem:[#allocation4 + $0x230] sm:$0xf0] %v2187_v34  ;;  %v8226_v17 = vld [vmem:[%s11695_s4 + $0x258] sm:$0xff]   ;;  %v2421_v41 = vpack.c.bf16 %v2346_v22, %v2321_v26 }
 0x3c2   :  { %v2284_v58 = vld [vmem:[#allocation3 + $0x12] sm:$0xf]  ;;  %v2286_v25 = vld [vmem:[#allocation3 + $0x1a] sm:$0xf]  ;;  %v2291_v30 = vld [vmem:[#allocation3 + $0x22] sm:$0xf]  ;;  %7716 = vmatprep.subr.bf16.mxu1 %v8224_v2 }
 0x3c3   :  { %2197 = vst [vmem:[#allocation4 + $0x2f8] sm:$0xf0] %v2195_v38  ;;  %2285 = vst [vmem:[#allocation4 + $0xc0] sm:$0xf] %v2284_v58  ;;  %v2288_v51 = vrot.slane %v2286_v25, 4  ;;  %v8227_v55 = vld [vmem:[%s11695_s4 + $0x218] sm:$0xff]  }
 0x3c4   :  { %2292 = vst [vmem:[#allocation4 + $0x188] sm:$0xf] %v2291_v30  ;;  %v2293_v33 = vld [vmem:[#allocation3 + $0x2a] sm:$0xf]  ;;  %4250 = vmatmul.mubr.bf16.gmra.mrb[28].mxu1 %v2443_v1  ;;  %v8228_v13 = vld [vmem:[%s11695_s4 + $0x260] sm:$0xff]   ;;  %v8232_v31 = vld [vmem:[%s11695_s4 + $0x270] sm:$0xff]  }
 0x3c5   :  { %v2295_v42 = vrot.slane %v2293_v33, 4  ;;  %2290 = vst [vmem:[#allocation4 + $0xc0] sm:$0xf0] %v2288_v51  ;;  %7717 = vmatpush3.bf16.msra.mxu1 %v8225_v18  ;;  %4290 = vmatprep.mubr.bf16.mxu1 %v2421_v41  ;;  %v2298_v43 = vld [vmem:[#allocation3 + $0xd2] sm:$0xf]  ;;  %v8229_v27 = vld [vmem:[%s11695_s4 + $0x220] sm:$0xff]  }
 0x3c6   :  { %7718 = vmatprep.subr.bf16.mxu1 %v8226_v17  ;;  %2299 = vst [vmem:[#allocation4 + $0x250] sm:$0xf] %v2298_v43  ;;  %v2300_v63 = vld [vmem:[#allocation3 + $0xda] sm:$0xf]  ;;  %v8230_v19 = vld [vmem:[%s11695_s4 + $0x268] sm:$0xff]   ;;  %v8233_v52 = vld [vmem:[%s11695_s4 + $0x230] sm:$0xff]  }
 0x3c7   :  { %2297 = vst [vmem:[#allocation4 + $0x188] sm:$0xf0] %v2295_v42  ;;  %v2302_v23 = vrot.slane %v2300_v63, 4  ;;  %v2305_v47 = vld [vmem:[#allocation3 + $0xe2] sm:$0xf]  ;;  %v8231_v39 = vld [vmem:[%s11695_s4 + $0x228] sm:$0xff]  }
 0x3c8   :  { %v2307_v57 = vld [vmem:[#allocation3 + $0xea] sm:$0xf]  ;;  %2306 = vst [vmem:[#allocation4 + $0x318] sm:$0xf] %v2305_v47  ;;  %v8234_v11 = vld [vmem:[%s11695_s4 + $0x278] sm:$0xff]   ;;  %v8236_v15 = vld [vmem:[%s11695_s4 + $0x2c0] sm:$0xff]  }
 0x3c9   :  { %7719 = vmatpush3.bf16.msra.mxu1 %v8227_v55  ;;  %v2309_v3 = vrot.slane %v2307_v57, 4  ;;  %2304 = vst [vmem:[#allocation4 + $0x250] sm:$0xf0] %v2302_v23  ;;  %v8235_v35 = vld [vmem:[%s11695_s4 + $0x238] sm:$0xff]   ;;  %v2320_v61 = vld [vmem:[#allocation4 + $0x40] sm:$0xff]  ;;  %v2345_v8 = vld [vmem:[#allocation4 + $0x108] sm:$0xff] }
 0x3ca   :  { %7720 = vmatprep.subr.bf16.mxu1 %v8228_v13  ;;  %v2371_v60 = vld [vmem:[#allocation4 + $0x1d8] sm:$0xff]  ;;  %v2396_v7 = vld [vmem:[#allocation4 + $0x2a0] sm:$0xff]  ;;  %v2420_v48 = vpack.c.bf16 %v2345_v8, %v2320_v61  ;;  %v8238_v49 = vld [vmem:[%s11695_s4 + $0x2c8] sm:$0xff]  }
 0x3cb   :  { %2311 = vst [vmem:[#allocation4 + $0x318] sm:$0xf0] %v2309_v3  ;;  %v8237_v21 = vld [vmem:[%s11695_s4 + $0x280] sm:$0xff]   ;;  %v2446_v0 = vpack.c.bf16 %v2396_v7, %v2371_v60  ;;  %v8239_v29 = vld [vmem:[%s11695_s4 + $0x288] sm:$0xff]   ;;  %v8240_v6 = vld [vmem:[%s11695_s4 + $0x2d0] sm:$0xff]  }
 0x3cc   :  { %v2370_v53 = vld [vmem:[#allocation4 + $0x1d0] sm:$0xff]  ;;  %v2395_v45 = vld [vmem:[#allocation4 + $0x298] sm:$0xff]  ;;  %v2348_v12 = vld [vmem:[#allocation4 + $0x120] sm:$0xff] }
 0x3cd   :  { %7721 = vmatpush3.bf16.msra.mxu1 %v8229_v27  ;;  %v2323_v9 = vld [vmem:[#allocation4 + $0x58] sm:$0xff]  ;;  %v8241_v16 = vld [vmem:[%s11695_s4 + $0x290] sm:$0xff]   ;;  %v2445_v54 = vpack.c.bf16 %v2395_v45, %v2370_v53  ;;  %v8244_v32 = vld [vmem:[%s11695_s4 + $0x2e0] sm:$0xff]  }
 0x3ce   :  { %7722 = vmatprep.subr.bf16.mxu1 %v8230_v19  ;;  %v8242_v20 = vld [vmem:[%s11695_s4 + $0x2d8] sm:$0xff]   ;;  %v2423_v24 = vpack.c.bf16 %v2348_v12, %v2323_v9  ;;  %v8245_v4 = vld [vmem:[%s11695_s4 + $0x2a0] sm:$0xff]   ;;  %v8246_v36 = vld [vmem:[%s11695_s4 + $0x2e8] sm:$0xff]  }
 0x3cf   :  { %v8243_v28 = vld [vmem:[%s11695_s4 + $0x298] sm:$0xff]   ;;  %v8247_v40 = vld [vmem:[%s11695_s4 + $0x2a8] sm:$0xff]   ;;  %v8248_v44 = vld [vmem:[%s11695_s4 + $0x2f0] sm:$0xff]  }
 0x3d0   :  { %v8249_v50 = vld [vmem:[%s11695_s4 + $0x2b0] sm:$0xff]   ;;  %v8250_v56 = vld [vmem:[%s11695_s4 + $0x2f8] sm:$0xff]   ;;  %v8252_v62 = vld [vmem:[%s11695_s4 + $0x340] sm:$0xff]  }
 0x3d1   :  { %7723 = vmatpush3.bf16.msra.mxu1 %v8231_v39  ;;  %v8251_v59 = vld [vmem:[%s11695_s4 + $0x2b8] sm:$0xff]   ;;  %v2322_v2 = vld [vmem:[#allocation4 + $0x50] sm:$0xff]  ;;  %v2373_v10 = vld [vmem:[#allocation4 + $0x1e8] sm:$0xff] }
 0x3d2   :  { %7724 = vmatprep.subr.bf16.mxu1 %v8232_v31  ;;  %v2347_v5 = vld [vmem:[#allocation4 + $0x118] sm:$0xff]  ;;  %v2398_v14 = vld [vmem:[#allocation4 + $0x2b0] sm:$0xff]  ;;  %v8253_v18 = vld [vmem:[%s11695_s4 + $0x300] sm:$0xff]  }
 0x3d3   :  { %v2422_v26 = vpack.c.bf16 %v2347_v5, %v2322_v2  ;;  %v8254_v34 = vld [vmem:[%s11695_s4 + $0x348] sm:$0xff]   ;;  %v2448_v46 = vpack.c.bf16 %v2398_v14, %v2373_v10  ;;  %v8256_v22 = vld [vmem:[%s11695_s4 + $0x350] sm:$0xff]   ;;  %v2372_v38 = vld [vmem:[#allocation4 + $0x1e0] sm:$0xff] }
 0x3d4   :  { %v8255_v37 = vld [vmem:[%s11695_s4 + $0x308] sm:$0xff]   ;;  %v2350_v30 = vld [vmem:[#allocation4 + $0x130] sm:$0xff]  ;;  %v8258_v51 = vld [vmem:[%s11695_s4 + $0x358] sm:$0xff]  }
 0x3d5   :  { %7725 = vmatpush3.bf16.msra.mxu1 %v8233_v52  ;;  %v2397_v58 = vld [vmem:[#allocation4 + $0x2a8] sm:$0xff]  ;;  %v8257_v1 = vld [vmem:[%s11695_s4 + $0x310] sm:$0xff]   ;;  %v8259_v41 = vld [vmem:[%s11695_s4 + $0x318] sm:$0xff]  }
 0x3d6   :  { %7726 = vmatprep.subr.bf16.mxu1 %v8234_v11  ;;  %v2325_v25 = vld [vmem:[#allocation4 + $0x68] sm:$0xff]  ;;  %v2447_v17 = vpack.c.bf16 %v2397_v58, %v2372_v38  ;;  %v8260_v42 = vld [vmem:[%s11695_s4 + $0x360] sm:$0xff]   ;;  %v8264_v27 = vld [vmem:[%s11695_s4 + $0x370] sm:$0xff]  }
 0x3d7   :  { %v2425_v33 = vpack.c.bf16 %v2350_v30, %v2325_v25  ;;  %v8261_v55 = vld [vmem:[%s11695_s4 + $0x320] sm:$0xff]   ;;  %v8262_v13 = vld [vmem:[%s11695_s4 + $0x368] sm:$0xff]   ;;  %v8265_v63 = vld [vmem:[%s11695_s4 + $0x330] sm:$0xff]  }
 0x3d8   :  { %v8263_v43 = vld [vmem:[%s11695_s4 + $0x328] sm:$0xff]   ;;  %v8266_v19 = vld [vmem:[%s11695_s4 + $0x378] sm:$0xff]   ;;  %v8268_v47 = vld [vmem:[%s11695_s4 + $0x3c0] sm:$0xff]  }
 0x3d9   :  { %7727 = vmatpush3.bf16.msra.mxu1 %v8235_v35  ;;  %v8267_v23 = vld [vmem:[%s11695_s4 + $0x338] sm:$0xff]   ;;  %v2324_v57 = vld [vmem:[#allocation4 + $0x60] sm:$0xff]  ;;  %v2349_v3 = vld [vmem:[#allocation4 + $0x128] sm:$0xff] }
 0x3da   :  { %7740 = vmatprep.subr.bf16.mxu1 %v8236_v15  ;;  %v2375_v39 = vld [vmem:[#allocation4 + $0x1f8] sm:$0xff]  ;;  %v2400_v31 = vld [vmem:[#allocation4 + $0x2c0] sm:$0xff]  ;;  %v2424_v11 = vpack.c.bf16 %v2349_v3, %v2324_v57  ;;  %v8270_v35 = vld [vmem:[%s11695_s4 + $0x3c8] sm:$0xff]  }
 0x3db   :  { %v8269_v52 = vld [vmem:[%s11695_s4 + $0x380] sm:$0xff]   ;;  %v2450_v15 = vpack.c.bf16 %v2400_v31, %v2375_v39  ;;  %v8271_v61 = vld [vmem:[%s11695_s4 + $0x388] sm:$0xff]   ;;  %v8272_v8 = vld [vmem:[%s11695_s4 + $0x3d0] sm:$0xff]  }
 0x3dc   :  { %4291 = vmatmul.mubr.bf16.vlgmr.msra.gmra.mrb[32].mxu1 %v2420_v48  ;;  %v2374_v60 = vld [vmem:[#allocation4 + $0x1f0] sm:$0xff]  ;;  %v2399_v7 = vld [vmem:[#allocation4 + $0x2b8] sm:$0xff]  ;;  %v2352_v48 = vld [vmem:[#allocation4 + $0x140] sm:$0xff] }
 0x3dd   :  { %4298 = vmatprep.mubr.bf16.mxu1 %v2446_v0  ;;  %7741 = vmatpush3.bf16.msra.mxu1 %v8237_v21  ;;  %v2327_v21 = vld [vmem:[#allocation4 + $0x78] sm:$0xff]  ;;  %v2449_v0 = vpack.c.bf16 %v2399_v7, %v2374_v60  ;;  %v8276_v45 = vld [vmem:[%s11695_s4 + $0x3e0] sm:$0xff]   ;;  %v8278_v12 = vld [vmem:[%s11695_s4 + $0x3e8] sm:$0xff]  }
 0x3de   :  { %7742 = vmatprep.subr.bf16.mxu1 %v8238_v49  ;;  %v8273_v49 = vld [vmem:[%s11695_s4 + $0x390] sm:$0xff]   ;;  %v8275_v53 = vld [vmem:[%s11695_s4 + $0x398] sm:$0xff]   ;;  %v8277_v9 = vld [vmem:[%s11695_s4 + $0x3a0] sm:$0xff]  }
 0x3df   :  { %v8283_v10 = vld [vmem:[%s11695_s4 + $0x3b8] sm:$0xff]   ;;  %v8284_v14 = vld [vmem:[%s11695_s4 + $0x440] sm:$0xff]   ;;  %v2402_v38 = vld [vmem:[#allocation4 + $0x2d0] sm:$0xff] }
 0x3e0   :  { %v2329_v57 = vld [vmem:[#allocation4 + $0x88] sm:$0xff]  ;;  %v2354_v3 = vld [vmem:[#allocation4 + $0x150] sm:$0xff] }
 0x3e1   :  { %7743 = vmatpush3.bf16.msra.mxu1 %v8239_v29  ;;  %v8274_v29 = vld [vmem:[%s11695_s4 + $0x3d8] sm:$0xff]   ;;  %v8289_v39 = vld [vmem:[%s11695_s4 + $0x410] sm:$0xff]   ;;  %v8295_v60 = vld [vmem:[%s11695_s4 + $0x428] sm:$0xff]  }
 0x3e2   :  { %7744 = vmatprep.subr.bf16.mxu1 %v8240_v6  ;;  %v2427_v6 = vpack.c.bf16 %v2352_v48, %v2327_v21  ;;  %v8296_v7 = vld [vmem:[%s11695_s4 + $0x470] sm:$0xff]  }
 0x3e4   :  { %4299 = vmatmul.mubr.bf16.gmra.mrb[36].mxu1 %v2445_v54  ;;  %v8280_v54 = vld [vmem:[%s11695_s4 + $0x3f0] sm:$0xff]  }
 0x3e5   :  { %7745 = vmatpush3.bf16.msra.mxu1 %v8241_v16  ;;  %4339 = vmatprep.mubr.bf16.mxu1 %v2423_v24  ;;  %v8279_v16 = vld [vmem:[%s11695_s4 + $0x3a8] sm:$0xff]  }
 0x3e6   :  { %7746 = vmatprep.subr.bf16.mxu1 %v8242_v20 }
 0x3e9   :  { %7747 = vmatpush3.bf16.msra.mxu1 %v8243_v28 }
 0x3ea   :  { %7748 = vmatprep.subr.bf16.mxu1 %v8244_v32 }
 0x3ed   :  { %7749 = vmatpush3.bf16.msra.mxu1 %v8245_v4 }
 0x3ee   :  { %7750 = vmatprep.subr.bf16.mxu1 %v8246_v36 }
 0x3f1   :  { %7751 = vmatpush3.bf16.msra.mxu1 %v8247_v40  ;;  %v8281_v40 = vld [vmem:[%s11695_s4 + $0x3b0] sm:$0xff]  }
 0x3f2   :  { %7752 = vmatprep.subr.bf16.mxu1 %v8248_v44 }
 0x3f5   :  { %7753 = vmatpush3.bf16.msra.mxu1 %v8249_v50 }
 0x3f6   :  { %7754 = vmatprep.subr.bf16.mxu1 %v8250_v56 }
 0x3f9   :  { %7755 = vmatpush3.bf16.msra.mxu1 %v8251_v59  ;;  %v8282_v59 = vld [vmem:[%s11695_s4 + $0x3f8] sm:$0xff]  }
 0x3fa   :  { %7768 = vmatprep.subr.bf16.mxu1 %v8252_v62 }
 0x3fc   :  { %4340 = vmatmul.mubr.bf16.vlgmr.msra.gmra.mrb[40].mxu1 %v2422_v26  ;;  %v2326_v26 = vld [vmem:[#allocation4 + $0x70] sm:$0xff] }
 0x3fd   :  { %4347 = vmatprep.mubr.bf16.mxu1 %v2448_v46  ;;  %7769 = vmatpush3.bf16.msra.mxu1 %v8253_v18 }
 0x3fe   :  { %7770 = vmatprep.subr.bf16.mxu1 %v8254_v34  ;;  %v2351_v34 = vld [vmem:[#allocation4 + $0x138] sm:$0xff] }
 0x401   :  { %7771 = vmatpush3.bf16.msra.mxu1 %v8255_v37 }
 0x402   :  { %7772 = vmatprep.subr.bf16.mxu1 %v8256_v22  ;;  %v2377_v22 = vld [vmem:[#allocation4 + $0x208] sm:$0xff] }
 0x404   :  { %4348 = vmatmul.mubr.bf16.gmra.mrb[44].mxu1 %v2447_v17 }
 0x405   :  { %7773 = vmatpush3.bf16.msra.mxu1 %v8257_v1  ;;  %4388 = vmatprep.mubr.bf16.mxu1 %v2425_v33  ;;  %v8285_v1 = vld [vmem:[%s11695_s4 + $0x400] sm:$0xff]  }
 0x406   :  { %7774 = vmatprep.subr.bf16.mxu1 %v8258_v51 }
 0x409   :  { %7775 = vmatpush3.bf16.msra.mxu1 %v8259_v41  ;;  %v2426_v41 = vpack.c.bf16 %v2351_v34, %v2326_v26  ;;  %v8303_v34 = vld [vmem:[%s11695_s4 + $0x488] sm:$0xff]  }
 0x40a   :  { %7776 = vmatprep.subr.bf16.mxu1 %v8260_v42  ;;  %v8286_v42 = vld [vmem:[%s11695_s4 + $0x448] sm:$0xff]  }
 0x40d   :  { %7777 = vmatpush3.bf16.msra.mxu1 %v8261_v55 }
 0x40e   :  { %7778 = vmatprep.subr.bf16.mxu1 %v8262_v13 }
 0x411   :  { %7779 = vmatpush3.bf16.msra.mxu1 %v8263_v43  ;;  %v2452_v43 = vpack.c.bf16 %v2402_v38, %v2377_v22  ;;  %v2403_v22 = vld [vmem:[#allocation4 + $0x2d8] sm:$0xff] }
 0x412   :  { %7780 = vmatprep.subr.bf16.mxu1 %v8264_v27  ;;  %v2331_v38 = vld [vmem:[#allocation4 + $0x98] sm:$0xff] }
 0x415   :  { %7781 = vmatpush3.bf16.msra.mxu1 %v8265_v63  ;;  %v8287_v63 = vld [vmem:[%s11695_s4 + $0x408] sm:$0xff]  }
 0x416   :  { %7782 = vmatprep.subr.bf16.mxu1 %v8266_v19  ;;  %v8288_v19 = vld [vmem:[%s11695_s4 + $0x450] sm:$0xff]  }
 0x419   :  { %7783 = vmatpush3.bf16.msra.mxu1 %v8267_v23  ;;  %v2376_v23 = vld [vmem:[#allocation4 + $0x200] sm:$0xff] }
 0x41a   :  { %7796 = vmatprep.subr.bf16.mxu1 %v8268_v47  ;;  %v2401_v47 = vld [vmem:[#allocation4 + $0x2c8] sm:$0xff] }
 0x41b   :  { %v2451_v31 = vpack.c.bf16 %v2401_v47, %v2376_v23 }
 0x41c   :  { %4389 = vmatmul.mubr.bf16.vlgmr.msra.gmra.mrb[48].mxu1 %v2424_v11  ;;  %v2429_v11 = vpack.c.bf16 %v2354_v3, %v2329_v57  ;;  %v8313_v57 = vld [vmem:[%s11695_s4 + $0x4b0] sm:$0xff]  }
 0x41d   :  { %4396 = vmatprep.mubr.bf16.mxu1 %v2450_v15  ;;  %7797 = vmatpush3.bf16.msra.mxu1 %v8269_v52  ;;  %v8290_v52 = vld [vmem:[%s11695_s4 + $0x458] sm:$0xff]   ;;  %v8292_v15 = vld [vmem:[%s11695_s4 + $0x460] sm:$0xff]  }
 0x41e   :  { %7798 = vmatprep.subr.bf16.mxu1 %v8270_v35  ;;  %v8291_v35 = vld [vmem:[%s11695_s4 + $0x418] sm:$0xff]  }
 0x41f   :  { %v7616_v20 = vpop.f32.mrb[0].mxu1 }
 0x420   :  { %v7617_v28 = vpop.f32.mrb[1].mxu1 }
 0x421   :  { %7799 = vmatpush3.bf16.msra.mxu1 %v8271_v61  ;;  %v10702_v32 = vadd.f32 %v7617_v28, %v7616_v20  ;;  %v7619_v36 = vpop.f32.mrb[2].mxu1  ;;  %v8293_v61 = vld [vmem:[%s11695_s4 + $0x420] sm:$0xff]   ;;  %v2353_v28 = vld [vmem:[#allocation4 + $0x148] sm:$0xff] }
 0x422   :  { %7800 = vmatprep.subr.bf16.mxu1 %v8272_v8  ;;  %v7924_v24 = vpop.f32.mrb[128].mxu0  ;;  %v7620_v56 = vpop.f32.mrb[3].mxu1  ;;  %v8294_v8 = vld [vmem:[%s11695_s4 + $0x468] sm:$0xff]  }
 0x423   :  { %v7925_v4 = vpop.f32.mrb[129].mxu0  ;;  %v10712_v62 = vadd.f32 %v7620_v56, %v7619_v36  ;;  %v2404_v36 = vld [vmem:[#allocation4 + $0x2e0] sm:$0xff] }
 0x424   :  { %4397 = vmatmul.mubr.bf16.gmra.mrb[52].mxu1 %v2449_v0  ;;  %v10707_v44 = vadd.f32 %v7925_v4, %v7924_v24  ;;  %v7927_v50 = vpop.f32.mrb[130].mxu0  ;;  %v2328_v24 = vld [vmem:[#allocation4 + $0x80] sm:$0xff] }
 0x425   :  { %7801 = vmatpush3.bf16.msra.mxu1 %v8273_v49  ;;  %4437 = vmatprep.mubr.bf16.mxu1 %v2427_v6  ;;  %v7928_v2 = vpop.f32.mrb[131].mxu0  ;;  %v8301_v56 = vld [vmem:[%s11695_s4 + $0x480] sm:$0xff]  }
 0x426   :  { %7802 = vmatprep.subr.bf16.mxu1 %v8274_v29  ;;  %v10714_v5 = vadd.f32 %v7928_v2, %v7927_v50  ;;  %v8297_v29 = vld [vmem:[%s11695_s4 + $0x430] sm:$0xff]   ;;  %v8302_v2 = vld [vmem:[%s11695_s4 + $0x4c8] sm:$0xff]  }
 0x427   :  { %v7622_v18 = vpop.f32.mrb[4].mxu1 }
 0x428   :  { %v7623_v37 = vpop.f32.mrb[5].mxu1 }
 0x429   :  { %7803 = vmatpush3.bf16.msra.mxu1 %v8275_v53  ;;  %v10722_v58 = vadd.f32 %v7623_v37, %v7622_v18  ;;  %v7625_v30 = vpop.f32.mrb[6].mxu1  ;;  %v8298_v53 = vld [vmem:[%s11695_s4 + $0x478] sm:$0xff]   ;;  %v2378_v37 = vld [vmem:[#allocation4 + $0x210] sm:$0xff] }
 0x42a   :  { %7804 = vmatprep.subr.bf16.mxu1 %v8276_v45  ;;  %v7626_v33 = vpop.f32.mrb[7].mxu1 }
 0x42b   :  { %v10732_v55 = vadd.f32 %v7626_v33, %v7625_v30  ;;  %v2453_v30 = vpack.c.bf16 %v2403_v22, %v2378_v37  ;;  %v8307_v33 = vld [vmem:[%s11695_s4 + $0x498] sm:$0xff]  }
 0x42c   :  { %v7930_v46 = vpop.f32.mrb[132].mxu0 }
 0x42d   :  { %7805 = vmatpush3.bf16.msra.mxu1 %v8277_v9  ;;  %v7931_v25 = vpop.f32.mrb[133].mxu0 }
 0x42e   :  { %7806 = vmatprep.subr.bf16.mxu1 %v8278_v12  ;;  %v10727_v17 = vadd.f32 %v7931_v25, %v7930_v46  ;;  %v7933_v51 = vpop.f32.mrb[134].mxu0  ;;  %v8304_v46 = vld [vmem:[%s11695_s4 + $0x4d0] sm:$0xff]  }
 0x42f   :  { %v7934_v13 = vpop.f32.mrb[135].mxu0  ;;  %v8305_v25 = vld [vmem:[%s11695_s4 + $0x490] sm:$0xff]  }
 0x430   :  { %v10734_v27 = vadd.f32 %v7934_v13, %v7933_v51  ;;  %v8311_v13 = vld [vmem:[%s11695_s4 + $0x4a8] sm:$0xff]  }
 0x431   :  { %7807 = vmatpush3.bf16.msra.mxu1 %v8279_v16  ;;  %v8299_v16 = vld [vmem:[%s11695_s4 + $0x438] sm:$0xff]  }
 0x432   :  { %7808 = vmatprep.subr.bf16.mxu1 %v8280_v54  ;;  %v8300_v54 = vld [vmem:[%s11695_s4 + $0x4c0] sm:$0xff]  }
 0x435   :  { %7809 = vmatpush3.bf16.msra.mxu1 %v8281_v40 }
 0x436   :  { %7810 = vmatprep.subr.bf16.mxu1 %v8282_v59 }
 0x439   :  { %7811 = vmatpush3.bf16.msra.mxu1 %v8283_v10 }
 0x43a   :  { %7824 = vmatprep.subr.bf16.mxu1 %v8284_v14 }
 0x43c   :  { %4438 = vmatmul.mubr.bf16.vlgmr.msra.gmra.mrb[56].mxu1 %v2426_v41  ;;  %v8308_v41 = vld [vmem:[%s11695_s4 + $0x4e0] sm:$0xff]  }
 0x43d   :  { %4445 = vmatprep.mubr.bf16.mxu1 %v2452_v43  ;;  %7825 = vmatpush3.bf16.msra.mxu1 %v8285_v1  ;;  %v8306_v1 = vld [vmem:[%s11695_s4 + $0x4d8] sm:$0xff]   ;;  %v8312_v43 = vld [vmem:[%s11695_s4 + $0x4f0] sm:$0xff]  }
 0x43e   :  { %7826 = vmatprep.subr.bf16.mxu1 %v8286_v42  ;;  %v8309_v42 = vld [vmem:[%s11695_s4 + $0x4a0] sm:$0xff]  }
 0x441   :  { %7827 = vmatpush3.bf16.msra.mxu1 %v8287_v63 }
 0x442   :  { %7828 = vmatprep.subr.bf16.mxu1 %v8288_v19 }
 0x443   :  { %v7644_v21 = vpop.f32.mrb[8].mxu1 }
 0x444   :  { %4446 = vmatmul.mubr.bf16.gmra.mrb[60].mxu1 %v2451_v31  ;;  %v7645_v48 = vpop.f32.mrb[9].mxu1 }
 0x445   :  { %7829 = vmatpush3.bf16.msra.mxu1 %v8289_v39  ;;  %4486 = vmatprep.mubr.bf16.mxu1 %v2429_v11  ;;  %v7646_v49 = vadd.f32 %v7645_v48, %v7644_v21  ;;  %v7647_v0 = vpop.f32.mrb[10].mxu1  ;;  %v8314_v39 = vld [vmem:[%s11695_s4 + $0x4f8] sm:$0xff]   ;;  %v2381_v21 = vld [vmem:[#allocation4 + $0x228] sm:$0xff]  ;;  %v2406_v48 = vld [vmem:[#allocation4 + $0x2f0] sm:$0xff] }
 0x446   :  { %7830 = vmatprep.subr.bf16.mxu1 %v8290_v52  ;;  %v7648_v6 = vpop.f32.mrb[11].mxu1 }
 0x447   :  { %v10773_v45 = vadd.f32 %v7646_v49, %v10702_v32  ;;  %v7649_v9 = vadd.f32 %v7648_v6, %v7647_v0  ;;  %v2379_v32 = vld [vmem:[#allocation4 + $0x218] sm:$0xff] }
 0x448   :  { %v2454_v18 = vpack.c.bf16 %v2404_v36, %v2379_v32  ;;  %v2333_v32 = vld [vmem:[#allocation4 + $0xa8] sm:$0xff]  ;;  %v8321_v36 = vld [vmem:[%s11695_s4 + $0x510] sm:$0xff]  }
 0x449   :  { %7831 = vmatpush3.bf16.msra.mxu1 %v8291_v35  ;;  %v10776_v12 = vadd.f32 %v7649_v9, %v10712_v62  ;;  %v2428_v62 = vpack.c.bf16 %v2353_v28, %v2328_v24  ;;  %v8315_v35 = vld [vmem:[%s11695_s4 + $0x4b8] sm:$0xff]   ;;  %v8320_v24 = vld [vmem:[%s11695_s4 + $0x550] sm:$0xff]   ;;  %v2380_v28 = vld [vmem:[#allocation4 + $0x220] sm:$0xff] }
 0x44a   :  { %7832 = vmatprep.subr.bf16.mxu1 %v8292_v15  ;;  %v8316_v15 = vld [vmem:[%s11695_s4 + $0x540] sm:$0xff]  }
 0x44c   :  { %v7650_v20 = vpop.f32.mrb[12].mxu1 }
 0x44d   :  { %7833 = vmatpush3.bf16.msra.mxu1 %v8293_v61  ;;  %v7651_v4 = vpop.f32.mrb[13].mxu1 }
 0x44e   :  { %7834 = vmatprep.subr.bf16.mxu1 %v8294_v8  ;;  %v7652_v40 = vadd.f32 %v7651_v4, %v7650_v20  ;;  %v7653_v50 = vpop.f32.mrb[14].mxu1  ;;  %v2330_v8 = vld [vmem:[#allocation4 + $0x90] sm:$0xff]  ;;  %v8319_v20 = vld [vmem:[%s11695_s4 + $0x508] sm:$0xff]  }
 0x44f   :  { %v7654_v59 = vpop.f32.mrb[15].mxu1  ;;  %v2405_v4 = vld [vmem:[#allocation4 + $0x2e8] sm:$0xff] }
 0x450   :  { %v10791_v10 = vadd.f32 %v7652_v40, %v10722_v58  ;;  %v7655_v14 = vadd.f32 %v7654_v59, %v7653_v50  ;;  %v2356_v58 = vld [vmem:[#allocation4 + $0x160] sm:$0xff]  ;;  %v2455_v40 = vpack.c.bf16 %v2405_v4, %v2380_v28  ;;  %v2358_v50 = vld [vmem:[#allocation4 + $0x170] sm:$0xff] }
 0x451   :  { %7835 = vmatpush3.bf16.msra.mxu1 %v8295_v60  ;;  %v2431_v51 = vpack.c.bf16 %v2356_v58, %v2331_v38  ;;  %v2355_v60 = vld [vmem:[#allocation4 + $0x158] sm:$0xff]  ;;  %v2433_v59 = vpack.c.bf16 %v2358_v50, %v2333_v32  ;;  %v8329_v38 = vld [vmem:[%s11695_s4 + $0x530] sm:$0xff]  }
 0x452   :  { %7836 = vmatprep.subr.bf16.mxu1 %v8296_v7  ;;  %v10794_v26 = vadd.f32 %v7655_v14, %v10732_v55  ;;  %v8310_v55 = vld [vmem:[%s11695_s4 + $0x4e8] sm:$0xff]   ;;  %v2386_v32 = vld [vmem:[#allocation4 + $0x250] sm:$0xff] }
 0x453   :  { %v8326_v14 = vld [vmem:[%s11695_s4 + $0x568] sm:$0xff]  }
 0x455   :  { %7837 = vmatpush3.bf16.msra.mxu1 %v8297_v29  ;;  %v8317_v29 = vld [vmem:[%s11695_s4 + $0x500] sm:$0xff]  }
 0x456   :  { %7838 = vmatprep.subr.bf16.mxu1 %v8298_v53  ;;  %v2430_v53 = vpack.c.bf16 %v2355_v60, %v2330_v8  ;;  %v2336_v8 = vld [vmem:[#allocation4 + $0xc0] sm:$0xff]  ;;  %v2407_v60 = vld [vmem:[#allocation4 + $0x2f8] sm:$0xff] }
 0x459   :  { %7839 = vmatpush3.bf16.msra.mxu1 %v8299_v16  ;;  %v2456_v16 = vpack.c.bf16 %v2406_v48, %v2381_v21  ;;  %v2361_v21 = vld [vmem:[#allocation4 + $0x188] sm:$0xff]  ;;  %v8335_v48 = vld [vmem:[%s11695_s4 + $0x618] sm:$0xff]  }
 0x45a   :  { %7852 = vmatprep.subr.bf16.mxu1 %v8300_v54 }
 0x45c   :  { %4487 = vmatmul.mubr.bf16.vlgmr.msra.gmra.mrb[64].mxu1 %v2428_v62  ;;  %v8323_v62 = vld [vmem:[%s11695_s4 + $0x518] sm:$0xff]  }
 0x45d   :  { %4494 = vmatprep.mubr.bf16.mxu1 %v2454_v18  ;;  %7853 = vmatpush3.bf16.msra.mxu1 %v8301_v56  ;;  %v8322_v56 = vld [vmem:[%s11695_s4 + $0x558] sm:$0xff]   ;;  %v8327_v18 = vld [vmem:[%s11695_s4 + $0x528] sm:$0xff]  }
 0x45e   :  { %7854 = vmatprep.subr.bf16.mxu1 %v8302_v2  ;;  %v8324_v2 = vld [vmem:[%s11695_s4 + $0x560] sm:$0xff]  }
 0x461   :  { %7855 = vmatpush3.bf16.msra.mxu1 %v8303_v34 }
 0x462   :  { %7856 = vmatprep.subr.bf16.mxu1 %v8304_v46 }
 0x464   :  { %4495 = vmatmul.mubr.bf16.gmra.mrb[68].mxu1 %v2453_v30 }
 0x465   :  { %7857 = vmatpush3.bf16.msra.mxu1 %v8305_v25  ;;  %4535 = vmatprep.mubr.bf16.mxu1 %v2431_v51  ;;  %v8330_v25 = vld [vmem:[%s11695_s4 + $0x578] sm:$0xff]  }
 0x466   :  { %7858 = vmatprep.subr.bf16.mxu1 %v8306_v1 }
 0x469   :  { %7859 = vmatpush3.bf16.msra.mxu1 %v8307_v33  ;;  %v7672_v63 = vpop.f32.mrb[16].mxu1  ;;  %v8331_v33 = vld [vmem:[%s11695_s4 + $0x538] sm:$0xff]  }
 0x46a   :  { %7860 = vmatprep.subr.bf16.mxu1 %v8308_v41  ;;  %v7673_v19 = vpop.f32.mrb[17].mxu1  ;;  %v8332_v41 = vld [vmem:[%s11695_s4 + $0x600] sm:$0xff]  }
 0x46b   :  { %v7674_v23 = vadd.f32 %v7673_v19, %v7672_v63  ;;  %v7675_v47 = vpop.f32.mrb[18].mxu1 }
 0x46c   :  { %v7676_v3 = vpop.f32.mrb[19].mxu1 }
 0x46d   :  { %7861 = vmatpush3.bf16.msra.mxu1 %v8309_v42  ;;  %v10833_v31 = vadd.f32 %v7674_v23, %v10773_v45  ;;  %v7677_v52 = vadd.f32 %v7676_v3, %v7675_v47  ;;  %v8318_v45 = vld [vmem:[%s11695_s4 + $0x548] sm:$0xff]   ;;  %v2408_v3 = vld [vmem:[#allocation4 + $0x300] sm:$0xff] }
 0x46e   :  { %7862 = vmatprep.subr.bf16.mxu1 %v8310_v55  ;;  %v2332_v55 = vld [vmem:[#allocation4 + $0xa0] sm:$0xff]  ;;  %v2357_v23 = vld [vmem:[#allocation4 + $0x168] sm:$0xff] }
 0x46f   :  { %v10836_v11 = vadd.f32 %v7677_v52, %v10776_v12 }
 0x471   :  { %7863 = vmatpush3.bf16.msra.mxu1 %v8311_v13 }
 0x472   :  { %7864 = vmatprep.subr.bf16.mxu1 %v8312_v43  ;;  %v2383_v43 = vld [vmem:[#allocation4 + $0x238] sm:$0xff] }
 0x475   :  { %7865 = vmatpush3.bf16.msra.mxu1 %v8313_v57  ;;  %v2432_v57 = vpack.c.bf16 %v2357_v23, %v2332_v55 }
 0x476   :  { %7866 = vmatprep.subr.bf16.mxu1 %v8314_v39  ;;  %v7678_v61 = vpop.f32.mrb[20].mxu1  ;;  %v8333_v39 = vld [vmem:[%s11695_s4 + $0x608] sm:$0xff]  }
 0x477   :  { %v7679_v7 = vpop.f32.mrb[21].mxu1 }
 0x478   :  { %v7680_v49 = vadd.f32 %v7679_v7, %v7678_v61  ;;  %v7681_v0 = vpop.f32.mrb[22].mxu1  ;;  %v2382_v61 = vld [vmem:[#allocation4 + $0x230] sm:$0xff] }
 0x479   :  { %7867 = vmatpush3.bf16.msra.mxu1 %v8315_v35  ;;  %v7682_v6 = vpop.f32.mrb[23].mxu1  ;;  %v2457_v7 = vpack.c.bf16 %v2407_v60, %v2382_v61 }
 0x47a   :  { %7880 = vmatprep.subr.bf16.mxu1 %v8316_v15  ;;  %v10851_v9 = vadd.f32 %v7680_v49, %v10791_v10  ;;  %v7683_v12 = vadd.f32 %v7682_v6, %v7681_v0  ;;  %v8325_v10 = vld [vmem:[%s11695_s4 + $0x520] sm:$0xff]   ;;  %v8334_v15 = vld [vmem:[%s11695_s4 + $0x610] sm:$0xff]   ;;  %v2436_v49 = vpack.c.bf16 %v2361_v21, %v2336_v8 }
 0x47b   :  { %v8336_v0 = vld [vmem:[%s11695_s4 + $0x620] sm:$0xff]   ;;  %v8338_v6 = vld [vmem:[%s11695_s4 + $0x630] sm:$0xff]  }
 0x47c   :  { %4536 = vmatmul.mubr.bf16.vlgmr.msra.gmra.mrb[72].mxu1 %v2430_v53  ;;  %v10854_v54 = vadd.f32 %v7683_v12, %v10794_v26  ;;  %v8328_v26 = vld [vmem:[%s11695_s4 + $0x570] sm:$0xff]  }
 0x47d   :  { %4543 = vmatprep.mubr.bf16.mxu1 %v2456_v16  ;;  %7881 = vmatpush3.bf16.msra.mxu1 %v8317_v29  ;;  %v8337_v29 = vld [vmem:[%s11695_s4 + $0x628] sm:$0xff]  }
 0x47e   :  { %7882 = vmatprep.subr.bf16.mxu1 %v8318_v45 }
 0x481   :  { %7883 = vmatpush3.bf16.msra.mxu1 %v8319_v20 }
 0x482   :  { %7884 = vmatprep.subr.bf16.mxu1 %v8320_v24 }
 0x484   :  { %4544 = vmatmul.mubr.bf16.gmra.mrb[76].mxu1 %v2455_v40 }
 0x485   :  { %7885 = vmatpush3.bf16.msra.mxu1 %v8321_v36  ;;  %4584 = vmatprep.mubr.bf16.mxu1 %v2433_v59 }
 0x486   :  { %7886 = vmatprep.subr.bf16.mxu1 %v8322_v56  ;;  %v2411_v56 = vld [vmem:[#allocation4 + $0x318] sm:$0xff] }
 0x489   :  { %7887 = vmatpush3.bf16.msra.mxu1 %v8323_v62  ;;  %v2461_v62 = vpack.c.bf16 %v2411_v56, %v2386_v32 }
 0x48a   :  { %7888 = vmatprep.subr.bf16.mxu1 %v8324_v2 }
 0x48d   :  { %7889 = vmatpush3.bf16.msra.mxu1 %v8325_v10 }
 0x48e   :  { %7890 = vmatprep.subr.bf16.mxu1 %v8326_v14 }
 0x48f   :  { %v7700_v34 = vpop.f32.mrb[24].mxu1 }
 0x490   :  { %v7701_v46 = vpop.f32.mrb[25].mxu1 }
 0x491   :  { %v7702_v37 = vadd.f32 %v7701_v46, %v7700_v34  ;;  %v7703_v22 = vpop.f32.mrb[26].mxu1  ;;  %7891 = vmatpush3.bf16.msra.mxu1 %v8327_v18  ;;  %v11873_v18 = vmov 0.0  }
 0x492   :  { %v7704_v58 = vpop.f32.mrb[27].mxu1  ;;  %7892 = vmatprep.subr.bf16.mxu1 %v8328_v26 }
 0x493   :  { %v4244_v30 = vadd.f32 %v7702_v37, %v10833_v31  ;;  %v7705_v1 = vadd.f32 %v7704_v58, %v7703_v22 }
 0x495   :  { %v4247_v51 = vadd.f32 %v7705_v1, %v10836_v11  ;;  %7893 = vmatpush3.bf16.msra.mxu1 %v8329_v38  ;;  %v2458_v11 = vpack.c.bf16 %v2408_v3, %v2383_v43 }
 0x496   :  { %7894 = vmatprep.subr.bf16.mxu1 %v8330_v25 }
 0x497   :  { %v7706_v42 = vpop.f32.mrb[28].mxu1 }
 0x498   :  { %v7707_v13 = vpop.f32.mrb[29].mxu1 }
 0x499   :  { %v7708_v63 = vadd.f32 %v7707_v13, %v7706_v42  ;;  %v7709_v19 = vpop.f32.mrb[30].mxu1  ;;  %7895 = vmatpush3.bf16.msra.mxu1 %v8331_v33 }
 0x49a   :  { %v7710_v47 = vpop.f32.mrb[31].mxu1  ;;  %7990 = vmatprep.subr.bf16.mxu1 %v8332_v41 }
 0x49b   :  { %v4252_v31 = vadd.f32 %v7708_v63, %v10851_v9  ;;  %v7711_v52 = vadd.f32 %v7710_v47, %v7709_v19 }
 0x49c   :  { %4585 = vmatmul.mubr.bf16.vlgmr.msra.gmra.mrb[80].mxu1 %v2432_v57 }
 0x49d   :  { %v4255_v35 = vadd.f32 %v7711_v52, %v10854_v54  ;;  %4592 = vmatprep.mubr.bf16.mxu1 %v2458_v11  ;;  %7991 = vmatpush3.bf16.msra.mxu1 %v8332_v41  ;;  %v8339_v54 = vld [vmem:[%s11695_s4 + $0x638] sm:$0xff]  }
 0x49e   :  { %7992 = vmatprep.subr.bf16.mxu1 %v8333_v39 }
 0x4a1   :  { %7993 = vmatpush3.bf16.msra.mxu1 %v8333_v39 }
 0x4a2   :  { %7994 = vmatprep.subr.bf16.mxu1 %v8334_v15 }
 0x4a4   :  { %4593 = vmatmul.mubr.bf16.gmra.mrb[84].mxu1 %v2457_v7 }
 0x4a5   :  { %7995 = vmatpush3.bf16.msra.mxu1 %v8334_v15  ;;  %8006 = vmatprep.mubr.bf16.mxu1 %v2436_v49 }
 0x4a6   :  { %7996 = vmatprep.subr.bf16.mxu1 %v8335_v48 }
 0x4a9   :  { %7997 = vmatpush3.bf16.msra.mxu1 %v8335_v48 }
 0x4aa   :  { %7998 = vmatprep.subr.bf16.mxu1 %v8336_v0 }
 0x4ad   :  { %7999 = vmatpush3.bf16.msra.mxu1 %v8336_v0 }
 0x4ae   :  { %8000 = vmatprep.subr.bf16.mxu1 %v8337_v29 }
 0x4af   :  { %v7728_v53 = vpop.f32.mrb[32].mxu1 }
 0x4b0   :  { %v7729_v45 = vpop.f32.mrb[33].mxu1 }
 0x4b1   :  { %v7730_v9 = vadd.f32 %v7729_v45, %v7728_v53  ;;  %v7731_v12 = vpop.f32.mrb[34].mxu1  ;;  %8001 = vmatpush3.bf16.msra.mxu1 %v8337_v29 }
 0x4b2   :  { %v7732_v16 = vpop.f32.mrb[35].mxu1  ;;  %8002 = vmatprep.subr.bf16.mxu1 %v8338_v6 }
 0x4b3   :  { %v4293_v20 = vadd.f32 %v7730_v9, %v4244_v30  ;;  %v7733_v24 = vadd.f32 %v7732_v16, %v7731_v12 }
 0x4b5   :  { %v4296_v28 = vadd.f32 %v7733_v24, %v4247_v51  ;;  %8003 = vmatpush3.bf16.msra.mxu1 %v8338_v6 }
 0x4b6   :  { %8004 = vmatprep.subr.bf16.mxu1 %v8339_v54 }
 0x4b7   :  { %v7734_v4 = vpop.f32.mrb[36].mxu1 }
 0x4b8   :  { %v7735_v36 = vpop.f32.mrb[37].mxu1 }
 0x4b9   :  { %v7736_v40 = vadd.f32 %v7735_v36, %v7734_v4  ;;  %v7737_v50 = vpop.f32.mrb[38].mxu1  ;;  %8005 = vmatpush3.bf16.msra.mxu1 %v8339_v54 }
 0x4ba   :  { %v7738_v59 = vpop.f32.mrb[39].mxu1 }
 0x4bb   :  { %v4301_v2 = vadd.f32 %v7736_v40, %v4252_v31  ;;  %v7739_v10 = vadd.f32 %v7738_v59, %v7737_v50 }
 0x4bc   :  { %8007 = vmatmul.mubr.bf16.vlgmr.msra.gmra.mrb[88].mxu1 %v2461_v62 }
 0x4bd   :  { %v4304_v14 = vadd.f32 %v7739_v10, %v4255_v35  ;;  %6221 = vmatprep.mubr.f32.mxu1 %v11873_v18 }
 0x4cf   :  { %v7756_v26 = vpop.f32.mrb[40].mxu1 }
 0x4d0   :  { %v7757_v34 = vpop.f32.mrb[41].mxu1 }
 0x4d1   :  { %v7758_v46 = vadd.f32 %v7757_v34, %v7756_v26  ;;  %v7759_v37 = vpop.f32.mrb[42].mxu1 }
 0x4d2   :  { %v7760_v22 = vpop.f32.mrb[43].mxu1 }
 0x4d3   :  { %v4342_v38 = vadd.f32 %v7758_v46, %v4293_v20  ;;  %v7761_v58 = vadd.f32 %v7760_v22, %v7759_v37 }
 0x4d5   :  { %v4345_v25 = vadd.f32 %v7761_v58, %v4296_v28 }
 0x4d7   :  { %v7762_v30 = vpop.f32.mrb[44].mxu1 }
 0x4d8   :  { %v7763_v1 = vpop.f32.mrb[45].mxu1 }
 0x4d9   :  { %v7764_v51 = vadd.f32 %v7763_v1, %v7762_v30  ;;  %v7765_v33 = vpop.f32.mrb[46].mxu1 }
 0x4da   :  { %v7766_v41 = vpop.f32.mrb[47].mxu1 }
 0x4db   :  { %v4350_v42 = vadd.f32 %v7764_v51, %v4301_v2  ;;  %v7767_v55 = vadd.f32 %v7766_v41, %v7765_v33 }
 0x4dd   :  { %v4353_v13 = vadd.f32 %v7767_v55, %v4304_v14 }
 0x4ef   :  { %v7784_v43 = vpop.f32.mrb[48].mxu1 }
 0x4f0   :  { %v7785_v63 = vpop.f32.mrb[49].mxu1 }
 0x4f1   :  { %v7786_v19 = vadd.f32 %v7785_v63, %v7784_v43  ;;  %v7787_v23 = vpop.f32.mrb[50].mxu1 }
 0x4f2   :  { %v7788_v47 = vpop.f32.mrb[51].mxu1 }
 0x4f3   :  { %v4391_v57 = vadd.f32 %v7786_v19, %v4342_v38  ;;  %v7789_v3 = vadd.f32 %v7788_v47, %v7787_v23  ;;  %v4858_v47 = vld [vmem:[#allocation6 + $0x1] sm:$0x3] }
 0x4f4   :  { %4859 = vst [vmem:[#allocation7 + $0x8] sm:$0x3] %v4858_v47  ;;  %v8381_v47 = vld [vmem:[%s11698_s7 + $0xd4] ss:$8 sps:$4 sm:$0xff]  }
 0x4f5   :  { %v4394_v39 = vadd.f32 %v7789_v3, %v4345_v25  ;;  %v8342_v3 = vld [vmem:[%s11698_s7 + $0x4] ss:$8 sps:$4 sm:$0xff]  }
 0x4f6   :  { %5878 = vmatprep.subr.bf16.mxu0 %v8342_v3 }
 0x4f7   :  { %v7790_v31 = vpop.f32.mrb[52].mxu1 }
 0x4f8   :  { %v7791_v52 = vpop.f32.mrb[53].mxu1 }
 0x4f9   :  { %v7792_v11 = vadd.f32 %v7791_v52, %v7790_v31  ;;  %v7793_v35 = vpop.f32.mrb[54].mxu1  ;;  %v8345_v31 = vld [vmem:[%s11698_s7 + $0x14] ss:$8 sps:$4 sm:$0xff]  }
 0x4fa   :  { %v7794_v15 = vpop.f32.mrb[55].mxu1 }
 0x4fb   :  { %v4399_v61 = vadd.f32 %v7792_v11, %v4350_v42  ;;  %v7795_v8 = vadd.f32 %v7794_v15, %v7793_v35  ;;  %v8343_v15 = vld [vmem:[%s11698_s7 + $0x10] ss:$8 sps:$4 sm:$0xff]  }
 0x4fd   :  { %v4402_v60 = vadd.f32 %v7795_v8, %v4353_v13  ;;  %v8348_v8 = vld [vmem:[%s11698_s7 + $0x24] ss:$8 sps:$4 sm:$0xff]  }
 0x50f   :  { %v7812_v7 = vpop.f32.mrb[56].mxu1 }
 0x510   :  { %v7813_v21 = vpop.f32.mrb[57].mxu1 }
 0x511   :  { %v7814_v48 = vadd.f32 %v7813_v21, %v7812_v7  ;;  %v7815_v49 = vpop.f32.mrb[58].mxu1 }
 0x512   :  { %v7816_v0 = vpop.f32.mrb[59].mxu1 }
 0x513   :  { %v4440_v29 = vadd.f32 %v7814_v48, %v4391_v57  ;;  %v7817_v6 = vadd.f32 %v7816_v0, %v7815_v49  ;;  %v8340_v57 = vld [vmem:[%s11698_s7] ss:$8 sps:$4 sm:$0xff]   ;;  %v8351_v0 = vld [vmem:[%s11698_s7 + $0x34] ss:$8 sps:$4 sm:$0xff]  }
 0x514   :  { %5879 = vmatpush1.bf16.msra.mxu0 %v8340_v57  ;;  %v8346_v49 = vld [vmem:[%s11698_s7 + $0x20] ss:$8 sps:$4 sm:$0xff]  }
 0x515   :  { %v4443_v53 = vadd.f32 %v7817_v6, %v4394_v39  ;;  %5880 = vmatprep.subr.bf16.mxu0 %v8345_v31  ;;  %v8384_v31 = vld [vmem:[%s11698_s7 + $0xe4] ss:$8 sps:$4 sm:$0xff]  }
 0x517   :  { %v7818_v45 = vpop.f32.mrb[60].mxu1 }
 0x518   :  { %v7819_v9 = vpop.f32.mrb[61].mxu1  ;;  %5881 = vmatpush1.bf16.msra.mxu0 %v8343_v15  ;;  %v8387_v15 = vld [vmem:[%s11698_s7 + $0xf4] ss:$8 sps:$4 sm:$0xff]  }
 0x519   :  { %v7820_v12 = vadd.f32 %v7819_v9, %v7818_v45  ;;  %v7821_v16 = vpop.f32.mrb[62].mxu1  ;;  %5882 = vmatprep.subr.bf16.mxu0 %v8348_v8 }
 0x51a   :  { %v7822_v54 = vpop.f32.mrb[63].mxu1 }
 0x51b   :  { %v4448_v20 = vadd.f32 %v7820_v12, %v4399_v61  ;;  %v7823_v24 = vadd.f32 %v7822_v54, %v7821_v16  ;;  %v8354_v16 = vld [vmem:[%s11698_s7 + $0x44] ss:$8 sps:$4 sm:$0xff]  }
 0x51c   :  { %5883 = vmatpush1.bf16.msra.mxu0 %v8346_v49 }
 0x51d   :  { %v4451_v28 = vadd.f32 %v7823_v24, %v4402_v60  ;;  %5884 = vmatprep.subr.bf16.mxu0 %v8351_v0 }
 0x52f   :  { %v7840_v4 = vpop.f32.mrb[64].mxu1 }
 0x530   :  { %v7841_v32 = vpop.f32.mrb[65].mxu1 }
 0x531   :  { %v7842_v36 = vadd.f32 %v7841_v32, %v7840_v4  ;;  %v7843_v40 = vpop.f32.mrb[66].mxu1  ;;  %v8357_v4 = vld [vmem:[%s11698_s7 + $0x54] ss:$8 sps:$4 sm:$0xff]  }
 0x532   :  { %v7844_v50 = vpop.f32.mrb[67].mxu1 }
 0x533   :  { %v4489_v56 = vadd.f32 %v7842_v36, %v4440_v29  ;;  %v7845_v59 = vadd.f32 %v7844_v50, %v7843_v40  ;;  %v8355_v36 = vld [vmem:[%s11698_s7 + $0x50] ss:$8 sps:$4 sm:$0xff]  }
 0x534   :  { %v4865_v40 = vld [vmem:[#allocation6 + $0x11] sm:$0x3] }
 0x535   :  { %v4492_v62 = vadd.f32 %v7845_v59, %v4443_v53  ;;  %v4867_v50 = vrot.slane %v4865_v40, 4  ;;  %v4848_v59 = vld [vmem:[#allocation6 + $0x10] sm:$0x3] }
 0x537   :  { %v7846_v2 = vpop.f32.mrb[68].mxu1  ;;  %4869 = vst [vmem:[#allocation7 + $0x8] sm:$0x30] %v4867_v50 }
 0x538   :  { %v7847_v10 = vpop.f32.mrb[69].mxu1 }
 0x539   :  { %v7848_v14 = vadd.f32 %v7847_v10, %v7846_v2  ;;  %v7849_v18 = vpop.f32.mrb[70].mxu1  ;;  %v8363_v2 = vld [vmem:[%s11698_s7 + $0x74] ss:$8 sps:$4 sm:$0xff]   ;;  %v8361_v10 = vld [vmem:[%s11698_s7 + $0x70] ss:$8 sps:$4 sm:$0xff]  }
 0x53a   :  { %v7850_v26 = vpop.f32.mrb[71].mxu1 }
 0x53b   :  { %v4497_v34 = vadd.f32 %v7848_v14, %v4448_v20  ;;  %v7851_v46 = vadd.f32 %v7850_v26, %v7849_v18  ;;  %v8366_v14 = vld [vmem:[%s11698_s7 + $0x84] ss:$8 sps:$4 sm:$0xff]   ;;  %v8364_v18 = vld [vmem:[%s11698_s7 + $0x80] ss:$8 sps:$4 sm:$0xff]   ;;  %v8369_v26 = vld [vmem:[%s11698_s7 + $0x94] ss:$8 sps:$4 sm:$0xff]  }
 0x53d   :  { %v4500_v37 = vadd.f32 %v7851_v46, %v4451_v28  ;;  %v8367_v46 = vld [vmem:[%s11698_s7 + $0x90] ss:$8 sps:$4 sm:$0xff]  }
 0x54f   :  { %v7868_v22 = vpop.f32.mrb[72].mxu1 }
 0x550   :  { %v7869_v38 = vpop.f32.mrb[73].mxu1 }
 0x551   :  { %v7870_v58 = vadd.f32 %v7869_v38, %v7868_v22  ;;  %v7871_v25 = vpop.f32.mrb[74].mxu1  ;;  %v8372_v38 = vld [vmem:[%s11698_s7 + $0xa4] ss:$8 sps:$4 sm:$0xff]  }
 0x552   :  { %v7872_v30 = vpop.f32.mrb[75].mxu1 }
 0x553   :  { %v4538_v1 = vadd.f32 %v7870_v58, %v4489_v56  ;;  %v7873_v51 = vadd.f32 %v7872_v30, %v7871_v25  ;;  %v4840_v56 = vld [vmem:[#allocation6] sm:$0x3] }
 0x554   :  { %4841 = vst [vmem:[#allocation7] sm:$0x3] %v4840_v56  ;;  %v7356_v56 = vld [vmem:[%s11699_s5] ss:$0 sm:$0xff] }
 0x555   :  { %v4541_v33 = vadd.f32 %v7873_v51, %v4492_v62  ;;  %v8358_v62 = vld [vmem:[%s11698_s7 + $0x60] ss:$8 sps:$4 sm:$0xff]  }
 0x557   :  { %v7874_v41 = vpop.f32.mrb[76].mxu1 }
 0x558   :  { %v7875_v42 = vpop.f32.mrb[77].mxu1 }
 0x559   :  { %v7876_v55 = vadd.f32 %v7875_v42, %v7874_v41  ;;  %v7877_v13 = vpop.f32.mrb[78].mxu1  ;;  %v8375_v41 = vld [vmem:[%s11698_s7 + $0xb4] ss:$8 sps:$4 sm:$0xff]  }
 0x55a   :  { %v7878_v43 = vpop.f32.mrb[79].mxu1 }
 0x55b   :  { %v4546_v63 = vadd.f32 %v7876_v55, %v4497_v34  ;;  %v7879_v19 = vadd.f32 %v7878_v43, %v7877_v13  ;;  %v8373_v13 = vld [vmem:[%s11698_s7 + $0xb0] ss:$8 sps:$4 sm:$0xff]   ;;  %v8378_v43 = vld [vmem:[%s11698_s7 + $0xc4] ss:$8 sps:$4 sm:$0xff]  }
 0x55d   :  { %v4549_v23 = vadd.f32 %v7879_v19, %v4500_v37 }
 0x56f   :  { %v7896_v39 = vpop.f32.mrb[80].mxu1 }
 0x570   :  { %v7897_v52 = vpop.f32.mrb[81].mxu1 }
 0x571   :  { %v7898_v11 = vadd.f32 %v7897_v52, %v7896_v39  ;;  %v7899_v35 = vpop.f32.mrb[82].mxu1  ;;  %v8379_v39 = vld [vmem:[%s11698_s7 + $0xd0] ss:$8 sps:$4 sm:$0xff]  }
 0x572   :  { %v7900_v61 = vpop.f32.mrb[83].mxu1 }
 0x573   :  { %v4587_v60 = vadd.f32 %v7898_v11, %v4538_v1  ;;  %v7901_v7 = vadd.f32 %v7900_v61, %v7899_v35  ;;  %v8382_v35 = vld [vmem:[%s11698_s7 + $0xe0] ss:$8 sps:$4 sm:$0xff]  }
 0x575   :  { %v4590_v21 = vadd.f32 %v7901_v7, %v4541_v33  ;;  %v4636_v48 = vadd.f32 %v10707_v44, %v4587_v60  ;;  %v8349_v44 = vld [vmem:[%s11698_s7 + $0x30] ss:$8 sps:$4 sm:$0xff]   ;;  %v8370_v33 = vld [vmem:[%s11698_s7 + $0xa0] ss:$8 sps:$4 sm:$0xff]   ;;  %v8390_v7 = vld [vmem:[%s11698_s7 + $0x104] ss:$8 sps:$4 sm:$0xff]  }
 0x576   :  { %5885 = vmatpush1.bf16.msra.mxu0 %v8349_v44  ;;  %v8385_v60 = vld [vmem:[%s11698_s7 + $0xf0] ss:$8 sps:$4 sm:$0xff]  }
 0x577   :  { %v7902_v29 = vpop.f32.mrb[84].mxu1  ;;  %v4639_v6 = vadd.f32 %v10714_v5, %v4590_v21  ;;  %v8352_v5 = vld [vmem:[%s11698_s7 + $0x40] ss:$8 sps:$4 sm:$0xff]   ;;  %5886 = vmatprep.subr.bf16.mxu0 %v8354_v16 }
 0x578   :  { %v7903_v53 = vpop.f32.mrb[85].mxu1 }
 0x579   :  { %v7904_v45 = vadd.f32 %v7903_v53, %v7902_v29  ;;  %v7905_v9 = vpop.f32.mrb[86].mxu1 }
 0x57a   :  { %v7906_v12 = vpop.f32.mrb[87].mxu1  ;;  %5887 = vmatpush1.bf16.msra.mxu0 %v8352_v5  ;;  %v4875_v5 = vld [vmem:[#allocation6 + $0x2] sm:$0x3] }
 0x57b   :  { %v4595_v54 = vadd.f32 %v7904_v45, %v4546_v63  ;;  %v7907_v20 = vadd.f32 %v7906_v12, %v7905_v9  ;;  %5888 = vmatprep.subr.bf16.mxu0 %v8357_v4  ;;  %v4882_v4 = vld [vmem:[#allocation6 + $0x12] sm:$0x3]  ;;  %4876 = vst [vmem:[#allocation7 + $0x10] sm:$0x3] %v4875_v5 }
 0x57d   :  { %v4598_v24 = vadd.f32 %v7907_v20, %v4549_v23  ;;  %v4644_v28 = vadd.f32 %v10727_v17, %v4595_v54  ;;  %v8360_v17 = vld [vmem:[%s11698_s7 + $0x64] ss:$8 sps:$4 sm:$0xff]   ;;  %v8376_v23 = vld [vmem:[%s11698_s7 + $0xc0] ss:$8 sps:$4 sm:$0xff]  }
 0x57e   :  { %5889 = vmatpush1.bf16.msra.mxu0 %v8355_v36 }
 0x57f   :  { %v4647_v32 = vadd.f32 %v10734_v27, %v4598_v24  ;;  %v4850_v27 = vrot.slane %v4848_v59, 4  ;;  %5890 = vmatprep.subr.bf16.mxu0 %v8360_v17 }
 0x581   :  { %4852 = vst [vmem:[#allocation7] sm:$0x30] %v4850_v27 }
 0x582   :  { %5891 = vmatpush1.bf16.msra.mxu0 %v8358_v62 }
 0x583   :  { %5892 = vmatprep.subr.bf16.mxu0 %v8363_v2 }
 0x586   :  { %5893 = vmatpush1.bf16.msra.mxu0 %v8361_v10  ;;  %v7357_v10 = vld [vmem:[%s11700_s6] ss:$0 sm:$0xff] }
 0x587   :  { %5894 = vmatprep.subr.bf16.mxu0 %v8366_v14 }
 0x58a   :  { %5895 = vmatpush1.bf16.msra.mxu0 %v8364_v18 }
 0x58b   :  { %5896 = vmatprep.subr.bf16.mxu0 %v8369_v26 }
 0x58e   :  { %5897 = vmatpush1.bf16.msra.mxu0 %v8367_v46 }
 0x58f   :  { %v8008_v34 = vpop.f32.mrb[88].mxu1  ;;  %5898 = vmatprep.subr.bf16.mxu0 %v8372_v38 }
 0x590   :  { %v4693_v37 = vadd.f32 %v8008_v34, %v4644_v28  ;;  %v4684_v22 = vpop.f32.mrb[89].mxu1 }
 0x591   :  { %v4685_v58 = vadd.f32 %v4684_v22, %v4636_v48  ;;  %v8009_v25 = vpop.f32.mrb[90].mxu1 }
 0x592   :  { %v4696_v30 = vadd.f32 %v8009_v25, %v4647_v32  ;;  %v4687_v1 = vpop.f32.mrb[91].mxu1  ;;  %5899 = vmatpush1.bf16.msra.mxu0 %v8370_v33  ;;  %v4884_v32 = vrot.slane %v4882_v4, 4 }
 0x593   :  { %v4688_v51 = vadd.f32 %v4687_v1, %v4639_v6  ;;  %5900 = vmatprep.subr.bf16.mxu0 %v8375_v41 }
 0x594   :  { %4886 = vst [vmem:[#allocation7 + $0x10] sm:$0x30] %v4884_v32 }
 0x595   :  { %v4701_v42 = vadd.f32 %v4688_v51, %v4685_v58 }
 0x596   :  { %5901 = vmatpush1.bf16.msra.mxu0 %v8373_v13 }
 0x597   :  { %v4702_v55 = vadd.f32 %v4701_v42, %v4693_v37  ;;  %5902 = vmatprep.subr.bf16.mxu0 %v8378_v43 }
 0x599   :  { %v4703_v63 = vadd.f32 %v4702_v55, %v4696_v30 }
 0x59a   :  { %5903 = vmatpush1.bf16.msra.mxu0 %v8376_v23 }
 0x59b   :  { %v4704_v19 = vrot.slane %v4703_v63, 4  ;;  %5904 = vmatprep.subr.bf16.mxu0 %v8381_v47 }
 0x59d   :  { %v4705_v57 = vadd.f32 %v4704_v19, %v4703_v63 }
 0x59e   :  { %5905 = vmatpush1.bf16.msra.mxu0 %v8379_v39 }
 0x59f   :  { %v4706_v3 = vrot.slane %v4705_v57, 2  ;;  %5906 = vmatprep.subr.bf16.mxu0 %v8384_v31 }
 0x5a1   :  { %v4707_v52 = vadd.f32 %v4706_v3, %v4705_v57 }
 0x5a2   :  { %5907 = vmatpush1.bf16.msra.mxu0 %v8382_v35 }
 0x5a3   :  { %v4708_v11 = vrot.slane %v4707_v52, 1  ;;  %5908 = vmatprep.subr.bf16.mxu0 %v8387_v15 }
 0x5a5   :  { %v4709_v61 = vadd.f32 %v4708_v11, %v4707_v52 }
 0x5a6   :  { %5909 = vmatpush1.bf16.msra.mxu0 %v8385_v60 }
 0x5a7   :  { %v4711_v8 = vmul.f32 0.03125, %v4709_v61  ;;  %5919 = vmatprep.subr.bf16.mxu0 %v8390_v7 }
 0x5a9   :  { %v4712_v21 = vsub.f32 %v4685_v58, %v4711_v8  ;;  %v4713_v48 = vsub.f32 %v4688_v51, %v4711_v8  ;;  %v4714_v49 = vsub.f32 %v4693_v37, %v4711_v8  ;;  %v4715_v0 = vsub.f32 %v4696_v30, %v4711_v8 }
 0x5ab   :  { %v4716_v29 = vmul.f32 %v4712_v21, %v4712_v21  ;;  %v4717_v6 = vmul.f32 %v4713_v48, %v4713_v48  ;;  %v4718_v53 = vmul.f32 %v4714_v49, %v4714_v49  ;;  %v4719_v9 = vmul.f32 %v4715_v0, %v4715_v0 }
 0x5ad   :  { %v4720_v45 = vadd.f32 %v4717_v6, %v4716_v29 }
 0x5af   :  { %v4721_v44 = vadd.f32 %v4720_v45, %v4718_v53 }
 0x5b1   :  { %v4722_v12 = vadd.f32 %v4721_v44, %v4719_v9 }
 0x5b3   :  { %v4723_v16 = vrot.slane %v4722_v12, 4 }
 0x5b5   :  { %v4724_v54 = vadd.f32 %v4723_v16, %v4722_v12 }
 0x5b7   :  { %v4725_v20 = vrot.slane %v4724_v54, 2 }
 0x5b9   :  { %v4726_v24 = vadd.f32 %v4725_v20, %v4724_v54 }
 0x5bb   :  { %v4727_v28 = vrot.slane %v4726_v24, 1 }
 0x5bd   :  { %v4728_v36 = vadd.f32 %v4727_v28, %v4726_v24 }
 0x5bf   :  { %v4729_v17 = vmul.f32 0.03125, %v4728_v36 }
 0x5c1   :  { %v4730_v40 = vadd.f32 1e-05, %v4729_v17 }
 0x5c3   :  { %8686 = vrsqrt.f32 %v4730_v40 }
 0x5cd   :  { %v8687_v50 = vpop.eup %8686 }
 0x5ce   :  { %v4732_v59 = vmul.f32 %v8687_v50, %v4712_v21  ;;  %v4733_v62 = vmul.f32 %v8687_v50, %v4713_v48  ;;  %v4734_v27 = vmul.f32 %v8687_v50, %v4714_v49  ;;  %v4735_v2 = vmul.f32 %v8687_v50, %v4715_v0 }
 0x5d0   :  { %v4742_v14 = vmul.f32 %v7356_v56, %v4732_v59  ;;  %v4743_v18 = vmul.f32 %v7356_v56, %v4733_v62  ;;  %v4744_v26 = vmul.f32 %v7356_v56, %v4734_v27  ;;  %v4745_v34 = vmul.f32 %v7356_v56, %v4735_v2 }
 0x5d2   :  { %v4752_v46 = vadd.f32 %v7357_v10, %v4742_v14  ;;  %v4753_v37 = vadd.f32 %v7357_v10, %v4743_v18  ;;  %v4754_v22 = vadd.f32 %v7357_v10, %v4744_v26  ;;  %v4755_v38 = vadd.f32 %v7357_v10, %v4745_v34  ;;  %v4964_v34 = vld [vmem:[#allocation6 + $0xd] sm:$0x3] }
 0x5d4   :  { %v4756_v58 = vmax.f32 %v4752_v46, 0.0  ;;  %v4757_v25 = vmax.f32 %v4753_v37, 0.0  ;;  %v4758_v30 = vmax.f32 %v4754_v22, 0.0  ;;  %v4759_v1 = vmax.f32 %v4755_v38, 0.0 }
 0x5d5   :  { %v4966_v38 = vrot.slane %v4964_v34, 6  ;;  %v8396_v34 = vld [vmem:[%s11698_s7 + $0x124] ss:$8 sps:$4 sm:$0xff]  }
 0x5d6   :  { %4760 = vst [vmem:[#allocation5] sm:$0xff] %v4756_v58  ;;  %4761 = vst [vmem:[#allocation5 + $0x8] sm:$0xff] %v4757_v25 }
 0x5d7   :  { %4762 = vst [vmem:[#allocation5 + $0x10] sm:$0xff] %v4758_v30  ;;  %4763 = vst [vmem:[#allocation5 + $0x18] sm:$0xff] %v4759_v1 }
 0x5d8   :  { %4968 = vst [vmem:[#allocation7 + $0x38] sm:$0xc] %v4966_v38  ;;  %v8402_v38 = vld [vmem:[%s11698_s7 + $0x144] ss:$8 sps:$4 sm:$0xff]  }
 0x5dd   :  { %v4772_v51 = vld [vmem:[#allocation5] sm:$0x1]  ;;  %v4773_v33 = vld [vmem:[#allocation5 + $0x1] sm:$0x1]  ;;  %v4775_v41 = vld [vmem:[#allocation5 + $0x4] sm:$0x1] }
 0x5de   :  { %v4774_v42 = vmax.f32 %v4772_v51, %v4773_v33  ;;  %v4776_v55 = vld [vmem:[#allocation5 + $0x5] sm:$0x1]  ;;  %v4781_v13 = vld [vmem:[#allocation5 + $0x2] sm:$0x1]  ;;  %v4782_v43 = vld [vmem:[#allocation5 + $0x3] sm:$0x1] }
 0x5df   :  { %v4777_v63 = vmax.f32 %v4775_v41, %v4776_v55  ;;  %v4783_v19 = vmax.f32 %v4781_v13, %v4782_v43  ;;  %v4784_v23 = vld [vmem:[#allocation5 + $0x6] sm:$0x1]  ;;  %v4785_v47 = vld [vmem:[#allocation5 + $0x7] sm:$0x1]  ;;  %v4789_v57 = vld [vmem:[#allocation5 + $0x8] sm:$0x1] }
 0x5e0   :  { %v4786_v3 = vmax.f32 %v4784_v23, %v4785_v47  ;;  %v4790_v39 = vld [vmem:[#allocation5 + $0x9] sm:$0x1]  ;;  %v4792_v31 = vld [vmem:[#allocation5 + $0xc] sm:$0x1]  ;;  %v4793_v52 = vld [vmem:[#allocation5 + $0xd] sm:$0x1] }
 0x5e1   :  { %v4778_v11 = vmax.f32 %v4774_v42, %v4777_v63  ;;  %v4791_v35 = vmax.f32 %v4789_v57, %v4790_v39  ;;  %v4794_v15 = vmax.f32 %v4792_v31, %v4793_v52  ;;  %v4798_v61 = vld [vmem:[#allocation5 + $0xa] sm:$0x1]  ;;  %v4799_v8 = vld [vmem:[#allocation5 + $0xb] sm:$0x1]  ;;  %v4801_v60 = vld [vmem:[#allocation5 + $0xe] sm:$0x1] }
 0x5e2   :  { %v4787_v7 = vmax.f32 %v4783_v19, %v4786_v3  ;;  %v4800_v21 = vmax.f32 %v4798_v61, %v4799_v8  ;;  %v4802_v48 = vld [vmem:[#allocation5 + $0xf] sm:$0x1]  ;;  %v4806_v49 = vld [vmem:[#allocation5 + $0x10] sm:$0x1]  ;;  %v4807_v0 = vld [vmem:[#allocation5 + $0x11] sm:$0x1] }
 0x5e3   :  { %4780 = vst [vmem:[#allocation6 + $0x5] sm:$0x1] %v4778_v11  ;;  %v4795_v29 = vmax.f32 %v4791_v35, %v4794_v15  ;;  %v4803_v6 = vmax.f32 %v4801_v60, %v4802_v48  ;;  %v4808_v53 = vmax.f32 %v4806_v49, %v4807_v0  ;;  %v4809_v45 = vld [vmem:[#allocation5 + $0x14] sm:$0x1]  ;;  %v4810_v9 = vld [vmem:[#allocation5 + $0x15] sm:$0x1] }
 0x5e4   :  { %v4815_v44 = vld [vmem:[#allocation5 + $0x12] sm:$0x1]  ;;  %4788 = vst [vmem:[#allocation6 + $0x6] sm:$0x1] %v4787_v7  ;;  %v4811_v12 = vmax.f32 %v4809_v45, %v4810_v9  ;;  %v4816_v16 = vld [vmem:[#allocation5 + $0x13] sm:$0x1] }
 0x5e5   :  { %v4818_v54 = vld [vmem:[#allocation5 + $0x16] sm:$0x1]  ;;  %v4819_v20 = vld [vmem:[#allocation5 + $0x17] sm:$0x1]  ;;  %4797 = vst [vmem:[#allocation6 + $0x9] sm:$0x1] %v4795_v29  ;;  %v4804_v24 = vmax.f32 %v4800_v21, %v4803_v6  ;;  %v4817_v28 = vmax.f32 %v4815_v44, %v4816_v16 }
 0x5e6   :  { %v4820_v5 = vmax.f32 %v4818_v54, %v4819_v20  ;;  %v4823_v4 = vld [vmem:[#allocation5 + $0x18] sm:$0x1]  ;;  %v4824_v32 = vld [vmem:[#allocation5 + $0x19] sm:$0x1]  ;;  %v4826_v36 = vld [vmem:[#allocation5 + $0x1c] sm:$0x1]  ;;  %v4812_v17 = vmax.f32 %v4808_v53, %v4811_v12 }
 0x5e7   :  { %v4825_v40 = vmax.f32 %v4823_v4, %v4824_v32  ;;  %v4827_v50 = vld [vmem:[#allocation5 + $0x1d] sm:$0x1]  ;;  %v4832_v56 = vld [vmem:[#allocation5 + $0x1a] sm:$0x1]  ;;  %v4833_v59 = vld [vmem:[#allocation5 + $0x1b] sm:$0x1] }
 0x5e8   :  { %4805 = vst [vmem:[#allocation6 + $0xa] sm:$0x1] %v4804_v24  ;;  %v4821_v62 = vmax.f32 %v4817_v28, %v4820_v5  ;;  %v4828_v27 = vmax.f32 %v4826_v36, %v4827_v50  ;;  %v4834_v2 = vmax.f32 %v4832_v56, %v4833_v59  ;;  %v4835_v10 = vld [vmem:[#allocation5 + $0x1e] sm:$0x1]  ;;  %v4836_v14 = vld [vmem:[#allocation5 + $0x1f] sm:$0x1] }
 0x5e9   :  { %4814 = vst [vmem:[#allocation6 + $0x15] sm:$0x1] %v4812_v17  ;;  %v4837_v18 = vmax.f32 %v4835_v10, %v4836_v14  ;;  %v4974_v53 = vld [vmem:[#allocation6 + $0x1d] sm:$0x3]  ;;  %v4946_v12 = vld [vmem:[#allocation6 + $0xc] sm:$0x3] }
 0x5ea   :  { %4822 = vst [vmem:[#allocation6 + $0x16] sm:$0x1] %v4821_v62  ;;  %v4829_v26 = vmax.f32 %v4825_v40, %v4828_v27  ;;  %v4842_v37 = vld [vmem:[#allocation6 + $0x4] sm:$0x3]  ;;  %v4976_v9 = vrot.slane %v4974_v53, 2  ;;  %v4948_v20 = vrot.slane %v4946_v12, 6 }
 0x5eb   :  { %v4838_v46 = vmax.f32 %v4834_v2, %v4837_v18  ;;  %v4892_v22 = vld [vmem:[#allocation6 + $0x4] sm:$0x3]  ;;  %v4844_v25 = vrot.slane %v4842_v37, 6  ;;  %v4877_v30 = vld [vmem:[#allocation6 + $0x6] sm:$0x3] }
 0x5ec   :  { %4831 = vst [vmem:[#allocation6 + $0x19] sm:$0x1] %v4829_v26  ;;  %v4860_v58 = vld [vmem:[#allocation6 + $0x5] sm:$0x3]  ;;  %4893 = vst [vmem:[#allocation7 + $0x18] sm:$0x3] %v4892_v22 }
 0x5ed   :  { %4839 = vst [vmem:[#allocation6 + $0x1a] sm:$0x1] %v4838_v46  ;;  %v4862_v1 = vrot.slane %v4860_v58, 6  ;;  %v4894_v51 = vld [vmem:[#allocation6 + $0x8] sm:$0x3]  ;;  %v4879_v33 = vrot.slane %v4877_v30, 6 }
 0x5ee   :  { %v4926_v41 = vld [vmem:[#allocation6 + $0x6] sm:$0x3]  ;;  %4846 = vst [vmem:[#allocation7] sm:$0xc] %v4844_v25  ;;  %v4896_v42 = vrot.slane %v4894_v51, 6 }
 0x5ef   :  { %4927 = vst [vmem:[#allocation7 + $0x28] sm:$0x3] %v4926_v41  ;;  %4864 = vst [vmem:[#allocation7 + $0x8] sm:$0xc] %v4862_v1  ;;  %v4928_v55 = vld [vmem:[#allocation6 + $0xa] sm:$0x3] }
 0x5f0   :  { %4881 = vst [vmem:[#allocation7 + $0x10] sm:$0xc] %v4879_v33  ;;  %v4909_v13 = vld [vmem:[#allocation6 + $0x5] sm:$0x3]  ;;  %v4911_v43 = vld [vmem:[#allocation6 + $0x9] sm:$0x3] }
 0x5f1   :  { %v4853_v63 = vld [vmem:[#allocation6 + $0x14] sm:$0x3]  ;;  %4898 = vst [vmem:[#allocation7 + $0x18] sm:$0xc] %v4896_v42  ;;  %v4930_v23 = vrot.slane %v4928_v55, 6  ;;  %v4913_v47 = vrot.slane %v4911_v43, 6 }
 0x5f2   :  { %v4899_v19 = vld [vmem:[#allocation6 + $0x14] sm:$0x3]  ;;  %4910 = vst [vmem:[#allocation7 + $0x20] sm:$0x3] %v4909_v13  ;;  %v4855_v3 = vrot.slane %v4853_v63, 2 }
 0x5f3   :  { %v4870_v57 = vld [vmem:[#allocation6 + $0x15] sm:$0x3]  ;;  %v4901_v39 = vrot.slane %v4899_v19, 4  ;;  %4932 = vst [vmem:[#allocation7 + $0x28] sm:$0xc] %v4930_v23 }
 0x5f4   :  { %v4887_v31 = vld [vmem:[#allocation6 + $0x16] sm:$0x3]  ;;  %v4872_v52 = vrot.slane %v4870_v57, 2  ;;  %4915 = vst [vmem:[#allocation7 + $0x20] sm:$0xc] %v4913_v47 }
 0x5f5   :  { %v4889_v11 = vrot.slane %v4887_v31, 2  ;;  %v4933_v35 = vld [vmem:[#allocation6 + $0x16] sm:$0x3]  ;;  %4857 = vst [vmem:[#allocation7] sm:$0xc0] %v4855_v3 }
 0x5f6   :  { %4903 = vst [vmem:[#allocation7 + $0x18] sm:$0x30] %v4901_v39  ;;  %v4904_v15 = vld [vmem:[#allocation6 + $0x18] sm:$0x3]  ;;  %v4935_v61 = vrot.slane %v4933_v35, 4 }
 0x5f7   :  { %4874 = vst [vmem:[#allocation7 + $0x8] sm:$0xc0] %v4872_v52  ;;  %v4906_v8 = vrot.slane %v4904_v15, 2  ;;  %4891 = vst [vmem:[#allocation7 + $0x10] sm:$0xc0] %v4889_v11 }
 0x5f8   :  { %v4938_v60 = vld [vmem:[#allocation6 + $0x1a] sm:$0x3]  ;;  %4937 = vst [vmem:[#allocation7 + $0x28] sm:$0x30] %v4935_v61  ;;  %v4916_v21 = vld [vmem:[#allocation6 + $0x15] sm:$0x3] }
 0x5f9   :  { %v4940_v7 = vrot.slane %v4938_v60, 2  ;;  %4908 = vst [vmem:[#allocation7 + $0x18] sm:$0xc0] %v4906_v8  ;;  %v4918_v48 = vrot.slane %v4916_v21, 4  ;;  %v4921_v49 = vld [vmem:[#allocation6 + $0x19] sm:$0x3] }
 0x5fa   :  { %v4962_v0 = vld [vmem:[#allocation6 + $0x9] sm:$0x3]  ;;  %v4923_v29 = vrot.slane %v4921_v49, 2  ;;  %v4969_v6 = vld [vmem:[#allocation6 + $0x19] sm:$0x3] }
 0x5fb   :  { %4942 = vst [vmem:[#allocation7 + $0x28] sm:$0xc0] %v4940_v7  ;;  %4963 = vst [vmem:[#allocation7 + $0x38] sm:$0x3] %v4962_v0  ;;  %v4971_v45 = vrot.slane %v4969_v6, 4 }
 0x5fc   :  { %4920 = vst [vmem:[#allocation7 + $0x20] sm:$0x30] %v4918_v48  ;;  %4925 = vst [vmem:[#allocation7 + $0x20] sm:$0xc0] %v4923_v29  ;;  %v4943_v44 = vld [vmem:[#allocation6 + $0x8] sm:$0x3] }
 0x5fd   :  { %v4951_v16 = vld [vmem:[#allocation6 + $0x18] sm:$0x3]  ;;  %v4996_v54 = vld [vmem:[#allocation7] sm:$0xff]  ;;  %4973 = vst [vmem:[#allocation7 + $0x38] sm:$0x30] %v4971_v45 }
 0x5fe   :  { %4978 = vst [vmem:[#allocation7 + $0x38] sm:$0xc0] %v4976_v9  ;;  %4944 = vst [vmem:[#allocation7 + $0x30] sm:$0x3] %v4943_v44  ;;  %v4953_v24 = vrot.slane %v4951_v16, 4  ;;  %v4997_v5 = vld [vmem:[#allocation7 + $0x8] sm:$0xff]  ;;  %v5005_v32 = vpack.c.bf16 %v4996_v54, %v4996_v54 }
 0x5ff   :  { %v4957_v28 = vld [vmem:[#allocation6 + $0x1c] sm:$0x3]  ;;  %v8388_v4 = vld [vmem:[%s11698_s7 + $0x100] ss:$8 sps:$4 sm:$0xff]   ;;  %v5006_v40 = vpack.c.bf16 %v4997_v5, %v4997_v5  ;;  %4950 = vst [vmem:[#allocation7 + $0x30] sm:$0xc] %v4948_v20 }
 0x600   :  { %v4959_v36 = vrot.slane %v4957_v28, 2  ;;  %v4979_v17 = vld [vmem:[#allocation6 + $0xa] sm:$0x3]  ;;  %4955 = vst [vmem:[#allocation7 + $0x30] sm:$0x30] %v4953_v24  ;;  %v4999_v62 = vld [vmem:[#allocation7 + $0x18] sm:$0xff] }
 0x601   :  { %4980 = vst [vmem:[#allocation7 + $0x40] sm:$0x3] %v4979_v17  ;;  %v4981_v50 = vld [vmem:[#allocation6 + $0xe] sm:$0x3]  ;;  %v4986_v56 = vld [vmem:[#allocation6 + $0x1a] sm:$0x3]  ;;  %5910 = vmatprep.mubr.bf16.mxu0 %v5006_v40  ;;  %v5008_v18 = vpack.c.bf16 %v4999_v62, %v4999_v62 }
 0x602   :  { %v4991_v59 = vld [vmem:[#allocation6 + $0x1e] sm:$0x3]  ;;  %4961 = vst [vmem:[#allocation7 + $0x30] sm:$0xc0] %v4959_v36  ;;  %v4983_v2 = vrot.slane %v4981_v50, 6  ;;  %v4988_v10 = vrot.slane %v4986_v56, 4  ;;  %5911 = vmatmul.mubr.bf16.vlgmr.msra.gmra.mrb[136].mxu0 %v5005_v32 }
 0x603   :  { %v8393_v27 = vld [vmem:[%s11698_s7 + $0x114] ss:$8 sps:$4 sm:$0xff]   ;;  %v4993_v14 = vrot.slane %v4991_v59, 2  ;;  %5920 = vmatpush1.bf16.msra.mxu0 %v8388_v4  ;;  %5951 = vmatprep.mubr.bf16.mxu0 %v5008_v18  ;;  %v8391_v26 = vld [vmem:[%s11698_s7 + $0x110] ss:$8 sps:$4 sm:$0xff]   ;;  %v5001_v60 = vld [vmem:[#allocation7 + $0x28] sm:$0xff] }
 0x604   :  { %4985 = vst [vmem:[#allocation7 + $0x40] sm:$0xc] %v4983_v2  ;;  %4990 = vst [vmem:[#allocation7 + $0x40] sm:$0x30] %v4988_v10  ;;  %5921 = vmatprep.subr.bf16.mxu0 %v8393_v27  ;;  %v8394_v46 = vld [vmem:[%s11698_s7 + $0x120] ss:$8 sps:$4 sm:$0xff]   ;;  %v5010_v49 = vpack.c.bf16 %v5001_v60, %v5001_v60 }
 0x605   :  { %4995 = vst [vmem:[#allocation7 + $0x40] sm:$0xc0] %v4993_v14  ;;  %v8399_v37 = vld [vmem:[%s11698_s7 + $0x134] ss:$8 sps:$4 sm:$0xff]   ;;  %v8397_v22 = vld [vmem:[%s11698_s7 + $0x130] ss:$8 sps:$4 sm:$0xff]  }
 0x606   :  { %v8400_v58 = vld [vmem:[%s11698_s7 + $0x140] ss:$8 sps:$4 sm:$0xff]   ;;  %v8405_v25 = vld [vmem:[%s11698_s7 + $0x154] ss:$8 sps:$4 sm:$0xff]   ;;  %v8403_v30 = vld [vmem:[%s11698_s7 + $0x150] ss:$8 sps:$4 sm:$0xff]  }
 0x607   :  { %5922 = vmatpush1.bf16.msra.mxu0 %v8391_v26  ;;  %v8408_v1 = vld [vmem:[%s11698_s7 + $0x164] ss:$8 sps:$4 sm:$0xff]   ;;  %v8406_v51 = vld [vmem:[%s11698_s7 + $0x160] ss:$8 sps:$4 sm:$0xff]   ;;  %v8411_v33 = vld [vmem:[%s11698_s7 + $0x174] ss:$8 sps:$4 sm:$0xff]  }
 0x608   :  { %5923 = vmatprep.subr.bf16.mxu0 %v8396_v34  ;;  %v8409_v41 = vld [vmem:[%s11698_s7 + $0x170] ss:$8 sps:$4 sm:$0xff]   ;;  %v8414_v42 = vld [vmem:[%s11698_s7 + $0x184] ss:$8 sps:$4 sm:$0xff]   ;;  %v8412_v55 = vld [vmem:[%s11698_s7 + $0x180] ss:$8 sps:$4 sm:$0xff]  }
 0x609   :  { %v8417_v13 = vld [vmem:[%s11698_s7 + $0x194] ss:$8 sps:$4 sm:$0xff]   ;;  %v8415_v43 = vld [vmem:[%s11698_s7 + $0x190] ss:$8 sps:$4 sm:$0xff]   ;;  %v8420_v63 = vld [vmem:[%s11698_s7 + $0x1a4] ss:$8 sps:$4 sm:$0xff]  }
 0x60a   :  { %v8418_v19 = vld [vmem:[%s11698_s7 + $0x1a0] ss:$8 sps:$4 sm:$0xff]   ;;  %v8423_v23 = vld [vmem:[%s11698_s7 + $0x1b4] ss:$8 sps:$4 sm:$0xff]   ;;  %v8421_v47 = vld [vmem:[%s11698_s7 + $0x1b0] ss:$8 sps:$4 sm:$0xff]  }
 0x60b   :  { %5924 = vmatpush1.bf16.msra.mxu0 %v8394_v46  ;;  %v8426_v57 = vld [vmem:[%s11698_s7 + $0x1c4] ss:$8 sps:$4 sm:$0xff]   ;;  %v8424_v3 = vld [vmem:[%s11698_s7 + $0x1c0] ss:$8 sps:$4 sm:$0xff]   ;;  %v8429_v39 = vld [vmem:[%s11698_s7 + $0x1d4] ss:$8 sps:$4 sm:$0xff]  }
 0x60c   :  { %5925 = vmatprep.subr.bf16.mxu0 %v8399_v37  ;;  %v8427_v31 = vld [vmem:[%s11698_s7 + $0x1d0] ss:$8 sps:$4 sm:$0xff]   ;;  %v8432_v52 = vld [vmem:[%s11698_s7 + $0x1e4] ss:$8 sps:$4 sm:$0xff]   ;;  %v8430_v11 = vld [vmem:[%s11698_s7 + $0x1e0] ss:$8 sps:$4 sm:$0xff]  }
 0x60d   :  { %v8435_v35 = vld [vmem:[%s11698_s7 + $0x1f4] ss:$8 sps:$4 sm:$0xff]   ;;  %v8433_v15 = vld [vmem:[%s11698_s7 + $0x1f0] ss:$8 sps:$4 sm:$0xff]   ;;  %v8438_v61 = vld [vmem:[%s11698_s7 + $0x204] ss:$8 sps:$4 sm:$0xff]  }
 0x60e   :  { %v4998_v8 = vld [vmem:[#allocation7 + $0x10] sm:$0xff]  ;;  %v8436_v7 = vld [vmem:[%s11698_s7 + $0x200] ss:$8 sps:$4 sm:$0xff]   ;;  %v8444_v29 = vld [vmem:[%s11698_s7 + $0x224] ss:$8 sps:$4 sm:$0xff]  }
 0x60f   :  { %5926 = vmatpush1.bf16.msra.mxu0 %v8397_v22  ;;  %v5007_v21 = vpack.c.bf16 %v4998_v8, %v4998_v8  ;;  %v8441_v48 = vld [vmem:[%s11698_s7 + $0x214] ss:$8 sps:$4 sm:$0xff]   ;;  %v8439_v0 = vld [vmem:[%s11698_s7 + $0x210] ss:$8 sps:$4 sm:$0xff]   ;;  %v8442_v6 = vld [vmem:[%s11698_s7 + $0x220] ss:$8 sps:$4 sm:$0xff]  }
 0x610   :  { %5927 = vmatprep.subr.bf16.mxu0 %v8402_v38  ;;  %v8447_v53 = vld [vmem:[%s11698_s7 + $0x234] ss:$8 sps:$4 sm:$0xff]   ;;  %v8445_v45 = vld [vmem:[%s11698_s7 + $0x230] ss:$8 sps:$4 sm:$0xff]   ;;  %v8450_v9 = vld [vmem:[%s11698_s7 + $0x244] ss:$8 sps:$4 sm:$0xff]  }
 0x611   :  { %v8448_v44 = vld [vmem:[%s11698_s7 + $0x240] ss:$8 sps:$4 sm:$0xff]   ;;  %v8453_v12 = vld [vmem:[%s11698_s7 + $0x254] ss:$8 sps:$4 sm:$0xff]   ;;  %v8451_v16 = vld [vmem:[%s11698_s7 + $0x250] ss:$8 sps:$4 sm:$0xff]  }
 0x612   :  { %v8456_v54 = vld [vmem:[%s11698_s7 + $0x264] ss:$8 sps:$4 sm:$0xff]   ;;  %v8454_v20 = vld [vmem:[%s11698_s7 + $0x260] ss:$8 sps:$4 sm:$0xff]   ;;  %v8459_v24 = vld [vmem:[%s11698_s7 + $0x274] ss:$8 sps:$4 sm:$0xff]  }
 0x613   :  { %5928 = vmatpush1.bf16.msra.mxu0 %v8400_v58  ;;  %v8457_v28 = vld [vmem:[%s11698_s7 + $0x270] ss:$8 sps:$4 sm:$0xff]   ;;  %v8462_v5 = vld [vmem:[%s11698_s7 + $0x284] ss:$8 sps:$4 sm:$0xff]   ;;  %v8460_v4 = vld [vmem:[%s11698_s7 + $0x280] ss:$8 sps:$4 sm:$0xff]  }
 0x614   :  { %5929 = vmatprep.subr.bf16.mxu0 %v8405_v25  ;;  %v8465_v32 = vld [vmem:[%s11698_s7 + $0x294] ss:$8 sps:$4 sm:$0xff]   ;;  %v8463_v36 = vld [vmem:[%s11698_s7 + $0x290] ss:$8 sps:$4 sm:$0xff]   ;;  %v8468_v17 = vld [vmem:[%s11698_s7 + $0x2a4] ss:$8 sps:$4 sm:$0xff]  }
 0x615   :  { %v8466_v40 = vld [vmem:[%s11698_s7 + $0x2a0] ss:$8 sps:$4 sm:$0xff]   ;;  %v8471_v50 = vld [vmem:[%s11698_s7 + $0x2b4] ss:$8 sps:$4 sm:$0xff]   ;;  %v8469_v56 = vld [vmem:[%s11698_s7 + $0x2b0] ss:$8 sps:$4 sm:$0xff]  }
 0x616   :  { %v8474_v59 = vld [vmem:[%s11698_s7 + $0x2c4] ss:$8 sps:$4 sm:$0xff]   ;;  %v8472_v62 = vld [vmem:[%s11698_s7 + $0x2c0] ss:$8 sps:$4 sm:$0xff]   ;;  %v8477_v27 = vld [vmem:[%s11698_s7 + $0x2d4] ss:$8 sps:$4 sm:$0xff]  }
 0x617   :  { %5930 = vmatpush1.bf16.msra.mxu0 %v8403_v30  ;;  %v8475_v2 = vld [vmem:[%s11698_s7 + $0x2d0] ss:$8 sps:$4 sm:$0xff]   ;;  %v8480_v10 = vld [vmem:[%s11698_s7 + $0x2e4] ss:$8 sps:$4 sm:$0xff]   ;;  %v8478_v14 = vld [vmem:[%s11698_s7 + $0x2e0] ss:$8 sps:$4 sm:$0xff]  }
 0x618   :  { %5931 = vmatprep.subr.bf16.mxu0 %v8408_v1  ;;  %v8483_v18 = vld [vmem:[%s11698_s7 + $0x2f4] ss:$8 sps:$4 sm:$0xff]   ;;  %v8481_v26 = vld [vmem:[%s11698_s7 + $0x2f0] ss:$8 sps:$4 sm:$0xff]   ;;  %v8486_v34 = vld [vmem:[%s11698_s7 + $0x304] ss:$8 sps:$4 sm:$0xff]  }
 0x619   :  { %v5000_v46 = vld [vmem:[#allocation7 + $0x20] sm:$0xff]  ;;  %v5003_v37 = vld [vmem:[#allocation7 + $0x38] sm:$0xff] }
 0x61a   :  { %v8484_v22 = vld [vmem:[%s11698_s7 + $0x300] ss:$8 sps:$4 sm:$0xff]   ;;  %v5009_v38 = vpack.c.bf16 %v5000_v46, %v5000_v46  ;;  %v8489_v58 = vld [vmem:[%s11698_s7 + $0x314] ss:$8 sps:$4 sm:$0xff]   ;;  %v5012_v25 = vpack.c.bf16 %v5003_v37, %v5003_v37  ;;  %v8487_v30 = vld [vmem:[%s11698_s7 + $0x310] ss:$8 sps:$4 sm:$0xff]  }
 0x61b   :  { %5932 = vmatpush1.bf16.msra.mxu0 %v8406_v51  ;;  %v8492_v1 = vld [vmem:[%s11698_s7 + $0x324] ss:$8 sps:$4 sm:$0xff]   ;;  %v8490_v51 = vld [vmem:[%s11698_s7 + $0x320] ss:$8 sps:$4 sm:$0xff]   ;;  %v8525_v60 = vld [vmem:[%s11698_s7 + $0x3d4] ss:$8 sps:$4 sm:$0xff]  }
 0x61c   :  { %5933 = vmatprep.subr.bf16.mxu0 %v8411_v33  ;;  %v8495_v33 = vld [vmem:[%s11698_s7 + $0x334] ss:$8 sps:$4 sm:$0xff]   ;;  %v8520_v8 = vld [vmem:[%s11698_s7 + $0x3c0] ss:$8 sps:$4 sm:$0xff]  }
 0x61f   :  { %5934 = vmatpush1.bf16.msra.mxu0 %v8409_v41  ;;  %v8493_v41 = vld [vmem:[%s11698_s7 + $0x330] ss:$8 sps:$4 sm:$0xff]  }
 0x620   :  { %5935 = vmatprep.subr.bf16.mxu0 %v8414_v42  ;;  %v8498_v42 = vld [vmem:[%s11698_s7 + $0x344] ss:$8 sps:$4 sm:$0xff]  }
 0x623   :  { %5936 = vmatpush1.bf16.msra.mxu0 %v8412_v55  ;;  %v8496_v55 = vld [vmem:[%s11698_s7 + $0x340] ss:$8 sps:$4 sm:$0xff]  }
 0x624   :  { %5937 = vmatprep.subr.bf16.mxu0 %v8417_v13  ;;  %v8501_v13 = vld [vmem:[%s11698_s7 + $0x354] ss:$8 sps:$4 sm:$0xff]  }
 0x627   :  { %5938 = vmatpush1.bf16.msra.mxu0 %v8415_v43  ;;  %v8499_v43 = vld [vmem:[%s11698_s7 + $0x350] ss:$8 sps:$4 sm:$0xff]  }
 0x628   :  { %5939 = vmatprep.subr.bf16.mxu0 %v8420_v63  ;;  %v8504_v63 = vld [vmem:[%s11698_s7 + $0x364] ss:$8 sps:$4 sm:$0xff]  }
 0x62b   :  { %5940 = vmatpush1.bf16.msra.mxu0 %v8418_v19  ;;  %v8502_v19 = vld [vmem:[%s11698_s7 + $0x360] ss:$8 sps:$4 sm:$0xff]  }
 0x62c   :  { %5941 = vmatprep.subr.bf16.mxu0 %v8423_v23  ;;  %v8507_v23 = vld [vmem:[%s11698_s7 + $0x374] ss:$8 sps:$4 sm:$0xff]  }
 0x62f   :  { %5942 = vmatpush1.bf16.msra.mxu0 %v8421_v47  ;;  %v8505_v47 = vld [vmem:[%s11698_s7 + $0x370] ss:$8 sps:$4 sm:$0xff]  }
 0x630   :  { %5943 = vmatprep.subr.bf16.mxu0 %v8426_v57  ;;  %v8510_v57 = vld [vmem:[%s11698_s7 + $0x384] ss:$8 sps:$4 sm:$0xff]  }
 0x633   :  { %5944 = vmatpush1.bf16.msra.mxu0 %v8424_v3  ;;  %v8508_v3 = vld [vmem:[%s11698_s7 + $0x380] ss:$8 sps:$4 sm:$0xff]  }
 0x634   :  { %5945 = vmatprep.subr.bf16.mxu0 %v8429_v39  ;;  %v8513_v39 = vld [vmem:[%s11698_s7 + $0x394] ss:$8 sps:$4 sm:$0xff]  }
 0x637   :  { %5946 = vmatpush1.bf16.msra.mxu0 %v8427_v31  ;;  %v8511_v31 = vld [vmem:[%s11698_s7 + $0x390] ss:$8 sps:$4 sm:$0xff]  }
 0x638   :  { %5947 = vmatprep.subr.bf16.mxu0 %v8432_v52  ;;  %v8516_v52 = vld [vmem:[%s11698_s7 + $0x3a4] ss:$8 sps:$4 sm:$0xff]  }
 0x63b   :  { %5948 = vmatpush1.bf16.msra.mxu0 %v8430_v11  ;;  %v8514_v11 = vld [vmem:[%s11698_s7 + $0x3a0] ss:$8 sps:$4 sm:$0xff]  }
 0x63c   :  { %5949 = vmatprep.subr.bf16.mxu0 %v8435_v35  ;;  %v8519_v35 = vld [vmem:[%s11698_s7 + $0x3b4] ss:$8 sps:$4 sm:$0xff]  }
 0x63f   :  { %5950 = vmatpush1.bf16.msra.mxu0 %v8433_v15  ;;  %v8517_v15 = vld [vmem:[%s11698_s7 + $0x3b0] ss:$8 sps:$4 sm:$0xff]  }
 0x640   :  { %5960 = vmatprep.subr.bf16.mxu0 %v8438_v61  ;;  %v8522_v61 = vld [vmem:[%s11698_s7 + $0x3c4] ss:$8 sps:$4 sm:$0xff]  }
 0x642   :  { %5952 = vmatmul.mubr.bf16.vlgmr.msra.gmra.mrb[136].mxu0 %v5007_v21  ;;  %v8528_v21 = vld [vmem:[%s11698_s7 + $0x3e4] ss:$8 sps:$4 sm:$0xff]  }
 0x643   :  { %5961 = vmatpush1.bf16.msra.mxu0 %v8436_v7  ;;  %5992 = vmatprep.mubr.bf16.mxu0 %v5010_v49  ;;  %v8523_v7 = vld [vmem:[%s11698_s7 + $0x3d0] ss:$8 sps:$4 sm:$0xff]   ;;  %v8531_v49 = vld [vmem:[%s11698_s7 + $0x3f4] ss:$8 sps:$4 sm:$0xff]  }
 0x644   :  { %5962 = vmatprep.subr.bf16.mxu0 %v8441_v48  ;;  %v8526_v48 = vld [vmem:[%s11698_s7 + $0x3e0] ss:$8 sps:$4 sm:$0xff]  }
 0x647   :  { %5963 = vmatpush1.bf16.msra.mxu0 %v8439_v0  ;;  %v8529_v0 = vld [vmem:[%s11698_s7 + $0x3f0] ss:$8 sps:$4 sm:$0xff]  }
 0x648   :  { %5964 = vmatprep.subr.bf16.mxu0 %v8444_v29  ;;  %v8534_v29 = vld [vmem:[%s11698_s7 + $0x404] ss:$8 sps:$4 sm:$0xff]  }
 0x64b   :  { %5965 = vmatpush1.bf16.msra.mxu0 %v8442_v6  ;;  %v5002_v6 = vld [vmem:[#allocation7 + $0x30] sm:$0xff] }
 0x64c   :  { %5966 = vmatprep.subr.bf16.mxu0 %v8447_v53  ;;  %v8532_v53 = vld [vmem:[%s11698_s7 + $0x400] ss:$8 sps:$4 sm:$0xff]  }
 0x64f   :  { %5967 = vmatpush1.bf16.msra.mxu0 %v8445_v45  ;;  %v5011_v45 = vpack.c.bf16 %v5002_v6, %v5002_v6 }
 0x650   :  { %5968 = vmatprep.subr.bf16.mxu0 %v8450_v9  ;;  %v8537_v9 = vld [vmem:[%s11698_s7 + $0x414] ss:$8 sps:$4 sm:$0xff]  }
 0x653   :  { %5969 = vmatpush1.bf16.msra.mxu0 %v8448_v44  ;;  %v8535_v44 = vld [vmem:[%s11698_s7 + $0x410] ss:$8 sps:$4 sm:$0xff]  }
 0x654   :  { %5970 = vmatprep.subr.bf16.mxu0 %v8453_v12  ;;  %v11874_v12 = vmov 0  }
 0x657   :  { %5971 = vmatpush1.bf16.msra.mxu0 %v8451_v16  ;;  %v8540_v16 = vld [vmem:[%s11698_s7 + $0x424] ss:$8 sps:$4 sm:$0xff]  }
 0x658   :  { %5972 = vmatprep.subr.bf16.mxu0 %v8456_v54  ;;  %v8538_v54 = vld [vmem:[%s11698_s7 + $0x420] ss:$8 sps:$4 sm:$0xff]  }
 0x65b   :  { %5973 = vmatpush1.bf16.msra.mxu0 %v8454_v20  ;;  %v8543_v20 = vld [vmem:[%s11698_s7 + $0x434] ss:$8 sps:$4 sm:$0xff]  }
 0x65c   :  { %5974 = vmatprep.subr.bf16.mxu0 %v8459_v24  ;;  %v8541_v24 = vld [vmem:[%s11698_s7 + $0x430] ss:$8 sps:$4 sm:$0xff]  }
 0x65f   :  { %5975 = vmatpush1.bf16.msra.mxu0 %v8457_v28  ;;  %v8546_v28 = vld [vmem:[%s11698_s7 + $0x444] ss:$8 sps:$4 sm:$0xff]  }
 0x660   :  { %5976 = vmatprep.subr.bf16.mxu0 %v8462_v5  ;;  %v8544_v5 = vld [vmem:[%s11698_s7 + $0x440] ss:$8 sps:$4 sm:$0xff]  }
 0x663   :  { %5977 = vmatpush1.bf16.msra.mxu0 %v8460_v4  ;;  %v8549_v4 = vld [vmem:[%s11698_s7 + $0x454] ss:$8 sps:$4 sm:$0xff]  }
 0x664   :  { %5978 = vmatprep.subr.bf16.mxu0 %v8465_v32  ;;  %v8547_v32 = vld [vmem:[%s11698_s7 + $0x450] ss:$8 sps:$4 sm:$0xff]  }
 0x667   :  { %5979 = vmatpush1.bf16.msra.mxu0 %v8463_v36  ;;  %v8552_v36 = vld [vmem:[%s11698_s7 + $0x464] ss:$8 sps:$4 sm:$0xff]  }
 0x668   :  { %5980 = vmatprep.subr.bf16.mxu0 %v8468_v17  ;;  %v8550_v17 = vld [vmem:[%s11698_s7 + $0x460] ss:$8 sps:$4 sm:$0xff]  }
 0x66b   :  { %5981 = vmatpush1.bf16.msra.mxu0 %v8466_v40  ;;  %v8555_v40 = vld [vmem:[%s11698_s7 + $0x474] ss:$8 sps:$4 sm:$0xff]  }
 0x66c   :  { %5982 = vmatprep.subr.bf16.mxu0 %v8471_v50  ;;  %v8553_v50 = vld [vmem:[%s11698_s7 + $0x470] ss:$8 sps:$4 sm:$0xff]  }
 0x66f   :  { %5983 = vmatpush1.bf16.msra.mxu0 %v8469_v56  ;;  %v5004_v56 = vld [vmem:[#allocation7 + $0x40] sm:$0xff] }
 0x670   :  { %5984 = vmatprep.subr.bf16.mxu0 %v8474_v59  ;;  %v5013_v59 = vpack.c.bf16 %v5004_v56, %v5004_v56  ;;  %v8559_v56 = vld [vmem:[%s11701_s11 + $0x20] ss:$16 sps:$4 sm:$0xff]  }
 0x673   :  { %5985 = vmatpush1.bf16.msra.mxu0 %v8472_v62 }
 0x674   :  { %5986 = vmatprep.subr.bf16.mxu0 %v8477_v27 }
 0x677   :  { %5987 = vmatpush1.bf16.msra.mxu0 %v8475_v2 }
 0x678   :  { %5988 = vmatprep.subr.bf16.mxu0 %v8480_v10 }
 0x67b   :  { %5989 = vmatpush1.bf16.msra.mxu0 %v8478_v14 }
 0x67c   :  { %5990 = vmatprep.subr.bf16.mxu0 %v8483_v18 }
 0x67f   :  { %5991 = vmatpush1.bf16.msra.mxu0 %v8481_v26 }
 0x680   :  { %6001 = vmatprep.subr.bf16.mxu0 %v8486_v34 }
 0x682   :  { %5993 = vmatmul.mubr.bf16.vlgmr.msra.gmra.mrb[136].mxu0 %v5009_v38 }
 0x683   :  { %6002 = vmatpush1.bf16.msra.mxu0 %v8484_v22  ;;  %6033 = vmatprep.mubr.bf16.mxu0 %v5012_v25 }
 0x684   :  { %6003 = vmatprep.subr.bf16.mxu0 %v8489_v58 }
 0x687   :  { %6004 = vmatpush1.bf16.msra.mxu0 %v8487_v30 }
 0x688   :  { %6005 = vmatprep.subr.bf16.mxu0 %v8492_v1 }
 0x68b   :  { %6006 = vmatpush1.bf16.msra.mxu0 %v8490_v51 }
 0x68c   :  { %6007 = vmatprep.subr.bf16.mxu0 %v8495_v33 }
 0x68f   :  { %6008 = vmatpush1.bf16.msra.mxu0 %v8493_v41 }
 0x690   :  { %6009 = vmatprep.subr.bf16.mxu0 %v8498_v42 }
 0x693   :  { %6010 = vmatpush1.bf16.msra.mxu0 %v8496_v55 }
 0x694   :  { %6011 = vmatprep.subr.bf16.mxu0 %v8501_v13 }
 0x697   :  { %6012 = vmatpush1.bf16.msra.mxu0 %v8499_v43 }
 0x698   :  { %6013 = vmatprep.subr.bf16.mxu0 %v8504_v63 }
 0x69b   :  { %6014 = vmatpush1.bf16.msra.mxu0 %v8502_v19 }
 0x69c   :  { %6015 = vmatprep.subr.bf16.mxu0 %v8507_v23 }
 0x69f   :  { %6016 = vmatpush1.bf16.msra.mxu0 %v8505_v47 }
 0x6a0   :  { %6017 = vmatprep.subr.bf16.mxu0 %v8510_v57 }
 0x6a3   :  { %6018 = vmatpush1.bf16.msra.mxu0 %v8508_v3 }
 0x6a4   :  { %6019 = vmatprep.subr.bf16.mxu0 %v8513_v39 }
 0x6a7   :  { %6020 = vmatpush1.bf16.msra.mxu0 %v8511_v31 }
 0x6a8   :  { %6021 = vmatprep.subr.bf16.mxu0 %v8516_v52 }
 0x6ab   :  { %6022 = vmatpush1.bf16.msra.mxu0 %v8514_v11 }
 0x6ac   :  { %6023 = vmatprep.subr.bf16.mxu0 %v8519_v35 }
 0x6af   :  { %6024 = vmatpush1.bf16.msra.mxu0 %v8517_v15 }
 0x6b0   :  { %6025 = vmatprep.subr.bf16.mxu0 %v8522_v61  ;;  %v6125_v61 = vlaneseq }
 0x6b3   :  { %6026 = vmatpush1.bf16.msra.mxu0 %v8520_v8 }
 0x6b4   :  { %6027 = vmatprep.subr.bf16.mxu0 %v8525_v60 }
 0x6b7   :  { %6028 = vmatpush1.bf16.msra.mxu0 %v8523_v7 }
 0x6b8   :  { %6029 = vmatprep.subr.bf16.mxu0 %v8528_v21  ;;  %v11367_v21 = vshrl.u32 %v6125_v61, 7  ;;  %v8612_v61 = vld [vmem:[%s11701_s11 + $0x4c] ss:$16 sps:$4 sm:$0xff]  }
 0x6bb   :  { %6030 = vmatpush1.bf16.msra.mxu0 %v8526_v48  ;;  %v11370_v48 = vsub.s32 0, %v11367_v21 }
 0x6bc   :  { %6031 = vmatprep.subr.bf16.mxu0 %v8531_v49  ;;  %v6083_v49 = vld [vmem:[%s11702_s8] sm:$0x3] }
 0x6bd   :  { %v6128_v6 = vrot.slane %v6083_v49, %v11370_v48 }
 0x6bf   :  { %6032 = vmatpush1.bf16.msra.mxu0 %v8529_v0  ;;  %v11376_v0 = vsub.s32 1, %v11367_v21 }
 0x6c0   :  { %6042 = vmatprep.subr.bf16.mxu0 %v8534_v29  ;;  %v6084_v29 = vld [vmem:[%s11703_s9] sm:$0x3] }
 0x6c2   :  { %6034 = vmatmul.mubr.bf16.vlgmr.msra.gmra.mrb[136].mxu0 %v5011_v45  ;;  %v6132_v45 = vrot.slane %v6083_v49, %v11376_v0  ;;  %v8618_v49 = vld [vmem:[%s11701_s11 + $0x8c] ss:$16 sps:$4 sm:$0xff]  }
 0x6c3   :  { %6043 = vmatpush1.bf16.msra.mxu0 %v8532_v53  ;;  %6074 = vmatprep.mubr.bf16.mxu0 %v11874_v12  ;;  %v6141_v12 = vrot.slane %v6084_v29, %v11370_v48 }
 0x6c4   :  { %6044 = vmatprep.subr.bf16.mxu0 %v8537_v9 }
 0x6c7   :  { %6045 = vmatpush1.bf16.msra.mxu0 %v8535_v44 }
 0x6c8   :  { %6046 = vmatprep.subr.bf16.mxu0 %v8540_v16 }
 0x6cb   :  { %6047 = vmatpush1.bf16.msra.mxu0 %v8538_v54  ;;  %v6145_v54 = vrot.slane %v6084_v29, %v11376_v0  ;;  %v8616_v29 = vld [vmem:[%s11701_s11 + $0x88] ss:$16 sps:$4 sm:$0xff]  }
 0x6cc   :  { %6048 = vmatprep.subr.bf16.mxu0 %v8543_v20 }
 0x6cf   :  { %6049 = vmatpush1.bf16.msra.mxu0 %v8541_v24 }
 0x6d0   :  { %6050 = vmatprep.subr.bf16.mxu0 %v8546_v28 }
 0x6d3   :  { %6051 = vmatpush1.bf16.msra.mxu0 %v8544_v5 }
 0x6d4   :  { %6052 = vmatprep.subr.bf16.mxu0 %v8549_v4 }
 0x6d7   :  { %6053 = vmatpush1.bf16.msra.mxu0 %v8547_v32  ;;  %v8558_v32 = vld [vmem:[%s11701_s11 + $0x4] ss:$16 sps:$4 sm:$0xff]  }
 0x6d8   :  { %6054 = vmatprep.subr.bf16.mxu0 %v8552_v36 }
 0x6db   :  { %6055 = vmatpush1.bf16.msra.mxu0 %v8550_v17  ;;  %v6152_v17 = vld [vmem:[%s11704_s10] sm:$0x3] }
 0x6dc   :  { %6056 = vmatprep.subr.bf16.mxu0 %v8555_v40  ;;  %v8556_v40 = vld [vmem:[%s11701_s11] ss:$16 sps:$4 sm:$0xff]  }
 0x6df   :  { %6057 = vmatpush1.bf16.msra.mxu0 %v8553_v50  ;;  %v8561_v50 = vld [vmem:[%s11701_s11 + $0x24] ss:$16 sps:$4 sm:$0xff]  }
 0x6e2   :  { %6075 = vmatmul.mubr.bf16.vlgmr.msra.gmra.mrb[136].mxu0 %v5013_v59  ;;  %v8564_v59 = vld [vmem:[%s11701_s11 + $0x44] ss:$16 sps:$4 sm:$0xff]  }
 0x7b5   :  { %v6076_v62 = vpop.f32.mrb[136].mxu0 }
 0x7b6   :  { %v6085_v27 = vrot.slane %v6076_v62, 4  ;;  %v6078_v2 = vpop.f32.mrb[137].mxu0 }
 0x7b7   :  { %v6091_v10 = vrot.slane %v6078_v2, 4  ;;  %v6080_v14 = vpop.f32.mrb[138].mxu0 }
 0x7b8   :  { %v6086_v18 = vadd.f32 %v6085_v27, %v6076_v62  ;;  %v6081_v26 = vpop.f32.mrb[139].mxu0  ;;  %v8567_v27 = vld [vmem:[%s11701_s11 + $0x64] ss:$16 sps:$4 sm:$0xff]   ;;  %v8568_v14 = vld [vmem:[%s11701_s11 + $0x80] ss:$16 sps:$4 sm:$0xff]  }
 0x7b9   :  { %v6092_v34 = vadd.f32 %v6091_v10, %v6078_v2  ;;  %v8570_v10 = vld [vmem:[%s11701_s11 + $0x84] ss:$16 sps:$4 sm:$0xff]   ;;  %v8571_v26 = vld [vmem:[%s11701_s11 + $0xa0] ss:$16 sps:$4 sm:$0xff]  }
 0x7ba   :  { %v6087_v46 = vrot.slane %v6086_v18, 2 }
 0x7bb   :  { %v6093_v37 = vrot.slane %v6092_v34, 2 }
 0x7bc   :  { %v6088_v22 = vadd.f32 %v6087_v46, %v6086_v18  ;;  %v8573_v18 = vld [vmem:[%s11701_s11 + $0xa4] ss:$16 sps:$4 sm:$0xff]   ;;  %v8574_v46 = vld [vmem:[%s11701_s11 + $0xc0] ss:$16 sps:$4 sm:$0xff]  }
 0x7bd   :  { %v6094_v38 = vadd.f32 %v6093_v37, %v6092_v34  ;;  %v8576_v34 = vld [vmem:[%s11701_s11 + $0xc4] ss:$16 sps:$4 sm:$0xff]  }
 0x7be   :  { %v6089_v58 = vrot.slane %v6088_v22, 1  ;;  %v8579_v37 = vld [vmem:[%s11701_s11 + $0xe4] ss:$16 sps:$4 sm:$0xff]  }
 0x7bf   :  { %v6095_v25 = vrot.slane %v6094_v38, 1 }
 0x7c0   :  { %v6090_v30 = vadd.f32 %v6089_v58, %v6088_v22  ;;  %v8577_v22 = vld [vmem:[%s11701_s11 + $0xe0] ss:$16 sps:$4 sm:$0xff]  }
 0x7c1   :  { %v6096_v1 = vadd.f32 %v6095_v25, %v6094_v38  ;;  %v8582_v38 = vld [vmem:[%s11701_s11 + $0x104] ss:$16 sps:$4 sm:$0xff]   ;;  %v8580_v58 = vld [vmem:[%s11701_s11 + $0x100] ss:$16 sps:$4 sm:$0xff]  }
 0x7c2   :  { %v6098_v51 = vmul.f32 0.125, %v6090_v30  ;;  %v8585_v25 = vld [vmem:[%s11701_s11 + $0x124] ss:$16 sps:$4 sm:$0xff]   ;;  %v8583_v30 = vld [vmem:[%s11701_s11 + $0x120] ss:$16 sps:$4 sm:$0xff]  }
 0x7c3   :  { %v6099_v33 = vmul.f32 0.125, %v6096_v1  ;;  %v8588_v1 = vld [vmem:[%s11701_s11 + $0x144] ss:$16 sps:$4 sm:$0xff]  }
 0x7c4   :  { %v6100_v41 = vsub.f32 %v6076_v62, %v6098_v51  ;;  %v8562_v62 = vld [vmem:[%s11701_s11 + $0x40] ss:$16 sps:$4 sm:$0xff]  }
 0x7c5   :  { %v6101_v42 = vsub.f32 %v6078_v2, %v6099_v33  ;;  %v8565_v2 = vld [vmem:[%s11701_s11 + $0x60] ss:$16 sps:$4 sm:$0xff]   ;;  %v8591_v33 = vld [vmem:[%s11701_s11 + $0x164] ss:$16 sps:$4 sm:$0xff]  }
 0x7c6   :  { %v6102_v55 = vmul.f32 %v6100_v41, %v6100_v41  ;;  %v8586_v51 = vld [vmem:[%s11701_s11 + $0x140] ss:$16 sps:$4 sm:$0xff]  }
 0x7c7   :  { %v6103_v13 = vmul.f32 %v6101_v42, %v6101_v42 }
 0x7c8   :  { %v6104_v43 = vrot.slane %v6102_v55, 4 }
 0x7c9   :  { %v6110_v63 = vrot.slane %v6103_v13, 4 }
 0x7ca   :  { %v6105_v19 = vadd.f32 %v6104_v43, %v6102_v55  ;;  %v8592_v55 = vld [vmem:[%s11701_s11 + $0x180] ss:$16 sps:$4 sm:$0xff]  }
 0x7cb   :  { %v6111_v23 = vadd.f32 %v6110_v63, %v6103_v13  ;;  %v8597_v13 = vld [vmem:[%s11701_s11 + $0x1a4] ss:$16 sps:$4 sm:$0xff]   ;;  %v8595_v43 = vld [vmem:[%s11701_s11 + $0x1a0] ss:$16 sps:$4 sm:$0xff]  }
 0x7cc   :  { %v6106_v47 = vrot.slane %v6105_v19, 2  ;;  %v8600_v63 = vld [vmem:[%s11701_s11 + $0x1c4] ss:$16 sps:$4 sm:$0xff]  }
 0x7cd   :  { %v6112_v57 = vrot.slane %v6111_v23, 2 }
 0x7ce   :  { %v6107_v3 = vadd.f32 %v6106_v47, %v6105_v19  ;;  %v8598_v19 = vld [vmem:[%s11701_s11 + $0x1c0] ss:$16 sps:$4 sm:$0xff]   ;;  %v8603_v47 = vld [vmem:[%s11701_s11 + $0x1e4] ss:$16 sps:$4 sm:$0xff]  }
 0x7cf   :  { %v6113_v39 = vadd.f32 %v6112_v57, %v6111_v23  ;;  %v8601_v23 = vld [vmem:[%s11701_s11 + $0x1e0] ss:$16 sps:$4 sm:$0xff]   ;;  %v8606_v57 = vld [vmem:[%s11701_s11 + $0xc] ss:$16 sps:$4 sm:$0xff]  }
 0x7d0   :  { %v6108_v31 = vrot.slane %v6107_v3, 1 }
 0x7d1   :  { %v6114_v52 = vrot.slane %v6113_v39, 1 }
 0x7d2   :  { %v6109_v11 = vadd.f32 %v6108_v31, %v6107_v3 }
 0x7d3   :  { %v6115_v35 = vadd.f32 %v6114_v52, %v6113_v39  ;;  %v8604_v52 = vld [vmem:[%s11701_s11 + $0x8] ss:$16 sps:$4 sm:$0xff]  }
 0x7d4   :  { %v6116_v15 = vmul.f32 0.125, %v6109_v11 }
 0x7d5   :  { %v6117_v8 = vmul.f32 0.125, %v6115_v35  ;;  %v8609_v35 = vld [vmem:[%s11701_s11 + $0x2c] ss:$16 sps:$4 sm:$0xff]  }
 0x7d6   :  { %v6118_v60 = vadd.f32 1e-05, %v6116_v15  ;;  %v8607_v15 = vld [vmem:[%s11701_s11 + $0x28] ss:$16 sps:$4 sm:$0xff]  }
 0x7d7   :  { %v6119_v7 = vadd.f32 1e-05, %v6117_v8  ;;  %v8610_v8 = vld [vmem:[%s11701_s11 + $0x48] ss:$16 sps:$4 sm:$0xff]  }
 0x7d8   :  { %8688 = vrsqrt.f32 %v6118_v60  ;;  %v8615_v60 = vld [vmem:[%s11701_s11 + $0x6c] ss:$16 sps:$4 sm:$0xff]  }
 0x7d9   :  { %8690 = vrsqrt.f32 %v6119_v7  ;;  %v8613_v7 = vld [vmem:[%s11701_s11 + $0x68] ss:$16 sps:$4 sm:$0xff]  }
 0x7e2   :  { %v8689_v53 = vpop.eup %8688 }
 0x7e3   :  { %v8691_v9 = vpop.eup %8690  ;;  %v6122_v44 = vmul.f32 %v8689_v53, %v6100_v41  ;;  %v8589_v41 = vld [vmem:[%s11701_s11 + $0x160] ss:$16 sps:$4 sm:$0xff]   ;;  %v8619_v53 = vld [vmem:[%s11701_s11 + $0xa8] ss:$16 sps:$4 sm:$0xff]  }
 0x7e4   :  { %v6123_v16 = vmul.f32 %v8691_v9, %v6101_v42  ;;  %v8594_v42 = vld [vmem:[%s11701_s11 + $0x184] ss:$16 sps:$4 sm:$0xff]   ;;  %v8622_v9 = vld [vmem:[%s11701_s11 + $0xc8] ss:$16 sps:$4 sm:$0xff]  }
 0x7e5   :  { %v6135_v20 = vmul.f32 %v6128_v6, %v6122_v44  ;;  %v8621_v6 = vld [vmem:[%s11701_s11 + $0xac] ss:$16 sps:$4 sm:$0xff]  }
 0x7e6   :  { %v6136_v24 = vmul.f32 %v6132_v45, %v6123_v16  ;;  %v8624_v45 = vld [vmem:[%s11701_s11 + $0xcc] ss:$16 sps:$4 sm:$0xff]  }
 0x7e7   :  { %v6148_v28 = vadd.f32 %v6141_v12, %v6135_v20  ;;  %v8627_v44 = vld [vmem:[%s11701_s11 + $0xec] ss:$16 sps:$4 sm:$0xff]   ;;  %v8625_v12 = vld [vmem:[%s11701_s11 + $0xe8] ss:$16 sps:$4 sm:$0xff]  }
 0x7e8   :  { %v6149_v5 = vadd.f32 %v6145_v54, %v6136_v24  ;;  %v8630_v16 = vld [vmem:[%s11701_s11 + $0x10c] ss:$16 sps:$4 sm:$0xff]   ;;  %v8628_v54 = vld [vmem:[%s11701_s11 + $0x108] ss:$16 sps:$4 sm:$0xff]  }
 0x7e9   :  { %v6150_v36 = vmax.f32 %v6148_v28, 0.0  ;;  %v8633_v20 = vld [vmem:[%s11701_s11 + $0x12c] ss:$16 sps:$4 sm:$0xff]   ;;  %v8631_v24 = vld [vmem:[%s11701_s11 + $0x128] ss:$16 sps:$4 sm:$0xff]  }
 0x7ea   :  { %v6151_v4 = vmax.f32 %v6149_v5, 0.0  ;;  %v8636_v28 = vld [vmem:[%s11701_s11 + $0x14c] ss:$16 sps:$4 sm:$0xff]   ;;  %v8634_v5 = vld [vmem:[%s11701_s11 + $0x148] ss:$16 sps:$4 sm:$0xff]  }
 0x7ec   :  { %6157 = vmatprep.subr.mxu1 %v6151_v4  ;;  %v8639_v4 = vld [vmem:[%s11701_s11 + $0x16c] ss:$16 sps:$4 sm:$0xff]  }
 0x7ed   :  { %6158 = vmatpush1.msra.mxu1 %v6150_v36  ;;  %v8642_v36 = vld [vmem:[%s11701_s11 + $0x18c] ss:$16 sps:$4 sm:$0xff]  }
 0x7ee   :  { %7502 = vmatmul.mubr.msk.f32.vlgmr.msra.gmra.mrb[92].mxu1 %vm6153_vm0, %v6152_v17  ;;  %6636 = vmatprep.subr.bf16.mxu1 %v8558_v32  ;;  %v8637_v32 = vld [vmem:[%s11701_s11 + $0x168] ss:$16 sps:$4 sm:$0xff]  }
 0x7ef   :  { %6637 = vmatpush1.bf16.msra.mxu1 %v8556_v40  ;;  %v8640_v17 = vld [vmem:[%s11701_s11 + $0x188] ss:$16 sps:$4 sm:$0xff]   ;;  %v8645_v40 = vld [vmem:[%s11701_s11 + $0x1ac] ss:$16 sps:$4 sm:$0xff]  }
 0x7f0   :  { %6638 = vmatprep.subr.bf16.mxu1 %v8561_v50  ;;  %v8643_v50 = vld [vmem:[%s11701_s11 + $0x1a8] ss:$16 sps:$4 sm:$0xff]  }
 0x7f3   :  { %6639 = vmatpush1.bf16.msra.mxu1 %v8559_v56  ;;  %v8648_v56 = vld [vmem:[%s11701_s11 + $0x1cc] ss:$16 sps:$4 sm:$0xff]  }
 0x7f4   :  { %6640 = vmatprep.subr.bf16.mxu1 %v8564_v59  ;;  %v8646_v59 = vld [vmem:[%s11701_s11 + $0x1c8] ss:$16 sps:$4 sm:$0xff]  }
 0x7f7   :  { %6641 = vmatpush1.bf16.msra.mxu1 %v8562_v62  ;;  %v8651_v62 = vld [vmem:[%s11701_s11 + $0x1ec] ss:$16 sps:$4 sm:$0xff]  }
 0x7f8   :  { %6642 = vmatprep.subr.bf16.mxu1 %v8567_v27  ;;  %v8649_v27 = vld [vmem:[%s11701_s11 + $0x1e8] ss:$16 sps:$4 sm:$0xff]  }
 0x7fb   :  { %6643 = vmatpush1.bf16.msra.mxu1 %v8565_v2  ;;  %v8652_v2 = vld [vmem:[%s11705_s13 + $0x40] sm:$0xff]  }
 0x7fc   :  { %6644 = vmatprep.subr.bf16.mxu1 %v8570_v10  ;;  %v8653_v10 = vld [vmem:[%s11705_s13] sm:$0xff]  }
 0x7ff   :  { %6645 = vmatpush1.bf16.msra.mxu1 %v8568_v14  ;;  %v8654_v14 = vld [vmem:[%s11705_s13 + $0x48] sm:$0xff]  }
 0x800   :  { %6646 = vmatprep.subr.bf16.mxu1 %v8573_v18  ;;  %v8655_v18 = vld [vmem:[%s11705_s13 + $0x8] sm:$0xff]  }
 0x803   :  { %6647 = vmatpush1.bf16.msra.mxu1 %v8571_v26  ;;  %v8656_v26 = vld [vmem:[%s11705_s13 + $0x50] sm:$0xff]  }
 0x804   :  { %6648 = vmatprep.subr.bf16.mxu1 %v8576_v34  ;;  %v8657_v34 = vld [vmem:[%s11705_s13 + $0x10] sm:$0xff]  }
 0x807   :  { %6649 = vmatpush1.bf16.msra.mxu1 %v8574_v46  ;;  %v8658_v46 = vld [vmem:[%s11705_s13 + $0x58] sm:$0xff]  }
 0x808   :  { %6650 = vmatprep.subr.bf16.mxu1 %v8579_v37  ;;  %v8659_v37 = vld [vmem:[%s11705_s13 + $0x18] sm:$0xff]  }
 0x80b   :  { %6651 = vmatpush1.bf16.msra.mxu1 %v8577_v22  ;;  %v8660_v22 = vld [vmem:[%s11705_s13 + $0x60] sm:$0xff]  }
 0x80c   :  { %6652 = vmatprep.subr.bf16.mxu1 %v8582_v38  ;;  %v8661_v38 = vld [vmem:[%s11705_s13 + $0x20] sm:$0xff]  }
 0x80f   :  { %6653 = vmatpush1.bf16.msra.mxu1 %v8580_v58  ;;  %v8662_v58 = vld [vmem:[%s11705_s13 + $0x68] sm:$0xff]  }
 0x810   :  { %6654 = vmatprep.subr.bf16.mxu1 %v8585_v25  ;;  %v8663_v25 = vld [vmem:[%s11705_s13 + $0x28] sm:$0xff]  }
 0x813   :  { %6655 = vmatpush1.bf16.msra.mxu1 %v8583_v30  ;;  %v8664_v30 = vld [vmem:[%s11705_s13 + $0x70] sm:$0xff]  }
 0x814   :  { %6656 = vmatprep.subr.bf16.mxu1 %v8588_v1  ;;  %v8665_v1 = vld [vmem:[%s11705_s13 + $0x30] sm:$0xff]  }
 0x817   :  { %6657 = vmatpush1.bf16.msra.mxu1 %v8586_v51  ;;  %v8666_v51 = vld [vmem:[%s11705_s13 + $0x78] sm:$0xff]  }
 0x818   :  { %6658 = vmatprep.subr.bf16.mxu1 %v8591_v33  ;;  %v8667_v33 = vld [vmem:[%s11705_s13 + $0x38] sm:$0xff]  }
 0x81b   :  { %6659 = vmatpush1.bf16.msra.mxu1 %v8589_v41  ;;  %v8668_v41 = vld [vmem:[%s11705_s13 + $0xc0] sm:$0xff]  }
 0x81c   :  { %6660 = vmatprep.subr.bf16.mxu1 %v8594_v42  ;;  %v6294_v42 = vld [vmem:[%s11706_s12] sm:$0xf] }
 0x81f   :  { %6661 = vmatpush1.bf16.msra.mxu1 %v8592_v55  ;;  %v6299_v55 = vrot.slane %v6294_v42, %v11370_v48  ;;  %v8670_v48 = vld [vmem:[%s11705_s13 + $0xc8] sm:$0xff]  }
 0x820   :  { %6662 = vmatprep.subr.bf16.mxu1 %v8597_v13  ;;  %v6303_v13 = vrot.slane %v6294_v42, %v11376_v0  ;;  %v8671_v0 = vld [vmem:[%s11705_s13 + $0x88] sm:$0xff]  }
 0x823   :  { %6663 = vmatpush1.bf16.msra.mxu1 %v8595_v43 }
 0x824   :  { %6664 = vmatprep.subr.bf16.mxu1 %v8600_v63 }
 0x827   :  { %6665 = vmatpush1.bf16.msra.mxu1 %v8598_v19 }
 0x828   :  { %6666 = vmatprep.subr.bf16.mxu1 %v8603_v47 }
 0x82b   :  { %6667 = vmatpush1.bf16.msra.mxu1 %v8601_v23 }
 0x82c   :  { %6677 = vmatprep.subr.bf16.mxu1 %v8606_v57 }
 0x8c1   :  { %v6223_v3 = vpop.f32.mrb[92].mxu1 }
 0x8c2   :  { %v6225_v39 = vpop.f32.mrb[93].mxu1  ;;  %v11490_v11 = vpack.c.bf16 %v6223_v3, %v6223_v3 }
 0x8c3   :  { %v6229_v31 = vpack.c.bf16 %v6225_v39, %v6225_v39 }
 0x8c5   :  { %6668 = vmatprep.mubr.bf16.mxu1 %v6229_v31 }
 0x8c6   :  { %6669 = vmatmul.mubr.bf16.vlgmr.msra.gmra.mrb[96].mxu1 %v11490_v11 }
 0x8c7   :  { %6678 = vmatpush1.bf16.msra.mxu1 %v8604_v52  ;;  %6709 = vmatprep.mubr.bf16.mxu1 %v6229_v31  ;;  %v8669_v52 = vld [vmem:[%s11705_s13 + $0x80] sm:$0xff]  }
 0x8c8   :  { %6679 = vmatprep.subr.bf16.mxu1 %v8609_v35  ;;  %v8672_v35 = vld [vmem:[%s11705_s13 + $0xd0] sm:$0xff]  }
 0x8cb   :  { %6680 = vmatpush1.bf16.msra.mxu1 %v8607_v15  ;;  %v8673_v15 = vld [vmem:[%s11705_s13 + $0x90] sm:$0xff]  }
 0x8cc   :  { %6681 = vmatprep.subr.bf16.mxu1 %v8612_v61  ;;  %v8674_v61 = vld [vmem:[%s11705_s13 + $0xd8] sm:$0xff]  }
 0x8cf   :  { %6682 = vmatpush1.bf16.msra.mxu1 %v8610_v8  ;;  %v8675_v8 = vld [vmem:[%s11705_s13 + $0x98] sm:$0xff]  }
 0x8d0   :  { %6683 = vmatprep.subr.bf16.mxu1 %v8615_v60  ;;  %v8676_v60 = vld [vmem:[%s11705_s13 + $0xe0] sm:$0xff]  }
 0x8d3   :  { %6684 = vmatpush1.bf16.msra.mxu1 %v8613_v7  ;;  %v8677_v7 = vld [vmem:[%s11705_s13 + $0xa0] sm:$0xff]  }
 0x8d4   :  { %6685 = vmatprep.subr.bf16.mxu1 %v8618_v49  ;;  %v8678_v49 = vld [vmem:[%s11705_s13 + $0xe8] sm:$0xff]  }
 0x8d7   :  { %6686 = vmatpush1.bf16.msra.mxu1 %v8616_v29  ;;  %v8679_v29 = vld [vmem:[%s11705_s13 + $0xa8] sm:$0xff]  }
 0x8d8   :  { %6687 = vmatprep.subr.bf16.mxu1 %v8621_v6  ;;  %v8680_v6 = vld [vmem:[%s11705_s13 + $0xf0] sm:$0xff]  }
 0x8db   :  { %6688 = vmatpush1.bf16.msra.mxu1 %v8619_v53  ;;  %v8681_v53 = vld [vmem:[%s11705_s13 + $0xb0] sm:$0xff]  }
 0x8dc   :  { %6689 = vmatprep.subr.bf16.mxu1 %v8624_v45  ;;  %v8682_v45 = vld [vmem:[%s11705_s13 + $0xf8] sm:$0xff]  }
 0x8df   :  { %6690 = vmatpush1.bf16.msra.mxu1 %v8622_v9  ;;  %v8683_v9 = vld [vmem:[%s11705_s13 + $0xb8] sm:$0xff]  }
 0x8e0   :  { %6691 = vmatprep.subr.bf16.mxu1 %v8627_v44  ;;  %v6306_v44 = vsub.s32 2, %v11367_v21 }
 0x8e3   :  { %6692 = vmatpush1.bf16.msra.mxu1 %v8625_v12  ;;  %v6310_v12 = vsub.s32 3, %v11367_v21  ;;  %v7567_v21 = vld [vmem:[%s11707_s14] ss:$0 sm:$0xff] }
 0x8e4   :  { %6693 = vmatprep.subr.bf16.mxu1 %v8630_v16  ;;  %v6307_v16 = vrot.slane %v6294_v42, %v6306_v44 }
 0x8e7   :  { %6694 = vmatpush1.bf16.msra.mxu1 %v8628_v54  ;;  %v6311_v54 = vrot.slane %v6294_v42, %v6310_v12 }
 0x8e8   :  { %6695 = vmatprep.subr.bf16.mxu1 %v8633_v20 }
 0x8eb   :  { %6696 = vmatpush1.bf16.msra.mxu1 %v8631_v24 }
 0x8ec   :  { %6697 = vmatprep.subr.bf16.mxu1 %v8636_v28 }
 0x8ef   :  { %6698 = vmatpush1.bf16.msra.mxu1 %v8634_v5 }
 0x8f0   :  { %6699 = vmatprep.subr.bf16.mxu1 %v8639_v4 }
 0x8f3   :  { %6700 = vmatpush1.bf16.msra.mxu1 %v8637_v32 }
 0x8f4   :  { %6701 = vmatprep.subr.bf16.mxu1 %v8642_v36 }
 0x8f7   :  { %6702 = vmatpush1.bf16.msra.mxu1 %v8640_v17 }
 0x8f8   :  { %6703 = vmatprep.subr.bf16.mxu1 %v8645_v40 }
 0x8fb   :  { %6704 = vmatpush1.bf16.msra.mxu1 %v8643_v50 }
 0x8fc   :  { %6705 = vmatprep.subr.bf16.mxu1 %v8648_v56 }
 0x8ff   :  { %6706 = vmatpush1.bf16.msra.mxu1 %v8646_v59 }
 0x900   :  { %6707 = vmatprep.subr.bf16.mxu1 %v8651_v62 }
 0x903   :  { %6708 = vmatpush1.bf16.msra.mxu1 %v8649_v27 }
 0x904   :  { %7946 = vmatprep.subr.bf16.mxu1 %v8652_v2 }
 0x906   :  { %6710 = vmatmul.mubr.bf16.vlgmr.msra.gmra.mrb[100].mxu1 %v11490_v11 }
 0x907   :  { %7947 = vmatpush3.bf16.msra.mxu1 %v8653_v10 }
 0x908   :  { %7948 = vmatprep.subr.bf16.mxu1 %v8654_v14 }
 0x90b   :  { %7949 = vmatpush3.bf16.msra.mxu1 %v8655_v18 }
 0x90c   :  { %7950 = vmatprep.subr.bf16.mxu1 %v8656_v26 }
 0x90f   :  { %7951 = vmatpush3.bf16.msra.mxu1 %v8657_v34 }
 0x910   :  { %7952 = vmatprep.subr.bf16.mxu1 %v8658_v46 }
 0x913   :  { %7953 = vmatpush3.bf16.msra.mxu1 %v8659_v37 }
 0x914   :  { %7954 = vmatprep.subr.bf16.mxu1 %v8660_v22 }
 0x917   :  { %7955 = vmatpush3.bf16.msra.mxu1 %v8661_v38 }
 0x918   :  { %7956 = vmatprep.subr.bf16.mxu1 %v8662_v58 }
 0x91b   :  { %7957 = vmatpush3.bf16.msra.mxu1 %v8663_v25 }
 0x91c   :  { %7958 = vmatprep.subr.bf16.mxu1 %v8664_v30 }
 0x91f   :  { %7959 = vmatpush3.bf16.msra.mxu1 %v8665_v1 }
 0x920   :  { %7960 = vmatprep.subr.bf16.mxu1 %v8666_v51 }
 0x923   :  { %7961 = vmatpush3.bf16.msra.mxu1 %v8667_v33 }
 0x924   :  { %7968 = vmatprep.subr.bf16.mxu1 %v8668_v41 }
 0x999   :  { %v6670_v43 = vpop.f32.mrb[96].mxu1 }
 0x99a   :  { %v6671_v63 = vadd.f32 %v6670_v43, %v6299_v55  ;;  %v6672_v19 = vpop.f32.mrb[97].mxu1 }
 0x99b   :  { %v6673_v23 = vadd.f32 %v6672_v19, %v6303_v13  ;;  %v6674_v47 = vpop.f32.mrb[98].mxu1 }
 0x99c   :  { %v6718_v57 = vmax.f32 %v6671_v63, 0.0  ;;  %v6675_v3 = vpop.f32.mrb[99].mxu1 }
 0x99d   :  { %v6719_v39 = vmax.f32 %v6673_v23, 0.0 }
 0x99e   :  { %v6722_v11 = vpack.c.bf16 %v6718_v57, %v6718_v57 }
 0x99f   :  { %v6723_v31 = vpack.c.bf16 %v6719_v39, %v6719_v39 }
 0x9a1   :  { %7021 = vmatprep.mubr.bf16.mxu1 %v6723_v31 }
 0x9a2   :  { %7022 = vmatmul.mubr.bf16.vlgmr.msra.gmra.mrb[104].mxu1 %v6722_v11 }
 0x9a3   :  { %7969 = vmatpush3.bf16.msra.mxu1 %v8669_v52 }
 0x9a4   :  { %7970 = vmatprep.subr.bf16.mxu1 %v8670_v48 }
 0x9a7   :  { %7971 = vmatpush3.bf16.msra.mxu1 %v8671_v0 }
 0x9a8   :  { %7972 = vmatprep.subr.bf16.mxu1 %v8672_v35 }
 0x9ab   :  { %7973 = vmatpush3.bf16.msra.mxu1 %v8673_v15 }
 0x9ac   :  { %7974 = vmatprep.subr.bf16.mxu1 %v8674_v61 }
 0x9af   :  { %7975 = vmatpush3.bf16.msra.mxu1 %v8675_v8 }
 0x9b0   :  { %7976 = vmatprep.subr.bf16.mxu1 %v8676_v60 }
 0x9b3   :  { %7977 = vmatpush3.bf16.msra.mxu1 %v8677_v7 }
 0x9b4   :  { %7978 = vmatprep.subr.bf16.mxu1 %v8678_v49 }
 0x9b7   :  { %7979 = vmatpush3.bf16.msra.mxu1 %v8679_v29 }
 0x9b8   :  { %7980 = vmatprep.subr.bf16.mxu1 %v8680_v6 }
 0x9bb   :  { %7981 = vmatpush3.bf16.msra.mxu1 %v8681_v53 }
 0x9bc   :  { %7982 = vmatprep.subr.bf16.mxu1 %v8682_v45 }
 0x9bf   :  { %7983 = vmatpush3.bf16.msra.mxu1 %v8683_v9 }
 0x9d9   :  { %v6711_v20 = vpop.f32.mrb[100].mxu1 }
 0x9da   :  { %v6712_v24 = vadd.f32 %v6711_v20, %v6307_v16  ;;  %v6713_v28 = vpop.f32.mrb[101].mxu1 }
 0x9db   :  { %v6714_v5 = vadd.f32 %v6713_v28, %v6311_v54  ;;  %v6715_v4 = vpop.f32.mrb[102].mxu1 }
 0x9dc   :  { %v6720_v32 = vmax.f32 %v6712_v24, 0.0  ;;  %v6716_v36 = vpop.f32.mrb[103].mxu1 }
 0x9dd   :  { %v6721_v17 = vmax.f32 %v6714_v5, 0.0 }
 0x9de   :  { %v6724_v50 = vpack.c.bf16 %v6720_v32, %v6720_v32 }
 0x9df   :  { %v6725_v40 = vpack.c.bf16 %v6721_v17, %v6721_v17 }
 0x9e1   :  { %7061 = vmatprep.mubr.bf16.mxu1 %v6725_v40 }
 0x9e2   :  { %7062 = vmatmul.mubr.bf16.vlgmr.msra.gmra.mrb[108].mxu1 %v6724_v50 }
 0xa75   :  { %v7962_v56 = vpop.f32.mrb[104].mxu1 }
 0xa76   :  { %v7963_v59 = vpop.f32.mrb[105].mxu1 }
 0xa77   :  { %v7964_v62 = vadd.f32 %v7963_v59, %v7962_v56  ;;  %v7965_v27 = vpop.f32.mrb[106].mxu1 }
 0xa78   :  { %v7966_v2 = vpop.f32.mrb[107].mxu1 }
 0xa79   :  { %v7024_v18 = vadd.f32 %v7964_v62, %v7567_v21 }
 0xab5   :  { %v7984_v10 = vpop.f32.mrb[108].mxu1 }
 0xab6   :  { %v7985_v14 = vpop.f32.mrb[109].mxu1 }
 0xab7   :  { %v7986_v26 = vadd.f32 %v7985_v14, %v7984_v10  ;;  %v7987_v34 = vpop.f32.mrb[110].mxu1 }
 0xab8   :  { %v7988_v46 = vpop.f32.mrb[111].mxu1 }
 0xab9   :  { %v7064_v37 = vadd.f32 %v7986_v26, %v7024_v18 }
 0xabb   :  { %7069 = vst [vmem:[%s11708_s15] sm:$0x3] %v7064_v37 }

</bundles_post_ra>
